<compile_context>
chip_gen: v7x
topology: tpu7x:2x2x1
jax: 0.10.0
libtpu: 0.0.40
codegen_flags: <defaults>
</compile_context>

<pallas_src>
import numpy as np
import jax
import jax.numpy as jnp
from jax.experimental import pallas as pl
from jax.experimental.pallas import tpu as pltpu


def _quantizer_kernel(e_ref, nct_ref, w_ref,
                      eq_ref, idx_ref, dconf_ref, rowsq_ref):
    e = e_ref[...].astype(jnp.float32)            # (TB, D)
    nct = nct_ref[...]                            # (D, N)  pre-normalized codebook^T
    w = w_ref[...]                                # (N, D)  raw codebook (f32)
    n = w.shape[0]

    # L2-normalize rows of e (F.normalize, eps=1e-12): rsqrt (EUP slot) + multiply.
    sq = jnp.sum(e * e, axis=1, keepdims=True)                        # (TB, 1)
    normed_e = e * jax.lax.rsqrt(jnp.maximum(sq, jnp.float32(1e-24)))

    # sim[b, j] = <normed_e[b], normed_c[j]>  — (TB,D) x (D,N), no transpose needed.
    sim = jnp.dot(normed_e, nct,
                  preferred_element_type=jnp.float32,
                  precision=jax.lax.Precision.HIGHEST)                # (TB, N)

    # argmax over entries (first occurrence on ties, matching torch/jnp argmax).
    m1 = jnp.max(sim, axis=1, keepdims=True)                          # (TB, 1)
    col = jax.lax.broadcasted_iota(jnp.int32, sim.shape, 1)           # (TB, N)
    idx = jnp.min(jnp.where(sim >= m1, col, jnp.int32(n)),
                  axis=1, keepdims=True)                              # (TB, 1)

    # one-hot assignments and quantized vectors (exact row selection via HIGHEST).
    assignments = (col == idx).astype(jnp.float32)                    # (TB, N)
    e_q = jnp.dot(assignments, w,
                  preferred_element_type=jnp.float32,
                  precision=jax.lax.Precision.HIGHEST)                # (TB, D)

    # per-row squared error (reduced to the final loss in the wrapper).
    diff = e_q - e
    row_sq = jnp.sum(diff * diff, axis=1, keepdims=True)              # (TB, 1)

    # top-2 gap: mask the argmax column, take max again.
    m2 = jnp.max(jnp.where(col == idx, -jnp.inf, sim), axis=1, keepdims=True)

    eq_ref[...] = e_q.astype(eq_ref.dtype)
    idx_ref[...] = idx
    dconf_ref[...] = (m1 - m2).astype(dconf_ref.dtype)
    rowsq_ref[...] = row_sq.astype(rowsq_ref.dtype)


def _pick_tile_b(B, target):
    """Largest batch tile <= target that divides B and is a multiple of 8."""
    if B <= target:
        return B
    for t in range(target, 7, -1):
        if t % 8 == 0 and B % t == 0:
            return t
    return B  # fallback: single tile over the whole batch


def quantizer_forward(e, weight, *, tile_b=None, max_tile_b=256,
                      vmem_limit_bytes=64 * 1024 * 1024):
    """Eval-mode Quantizer forward.

    Returns (e_q, loss, assignment_indices, delta_conf, loss_c_sum).
    """
    B, D = e.shape
    N, D2 = weight.shape
    assert D == D2
    if tile_b is None:
        tile_b = _pick_tile_b(B, max_tile_b)
    assert B % tile_b == 0
    grid = (B // tile_b,)

    # Hoisted (loop-invariant) codebook work: f32 cast, L2-normalize, transpose.
    w32 = weight.astype(jnp.float32)
    c_sq = jnp.sum(w32 * w32, axis=1, keepdims=True)
    normed_c = w32 * jax.lax.rsqrt(jnp.maximum(c_sq, jnp.float32(1e-24)))
    normed_c_t = jnp.transpose(normed_c)                               # (D, N)

    out_shapes = (
        jax.ShapeDtypeStruct((B, D), jnp.float32),   # e_q
        jax.ShapeDtypeStruct((B, 1), jnp.int32),     # assignment indices
        jax.ShapeDtypeStruct((B, 1), jnp.float32),   # delta_conf (top1 - top2)
        jax.ShapeDtypeStruct((B, 1), jnp.float32),   # per-row sum((e_q - e)^2)
    )

    e_q, idx, dconf, row_sq = pl.pallas_call(
        _quantizer_kernel,
        out_shape=out_shapes,
        grid=grid,
        in_specs=[
            pl.BlockSpec((tile_b, D), lambda i: (i, 0)),   # e: tiled over batch
            pl.BlockSpec((D, N), lambda i: (0, 0)),        # normed codebook^T (whole)
            pl.BlockSpec((N, D), lambda i: (0, 0)),        # raw codebook (whole)
        ],
        out_specs=(
            pl.BlockSpec((tile_b, D), lambda i: (i, 0)),
            pl.BlockSpec((tile_b, 1), lambda i: (i, 0)),
            pl.BlockSpec((tile_b, 1), lambda i: (i, 0)),
            pl.BlockSpec((tile_b, 1), lambda i: (i, 0)),
        ),
        compiler_params=pltpu.CompilerParams(
            dimension_semantics=("parallel",),             # no cross-tile state left
            vmem_limit_bytes=vmem_limit_bytes,
        ),
    )(e.astype(jnp.float32), normed_c_t, w32)

    # Loss reduction moved to the wrapper (keeps the grid axis parallel-safe).
    loss_c_sum = jnp.sum(row_sq)
    loss = loss_c_sum / jnp.float32(B * D)
    return e_q, loss, idx[:, 0], dconf[:, 0], loss_c_sum


def _reference(e, w):
    """Pure-JAX reference matching the PyTorch eval-mode forward."""
    eps = 1e-12
    ne = e / jnp.maximum(jnp.linalg.norm(e, axis=1, keepdims=True), eps)
    nc = w / jnp.maximum(jnp.linalg.norm(w, axis=1, keepdims=True), eps)
    sim = jnp.matmul(ne, nc.T, precision=jax.lax.Precision.HIGHEST)
    idx = jnp.argmax(sim, axis=1).astype(jnp.int32)
    assign = jax.nn.one_hot(idx, w.shape[0], dtype=jnp.float32)
    e_q = jnp.matmul(assign, w, precision=jax.lax.Precision.HIGHEST)
    loss = jnp.mean((e_q - e) ** 2)
    loss_sum = jnp.sum((e_q - e) ** 2)
    top2 = jax.lax.top_k(sim, 2)[0]
    dconf = top2[:, 0] - top2[:, 1]
    return e_q, loss, idx, dconf, loss_sum


def _check(outs, e, w):
    e_q, loss, idx, dconf, loss_sum = outs
    r_eq, r_loss, r_idx, r_dconf, r_lsum = _reference(e, w)
    np.testing.assert_allclose(np.asarray(e_q), np.asarray(r_eq), rtol=1e-5, atol=1e-5)
    np.testing.assert_allclose(np.asarray(loss), np.asarray(r_loss), rtol=1e-5, atol=1e-6)
    np.testing.assert_array_equal(np.asarray(idx), np.asarray(r_idx))
    np.testing.assert_allclose(np.asarray(dconf), np.asarray(r_dconf), rtol=1e-5, atol=1e-5)
    np.testing.assert_allclose(np.asarray(loss_sum), np.asarray(r_lsum), rtol=1e-5, atol=1e-3)


if __name__ == "__main__":
    key = jax.random.PRNGKey(0)
    k_e, k_w, k_e2, k_w2 = jax.random.split(key, 4)

    # Main case: exercises batch tiling (tile_b=256, grid=2) with MXU-sized tiles.
    B, D, N = 512, 128, 256   # batch, entry_dim, entry_num
    e = jax.random.normal(k_e, (B, D), dtype=jnp.float32)
    weight = jax.random.uniform(k_w, (N, D), dtype=jnp.float32,
                                minval=-1.0 / N, maxval=1.0 / N)
    outs = jax.block_until_ready(quantizer_forward(e, weight))
    _check(outs, e, weight)

    # Tiny-shape fallback case (tile_b == B, grid=1).
    B2, D2, N2 = 16, 32, 16
    e2 = jax.random.normal(k_e2, (B2, D2), dtype=jnp.float32)
    weight2 = jax.random.uniform(k_w2, (N2, D2), dtype=jnp.float32,
                                 minval=-1.0 / N2, maxval=1.0 / N2)
    outs2 = jax.block_until_ready(quantizer_forward(e2, weight2))
    _check(outs2, e2, weight2)

    print("KERNEL_OK")
</pallas_src>

<mosaic_0001>
module attributes {stable_mosaic.version = 11 : i64} {
  func.func @_quantizer_kernel(%arg0: i32, %arg1: memref<256x128xf32, #tpu.memory_space<vmem>>, %arg2: memref<128x256xf32, #tpu.memory_space<vmem>>, %arg3: memref<256x128xf32, #tpu.memory_space<vmem>>, %arg4: memref<256x128xf32, #tpu.memory_space<vmem>>, %arg5: memref<256x1xi32, #tpu.memory_space<vmem>>, %arg6: memref<256x1xf32, #tpu.memory_space<vmem>>, %arg7: memref<256x1xf32, #tpu.memory_space<vmem>>) attributes {dimension_semantics = [#tpu.dimension_semantics<parallel>], iteration_bounds = array<i64: 2>, scalar_prefetch = 0 : i64, scratch_operands = 0 : i64, tpu.core_type = #tpu.core_type<tc>, window_params = [{transform_indices = @transform_0, window_bounds = array<i64: 256, 128>}, {pipeline_mode = #tpu.pipeline_mode<synchronous>, transform_indices = @transform_1, window_bounds = array<i64: 128, 256>}, {pipeline_mode = #tpu.pipeline_mode<synchronous>, transform_indices = @transform_2, window_bounds = array<i64: 256, 128>}, {transform_indices = @transform_3, window_bounds = array<i64: 256, 128>}, {transform_indices = @transform_4, window_bounds = array<i64: 256, 1>}, {transform_indices = @transform_5, window_bounds = array<i64: 256, 1>}, {transform_indices = @transform_6, window_bounds = array<i64: 256, 1>}]} {
    %c0 = arith.constant 0 : index
    %c0_0 = arith.constant 0 : index
    %0 = vector.load %arg1[%c0, %c0_0] : memref<256x128xf32, #tpu.memory_space<vmem>>, vector<256x128xf32>
    %c0_1 = arith.constant 0 : index
    %c0_2 = arith.constant 0 : index
    %1 = vector.load %arg2[%c0_1, %c0_2] : memref<128x256xf32, #tpu.memory_space<vmem>>, vector<128x256xf32>
    %c0_3 = arith.constant 0 : index
    %c0_4 = arith.constant 0 : index
    %2 = vector.load %arg3[%c0_3, %c0_4] : memref<256x128xf32, #tpu.memory_space<vmem>>, vector<256x128xf32>
    %3 = arith.mulf %0, %0 : vector<256x128xf32>
    %cst = arith.constant dense<0.000000e+00> : vector<256xf32>
    %4 = vector.multi_reduction <add>, %3, %cst [1] : vector<256x128xf32> to vector<256xf32>
    %5 = vector.shape_cast %4 : vector<256xf32> to vector<256x1xf32>
    %cst_5 = arith.constant 1.000000e-24 : f32
    %6 = vector.broadcast %cst_5 : f32 to vector<256x1xf32>
    %7 = arith.maximumf %5, %6 : vector<256x1xf32>
    %8 = math.rsqrt %7 : vector<256x1xf32>
    %9 = vector.broadcast %8 : vector<256x1xf32> to vector<256x128xf32>
    %10 = arith.mulf %0, %9 : vector<256x128xf32>
    %cst_6 = arith.constant dense<0.000000e+00> : vector<256x256xf32>
    %11 = tpu.matmul %10, %1, %cst_6 {dimension_numbers = #tpu.dot_dimension_numbers<[1], [0], [0], [1], [0, 0, 1, 1], [], []>, precision = #tpu.contract_precision<fp32>} : vector<256x128xf32>, vector<128x256xf32>, vector<256x256xf32> -> vector<256x256xf32>
    %cst_7 = arith.constant dense<0xFF800000> : vector<256xf32>
    %12 = vector.multi_reduction <maximumf>, %11, %cst_7 [1] : vector<256x256xf32> to vector<256xf32>
    %13 = vector.shape_cast %12 : vector<256xf32> to vector<256x1xf32>
    %14 = tpu.iota {dimensions = array<i32: 1>} : vector<256x256xi32>
    %15 = vector.broadcast %13 : vector<256x1xf32> to vector<256x256xf32>
    %16 = arith.cmpf oge, %11, %15 : vector<256x256xf32>
    %c256_i32 = arith.constant 256 : i32
    %17 = vector.broadcast %c256_i32 : i32 to vector<256x256xi32>
    %18 = arith.select %16, %14, %17 : vector<256x256xi1>, vector<256x256xi32>
    %cst_8 = arith.constant dense<2147483647> : vector<256xi32>
    %19 = vector.multi_reduction <minsi>, %18, %cst_8 [1] : vector<256x256xi32> to vector<256xi32>
    %20 = vector.shape_cast %19 : vector<256xi32> to vector<256x1xi32>
    %21 = vector.broadcast %20 : vector<256x1xi32> to vector<256x256xi32>
    %22 = arith.cmpi eq, %14, %21 : vector<256x256xi32>
    %23 = arith.extui %22 : vector<256x256xi1> to vector<256x256xi32>
    %24 = arith.sitofp %23 : vector<256x256xi32> to vector<256x256xf32>
    %cst_9 = arith.constant dense<0.000000e+00> : vector<256x128xf32>
    %25 = tpu.matmul %24, %2, %cst_9 {dimension_numbers = #tpu.dot_dimension_numbers<[1], [0], [0], [1], [0, 0, 1, 1], [], []>, precision = #tpu.contract_precision<fp32>} : vector<256x256xf32>, vector<256x128xf32>, vector<256x128xf32> -> vector<256x128xf32>
    %26 = arith.subf %25, %0 : vector<256x128xf32>
    %27 = arith.mulf %26, %26 : vector<256x128xf32>
    %cst_10 = arith.constant dense<0.000000e+00> : vector<256xf32>
    %28 = vector.multi_reduction <add>, %27, %cst_10 [1] : vector<256x128xf32> to vector<256xf32>
    %29 = vector.shape_cast %28 : vector<256xf32> to vector<256x1xf32>
    %30 = vector.broadcast %20 : vector<256x1xi32> to vector<256x256xi32>
    %31 = arith.cmpi eq, %14, %30 : vector<256x256xi32>
    %cst_11 = arith.constant 0xFF800000 : f32
    %32 = vector.broadcast %cst_11 : f32 to vector<256x256xf32>
    %33 = arith.select %31, %32, %11 : vector<256x256xi1>, vector<256x256xf32>
    %cst_12 = arith.constant dense<0xFF800000> : vector<256xf32>
    %34 = vector.multi_reduction <maximumf>, %33, %cst_12 [1] : vector<256x256xf32> to vector<256xf32>
    %35 = vector.shape_cast %34 : vector<256xf32> to vector<256x1xf32>
    %c0_13 = arith.constant 0 : index
    %c0_14 = arith.constant 0 : index
    %36 = vector.load %arg4[%c0_13, %c0_14] : memref<256x128xf32, #tpu.memory_space<vmem>>, vector<256x128xf32>
    tpu.vector_store %arg4[%c0_13, %c0_14], %25 {strides = array<i32>} : memref<256x128xf32, #tpu.memory_space<vmem>>, vector<256x128xf32>,
    %c0_15 = arith.constant 0 : index
    %c0_16 = arith.constant 0 : index
    %37 = vector.load %arg5[%c0_15, %c0_16] : memref<256x1xi32, #tpu.memory_space<vmem>>, vector<256x1xi32>
    tpu.vector_store %arg5[%c0_15, %c0_16], %20 {strides = array<i32>} : memref<256x1xi32, #tpu.memory_space<vmem>>, vector<256x1xi32>,
    %38 = arith.subf %13, %35 : vector<256x1xf32>
    %c0_17 = arith.constant 0 : index
    %c0_18 = arith.constant 0 : index
    %39 = vector.load %arg6[%c0_17, %c0_18] : memref<256x1xf32, #tpu.memory_space<vmem>>, vector<256x1xf32>
    tpu.vector_store %arg6[%c0_17, %c0_18], %38 {strides = array<i32>} : memref<256x1xf32, #tpu.memory_space<vmem>>, vector<256x1xf32>,
    %c0_19 = arith.constant 0 : index
    %c0_20 = arith.constant 0 : index
    %40 = vector.load %arg7[%c0_19, %c0_20] : memref<256x1xf32, #tpu.memory_space<vmem>>, vector<256x1xf32>
    tpu.vector_store %arg7[%c0_19, %c0_20], %29 {strides = array<i32>} : memref<256x1xf32, #tpu.memory_space<vmem>>, vector<256x1xf32>,
    return
  }
  func.func @transform_0(%arg0: i32) -> (i32, i32) {
    %c0_i32 = arith.constant 0 : i32
    %c0_i32_0 = arith.constant 0 : i32
    return %arg0, %c0_i32 : i32, i32
  }
  func.func @transform_1(%arg0: i32) -> (i32, i32) {
    %c0_i32 = arith.constant 0 : i32
    %c0_i32_0 = arith.constant 0 : i32
    %c0_i32_1 = arith.constant 0 : i32
    return %c0_i32, %c0_i32_0 : i32, i32
  }
  func.func @transform_2(%arg0: i32) -> (i32, i32) {
    %c0_i32 = arith.constant 0 : i32
    %c0_i32_0 = arith.constant 0 : i32
    %c0_i32_1 = arith.constant 0 : i32
    return %c0_i32, %c0_i32_0 : i32, i32
  }
  func.func @transform_3(%arg0: i32) -> (i32, i32) {
    %c0_i32 = arith.constant 0 : i32
    %c0_i32_0 = arith.constant 0 : i32
    return %arg0, %c0_i32 : i32, i32
  }
  func.func @transform_4(%arg0: i32) -> (i32, i32) {
    %c0_i32 = arith.constant 0 : i32
    %c0_i32_0 = arith.constant 0 : i32
    return %arg0, %c0_i32 : i32, i32
  }
  func.func @transform_5(%arg0: i32) -> (i32, i32) {
    %c0_i32 = arith.constant 0 : i32
    %c0_i32_0 = arith.constant 0 : i32
    return %arg0, %c0_i32 : i32, i32
  }
  func.func @transform_6(%arg0: i32) -> (i32, i32) {
    %c0_i32 = arith.constant 0 : i32
    %c0_i32_0 = arith.constant 0 : i32
    return %arg0, %c0_i32 : i32, i32
  }
}

</mosaic_0001>

<bundles_post_ra>
// kernel: tpu_custom_call.1
= control target key start
LH: loop header
LB: loop body
LE: loop exit
PB: predicated region body
PF: predicated region fallthrough
CT: control target
= control target key end

     0   :  { %s14556_s0 = inlined_call_operand.hbm [shape: f32[512,128], index: 0, kind: input, shape index: {}]   ;;  %s14557_s1 = inlined_call_operand.hbm [shape: f32[128,256], index: 1, kind: input, shape index: {}]   ;;  %s14558_s2 = inlined_call_operand.hbm [shape: f32[256,128], index: 2, kind: input, shape index: {}]   ;;  %s14559_s3 = inlined_call_operand.hbm [shape: f32[512,128], index: 3, kind: output, shape index: {0}]   ;;  %s14560_s4 = inlined_call_operand.hbm [shape: s32[512,1], index: 4, kind: output, shape index: {1}]   ;;  %s14561_s5 = inlined_call_operand.hbm [shape: f32[512,1], index: 5, kind: output, shape index: {2}]   ;;  %s14562_s6 = inlined_call_operand.hbm [shape: f32[512,1], index: 6, kind: output, shape index: {3}]  }
   0x1   :  { %15516 = sst [smem:[#allocation281_spill]] %s14556_s0 }
   0x2   :  { %15517 = sst [smem:[#allocation282_spill]] %s14557_s1 }
   0x3   :  { %15518 = sst [smem:[#allocation283_spill]] %s14558_s2 }
   0x4   :  { %12 = vsyncpa [#allocation3], 0 }
   0x5   :  { %14 = vsyncpa [#allocation3 + $0x1], 0 }
   0x6   :  { %15 = vsyncpa [#allocation6], 0 }
   0x7   :  { %16 = vsyncpa [#allocation4], 0 }
   0x8   :  { %18 = vsyncpa [#allocation4 + $0x1], 0 }
   0x9   :  { %19 = vsyncpa [#allocation10], 0 }
   0xa   :  { %21 = vsyncpa [#allocation10 + $0x1], 0 }
   0xb   :  { %22 = vsyncpa [#allocation13], 0 }
   0xc   :  { %24 = vsyncpa [#allocation13 + $0x1], 0  ;;  %s9161_s21 = smov 0   ;;  %s9163_s22 = smov 0  }
   0xd   :  { %s9165_s23 = smov 0   ;;  %s9167_s24 = smov 0  }
   0xe LB: > { %s9182_s25 = sadd.s32 4294967295, %s9108_s24   ;;  %s14564_s26 = sadd.s32 4294967294, %s9108_s24   ;;  %s9108_s24 = sphi %s9167_s24, %s17185_s24   ;;  %s9104_s23 = sphi %s9165_s23, %s17184_s23   ;;  %s9100_s22 = sphi %s9163_s22, %s17183_s22   ;;  %s9096_s21 = sphi %s9161_s21, %s17182_s21  }
   0xf   : > { %p50_p0 = scmp.ne.s32.totalorder %s9100_s22, %s9096_s21  ;;  %p14563_p1 = scmp.eq.s32.totalorder %s9182_s25, 0 }
  0x10   : > { %p122_p3 = scmp.eq.s32.totalorder %s14564_s26, 1  ;;  %p7235_p5 = scmp.ge.s32.totalorder %s9108_s24, 1 }
  0x11   : > { %p9193_p4 = por %p14563_p1, %p50_p0  ;;  %p207_p7 = scmp.lt.s32.totalorder %s9108_s24, 3 }
  0x12   : > { %p9198_p6 = por %p122_p3, %p50_p0  ;;  %s9110_s30 = smov [#allocation5]  }
  0x13   : > { %s15519_s27 = scalar_select %p9193_p4, 1, 0 }
  0x14   : > { %s15520_s28 = scalar_select %p9198_p6, 1, 0 }
  0x15   : > { %p9203_p8 = pnand %p7235_p5, %p207_p7  ;;  %s219_s7 = sshll.u32 %s9110_s30, 4  ;;  %s9207_s7 = int_to_ptr.vmem [resolvable:$true] %s219_s7 }
  0x16   : > { %s9111_s9 = smov [#allocation7]   ;;  %s15523_s1 = sld [smem:[#allocation282_spill]] }
  0x17   : > { %p8691_p9 = pneg %p9203_p8  ;;  %s232_s10 = sshll.u32 %s9111_s9, 4  ;;  %s9218_s10 = int_to_ptr.vmem [resolvable:$true] %s232_s10 }
  0x19   : > { %p9214_p11 = pnand %p8691_p9, %p14563_p1 }
  0x1b   : > { %p8862_p13 = pneg %p9214_p11 }
  0x1c   : > { %s8860_s13 = scalar_lea.hbm %s15523_s1, 4096 }
  0x1d   : > { %p8861_p12 = scmp.ne.s32.totalorder %s15523_s1, %s8860_s13  ;;  %p8867_p5 = scmp.lt.u32.totalorder %s8860_s13, %s15523_s1 }
  0x1f   : > { %p8863_p0 = pnand %p8862_p13, %p8861_p12 }
  0x21   : > { %p8864_p3 = pneg %p8863_p0 }
  0x23   : > { %p8869_p7 = pnand %p8867_p5, %p8864_p3 }
  0x25   : > { %8872 = shalt.err (!%p8869_p7)
}
  0x26   : > { %s8873_s18 = scalar_lea.vmem %s9207_s7, 4096  ;;  %p8881_p2 = scmp.lt.s32.totalorder %s9207_s7, %s9207_s7 }
  0x27   : > { %p8874_p9 = scmp.ne.s32.totalorder %s9207_s7, %s8873_s18  ;;  %p8882_p12 = scmp.lt.s32.totalorder %s8873_s18, %s8873_s18 }
  0x29   : > { %p8876_p10 = pnand %p8874_p9, %p8862_p13  ;;  %p8883_p0 = por %p8882_p12, %p8881_p2 }
  0x2b   : > { %p8877_p1 = pneg %p8876_p10 }
  0x2d   : > { %p8884_p6 = pnand %p8883_p0, %p8877_p1 }
  0x2f   : > { %8887 = shalt.err (!%p8884_p6)
}
  0x30   : > { %s9112_s19 = smov 256   ;;  %s9113_s20 = smov 16  }
  0x31   : > { %8694 = dma.hbm_to_vmem [thread:$0]  (!%p9214_p11), %s15523_s1, 4096, %s9207_s7, [#allocation6], %s9112_s19, %s9112_s19, %s9113_s20  }
  0x32   : > { %s15524_s2 = sld [smem:[#allocation283_spill]] }
  0x38   : > { %s8888_s13 = scalar_lea.hbm %s15524_s2, 4096 }
  0x39   : > { %p8889_p2 = scmp.ne.s32.totalorder %s15524_s2, %s8888_s13  ;;  %p8895_p10 = scmp.lt.u32.totalorder %s8888_s13, %s15524_s2 }
  0x3b   : > { %p8891_p1 = pnand %p8889_p2, %p8862_p13 }
  0x3d   : > { %p8892_p6 = pneg %p8891_p1 }
  0x3f   : > { %p8897_p3 = pnand %p8895_p10, %p8892_p6 }
  0x41   : > { %8900 = shalt.err (!%p8897_p3)
}
  0x42   : > { %s8901_s7 = scalar_lea.vmem %s9218_s10, 4096  ;;  %p8909_p12 = scmp.lt.s32.totalorder %s9218_s10, %s9218_s10 }
  0x43   : > { %p8902_p5 = scmp.ne.s32.totalorder %s9218_s10, %s8901_s7  ;;  %p8910_p0 = scmp.lt.s32.totalorder %s8901_s7, %s8901_s7 }
  0x45   : > { %p8904_p7 = pnand %p8902_p5, %p8862_p13  ;;  %p8911_p2 = por %p8910_p0, %p8909_p12 }
  0x47   : > { %p8905_p9 = pneg %p8904_p7 }
  0x49   : > { %p8912_p1 = pnand %p8911_p2, %p8905_p9 }
  0x4b   : > { %8915 = shalt.err (!%p8912_p1)
}
  0x4c   : > { %s9114_s18 = smov 128   ;;  %s9115_s19 = smov 8  }
  0x4d   : > { %8697 = dma.hbm_to_vmem [thread:$0]  (!%p9214_p11), %s15524_s2, 4096, %s9218_s10, [#allocation6], %s9114_s18, %s9114_s18, %s9115_s19  }
  0x4e   : > { %s9276_s9 = sadd.s32 1, %s9108_s24   ;;  %s37_s12 = sadd.s32 1, %s9104_s23 }
  0x4f   : > { %s34_s11 = ssub.s32 %s9108_s24, %s9276_s9  ;;  %p44_p6 = scmp.ne.s32.totalorder %s9104_s23, %s9100_s22 }
  0x50   : > { %p35_p13 = scmp.eq.s32.totalorder %s34_s11, 0  ;;  %p45_p10 = scmp.eq.s32.totalorder %s9108_s24, 0 }
  0x51   : > { %p15525_p5 = scmp.eq.s32.totalorder %s9182_s25, 1  ;;  %p8717_p9 = scmp.lt.s32.totalorder %s9108_s24, 2 }
  0x52   : > { %s9285_s13 = scalar_select %p35_p13, %s9104_s23, %s37_s12  }
  0x53   : > { %p46_p3 = por %p45_p10, %p44_p6  ;;  %p9289_p7 = por %p15525_p5, %p44_p6 }
  0x54   : > { %s246_s14 = sand.u32 1, %s9104_s23   ;;  %s7520_s10 = sshll.u32 %s9108_s24, 12 }
  0x55   : > { %s15526_s8 = scalar_select %p9289_p7, 1, 0 }
  0x56   : > { %s7239_s15 = sshll.u32 %s246_s14, 8  ;;  %s15527_s0 = sld [smem:[#allocation281_spill]] }
  0x57   : > { %s250_s20 = scalar_lea.vmem [#allocation2], %s7239_s15  ;;  %p9303_p11 = pnand %p8717_p9, %p46_p3 }
  0x58   : > { %s257_s30 = sshll.u32 %s250_s20, 4  ;;  %s9307_s12 = scalar_lea.sflag [#allocation3], %s246_s14  ;;  %s9301_s30 = int_to_ptr.vmem [resolvable:$true] %s257_s30 }
  0x59   : > { %p8918_p0 = pneg %p9303_p11 }
  0x5c   : > { %s9299_s7 = scalar_lea.hbm %s15527_s0, %s7520_s10  ;;  %s8921_s16 = scalar_lea.hbm %s15527_s0, 8192 }
  0x5d   : > { %s8916_s26 = scalar_lea.hbm %s9299_s7, 4096  ;;  %p8922_p13 = scmp.lt.u32.totalorder %s9299_s7, %s15527_s0 }
  0x5e   : > { %p8917_p12 = scmp.ne.s32.totalorder %s9299_s7, %s8916_s26  ;;  %p8923_p6 = scmp.lt.u32.totalorder %s8921_s16, %s8916_s26 }
  0x5f   : > { %p8925_p3 = scmp.lt.u32.totalorder %s8916_s26, %s9299_s7 }
  0x60   : > { %p8919_p2 = pnand %p8918_p0, %p8917_p12  ;;  %p8924_p10 = por %p8923_p6, %p8922_p13 }
  0x62   : > { %p8920_p1 = pneg %p8919_p2  ;;  %p8926_p5 = por %p8925_p3, %p8924_p10 }
  0x64   : > { %p8927_p9 = pnand %p8926_p5, %p8920_p1 }
  0x66   : > { %8930 = shalt.err (!%p8927_p9)
}
  0x67   : > { %s8931_s14 = scalar_lea.vmem %s9301_s30, 4096  ;;  %s9116_s15 = smov [#allocation2]  }
  0x68   : > { %p8932_p12 = scmp.ne.s32.totalorder %s9301_s30, %s8931_s14  ;;  %s8936_s10 = sshll.u32 %s9116_s15, 4  ;;  %s8937_s10 = int_to_ptr.vmem [resolvable:$false] %s8936_s10 }
  0x69   : > { %s8938_s17 = scalar_lea.vmem %s8937_s10, 8192  ;;  %p8939_p4 = scmp.lt.s32.totalorder %s9301_s30, %s8937_s10 }
  0x6a   : > { %p8934_p2 = pnand %p8932_p12, %p8918_p0  ;;  %p8940_p13 = scmp.lt.s32.totalorder %s8938_s17, %s8931_s14 }
  0x6c   : > { %p8935_p7 = pneg %p8934_p2  ;;  %p8941_p6 = por %p8940_p13, %p8939_p4 }
  0x6e   : > { %p8942_p10 = pnand %p8941_p6, %p8935_p7 }
  0x70   : > { %8945 = shalt.err (!%p8942_p10)
}
  0x71   : > { %8701 = dma.hbm_to_vmem [thread:$0]  (!%p9303_p11), %s9299_s7, 4096, %s9301_s30, %s9307_s12, %s9114_s18, %s9114_s18, %s9115_s19  }
  0x72   : > { %269 = sbr.rel (%p9203_p8) target bundleno = 2825 (0xb09), region = 32 }
  0x79   : > { %s9341_s26 = sand.u32 1, %s9100_s22   ;;  %p15529_p4 = scmp.ne.s32.totalorder %s15519_s27, 0 }
  0x7a   : > { %s9344_s16 = sshll.u32 %s9341_s26, 8  ;;  %s272_s11 = scalar_lea.sflag [#allocation3], %s9341_s26 }
  0x7b   : > { %s9348_s20 = scalar_lea.vmem [#allocation2], %s9344_s16 }
  0x7c   : > { %9075 = dma.done.wait (%p15529_p4), %s272_s11, 4096  }
  0x7d   : > { %9077 = vsyncadd (%p15529_p4), %s272_s11, 4294963200  ;;  %p15530_p7 = scmp.eq.s32.totalorder %s9182_s25, 0 }
  0x7f   : > { %9079 = dma.done.wait (%p15530_p7), [#allocation6], 8192   ;;  %p15531_p8 = pmov %p15530_p7 }
  0x80   : > { %v9359_v0 = vld [vmem:[%s9348_s20] sm:$0xff]  ;;  %v9362_v1 = vld [vmem:[%s9348_s20 + $0x10] sm:$0xff]  ;;  %v9365_v2 = vld [vmem:[%s9348_s20 + $0x8] sm:$0xff]  ;;  %s11771_s27 = scalar_lea.vmem [#allocation9], %s9344_s16  ;;  %s13446_s29 = scalar_lea.vmem [#allocation11], %s9344_s16 }
  0x81   : > { %9081 = vsyncadd (%p15531_p8), [#allocation6], 4294959104  ;;  %v428_v3 = vmul.f32 %v9359_v0, %v9359_v0  ;;  %v430_v4 = vmul.f32 %v9362_v1, %v9362_v1  ;;  %v9372_v5 = vld [vmem:[%s9348_s20 + $0x18] sm:$0xff]  ;;  %v429_v6 = vmul.f32 %v9365_v2, %v9365_v2  ;;  %v9379_v8 = vld [vmem:[%s9348_s20 + $0x20] sm:$0xff]  ;;  %s14253_s18 = scalar_lea.vmem [#allocation8], %s9344_s16  ;;  %s6977_s19 = sand.u32 1, %s9182_s25  }
  0x82   : > { %v431_v7 = vmul.f32 %v9372_v5, %v9372_v5  ;;  %v9382_v9 = vld [vmem:[%s9348_s20 + $0x28] sm:$0xff]  ;;  %v432_v10 = vmul.f32 %v9379_v8, %v9379_v8  ;;  %v9389_v12 = vld [vmem:[%s9348_s20 + $0x30] sm:$0xff]  ;;  %v9392_v13 = vld [vmem:[%s9348_s20 + $0x38] sm:$0xff]  ;;  %s14323_s7 = sshll.u32 %s9182_s25, 12  ;;  %s7017_s15 = sshll.u32 %s11771_s27, 4  ;;  %s14338_s15 = int_to_ptr.vmem [resolvable:$true] %s7017_s15 }
  0x83   : > { %460 = vadd.xlane.f32.xlu0 %v428_v3  ;;  %464 = vadd.xlane.f32.xlu1 %v430_v4  ;;  %v433_v11 = vmul.f32 %v9382_v9, %v9382_v9  ;;  %v9395_v14 = vld [vmem:[%s9348_s20 + $0x40] sm:$0xff]  ;;  %v9398_v15 = vld [vmem:[%s9348_s20 + $0x48] sm:$0xff]  ;;  %v434_v17 = vmul.f32 %v9389_v12, %v9389_v12  ;;  %v435_v18 = vmul.f32 %v9392_v13, %v9392_v13  ;;  %v9406_v19 = vld [vmem:[#allocation5 + $0x18] sm:$0xff]  ;;  %s14329_s14 = scalar_lea.hbm %s14560_s4, %s14323_s7  ;;  %s14336_s11 = scalar_lea.hbm %s14561_s5, %s14323_s7 }
  0x84   : > { %v9400_v16 = vld [vmem:[#allocation5 + $0x8] sm:$0xff]  ;;  %v364_v21 = vld [vmem:[#allocation5] sm:$0xff]  ;;  %v366_v22 = vld [vmem:[#allocation5 + $0x10] sm:$0xff]  ;;  %v14567_v23 = vand.u32 4294901760, %v9406_v19  ;;  %v436_v29 = vmul.f32 %v9395_v14, %v9395_v14  ;;  %v437_v36 = vmul.f32 %v9398_v15, %v9398_v15  ;;  %s14340_s25 = scalar_lea.sflag [#allocation10], %s6977_s19  ;;  %p17146_p0 = scmp.ne.s32.totalorder %s15526_s8, 0 }
  0x85   : > { %v14568_v20 = vand.u32 4294901760, %v9400_v16  ;;  %v622_v24 = vand.u32 4294901760, %v364_v21  ;;  %v626_v25 = vand.u32 4294901760, %v366_v22  ;;  %v369_v26 = vld [vmem:[#allocation5 + $0x28] sm:$0xff]  ;;  %v371_v27 = vld [vmem:[#allocation5 + $0x38] sm:$0xff]  ;;  %v368_v28 = vld [vmem:[#allocation5 + $0x20] sm:$0xff] }
  0x86   : > { %v628_v30 = vand.u32 4294901760, %v369_v26  ;;  %v632_v31 = vand.u32 4294901760, %v371_v27  ;;  %v370_v32 = vld [vmem:[#allocation5 + $0x30] sm:$0xff]  ;;  %v630_v33 = vand.u32 4294901760, %v368_v28  ;;  %v373_v34 = vld [vmem:[#allocation5 + $0x48] sm:$0xff]  ;;  %v375_v35 = vld [vmem:[#allocation5 + $0x58] sm:$0xff] }
  0x87   : > { %462 = vadd.xlane.f32.xlu0 %v429_v6  ;;  %466 = vadd.xlane.f32.xlu1 %v431_v7  ;;  %v9418_v37 = vpack.c.bf16 %v14567_v23, %v14568_v20  ;;  %v9420_v38 = vpack.c.bf16 %v626_v25, %v622_v24  ;;  %v9422_v39 = vsub.f32 %v364_v21, %v622_v24  ;;  %v372_v40 = vld [vmem:[#allocation5 + $0x40] sm:$0xff]  ;;  %v374_v41 = vld [vmem:[#allocation5 + $0x50] sm:$0xff]  ;;  %v634_v46 = vand.u32 4294901760, %v370_v32  ;;  %v9434_v47 = vld [vmem:[%s9348_s20 + $0x58] sm:$0xff]  ;;  %s9120_s30 = smov [#allocation9]  }
  0x88   : > { %v9425_v42 = vld [vmem:[%s9348_s20 + $0x50] sm:$0xff]  ;;  %v9427_v43 = vsub.f32 %v366_v22, %v626_v25  ;;  %v9429_v44 = vpack.c.bf16 %v632_v31, %v628_v30  ;;  %v9431_v45 = vsub.f32 %v369_v26, %v628_v30  ;;  %15538 = vst [vmem:[#allocation25_spill] sm:$0xff] %v9434_v47  ;;  %v9437_v48 = vsub.f32 %v371_v27, %v632_v31  ;;  %v377_v56 = vld [vmem:[#allocation5 + $0x68] sm:$0xff]  ;;  %v379_v57 = vld [vmem:[#allocation5 + $0x78] sm:$0xff] }
  0x89   : > { %15532 = vst [vmem:[#allocation19_spill] sm:$0xff] %v9418_v37  ;;  %15533 = vst [vmem:[#allocation20_spill] sm:$0xff] %v9420_v38  ;;  %7526 = vmatprep.subr.bf16.mxu0 %v9418_v37  ;;  %v9439_v49 = vsub.f32 %v368_v28, %v630_v33  ;;  %v636_v50 = vand.u32 4294901760, %v373_v34  ;;  %v640_v51 = vand.u32 4294901760, %v375_v35  ;;  %v9442_v52 = vpack.c.bf16 %v634_v46, %v630_v33  ;;  %v9449_v59 = vld [vmem:[%s9348_s20 + $0x60] sm:$0xff]  ;;  %v378_v3 = vld [vmem:[#allocation5 + $0x70] sm:$0xff] }
  0x8a   : > { %15534 = vst [vmem:[#allocation21_spill] sm:$0xff] %v9422_v39  ;;  %15535 = vst [vmem:[#allocation22_spill] sm:$0xff] %v9427_v43  ;;  %7528 = vmatpush1.bf16.msra.mxu0 %v9420_v38  ;;  %v9444_v53 = vsub.f32 %v370_v32, %v634_v46  ;;  %v638_v54 = vand.u32 4294901760, %v372_v40  ;;  %v642_v55 = vand.u32 4294901760, %v374_v41  ;;  %v438_v58 = vmul.f32 %v9425_v42, %v9425_v42  ;;  %v376_v63 = vld [vmem:[#allocation5 + $0x60] sm:$0xff]  ;;  %v9457_v6 = vld [vmem:[%s9348_s20 + $0x68] sm:$0xff] }
  0x8b   : > { %468 = vadd.xlane.f32.xlu0 %v432_v10  ;;  %470 = vadd.xlane.f32.xlu1 %v433_v11  ;;  %15536 = vst [vmem:[#allocation23_spill] sm:$0xff] %v9429_v44  ;;  %15537 = vst [vmem:[#allocation24_spill] sm:$0xff] %v9431_v45  ;;  %v9452_v60 = vpack.c.bf16 %v640_v51, %v636_v50  ;;  %v644_v61 = vand.u32 4294901760, %v377_v56  ;;  %v648_v62 = vand.u32 4294901760, %v379_v57  ;;  %v646_v22 = vand.u32 4294901760, %v376_v63  ;;  %v381_v25 = vld [vmem:[#allocation5 + $0x88] sm:$0xff] }
  0x8c   : > { %15539 = vst [vmem:[#allocation26_spill] sm:$0xff] %v9437_v48  ;;  %15540 = vst [vmem:[#allocation27_spill] sm:$0xff] %v9439_v49  ;;  %7530 = vmatprep.subr.bf16.mxu0 %v9429_v44  ;;  %v439_v4 = vmul.f32 %v9434_v47, %v9434_v47  ;;  %v9459_v7 = vsub.f32 %v373_v34, %v636_v50  ;;  %v9461_v10 = vsub.f32 %v375_v35, %v640_v51  ;;  %v383_v26 = vld [vmem:[#allocation5 + $0x98] sm:$0xff]  ;;  %v380_v31 = vld [vmem:[#allocation5 + $0x80] sm:$0xff] }
  0x8d   : > { %15541 = vst [vmem:[#allocation28_spill] sm:$0xff] %v9442_v52  ;;  %15542 = vst [vmem:[#allocation29_spill] sm:$0xff] %v9444_v53  ;;  %v9463_v11 = vsub.f32 %v372_v40, %v638_v54  ;;  %v9470_v21 = vpack.c.bf16 %v642_v55, %v638_v54  ;;  %v650_v24 = vand.u32 4294901760, %v378_v3  ;;  %v441_v27 = vmul.f32 %v9457_v6, %v9457_v6  ;;  %v382_v32 = vld [vmem:[#allocation5 + $0x90] sm:$0xff]  ;;  %v9496_v54 = vld [vmem:[%s9348_s20 + $0x80] sm:$0xff] }
  0x8e   : > { %15543 = vst [vmem:[#allocation30_spill] sm:$0xff] %v9449_v59  ;;  %15544 = vst [vmem:[#allocation31_spill] sm:$0xff] %v9452_v60  ;;  %7532 = vmatpush1.bf16.msra.mxu0 %v9442_v52  ;;  %v9475_v28 = vpack.c.bf16 %v648_v62, %v644_v61  ;;  %v656_v30 = vand.u32 4294901760, %v383_v26  ;;  %v9478_v33 = vld [vmem:[%s9348_s20 + $0x70] sm:$0xff]  ;;  %v9480_v34 = vsub.f32 %v377_v56, %v644_v61  ;;  %v654_v40 = vand.u32 4294901760, %v380_v31  ;;  %v387_v61 = vld [vmem:[#allocation5 + $0xb8] sm:$0xff] }
  0x8f   : > { %472 = vadd.xlane.f32.xlu0 %v434_v17  ;;  %474 = vadd.xlane.f32.xlu1 %v435_v18  ;;  %15545 = vst [vmem:[#allocation32_spill] sm:$0xff] %v9457_v6  ;;  %15546 = vst [vmem:[#allocation33_spill] sm:$0xff] %v9459_v7  ;;  %v9465_v17 = vsub.f32 %v374_v41, %v642_v55  ;;  %v440_v18 = vmul.f32 %v9449_v59, %v9449_v59  ;;  %v9487_v41 = vld [vmem:[%s9348_s20 + $0x78] sm:$0xff]  ;;  %v658_v56 = vand.u32 4294901760, %v382_v32  ;;  %v388_v44 = vld [vmem:[#allocation5 + $0xc0] sm:$0xff] }
  0x90   : > { %15547 = vst [vmem:[#allocation34_spill] sm:$0xff] %v9461_v10  ;;  %15548 = vst [vmem:[#allocation35_spill] sm:$0xff] %v9463_v11  ;;  %7534 = vmatprep.subr.bf16.mxu0 %v9452_v60  ;;  %v9482_v35 = vsub.f32 %v379_v57, %v648_v62  ;;  %v9489_v46 = vsub.f32 %v378_v3, %v650_v24  ;;  %v9493_v51 = vsub.f32 %v383_v26, %v656_v30  ;;  %v386_v26 = vld [vmem:[#allocation5 + $0xb0] sm:$0xff]  ;;  %v389_v60 = vld [vmem:[#allocation5 + $0xc8] sm:$0xff] }
  0x91   : > { %15549 = vst [vmem:[#allocation36_spill] sm:$0xff] %v9465_v17  ;;  %15550 = vst [vmem:[#allocation37_spill] sm:$0xff] %v9470_v21  ;;  %v9499_v55 = vpack.c.bf16 %v650_v24, %v646_v22  ;;  %v9501_v57 = vsub.f32 %v380_v31, %v654_v40  ;;  %v442_v62 = vmul.f32 %v9478_v33, %v9478_v33  ;;  %v9511_v24 = vld [vmem:[%s9348_s20 + $0x88] sm:$0xff]  ;;  %v9514_v31 = vld [vmem:[%s9348_s20 + $0x90] sm:$0xff] }
  0x92   : > { %15551 = vst [vmem:[#allocation38_spill] sm:$0xff] %v9475_v28  ;;  %15552 = vst [vmem:[#allocation39_spill] sm:$0xff] %v9478_v33  ;;  %7536 = vmatpush1.bf16.msra.mxu0 %v9470_v21  ;;  %v9516_v23 = vsub.f32 %v382_v32, %v658_v56  ;;  %v666_v21 = vand.u32 4294901760, %v386_v26  ;;  %v391_v52 = vld [vmem:[#allocation5 + $0xd8] sm:$0xff]  ;;  %v9530_v32 = vpack.c.bf16 %v658_v56, %v654_v40  ;;  %v393_v33 = vld [vmem:[#allocation5 + $0xe8] sm:$0xff] }
  0x93   : > { %476 = vadd.xlane.f32.xlu0 %v436_v29  ;;  %478 = vadd.xlane.f32.xlu1 %v437_v36  ;;  %v652_v29 = vand.u32 4294901760, %v381_v25  ;;  %15553 = vst [vmem:[#allocation40_spill] sm:$0xff] %v9480_v34  ;;  %15554 = vst [vmem:[#allocation41_spill] sm:$0xff] %v9482_v35  ;;  %v9484_v36 = vsub.f32 %v376_v63, %v646_v22  ;;  %v443_v22 = vmul.f32 %v9487_v41, %v9487_v41  ;;  %v9551_v6 = vld [vmem:[%s9348_s20 + $0x98] sm:$0xff] }
  0x94   : > { %15555 = vst [vmem:[#allocation42_spill] sm:$0xff] %v9487_v41  ;;  %15556 = vst [vmem:[#allocation43_spill] sm:$0xff] %v9496_v54  ;;  %7538 = vmatprep.subr.bf16.mxu0 %v9475_v28  ;;  %v9534_v37 = vsub.f32 %v386_v26, %v666_v21  ;;  %v390_v41 = vld [vmem:[#allocation5 + $0xd0] sm:$0xff]  ;;  %v445_v40 = vmul.f32 %v9511_v24, %v9511_v24  ;;  %v446_v56 = vmul.f32 %v9514_v31, %v9514_v31 }
  0x95   : > { %v9491_v50 = vsub.f32 %v381_v25, %v652_v29  ;;  %15557 = vst [vmem:[#allocation44_spill] sm:$0xff] %v9499_v55  ;;  %15558 = vst [vmem:[#allocation45_spill] sm:$0xff] %v9501_v57  ;;  %v9506_v63 = vpack.c.bf16 %v656_v30, %v652_v29  ;;  %v384_v25 = vld [vmem:[#allocation5 + $0xa0] sm:$0xff]  ;;  %v444_v29 = vmul.f32 %v9496_v54, %v9496_v54  ;;  %v15563_v30 = vand.u32 4294901760, %v9400_v16 }
  0x96   : > { %15560 = vst [vmem:[#allocation47_spill] sm:$0xff] %v9511_v24  ;;  %15561 = vst [vmem:[#allocation48_spill] sm:$0xff] %v9514_v31  ;;  %v662_v20 = vand.u32 4294901760, %v384_v25  ;;  %7540 = vmatpush1.bf16.msra.mxu0 %v9499_v55  ;;  %v668_v54 = vand.u32 4294901760, %v389_v60  ;;  %v670_v55 = vand.u32 4294901760, %v388_v44  ;;  %v674_v26 = vand.u32 4294901760, %v390_v41 }
  0x97   : > { %480 = vadd.xlane.f32.xlu0 %v438_v58  ;;  %482 = vadd.xlane.f32.xlu1 %v439_v4  ;;  %v385_v58 = vld [vmem:[#allocation5 + $0xa8] sm:$0xff]  ;;  %15559 = vst [vmem:[#allocation46_spill] sm:$0xff] %v9506_v63  ;;  %v664_v4 = vand.u32 4294901760, %v387_v61  ;;  %15562 = vst [vmem:[#allocation49_spill] sm:$0xff] %v9516_v23  ;;  %v9523_v28 = vsub.f32 %v9400_v16, %v15563_v30  ;;  %v15568_v16 = vand.u32 4294901760, %v9406_v19  ;;  %v672_v30 = vand.u32 4294901760, %v391_v52 }
  0x98   : > { %v660_v3 = vand.u32 4294901760, %v385_v58  ;;  %15567 = vst [vmem:[#allocation53_spill] sm:$0xff] %v9530_v32  ;;  %v9532_v38 = vsub.f32 %v384_v25, %v662_v20  ;;  %7542 = vmatprep.subr.bf16.mxu0 %v9506_v63  ;;  %v9548_v25 = vsub.f32 %v389_v60, %v668_v54  ;;  %v394_v63 = vld [vmem:[#allocation5 + $0xf0] sm:$0xff]  ;;  %v9562_v60 = vsub.f32 %v390_v41, %v674_v26  ;;  %v9574_v41 = vld [vmem:[%s9348_s20 + $0xa0] sm:$0xff] }
  0x99   : > { %15564 = vst [vmem:[#allocation50_spill] sm:$0xff] %v9523_v28  ;;  %v676_v31 = vand.u32 4294901760, %v393_v33 }
  0x9a   : > { %7544 = vmatpush1.bf16.msra.mxu0 %v9530_v32  ;;  %v9577_v32 = vld [vmem:[%s9348_s20 + $0xa8] sm:$0xff] }
  0x9b   : > { %484 = vadd.xlane.f32.xlu0 %v440_v18  ;;  %486 = vadd.xlane.f32.xlu1 %v441_v27  ;;  %v9525_v18 = vsub.f32 %v385_v58, %v660_v3  ;;  %v9527_v27 = vsub.f32 %v387_v61, %v664_v4  ;;  %v9539_v58 = vsub.f32 %v9406_v19, %v15568_v16  ;;  %v395_v19 = vld [vmem:[#allocation5 + $0xf8] sm:$0xff]  ;;  %v392_v16 = vld [vmem:[#allocation5 + $0xe0] sm:$0xff] }
  0x9c   : > { %v9542_v61 = vpack.c.bf16 %v664_v4, %v660_v3  ;;  %v9553_v3 = vpack.c.bf16 %v666_v21, %v662_v20  ;;  %v9555_v4 = vpack.c.bf16 %v672_v30, %v668_v54  ;;  %v680_v24 = vand.u32 4294901760, %v395_v19 }
  0x9d   : > { %15565 = vst [vmem:[#allocation51_spill] sm:$0xff] %v9525_v18  ;;  %15566 = vst [vmem:[#allocation52_spill] sm:$0xff] %v9527_v27  ;;  %v678_v59 = vand.u32 4294901760, %v392_v16  ;;  %v682_v20 = vand.u32 4294901760, %v394_v63  ;;  %v14599_v21 = vand.u32 4294901760, %v9523_v28  ;;  %v9569_v54 = vsub.f32 %v393_v33, %v676_v31 }
  0x9e   : > { %15569 = vst [vmem:[#allocation54_spill] sm:$0xff] %v9539_v58  ;;  %15570 = vst [vmem:[#allocation55_spill] sm:$0xff] %v9542_v61  ;;  %7546 = vmatprep.subr.bf16.mxu0 %v9542_v61 }
  0x9f   : > { %488 = vadd.xlane.f32.xlu0 %v442_v62  ;;  %490 = vadd.xlane.f32.xlu1 %v443_v22  ;;  %15571 = vst [vmem:[#allocation56_spill] sm:$0xff] %v9553_v3  ;;  %15572 = vst [vmem:[#allocation57_spill] sm:$0xff] %v9555_v4  ;;  %v9557_v62 = vsub.f32 %v391_v52, %v672_v30  ;;  %v9559_v22 = vsub.f32 %v388_v44, %v670_v55  ;;  %v14600_v52 = vmov 0.0  }
  0xa0   : > { %v447_v44 = vmul.f32 %v9551_v6, %v9551_v6  ;;  %v9571_v30 = vsub.f32 %v395_v19, %v680_v24  ;;  %v9579_v47 = vsub.f32 %v392_v16, %v678_v59  ;;  %v9581_v61 = vsub.f32 %v394_v63, %v682_v20  ;;  %716 = vmatprep.mubr.f32.mxu0 %v14600_v52  ;;  %v9601_v52 = vld [vmem:[%s9348_s20 + $0xb0] sm:$0xff] }
  0xa1   : > { %v1072_v33 = vsub.f32 %v9523_v28, %v14599_v21  ;;  %7548 = vmatpush1.bf16.msra.mxu0 %v9553_v3  ;;  %v9594_v63 = vpack.c.bf16 %v680_v24, %v676_v31  ;;  %v448_v21 = vmul.f32 %v9574_v41, %v9574_v41  ;;  %15576 = vst [vmem:[#allocation60_spill] sm:$0xff] %v9601_v52  ;;  %v9604_v3 = vld [vmem:[%s9348_s20 + $0xb8] sm:$0xff] }
  0xa2   : > { %7550 = vmatprep.subr.bf16.mxu0 %v9555_v4  ;;  %15577 = vst [vmem:[#allocation61_spill] sm:$0xff] %v9604_v3  ;;  %v9607_v24 = vpack.c.bf16 %v682_v20, %v678_v59 }
  0xa3   : > { %492 = vadd.xlane.f32.xlu0 %v444_v29  ;;  %494 = vadd.xlane.f32.xlu1 %v445_v40  ;;  %v9588_v29 = vpack.c.bf16 %v674_v26, %v670_v55  ;;  %v15574_v40 = vand.u32 4294901760, %v9539_v58  ;;  %15575 = vst [vmem:[#allocation59_spill] sm:$0xff] %v9594_v63  ;;  %v1073_v16 = vand.u32 4294901760, %v1072_v33  ;;  %v449_v55 = vmul.f32 %v9577_v32, %v9577_v32  ;;  %v9615_v33 = vld [vmem:[%s9348_s20 + $0xc0] sm:$0xff] }
  0xa4   : > { %15578 = vst [vmem:[#allocation62_spill] sm:$0xff] %v9607_v24  ;;  %15579 = vst [vmem:[#allocation63_spill] sm:$0xff] %v9615_v33  ;;  %v452_v59 = vmul.f32 %v9615_v33, %v9615_v33 }
  0xa5   : > { %15573 = vst [vmem:[#allocation58_spill] sm:$0xff] %v9588_v29  ;;  %v1084_v19 = vsub.f32 %v9539_v58, %v15574_v40  ;;  %7552 = vmatpush1.bf16.msra.mxu0 %v9588_v29  ;;  %v9618_v40 = vld [vmem:[%s9348_s20 + $0xc8] sm:$0xff]  ;;  %v14624_v29 = vand.u32 4294901760, %v9431_v45 }
  0xa6   : > { %7554 = vmatprep.subr.bf16.mxu0 %v9594_v63  ;;  %15580 = vst [vmem:[#allocation64_spill] sm:$0xff] %v9618_v40  ;;  %v453_v20 = vmul.f32 %v9618_v40, %v9618_v40 }
  0xa7   : > { %496 = vadd.xlane.f32.xlu0 %v446_v56  ;;  %498 = vadd.xlane.f32.xlu1 %v447_v44  ;;  %v1085_v26 = vand.u32 4294901760, %v1084_v19  ;;  %v450_v56 = vmul.f32 %v9601_v52, %v9601_v52  ;;  %v451_v44 = vmul.f32 %v9604_v3, %v9604_v3  ;;  %v9629_v19 = vld [vmem:[%s9348_s20 + $0xd8] sm:$0xff] }
  0xa8   : > { %15582 = vst [vmem:[#allocation66_spill] sm:$0xff] %v9629_v19 }
  0xa9   : > { %v7557_v31 = vpack.c.bf16 %v1085_v26, %v1073_v16  ;;  %7556 = vmatpush1.bf16.msra.mxu0 %v9607_v24  ;;  %v9636_v26 = vld [vmem:[%s9348_s20 + $0xe0] sm:$0xff] }
  0xaa   : > { %15583 = vst [vmem:[#allocation67_spill] sm:$0xff] %v9636_v26 }
  0xab   : > { %500 = vadd.xlane.f32.xlu0 %v448_v21  ;;  %502 = vadd.xlane.f32.xlu1 %v449_v55  ;;  %v9626_v21 = vld [vmem:[%s9348_s20 + $0xd0] sm:$0xff]  ;;  %v455_v55 = vmul.f32 %v9629_v19, %v9629_v19  ;;  %v1096_v19 = vsub.f32 %v9431_v45, %v14624_v29 }
  0xac   : > { %7558 = vmatprep.subr.bf16.mxu0 %v7557_v31  ;;  %15581 = vst [vmem:[#allocation65_spill] sm:$0xff] %v9626_v21  ;;  %v454_v16 = vmul.f32 %v9626_v21, %v9626_v21  ;;  %v9639_v31 = vld [vmem:[%s9348_s20 + $0xe8] sm:$0xff] }
  0xad   : > { %15584 = vst [vmem:[#allocation68_spill] sm:$0xff] %v9639_v31 }
  0xaf   : > { %504 = vadd.xlane.f32.xlu0 %v450_v56  ;;  %506 = vadd.xlane.f32.xlu1 %v451_v44  ;;  %v456_v56 = vmul.f32 %v9636_v26, %v9636_v26  ;;  %v457_v44 = vmul.f32 %v9639_v31, %v9639_v31 }
  0xb3   : > { %508 = vadd.xlane.f32.xlu0 %v452_v59  ;;  %510 = vadd.xlane.f32.xlu1 %v453_v20  ;;  %v9646_v59 = vld [vmem:[%s9348_s20 + $0xf0] sm:$0xff]  ;;  %v9649_v20 = vld [vmem:[%s9348_s20 + $0xf8] sm:$0xff] }
  0xb4   : > { %15585 = vst [vmem:[#allocation69_spill] sm:$0xff] %v9646_v59  ;;  %15586 = vst [vmem:[#allocation70_spill] sm:$0xff] %v9649_v20  ;;  %v458_v24 = vmul.f32 %v9646_v59, %v9646_v59  ;;  %v459_v63 = vmul.f32 %v9649_v20, %v9649_v20 }
  0xb7   : > { %512 = vadd.xlane.f32.xlu0 %v454_v16  ;;  %514 = vadd.xlane.f32.xlu1 %v455_v55  ;;  %v14618_v16 = vand.u32 4294901760, %v9422_v39  ;;  %v14621_v55 = vand.u32 4294901760, %v9427_v43 }
  0xbb   : > { %516 = vadd.xlane.f32.xlu0 %v456_v56  ;;  %518 = vadd.xlane.f32.xlu1 %v457_v44  ;;  %v1078_v56 = vsub.f32 %v9422_v39, %v14618_v16  ;;  %v1097_v16 = vand.u32 4294901760, %v1096_v19 }
  0xbd   : > { %v1079_v39 = vand.u32 4294901760, %v1078_v56  ;;  %v15590_v56 = vand.u32 4294901760, %v9459_v7 }
  0xbf   : > { %520 = vadd.xlane.f32.xlu0 %v458_v24  ;;  %522 = vadd.xlane.f32.xlu1 %v459_v63  ;;  %v1090_v24 = vsub.f32 %v9427_v43, %v14621_v55  ;;  %v15587_v55 = vand.u32 4294901760, %v9437_v48  ;;  %v1120_v40 = vsub.f32 %v9459_v7, %v15590_v56 }
  0xc1   : > { %v1108_v43 = vsub.f32 %v9437_v48, %v15587_v55  ;;  %v15591_v55 = vand.u32 4294901760, %v9461_v10  ;;  %v1121_v33 = vand.u32 4294901760, %v1120_v40 }
  0xc3   : > { %v1132_v29 = vsub.f32 %v9461_v10, %v15591_v55  ;;  %v1109_v7 = vand.u32 4294901760, %v1108_v43  ;;  %v14649_v55 = vand.u32 4294901760, %v9484_v36 }
 0x110   : > { %v461_v4 = vpop.xlane.xlu0 %460  ;;  %v465_v31 = vpop.xlane.xlu1 %464 }
 0x111   : > { %v524_v59 = vmax.f32 %v461_v4, 1e-24  ;;  %v526_v26 = vmax.f32 %v465_v31, 1e-24  ;;  %v15589_v31 = vand.u32 4294901760, %v9444_v53 }
 0x113   : > { %8764 = vrsqrt.f32 %v524_v59  ;;  %v15588_v59 = vand.u32 4294901760, %v9439_v49  ;;  %v1114_v20 = vsub.f32 %v9444_v53, %v15589_v31  ;;  %v15595_v53 = vand.u32 4294901760, %v9482_v35 }
 0x114   : > { %8766 = vrsqrt.f32 %v526_v26  ;;  %v463_v63 = vpop.xlane.xlu0 %462  ;;  %v467_v44 = vpop.xlane.xlu1 %466  ;;  %v1091_v26 = vand.u32 4294901760, %v1090_v24  ;;  %v15594_v24 = vand.u32 4294901760, %v9480_v34 }
 0x115   : > { %v525_v21 = vmax.f32 %v463_v63, 1e-24  ;;  %v527_v45 = vmax.f32 %v467_v44, 1e-24  ;;  %v1102_v4 = vsub.f32 %v9439_v49, %v15588_v59  ;;  %v15592_v44 = vand.u32 4294901760, %v9463_v11 }
 0x116   : > { %v15593_v59 = vand.u32 4294901760, %v9465_v17  ;;  %v1144_v19 = vsub.f32 %v9480_v34, %v15594_v24  ;;  %v1115_v48 = vand.u32 4294901760, %v1114_v20 }
 0x117   : > { %8768 = vrsqrt.f32 %v525_v21  ;;  %v1126_v63 = vsub.f32 %v9463_v11, %v15592_v44  ;;  %v1156_v21 = vsub.f32 %v9482_v35, %v15595_v53  ;;  %v1103_v11 = vand.u32 4294901760, %v1102_v4 }
 0x118   : > { %v1138_v49 = vsub.f32 %v9465_v17, %v15593_v59  ;;  %8770 = vrsqrt.f32 %v527_v45  ;;  %v469_v31 = vpop.xlane.xlu0 %468  ;;  %v471_v56 = vpop.xlane.xlu1 %470  ;;  %v1133_v59 = vand.u32 4294901760, %v1132_v29  ;;  %v14648_v17 = vand.u32 4294901760, %v9489_v46 }
 0x119   : > { %v528_v10 = vmax.f32 %v469_v31, 1e-24  ;;  %v529_v44 = vmax.f32 %v471_v56, 1e-24  ;;  %v1127_v24 = vand.u32 4294901760, %v1126_v63  ;;  %v1145_v34 = vand.u32 4294901760, %v1144_v19 }
 0x11a   : > { %v1139_v45 = vand.u32 4294901760, %v1138_v49  ;;  %v1157_v52 = vand.u32 4294901760, %v1156_v21  ;;  %v9708_v53 = vsub.f32 %v9484_v36, %v14649_v55  ;;  %v14647_v4 = vand.u32 4294901760, %v9491_v50 }
 0x11b   : > { %8772 = vrsqrt.f32 %v528_v10  ;;  %v9711_v29 = vpack.c.bf16 %v1091_v26, %v1079_v39  ;;  %v9713_v31 = vpack.c.bf16 %v1109_v7, %v1097_v16  ;;  %v9715_v10 = vpack.c.bf16 %v1115_v48, %v1103_v11 }
 0x11c   : > { %8774 = vrsqrt.f32 %v529_v44  ;;  %v473_v43 = vpop.xlane.xlu0 %472  ;;  %v475_v3 = vpop.xlane.xlu1 %474  ;;  %v9718_v19 = vpack.c.bf16 %v1133_v59, %v1121_v33  ;;  %v9723_v56 = vsub.f32 %v9489_v46, %v14648_v17  ;;  %v14650_v21 = vand.u32 4294901760, %v9493_v51 }
 0x11d   : > { %v8765_v20 = vpop.eup %8764  ;;  %v530_v40 = vmax.f32 %v473_v43, 1e-24  ;;  %v531_v44 = vmax.f32 %v475_v3, 1e-24  ;;  %v9727_v7 = vpack.c.bf16 %v1139_v45, %v1127_v24  ;;  %v9731_v16 = vpack.c.bf16 %v1157_v52, %v1145_v34 }
 0x11e   : > { %v8767_v49 = vpop.eup %8766  ;;  %v588_v63 = vmul.f32 %v8765_v20, %v9359_v0  ;;  %v9737_v33 = vsub.f32 %v9491_v50, %v14647_v4  ;;  %v14651_v3 = vand.u32 4294901760, %v9501_v57  ;;  %v14655_v24 = vand.u32 4294901760, %v9525_v18 }
 0x11f   : > { %8776 = vrsqrt.f32 %v530_v40  ;;  %v590_v39 = vmul.f32 %v8767_v49, %v9362_v1  ;;  %v14652_v1 = vand.u32 4294901760, %v9516_v23  ;;  %v1163_v43 = vand.u32 4294901760, %v9723_v56 }
 0x120   : > { %v9729_v48 = vand.u32 4294901760, %v588_v63  ;;  %v477_v11 = vpop.xlane.xlu0 %476  ;;  %v1180_v20 = vsub.f32 %v9493_v51, %v14650_v21  ;;  %8778 = vrsqrt.f32 %v531_v44  ;;  %v479_v49 = vpop.xlane.xlu1 %478  ;;  %v1174_v44 = vsub.f32 %v9501_v57, %v14651_v3 }
 0x121   : > { %v8769_v26 = vpop.eup %8768  ;;  %v9739_v59 = vand.u32 4294901760, %v590_v39  ;;  %v532_v40 = vmax.f32 %v477_v11, 1e-24  ;;  %v1192_v11 = vsub.f32 %v9525_v18, %v14655_v24  ;;  %v533_v21 = vmax.f32 %v479_v49, 1e-24 }
 0x122   : > { %15596 = vst [vmem:[#allocation71_spill] sm:$0xff] %v9729_v48  ;;  %v8771_v45 = vpop.eup %8770  ;;  %v9745_v34 = vsub.f32 %v588_v63, %v9729_v48  ;;  %v589_v52 = vmul.f32 %v8769_v26, %v9365_v2  ;;  %v1169_v2 = vand.u32 4294901760, %v9737_v33 }
 0x123   : > { %15597 = vst [vmem:[#allocation72_spill] sm:$0xff] %v9739_v59  ;;  %v591_v4 = vmul.f32 %v8771_v45, %v9372_v5  ;;  %v9758_v63 = vsub.f32 %v590_v39, %v9739_v59  ;;  %v1186_v5 = vsub.f32 %v9516_v23, %v14652_v1  ;;  %8780 = vrsqrt.f32 %v532_v40 }
 0x124   : > { %15598 = vst [vmem:[#allocation73_spill] sm:$0xff] %v9745_v34  ;;  %v14660_v55 = vand.u32 4294901760, %v9745_v34  ;;  %v9755_v0 = vand.u32 4294901760, %v589_v52  ;;  %v15603_v23 = vand.u32 4294901760, %v9527_v27  ;;  %v1175_v40 = vand.u32 4294901760, %v1174_v44  ;;  %v483_v44 = vpop.xlane.xlu1 %482 }
 0x125   : > { %v8773_v56 = vpop.eup %8772  ;;  %v9761_v26 = vand.u32 4294901760, %v591_v4  ;;  %8782 = vrsqrt.f32 %v533_v21 }
 0x126   : > { %15599 = vst [vmem:[#allocation74_spill] sm:$0xff] %v9755_v0  ;;  %v8775_v45 = vpop.eup %8774  ;;  %v720_v39 = vsub.f32 %v9745_v34, %v14660_v55  ;;  %v9776_v33 = vsub.f32 %v589_v52, %v9755_v0  ;;  %v592_v17 = vmul.f32 %v8773_v56, %v9379_v8  ;;  %v1204_v24 = vsub.f32 %v9527_v27, %v15603_v23  ;;  %v481_v52 = vpop.xlane.xlu0 %480 }
 0x127   : > { %15600 = vst [vmem:[#allocation75_spill] sm:$0xff] %v9761_v26  ;;  %v9780_v3 = vsub.f32 %v591_v4, %v9761_v26  ;;  %v593_v1 = vmul.f32 %v8775_v45, %v9382_v9  ;;  %v1181_v8 = vand.u32 4294901760, %v1180_v20  ;;  %v1187_v56 = vand.u32 4294901760, %v1186_v5 }
 0x128   : > { %15601 = vst [vmem:[#allocation76_spill] sm:$0xff] %v9776_v33  ;;  %v721_v18 = vand.u32 4294901760, %v720_v39  ;;  %v14665_v57 = vand.u32 4294901760, %v9776_v33  ;;  %v9788_v34 = vand.u32 4294901760, %v592_v17  ;;  %v1193_v23 = vand.u32 4294901760, %v1192_v11 }
 0x129   : > { %15602 = vst [vmem:[#allocation77_spill] sm:$0xff] %v9780_v3  ;;  %v8777_v49 = vpop.eup %8776  ;;  %v15605_v39 = vmov 0.0   ;;  %v534_v55 = vmax.f32 %v481_v52, 1e-24  ;;  %v9798_v5 = vand.u32 4294901760, %v593_v1  ;;  %v1205_v4 = vand.u32 4294901760, %v1204_v24 }
 0x12a   : > { %15604 = vst [vmem:[#allocation78_spill] sm:$0xff] %v9788_v34  ;;  %722 = vmatmul.mubr.f32.vlgmr.msra.gmra.mrb[0].mxu0 %v721_v18  ;;  %v731_v9 = vsub.f32 %v9776_v33, %v14665_v57  ;;  %v15607_v27 = vand.u32 4294901760, %v9758_v63  ;;  %v9805_v21 = vsub.f32 %v592_v17, %v9788_v34  ;;  %v8779_v11 = vpop.eup %8778  ;;  %v15609_v52 = vand.u32 4294901760, %v9708_v53 }
 0x12b   : > { %7560 = vmatpush1.bf16.msra.mxu0 %v9711_v29  ;;  %727 = vmatprep.mubr.f32.mxu0 %v15605_v39  ;;  %15606 = vst [vmem:[#allocation79_spill] sm:$0xff] %v9798_v5  ;;  %v594_v29 = vmul.f32 %v8777_v49, %v9389_v12  ;;  %v7573_v45 = vpack.c.bf16 %v1181_v8, %v1169_v2  ;;  %v14671_v33 = vand.u32 4294901760, %v9548_v25  ;;  %v14670_v24 = vand.u32 4294901760, %v9557_v62 }
 0x12c   : > { %v732_v18 = vand.u32 4294901760, %v731_v9  ;;  %v742_v57 = vsub.f32 %v9758_v63, %v15607_v27  ;;  %7562 = vmatprep.subr.bf16.mxu0 %v9713_v31  ;;  %15608 = vst [vmem:[#allocation80_spill] sm:$0xff] %v9805_v21  ;;  %v7571_v20 = vpack.c.bf16 %v1163_v43, %v15609_v52  ;;  %v535_v9 = vmax.f32 %v483_v44, 1e-24 }
 0x12d   : > { %v9812_v26 = vpack.c.bf16 %v1187_v56, %v1175_v40  ;;  %v15610_v27 = vand.u32 4294901760, %v9532_v38  ;;  %v15611_v31 = vand.u32 4294901760, %v9534_v37  ;;  %8784 = vrsqrt.f32 %v534_v55  ;;  %v485_v56 = vpop.xlane.xlu0 %484  ;;  %v8781_v55 = vpop.eup %8780 }
 0x12e   : > { %733 = vmatmul.mubr.f32.gmra.mrb[2].mxu0 %v732_v18  ;;  %v15612_v53 = vand.u32 4294901760, %v9780_v3  ;;  %v9826_v2 = vsub.f32 %v593_v1, %v9798_v5  ;;  %v9828_v49 = vpack.c.bf16 %v1205_v4, %v1193_v23  ;;  %v743_v8 = vand.u32 4294901760, %v742_v57 }
 0x12f   : > { %v1198_v17 = vsub.f32 %v9532_v38, %v15610_v27  ;;  %v1210_v12 = vsub.f32 %v9534_v37, %v15611_v31  ;;  %738 = vmatprep.mubr.f32.mxu0 %v15605_v39  ;;  %7564 = vmatpush1.bf16.msra.mxu0 %v9715_v10  ;;  %v14676_v40 = vand.u32 4294901760, %v9805_v21  ;;  %v9831_v44 = vand.u32 4294901760, %v594_v29 }
 0x130   : > { %v753_v43 = vsub.f32 %v9780_v3, %v15612_v53  ;;  %v595_v18 = vmul.f32 %v8779_v11, %v9392_v13  ;;  %7566 = vmatprep.subr.bf16.mxu0 %v9718_v19  ;;  %v1216_v10 = vsub.f32 %v9548_v25, %v14671_v33  ;;  %v1228_v1 = vsub.f32 %v9557_v62, %v14670_v24  ;;  %v8783_v53 = vpop.eup %8782 }
 0x131   : > { %15613 = vst [vmem:[#allocation81_spill] sm:$0xff] %v9831_v44  ;;  %v14674_v57 = vand.u32 4294901760, %v9559_v22  ;;  %v14673_v4 = vand.u32 4294901760, %v9562_v60  ;;  %8786 = vrsqrt.f32 %v535_v9  ;;  %v1199_v23 = vand.u32 4294901760, %v1198_v17  ;;  %v487_v9 = vpop.xlane.xlu1 %486 }
 0x132   : > { %744 = vmatmul.mubr.f32.gmra.mrb[4].mxu0 %v743_v8  ;;  %v14672_v13 = vand.u32 4294901760, %v9569_v54  ;;  %v14675_v19 = vand.u32 4294901760, %v9571_v30  ;;  %v754_v11 = vand.u32 4294901760, %v753_v43  ;;  %v536_v52 = vmax.f32 %v485_v56, 1e-24 }
 0x133   : > { %749 = vmatprep.mubr.f32.mxu0 %v15605_v39  ;;  %v14681_v27 = vand.u32 4294901760, %v9826_v2  ;;  %7568 = vmatpush1.bf16.msra.mxu0 %v9727_v7  ;;  %v1211_v31 = vand.u32 4294901760, %v1210_v12  ;;  %v764_v8 = vsub.f32 %v9805_v21, %v14676_v40  ;;  %v9852_v17 = vsub.f32 %v594_v29, %v9831_v44 }
 0x134   : > { %v9854_v24 = vand.u32 4294901760, %v595_v18  ;;  %v596_v33 = vmul.f32 %v8781_v55, %v9395_v14  ;;  %7570 = vmatprep.subr.bf16.mxu0 %v9731_v16  ;;  %v1217_v43 = vand.u32 4294901760, %v1216_v10  ;;  %v1229_v56 = vand.u32 4294901760, %v1228_v1 }
 0x135   : > { %15614 = vst [vmem:[#allocation82_spill] sm:$0xff] %v9852_v17  ;;  %v1222_v7 = vsub.f32 %v9559_v22, %v14674_v57  ;;  %v1234_v12 = vsub.f32 %v9562_v60, %v14673_v4  ;;  %v1240_v29 = vsub.f32 %v9569_v54, %v14672_v13  ;;  %v1252_v14 = vsub.f32 %v9571_v30, %v14675_v19  ;;  %v489_v57 = vpop.xlane.xlu0 %488 }
 0x136   : > { %15615 = vst [vmem:[#allocation83_spill] sm:$0xff] %v9854_v24  ;;  %755 = vmatmul.mubr.f32.gmra.mrb[6].mxu0 %v754_v11  ;;  %8788 = vrsqrt.f32 %v536_v52  ;;  %v775_v10 = vsub.f32 %v9826_v2, %v14681_v27  ;;  %v537_v1 = vmax.f32 %v487_v9, 1e-24  ;;  %v597_v11 = vmul.f32 %v8783_v53, %v9398_v15 }
 0x137   : > { %760 = vmatprep.mubr.f32.mxu0 %v15605_v39  ;;  %7572 = vmatpush1.bf16.msra.mxu0 %v7571_v20  ;;  %v765_v13 = vand.u32 4294901760, %v764_v8  ;;  %v14687_v4 = vand.u32 4294901760, %v9852_v17  ;;  %v9879_v19 = vsub.f32 %v595_v18, %v9854_v24  ;;  %v9881_v40 = vand.u32 4294901760, %v596_v33  ;;  %v8785_v55 = vpop.eup %8784 }
 0x138   : > { %7574 = vmatprep.subr.bf16.mxu0 %v7573_v45  ;;  %v7579_v52 = vpack.c.bf16 %v1211_v31, %v1199_v23  ;;  %v7581_v16 = vpack.c.bf16 %v1229_v56, %v1217_v43  ;;  %v1223_v21 = vand.u32 4294901760, %v1222_v7  ;;  %v1235_v3 = vand.u32 4294901760, %v1234_v12  ;;  %v491_v23 = vpop.xlane.xlu1 %490 }
 0x139   : > { %15616 = vst [vmem:[#allocation84_spill] sm:$0xff] %v9879_v19  ;;  %15617 = vst [vmem:[#allocation85_spill] sm:$0xff] %v9881_v40  ;;  %v1241_v9 = vand.u32 4294901760, %v1240_v29  ;;  %v1253_v27 = vand.u32 4294901760, %v1252_v14  ;;  %v15618_v15 = vand.u32 4294901760, %v9579_v47  ;;  %v15619_v53 = vand.u32 4294901760, %v9581_v61 }
 0x13a   : > { %766 = vmatmul.mubr.f32.gmra.mrb[8].mxu0 %v765_v13  ;;  %v776_v8 = vand.u32 4294901760, %v775_v10  ;;  %8790 = vrsqrt.f32 %v537_v1  ;;  %v538_v45 = vmax.f32 %v489_v57, 1e-24  ;;  %v9890_v31 = vand.u32 4294901760, %v597_v11  ;;  %v15623_v1 = vld [vmem:[#allocation25_spill] sm:$0xff] }
 0x13b   : > { %v1246_v20 = vsub.f32 %v9579_v47, %v15618_v15  ;;  %v1258_v18 = vsub.f32 %v9581_v61, %v15619_v53  ;;  %771 = vmatprep.mubr.f32.mxu0 %v15605_v39  ;;  %7576 = vmatpush1.bf16.msra.mxu0 %v9812_v26  ;;  %v8787_v13 = vpop.eup %8786  ;;  %v786_v43 = vsub.f32 %v9852_v17, %v14687_v4  ;;  %v14686_v56 = vand.u32 4294901760, %v9879_v19 }
 0x13c   : > { %15620 = vst [vmem:[#allocation86_spill] sm:$0xff] %v9890_v31  ;;  %v9898_v7 = vsub.f32 %v596_v33, %v9881_v40  ;;  %v598_v12 = vmul.f32 %v8785_v55, %v9425_v42  ;;  %7578 = vmatprep.subr.bf16.mxu0 %v9828_v49  ;;  %v539_v57 = vmax.f32 %v491_v23, 1e-24  ;;  %v7583_v29 = vpack.c.bf16 %v1235_v3, %v1223_v21  ;;  %v493_v3 = vpop.xlane.xlu0 %492 }
 0x13d   : > { %v7585_v14 = vpack.c.bf16 %v1253_v27, %v1241_v9  ;;  %v1247_v10 = vand.u32 4294901760, %v1246_v20  ;;  %8792 = vrsqrt.f32 %v538_v45  ;;  %v9904_v26 = vsub.f32 %v597_v11, %v9890_v31  ;;  %v15627_v45 = vld [vmem:[#allocation30_spill] sm:$0xff] }
 0x13e   : > { %15621 = vst [vmem:[#allocation87_spill] sm:$0xff] %v9898_v7  ;;  %777 = vmatmul.mubr.f32.gmra.mrb[10].mxu0 %v776_v8  ;;  %v599_v15 = vmul.f32 %v8787_v13, %v15623_v1  ;;  %v1259_v33 = vand.u32 4294901760, %v1258_v18  ;;  %v787_v53 = vand.u32 4294901760, %v786_v43  ;;  %v797_v42 = vsub.f32 %v9879_v19, %v14686_v56 }
 0x13f   : > { %782 = vmatprep.mubr.f32.mxu0 %v15605_v39  ;;  %15622 = vst [vmem:[#allocation88_spill] sm:$0xff] %v9904_v26  ;;  %7580 = vmatpush1.bf16.msra.mxu0 %v7579_v52  ;;  %v14684_v49 = vand.u32 4294901760, %v9898_v7  ;;  %v9911_v21 = vand.u32 4294901760, %v598_v12  ;;  %8794 = vrsqrt.f32 %v539_v57  ;;  %v540_v55 = vmax.f32 %v493_v3, 1e-24  ;;  %v495_v52 = vpop.xlane.xlu1 %494 }
 0x140   : > { %7582 = vmatprep.subr.bf16.mxu0 %v7581_v16  ;;  %v8789_v27 = vpop.eup %8788  ;;  %v14683_v11 = vand.u32 4294901760, %v9904_v26  ;;  %v9915_v9 = vand.u32 4294901760, %v599_v15  ;;  %v7587_v20 = vpack.c.bf16 %v1259_v33, %v1247_v10  ;;  %v798_v18 = vand.u32 4294901760, %v797_v42  ;;  %v497_v1 = vpop.xlane.xlu0 %496 }
 0x141   : > { %15624 = vst [vmem:[#allocation25_spill] sm:$0xff] %v9911_v21  ;;  %v808_v8 = vsub.f32 %v9898_v7, %v14684_v49  ;;  %v9921_v16 = vsub.f32 %v598_v12, %v9911_v21  ;;  %v600_v23 = vmul.f32 %v8789_v27, %v15627_v45  ;;  %v541_v43 = vmax.f32 %v495_v52, 1e-24  ;;  %v15633_v45 = vld [vmem:[#allocation39_spill] sm:$0xff] }
 0x142   : > { %788 = vmatmul.mubr.f32.gmra.mrb[12].mxu0 %v787_v53  ;;  %15625 = vst [vmem:[#allocation89_spill] sm:$0xff] %v9915_v9  ;;  %8796 = vrsqrt.f32 %v540_v55  ;;  %v819_v57 = vsub.f32 %v9904_v26, %v14683_v11  ;;  %v542_v27 = vmax.f32 %v497_v1, 1e-24 }
 0x143   : > { %793 = vmatprep.mubr.f32.mxu0 %v15605_v39  ;;  %7584 = vmatpush1.bf16.msra.mxu0 %v7583_v29  ;;  %15626 = vst [vmem:[#allocation90_spill] sm:$0xff] %v9921_v16  ;;  %v9929_v29 = vsub.f32 %v599_v15, %v9915_v9  ;;  %v809_v10 = vand.u32 4294901760, %v808_v8  ;;  %v14682_v12 = vand.u32 4294901760, %v9921_v16  ;;  %v9932_v33 = vand.u32 4294901760, %v600_v23 }
 0x144   : > { %7586 = vmatprep.subr.bf16.mxu0 %v7585_v14  ;;  %v8791_v13 = vpop.eup %8790  ;;  %v15630_v14 = vld [vmem:[#allocation32_spill] sm:$0xff]  ;;  %8798 = vrsqrt.f32 %v541_v43  ;;  %v820_v3 = vand.u32 4294901760, %v819_v57 }
 0x145   : > { %15628 = vst [vmem:[#allocation30_spill] sm:$0xff] %v9929_v29  ;;  %15629 = vst [vmem:[#allocation91_spill] sm:$0xff] %v9932_v33  ;;  %v601_v53 = vmul.f32 %v8791_v13, %v15630_v14  ;;  %v14685_v55 = vand.u32 4294901760, %v9929_v29  ;;  %v830_v52 = vsub.f32 %v9921_v16, %v14682_v12  ;;  %8800 = vrsqrt.f32 %v542_v27 }
 0x146   : > { %799 = vmatmul.mubr.f32.gmra.mrb[14].mxu0 %v798_v18  ;;  %v9941_v18 = vsub.f32 %v600_v23, %v9932_v33  ;;  %v501_v23 = vpop.xlane.xlu0 %500 }
 0x147   : > { %804 = vmatprep.mubr.f32.mxu0 %v15605_v39  ;;  %7588 = vmatpush1.bf16.msra.mxu0 %v7587_v20  ;;  %v8793_v42 = vpop.eup %8792  ;;  %v499_v20 = vpop.xlane.xlu1 %498  ;;  %v9943_v8 = vand.u32 4294901760, %v601_v53  ;;  %v841_v43 = vsub.f32 %v9929_v29, %v14685_v55  ;;  %v831_v14 = vand.u32 4294901760, %v830_v52 }
 0x148   : > { %15631 = vst [vmem:[#allocation32_spill] sm:$0xff] %v9941_v18  ;;  %v602_v13 = vmul.f32 %v8793_v42, %v15633_v45  ;;  %v543_v57 = vmax.f32 %v499_v20, 1e-24  ;;  %v14688_v12 = vand.u32 4294901760, %v9941_v18  ;;  %v544_v20 = vmax.f32 %v501_v23, 1e-24 }
 0x149   : > { %v8795_v15 = vpop.eup %8794  ;;  %15632 = vst [vmem:[#allocation92_spill] sm:$0xff] %v9943_v8  ;;  %v9953_v11 = vsub.f32 %v601_v53, %v9943_v8  ;;  %v842_v27 = vand.u32 4294901760, %v841_v43  ;;  %v15641_v23 = vld [vmem:[#allocation47_spill] sm:$0xff] }
 0x14a   : > { %810 = vmatmul.mubr.f32.gmra.mrb[16].mxu0 %v809_v10  ;;  %v15634_v10 = vld [vmem:[#allocation42_spill] sm:$0xff]  ;;  %v9955_v49 = vand.u32 4294901760, %v602_v13  ;;  %8802 = vrsqrt.f32 %v543_v57  ;;  %v852_v53 = vsub.f32 %v9941_v18, %v14688_v12  ;;  %v505_v18 = vpop.xlane.xlu0 %504 }
 0x14b   : > { %815 = vmatprep.mubr.f32.mxu0 %v15605_v39  ;;  %v603_v1 = vmul.f32 %v8795_v15, %v15634_v10  ;;  %15635 = vst [vmem:[#allocation39_spill] sm:$0xff] %v9953_v11  ;;  %v503_v15 = vpop.xlane.xlu1 %502  ;;  %v14693_v10 = vand.u32 4294901760, %v9953_v11  ;;  %8804 = vrsqrt.f32 %v544_v20 }
 0x14c   : > { %15636 = vst [vmem:[#allocation42_spill] sm:$0xff] %v9955_v49  ;;  %v8797_v42 = vpop.eup %8796  ;;  %v9967_v55 = vsub.f32 %v602_v13, %v9955_v49  ;;  %v545_v43 = vmax.f32 %v503_v15, 1e-24  ;;  %v853_v4 = vand.u32 4294901760, %v852_v53 }
 0x14d   : > { %v9960_v52 = vand.u32 4294901760, %v603_v1  ;;  %v863_v12 = vsub.f32 %v9953_v11, %v14693_v10 }
 0x14e   : > { %821 = vmatmul.mubr.f32.gmra.mrb[18].mxu0 %v820_v3  ;;  %v7589_v3 = vpack.c.bf16 %v9539_v58, %v9523_v28  ;;  %v8799_v45 = vpop.eup %8798  ;;  %15638 = vst [vmem:[#allocation94_spill] sm:$0xff] %v9967_v55  ;;  %v14696_v13 = vand.u32 4294901760, %v9967_v55  ;;  %8806 = vrsqrt.f32 %v545_v43 }
 0x14f   : > { %826 = vmatprep.mubr.f32.mxu0 %v15605_v39  ;;  %15637 = vst [vmem:[#allocation93_spill] sm:$0xff] %v9960_v52  ;;  %v9972_v57 = vsub.f32 %v603_v1, %v9960_v52  ;;  %v507_v20 = vpop.xlane.xlu1 %506 }
 0x150   : > { %7590 = vmatprep.subr.bf16.mxu0 %v7589_v3  ;;  %v605_v3 = vmul.f32 %v8799_v45, %v15641_v23  ;;  %v864_v45 = vand.u32 4294901760, %v863_v12  ;;  %v874_v53 = vsub.f32 %v9967_v55, %v14696_v13  ;;  %v15645_v23 = vld [vmem:[#allocation48_spill] sm:$0xff]  ;;  %v547_v43 = vmax.f32 %v507_v20, 1e-24 }
 0x151   : > { %v14699_v1 = vand.u32 4294901760, %v9972_v57 }
 0x152   : > { %832 = vmatmul.mubr.f32.gmra.mrb[20].mxu0 %v831_v14  ;;  %v15639_v14 = vld [vmem:[#allocation43_spill] sm:$0xff]  ;;  %v9983_v15 = vand.u32 4294901760, %v605_v3  ;;  %v875_v11 = vand.u32 4294901760, %v874_v53 }
 0x153   : > { %837 = vmatprep.mubr.f32.mxu0 %v15605_v39  ;;  %v604_v56 = vmul.f32 %v8797_v42, %v15639_v14  ;;  %15640 = vst [vmem:[#allocation43_spill] sm:$0xff] %v9972_v57  ;;  %v8801_v42 = vpop.eup %8800  ;;  %v511_v53 = vpop.xlane.xlu1 %510 }
 0x154   : > { %15643 = vst [vmem:[#allocation95_spill] sm:$0xff] %v9983_v15  ;;  %v606_v10 = vmul.f32 %v8801_v42, %v15645_v23  ;;  %v9997_v12 = vsub.f32 %v605_v3, %v9983_v15 }
 0x155   : > { %v9979_v29 = vand.u32 4294901760, %v604_v56 }
 0x156   : > { %843 = vmatmul.mubr.f32.gmra.mrb[22].mxu0 %v842_v27  ;;  %v546_v27 = vmax.f32 %v505_v18, 1e-24  ;;  %v885_v18 = vsub.f32 %v9972_v57, %v14699_v1  ;;  %15646 = vst [vmem:[#allocation48_spill] sm:$0xff] %v9997_v12  ;;  %v10000_v55 = vand.u32 4294901760, %v606_v10  ;;  %v14707_v23 = vand.u32 4294901760, %v9997_v12 }
 0x157   : > { %848 = vmatprep.mubr.f32.mxu0 %v15605_v39  ;;  %15642 = vst [vmem:[#allocation47_spill] sm:$0xff] %v9979_v29  ;;  %v9989_v14 = vsub.f32 %v604_v56, %v9979_v29  ;;  %v509_v56 = vpop.xlane.xlu0 %508 }
 0x158   : > { %8808 = vrsqrt.f32 %v546_v27  ;;  %15647 = vst [vmem:[#allocation97_spill] sm:$0xff] %v10000_v55  ;;  %v886_v27 = vand.u32 4294901760, %v885_v18  ;;  %v548_v20 = vmax.f32 %v509_v56, 1e-24  ;;  %v10009_v57 = vsub.f32 %v606_v10, %v10000_v55 }
 0x159   : > { %15644 = vst [vmem:[#allocation96_spill] sm:$0xff] %v9989_v14  ;;  %v14704_v13 = vand.u32 4294901760, %v9989_v14  ;;  %8810 = vrsqrt.f32 %v547_v43 }
 0x15a   : > { %854 = vmatmul.mubr.f32.gmra.mrb[24].mxu0 %v853_v4  ;;  %v8803_v4 = vpop.eup %8802  ;;  %15648 = vst [vmem:[#allocation98_spill] sm:$0xff] %v10009_v57  ;;  %8812 = vrsqrt.f32 %v548_v20  ;;  %v14712_v56 = vand.u32 4294901760, %v10009_v57  ;;  %v515_v20 = vpop.xlane.xlu1 %514 }
 0x15b   : > { %859 = vmatprep.mubr.f32.mxu0 %v15605_v39  ;;  %v607_v42 = vmul.f32 %v8803_v4, %v9551_v6  ;;  %v896_v3 = vsub.f32 %v9989_v14, %v14704_v13  ;;  %v549_v4 = vmax.f32 %v511_v53, 1e-24  ;;  %v513_v10 = vpop.xlane.xlu0 %512 }
 0x15d   : > { %v10011_v16 = vand.u32 4294901760, %v607_v42  ;;  %v897_v18 = vand.u32 4294901760, %v896_v3  ;;  %8814 = vrsqrt.f32 %v549_v4  ;;  %v15656_v4 = vld [vmem:[#allocation61_spill] sm:$0xff] }
 0x15e   : > { %865 = vmatmul.mubr.f32.gmra.mrb[26].mxu0 %v864_v45  ;;  %v8805_v45 = vpop.eup %8804 }
 0x15f   : > { %870 = vmatprep.mubr.f32.mxu0 %v15605_v39  ;;  %v8807_v1 = vpop.eup %8806  ;;  %15649 = vst [vmem:[#allocation99_spill] sm:$0xff] %v10011_v16  ;;  %v608_v6 = vmul.f32 %v8805_v45, %v9574_v41  ;;  %v10021_v13 = vsub.f32 %v607_v42, %v10011_v16 }
 0x160   : > { %v609_v43 = vmul.f32 %v8807_v1, %v9577_v32  ;;  %v918_v1 = vsub.f32 %v10009_v57, %v14712_v56  ;;  %v517_v57 = vpop.xlane.xlu0 %516 }
 0x161   : > { %15650 = vst [vmem:[#allocation100_spill] sm:$0xff] %v10021_v13  ;;  %v10023_v14 = vand.u32 4294901760, %v608_v6  ;;  %v14717_v42 = vand.u32 4294901760, %v10021_v13 }
 0x162   : > { %876 = vmatmul.mubr.f32.gmra.mrb[28].mxu0 %v875_v11  ;;  %v907_v11 = vsub.f32 %v9997_v12, %v14707_v23  ;;  %v8809_v41 = vpop.eup %8808  ;;  %v10026_v53 = vand.u32 4294901760, %v609_v43  ;;  %v15654_v23 = vld [vmem:[#allocation60_spill] sm:$0xff]  ;;  %v551_v12 = vmax.f32 %v515_v20, 1e-24  ;;  %v919_v26 = vand.u32 4294901760, %v918_v1 }
 0x163   : > { %881 = vmatprep.mubr.f32.mxu0 %v15605_v39  ;;  %15651 = vst [vmem:[#allocation101_spill] sm:$0xff] %v10023_v14  ;;  %v8811_v32 = vpop.eup %8810  ;;  %v10033_v3 = vsub.f32 %v608_v6, %v10023_v14  ;;  %v929_v56 = vsub.f32 %v10021_v13, %v14717_v42 }
 0x164   : > { %v908_v45 = vand.u32 4294901760, %v907_v11  ;;  %15652 = vst [vmem:[#allocation102_spill] sm:$0xff] %v10026_v53  ;;  %v10038_v11 = vsub.f32 %v609_v43, %v10026_v53 }
 0x165   : > { %15653 = vst [vmem:[#allocation103_spill] sm:$0xff] %v10033_v3  ;;  %v14720_v6 = vand.u32 4294901760, %v10033_v3  ;;  %v930_v20 = vand.u32 4294901760, %v929_v56 }
 0x166   : > { %887 = vmatmul.mubr.f32.gmra.mrb[30].mxu0 %v886_v27  ;;  %v550_v27 = vmax.f32 %v513_v10, 1e-24  ;;  %15655 = vst [vmem:[#allocation60_spill] sm:$0xff] %v10038_v11  ;;  %v611_v10 = vmul.f32 %v8811_v32, %v15656_v4  ;;  %v14723_v43 = vand.u32 4294901760, %v10038_v11  ;;  %v15660_v4 = vld [vmem:[#allocation63_spill] sm:$0xff] }
 0x167   : > { %892 = vmatprep.mubr.f32.mxu0 %v15605_v39  ;;  %v940_v32 = vsub.f32 %v10033_v3, %v14720_v6 }
 0x168   : > { %8816 = vrsqrt.f32 %v550_v27  ;;  %v10049_v27 = vand.u32 4294901760, %v611_v10 }
 0x169   : > { %8818 = vrsqrt.f32 %v551_v12  ;;  %v941_v13 = vand.u32 4294901760, %v940_v32 }
 0x16a   : > { %898 = vmatmul.mubr.f32.gmra.mrb[32].mxu0 %v897_v18  ;;  %v610_v18 = vmul.f32 %v8809_v41, %v15654_v23  ;;  %v8813_v23 = vpop.eup %8812  ;;  %v552_v41 = vmax.f32 %v517_v57, 1e-24  ;;  %15658 = vst [vmem:[#allocation104_spill] sm:$0xff] %v10049_v27  ;;  %v951_v57 = vsub.f32 %v10038_v11, %v14723_v43  ;;  %v10063_v56 = vsub.f32 %v611_v10, %v10049_v27 }
 0x16b   : > { %903 = vmatprep.mubr.f32.mxu0 %v15605_v39  ;;  %v612_v42 = vmul.f32 %v8813_v23, %v15660_v4  ;;  %v15663_v23 = vld [vmem:[#allocation64_spill] sm:$0xff] }
 0x16c   : > { %v10045_v7 = vand.u32 4294901760, %v610_v18  ;;  %8820 = vrsqrt.f32 %v552_v41  ;;  %15661 = vst [vmem:[#allocation63_spill] sm:$0xff] %v10063_v56  ;;  %v952_v41 = vand.u32 4294901760, %v951_v57  ;;  %v14733_v43 = vand.u32 4294901760, %v10063_v56 }
 0x16d   : > { %v10066_v3 = vand.u32 4294901760, %v612_v42 }
 0x16e   : > { %909 = vmatmul.mubr.f32.gmra.mrb[34].mxu0 %v908_v45  ;;  %15657 = vst [vmem:[#allocation61_spill] sm:$0xff] %v10045_v7  ;;  %v519_v45 = vpop.xlane.xlu1 %518  ;;  %v10055_v1 = vsub.f32 %v610_v18, %v10045_v7  ;;  %v521_v18 = vpop.xlane.xlu0 %520 }
 0x16f   : > { %914 = vmatprep.mubr.f32.mxu0 %v15605_v39  ;;  %v553_v12 = vmax.f32 %v519_v45, 1e-24  ;;  %15662 = vst [vmem:[#allocation106_spill] sm:$0xff] %v10066_v3  ;;  %v554_v45 = vmax.f32 %v521_v18, 1e-24  ;;  %v10075_v19 = vsub.f32 %v612_v42, %v10066_v3  ;;  %v15667_v18 = vld [vmem:[#allocation66_spill] sm:$0xff] }
 0x170   : > { %15659 = vst [vmem:[#allocation105_spill] sm:$0xff] %v10055_v1  ;;  %v14729_v6 = vand.u32 4294901760, %v10055_v1 }
 0x171   : > { %8822 = vrsqrt.f32 %v553_v12  ;;  %15664 = vst [vmem:[#allocation64_spill] sm:$0xff] %v10075_v19  ;;  %v973_v12 = vsub.f32 %v10063_v56, %v14733_v43 }
 0x172   : > { %920 = vmatmul.mubr.f32.gmra.mrb[36].mxu0 %v919_v26  ;;  %v8815_v26 = vpop.eup %8814  ;;  %v962_v10 = vsub.f32 %v10055_v1, %v14729_v6  ;;  %v523_v32 = vpop.xlane.xlu1 %522  ;;  %8824 = vrsqrt.f32 %v554_v45  ;;  %v14734_v1 = vand.u32 4294901760, %v10075_v19 }
 0x173   : > { %925 = vmatprep.mubr.f32.mxu0 %v15605_v39  ;;  %v613_v4 = vmul.f32 %v8815_v26, %v15663_v23  ;;  %v15666_v26 = vld [vmem:[#allocation65_spill] sm:$0xff]  ;;  %v555_v57 = vmax.f32 %v523_v32, 1e-24  ;;  %v15672_v32 = vld [vmem:[#allocation67_spill] sm:$0xff] }
 0x174   : > { %v963_v6 = vand.u32 4294901760, %v962_v10 }
 0x175   : > { %v10077_v58 = vand.u32 4294901760, %v613_v4  ;;  %8826 = vrsqrt.f32 %v555_v57 }
 0x176   : > { %931 = vmatmul.mubr.f32.gmra.mrb[38].mxu0 %v930_v20  ;;  %v8817_v20 = vpop.eup %8816 }
 0x177   : > { %936 = vmatprep.mubr.f32.mxu0 %v15605_v39  ;;  %v8819_v11 = vpop.eup %8818  ;;  %15665 = vst [vmem:[#allocation107_spill] sm:$0xff] %v10077_v58  ;;  %v10087_v42 = vsub.f32 %v613_v4, %v10077_v58 }
 0x178   : > { %v615_v23 = vmul.f32 %v8819_v11, %v15667_v18  ;;  %v984_v11 = vsub.f32 %v10075_v19, %v14734_v1 }
 0x179   : > { %15668 = vst [vmem:[#allocation65_spill] sm:$0xff] %v10087_v42  ;;  %v14739_v10 = vand.u32 4294901760, %v10087_v42 }
 0x17a   : > { %942 = vmatmul.mubr.f32.gmra.mrb[40].mxu0 %v941_v13  ;;  %v614_v13 = vmul.f32 %v8817_v20, %v15666_v26  ;;  %v8821_v20 = vpop.eup %8820  ;;  %v10092_v45 = vand.u32 4294901760, %v615_v23  ;;  %v985_v43 = vand.u32 4294901760, %v984_v11 }
 0x17b   : > { %947 = vmatprep.mubr.f32.mxu0 %v15605_v39  ;;  %v8823_v26 = vpop.eup %8822  ;;  %v616_v18 = vmul.f32 %v8821_v20, %v15672_v32  ;;  %v995_v1 = vsub.f32 %v10087_v42, %v14739_v10  ;;  %v15678_v32 = vld [vmem:[#allocation69_spill] sm:$0xff] }
 0x17c   : > { %v10089_v28 = vand.u32 4294901760, %v614_v13  ;;  %15670 = vst [vmem:[#allocation108_spill] sm:$0xff] %v10092_v45 }
 0x17d   : > { %v10111_v56 = vand.u32 4294901760, %v616_v18 }
 0x17e   : > { %953 = vmatmul.mubr.f32.gmra.mrb[42].mxu0 %v952_v41  ;;  %15669 = vst [vmem:[#allocation66_spill] sm:$0xff] %v10089_v28  ;;  %v974_v41 = vand.u32 4294901760, %v973_v12  ;;  %v10099_v4 = vsub.f32 %v614_v13, %v10089_v28  ;;  %v15674_v12 = vld [vmem:[#allocation68_spill] sm:$0xff]  ;;  %v8825_v13 = vpop.eup %8824 }
 0x17f   : > { %958 = vmatprep.mubr.f32.mxu0 %v15605_v39  ;;  %v617_v57 = vmul.f32 %v8823_v26, %v15674_v12  ;;  %15675 = vst [vmem:[#allocation68_spill] sm:$0xff] %v10111_v56  ;;  %v10121_v11 = vsub.f32 %v616_v18, %v10111_v56  ;;  %v618_v12 = vmul.f32 %v8825_v13, %v15678_v32  ;;  %v8827_v10 = vpop.eup %8826  ;;  %v15681_v18 = vld [vmem:[#allocation70_spill] sm:$0xff] }
 0x180   : > { %15671 = vst [vmem:[#allocation109_spill] sm:$0xff] %v10099_v4  ;;  %v14744_v19 = vand.u32 4294901760, %v10099_v4 }
 0x181   : > { %15677 = vst [vmem:[#allocation111_spill] sm:$0xff] %v10121_v11  ;;  %v14750_v17 = vand.u32 4294901760, %v10121_v11 }
 0x182   : > { %964 = vmatmul.mubr.f32.gmra.mrb[44].mxu0 %v963_v6  ;;  %v10104_v6 = vsub.f32 %v615_v23, %v10092_v45  ;;  %v996_v23 = vand.u32 4294901760, %v995_v1  ;;  %v1006_v26 = vsub.f32 %v10099_v4, %v14744_v19  ;;  %v10132_v19 = vand.u32 4294901760, %v618_v12 }
 0x183   : > { %969 = vmatprep.mubr.f32.mxu0 %v15605_v39  ;;  %v619_v4 = vmul.f32 %v8827_v10, %v15681_v18 }
 0x184   : > { %15673 = vst [vmem:[#allocation67_spill] sm:$0xff] %v10104_v6  ;;  %v14747_v20 = vand.u32 4294901760, %v10104_v6  ;;  %v1007_v1 = vand.u32 4294901760, %v1006_v26  ;;  %15680 = vst [vmem:[#allocation112_spill] sm:$0xff] %v10132_v19 }
 0x185   : > { %v10143_v26 = vand.u32 4294901760, %v619_v4 }
 0x186   : > { %975 = vmatmul.mubr.f32.gmra.mrb[46].mxu0 %v974_v41  ;;  %v10115_v41 = vand.u32 4294901760, %v617_v57 }
 0x187   : > { %980 = vmatprep.mubr.f32.mxu0 %v15605_v39  ;;  %15683 = vst [vmem:[#allocation113_spill] sm:$0xff] %v10143_v26 }
 0x188   : > { %15676 = vst [vmem:[#allocation110_spill] sm:$0xff] %v10115_v41  ;;  %v10129_v42 = vsub.f32 %v617_v57, %v10115_v41  ;;  %v10141_v57 = vsub.f32 %v618_v12, %v10132_v19 }
 0x18a   : > { %986 = vmatmul.mubr.f32.gmra.mrb[48].mxu0 %v985_v43  ;;  %v1017_v43 = vsub.f32 %v10104_v6, %v14747_v20  ;;  %15679 = vst [vmem:[#allocation69_spill] sm:$0xff] %v10129_v42  ;;  %v14748_v32 = vand.u32 4294901760, %v10129_v42  ;;  %15682 = vst [vmem:[#allocation70_spill] sm:$0xff] %v10141_v57 }
 0x18b   : > { %991 = vmatprep.mubr.f32.mxu0 %v15605_v39 }
 0x18c   : > { %v1018_v13 = vand.u32 4294901760, %v1017_v43  ;;  %v1039_v10 = vsub.f32 %v10129_v42, %v14748_v32  ;;  %v14749_v43 = vand.u32 4294901760, %v10141_v57 }
 0x18e   : > { %997 = vmatmul.mubr.f32.gmra.mrb[50].mxu0 %v996_v23  ;;  %v1028_v23 = vsub.f32 %v10121_v11, %v14750_v17  ;;  %v1040_v12 = vand.u32 4294901760, %v1039_v10  ;;  %v1050_v18 = vsub.f32 %v10141_v57, %v14749_v43  ;;  %v15686_v10 = vld [vmem:[#allocation22_spill] sm:$0xff]  ;;  %v15687_v17 = vld [vmem:[#allocation24_spill] sm:$0xff] }
 0x18f   : > { %1002 = vmatprep.mubr.f32.mxu0 %v15605_v39  ;;  %v15688_v57 = vld [vmem:[#allocation26_spill] sm:$0xff] }
 0x190   : > { %v1029_v20 = vand.u32 4294901760, %v1028_v23  ;;  %v1051_v23 = vand.u32 4294901760, %v1050_v18  ;;  %v15689_v18 = vld [vmem:[#allocation27_spill] sm:$0xff] }
 0x192   : > { %1008 = vmatmul.mubr.f32.gmra.mrb[52].mxu0 %v1007_v1  ;;  %v10151_v1 = vsub.f32 %v619_v4, %v10143_v26 }
 0x193   : > { %1013 = vmatprep.mubr.f32.mxu0 %v15605_v39 }
 0x194   : > { %15684 = vst [vmem:[#allocation114_spill] sm:$0xff] %v10151_v1 }
 0x196   : > { %1019 = vmatmul.mubr.f32.gmra.mrb[54].mxu0 %v1018_v13  ;;  %v14753_v13 = vand.u32 4294901760, %v10151_v1 }
 0x197   : > { %1024 = vmatprep.mubr.f32.mxu0 %v15605_v39 }
 0x198   : > { %v1061_v32 = vsub.f32 %v10151_v1, %v14753_v13  ;;  %v15690_v13 = vld [vmem:[#allocation29_spill] sm:$0xff] }
 0x199   : > { %v15691_v1 = vld [vmem:[#allocation33_spill] sm:$0xff] }
 0x19a   : > { %1030 = vmatmul.mubr.f32.gmra.mrb[56].mxu0 %v1029_v20  ;;  %v1062_v4 = vand.u32 4294901760, %v1061_v32  ;;  %v15685_v20 = vld [vmem:[#allocation21_spill] sm:$0xff]  ;;  %v15692_v32 = vld [vmem:[#allocation34_spill] sm:$0xff] }
 0x19b   : > { %1035 = vmatprep.mubr.f32.mxu0 %v15605_v39  ;;  %v7591_v43 = vpack.c.bf16 %v15686_v10, %v15685_v20  ;;  %v15693_v10 = vld [vmem:[#allocation35_spill] sm:$0xff]  ;;  %v15694_v20 = vld [vmem:[#allocation36_spill] sm:$0xff] }
 0x19e   : > { %1041 = vmatmul.mubr.f32.gmra.mrb[58].mxu0 %v1040_v12  ;;  %v7593_v12 = vpack.c.bf16 %v15688_v57, %v15687_v17  ;;  %v7599_v57 = vpack.c.bf16 %v15694_v20, %v15693_v10  ;;  %v15698_v20 = vld [vmem:[#allocation49_spill] sm:$0xff] }
 0x19f   : > { %1046 = vmatprep.mubr.f32.mxu0 %v15605_v39 }
 0x1a2   : > { %1052 = vmatmul.mubr.f32.gmra.mrb[60].mxu0 %v1051_v23  ;;  %v7595_v23 = vpack.c.bf16 %v15690_v13, %v15689_v18 }
 0x1a3   : > { %1057 = vmatprep.mubr.f32.mxu0 %v15605_v39 }
 0x1a6   : > { %1063 = vmatmul.mubr.f32.gmra.mrb[62].mxu0 %v1062_v4  ;;  %v7597_v4 = vpack.c.bf16 %v15692_v32, %v15691_v1 }
 0x1a7   : > { %1293 = vmatprep.mubr.f32.mxu0 %v15605_v39 }
 0x1aa   : > { %1295 = vmatmul.mubr.f32.vlgmr.msra.gmra.mrb[0].mxu0 %v9729_v48  ;;  %v15695_v48 = vld [vmem:[#allocation40_spill] sm:$0xff] }
 0x1ab   : > { %7592 = vmatpush1.bf16.msra.mxu0 %v7591_v43  ;;  %1300 = vmatprep.mubr.f32.mxu0 %v15605_v39  ;;  %v7601_v43 = vpack.c.bf16 %v9482_v35, %v15695_v48  ;;  %v15700_v48 = vld [vmem:[#allocation52_spill] sm:$0xff] }
 0x1ac   : > { %7594 = vmatprep.subr.bf16.mxu0 %v7593_v12  ;;  %v7603_v12 = vpack.c.bf16 %v9489_v46, %v9484_v36 }
 0x1ae   : > { %1302 = vmatmul.mubr.f32.gmra.mrb[2].mxu0 %v9755_v0  ;;  %v7605_v0 = vpack.c.bf16 %v9493_v51, %v9491_v50 }
 0x1af   : > { %1307 = vmatprep.mubr.f32.mxu0 %v15605_v39  ;;  %7596 = vmatpush1.bf16.msra.mxu0 %v7595_v23  ;;  %v15696_v23 = vld [vmem:[#allocation75_spill] sm:$0xff] }
 0x1b0   : > { %7598 = vmatprep.subr.bf16.mxu0 %v7597_v4  ;;  %v15697_v4 = vld [vmem:[#allocation45_spill] sm:$0xff] }
 0x1b1   : > { %v7607_v35 = vpack.c.bf16 %v15698_v20, %v15697_v4 }
 0x1b2   : > { %1309 = vmatmul.mubr.f32.gmra.mrb[4].mxu0 %v9739_v59  ;;  %v15699_v59 = vld [vmem:[#allocation51_spill] sm:$0xff] }
 0x1b3   : > { %1314 = vmatprep.mubr.f32.mxu0 %v15605_v39  ;;  %7600 = vmatpush1.bf16.msra.mxu0 %v7599_v57  ;;  %v7609_v10 = vpack.c.bf16 %v15700_v48, %v15699_v59  ;;  %v7611_v57 = vpack.c.bf16 %v9534_v37, %v9532_v38 }
 0x1b4   : > { %7602 = vmatprep.subr.bf16.mxu0 %v7601_v43  ;;  %v7613_v43 = vpack.c.bf16 %v9557_v62, %v9548_v25 }
 0x1b6   : > { %1316 = vmatmul.mubr.f32.gmra.mrb[6].mxu0 %v15696_v23  ;;  %v15748_v23 = vld [vmem:[#allocation21_spill] sm:$0xff] }
 0x1b7   : > { %1321 = vmatprep.mubr.f32.mxu0 %v15605_v39  ;;  %7604 = vmatpush1.bf16.msra.mxu0 %v7603_v12  ;;  %v7617_v12 = vpack.c.bf16 %v9571_v30, %v9569_v54 }
 0x1b8   : > { %7606 = vmatprep.subr.bf16.mxu0 %v7605_v0  ;;  %v7615_v0 = vpack.c.bf16 %v9562_v60, %v9559_v22 }
 0x1ba   : > { %1323 = vmatmul.mubr.f32.gmra.mrb[8].mxu0 %v9788_v34  ;;  %v15745_v34 = vld [vmem:[#allocation109_spill] sm:$0xff] }
 0x1bb   : > { %1328 = vmatprep.mubr.f32.mxu0 %v15605_v39  ;;  %7608 = vmatpush1.bf16.msra.mxu0 %v7607_v35  ;;  %v7619_v35 = vpack.c.bf16 %v9581_v61, %v9579_v47 }
 0x1bc   : > { %7610 = vmatprep.subr.bf16.mxu0 %v7609_v10  ;;  %v15701_v10 = vld [vmem:[#allocation19_spill] sm:$0xff] }
 0x1be   : > { %1330 = vmatmul.mubr.f32.gmra.mrb[10].mxu0 %v9798_v5  ;;  %v15742_v5 = vld [vmem:[#allocation63_spill] sm:$0xff] }
 0x1bf   : > { %1335 = vmatprep.mubr.f32.mxu0 %v15605_v39  ;;  %7612 = vmatpush1.bf16.msra.mxu0 %v7611_v57  ;;  %v15702_v57 = vld [vmem:[#allocation73_spill] sm:$0xff] }
 0x1c0   : > { %7614 = vmatprep.subr.bf16.mxu0 %v7613_v43  ;;  %v15703_v43 = vld [vmem:[#allocation20_spill] sm:$0xff] }
 0x1c2   : > { %1337 = vmatmul.mubr.f32.gmra.mrb[12].mxu0 %v9831_v44  ;;  %v15739_v44 = vld [vmem:[#allocation103_spill] sm:$0xff] }
 0x1c3   : > { %1342 = vmatprep.mubr.f32.mxu0 %v15605_v39  ;;  %7616 = vmatpush1.bf16.msra.mxu0 %v7615_v0  ;;  %v15704_v0 = vld [vmem:[#allocation23_spill] sm:$0xff] }
 0x1c4   : > { %7618 = vmatprep.subr.bf16.mxu0 %v7617_v12  ;;  %v15705_v12 = vld [vmem:[#allocation76_spill] sm:$0xff] }
 0x1c6   : > { %1344 = vmatmul.mubr.f32.gmra.mrb[14].mxu0 %v9854_v24  ;;  %v15736_v24 = vld [vmem:[#allocation48_spill] sm:$0xff] }
 0x1c7   : > { %1349 = vmatprep.mubr.f32.mxu0 %v15605_v39  ;;  %7620 = vmatpush1.bf16.msra.mxu0 %v7619_v35  ;;  %v15706_v35 = vld [vmem:[#allocation28_spill] sm:$0xff] }
 0x1c8   : > { %7622 = vmatprep.subr.bf16.mxu0 %v15701_v10 }
 0x1ca   : > { %1351 = vmatmul.mubr.f32.gmra.mrb[16].mxu0 %v9881_v40  ;;  %v15729_v40 = vld [vmem:[#allocation90_spill] sm:$0xff] }
 0x1cb   : > { %1356 = vmatprep.mubr.f32.mxu0 %v15605_v39 }
 0x1ce   : > { %1358 = vmatmul.mubr.f32.gmra.mrb[18].mxu0 %v9890_v31  ;;  %v15728_v31 = vld [vmem:[#allocation88_spill] sm:$0xff] }
 0x1cf   : > { %1363 = vmatprep.mubr.f32.mxu0 %v15605_v39 }
 0x1d2   : > { %1365 = vmatmul.mubr.f32.gmra.mrb[20].mxu0 %v9911_v21  ;;  %v15727_v21 = vld [vmem:[#allocation87_spill] sm:$0xff] }
 0x1d3   : > { %1370 = vmatprep.mubr.f32.mxu0 %v15605_v39 }
 0x1d6   : > { %1372 = vmatmul.mubr.f32.gmra.mrb[22].mxu0 %v9915_v9  ;;  %v15726_v9 = vld [vmem:[#allocation62_spill] sm:$0xff] }
 0x1d7   : > { %1377 = vmatprep.mubr.f32.mxu0 %v15605_v39 }
 0x1da   : > { %1379 = vmatmul.mubr.f32.gmra.mrb[24].mxu0 %v9932_v33  ;;  %v15725_v33 = vld [vmem:[#allocation84_spill] sm:$0xff] }
 0x1db   : > { %1384 = vmatprep.mubr.f32.mxu0 %v15605_v39 }
 0x1de   : > { %1386 = vmatmul.mubr.f32.gmra.mrb[26].mxu0 %v9943_v8 }
 0x1df   : > { %1391 = vmatprep.mubr.f32.mxu0 %v15605_v39 }
 0x1e2   : > { %1393 = vmatmul.mubr.f32.gmra.mrb[28].mxu0 %v9955_v49 }
 0x1e3   : > { %1398 = vmatprep.mubr.f32.mxu0 %v15605_v39 }
 0x1e6   : > { %1400 = vmatmul.mubr.f32.gmra.mrb[30].mxu0 %v9960_v52  ;;  %v15723_v52 = vld [vmem:[#allocation54_spill] sm:$0xff] }
 0x1e7   : > { %1405 = vmatprep.mubr.f32.mxu0 %v15605_v39  ;;  %v15724_v49 = vand.u32 4294901760, %v15723_v52  ;;  %v15733_v52 = vld [vmem:[#allocation94_spill] sm:$0xff] }
 0x1ea   : > { %1407 = vmatmul.mubr.f32.gmra.mrb[32].mxu0 %v9979_v29 }
 0x1eb   : > { %1412 = vmatprep.mubr.f32.mxu0 %v15605_v39 }
 0x1ee   : > { %1414 = vmatmul.mubr.f32.gmra.mrb[34].mxu0 %v9983_v15  ;;  %v15721_v15 = vld [vmem:[#allocation50_spill] sm:$0xff] }
 0x1ef   : > { %1419 = vmatprep.mubr.f32.mxu0 %v15605_v39  ;;  %v15722_v29 = vand.u32 4294901760, %v15721_v15  ;;  %v15734_v15 = vld [vmem:[#allocation43_spill] sm:$0xff] }
 0x1f1   : > { %v7653_v8 = vpack.c.bf16 %v15724_v49, %v15722_v29  ;;  %v15730_v49 = vld [vmem:[#allocation30_spill] sm:$0xff]  ;;  %v15731_v29 = vld [vmem:[#allocation32_spill] sm:$0xff] }
 0x1f2   : > { %1421 = vmatmul.mubr.f32.gmra.mrb[36].mxu0 %v10000_v55  ;;  %v15720_v55 = vld [vmem:[#allocation59_spill] sm:$0xff] }
 0x1f3   : > { %1426 = vmatprep.mubr.f32.mxu0 %v15605_v39 }
 0x1f6   : > { %1428 = vmatmul.mubr.f32.gmra.mrb[38].mxu0 %v10011_v16  ;;  %v15719_v16 = vld [vmem:[#allocation58_spill] sm:$0xff] }
 0x1f7   : > { %1433 = vmatprep.mubr.f32.mxu0 %v15605_v39 }
 0x1fa   : > { %1435 = vmatmul.mubr.f32.gmra.mrb[40].mxu0 %v10023_v14  ;;  %v15718_v14 = vld [vmem:[#allocation82_spill] sm:$0xff] }
 0x1fb   : > { %1440 = vmatprep.mubr.f32.mxu0 %v15605_v39 }
 0x1fe   : > { %1442 = vmatmul.mubr.f32.gmra.mrb[42].mxu0 %v10026_v53  ;;  %v15717_v53 = vld [vmem:[#allocation57_spill] sm:$0xff] }
 0x1ff   : > { %1447 = vmatprep.mubr.f32.mxu0 %v15605_v39 }
 0x202   : > { %1449 = vmatmul.mubr.f32.gmra.mrb[44].mxu0 %v10045_v7  ;;  %v15716_v7 = vld [vmem:[#allocation56_spill] sm:$0xff] }
 0x203   : > { %1454 = vmatprep.mubr.f32.mxu0 %v15605_v39 }
 0x206   : > { %1456 = vmatmul.mubr.f32.gmra.mrb[46].mxu0 %v10049_v27  ;;  %v15715_v27 = vld [vmem:[#allocation55_spill] sm:$0xff] }
 0x207   : > { %1461 = vmatprep.mubr.f32.mxu0 %v15605_v39 }
 0x20a   : > { %1463 = vmatmul.mubr.f32.gmra.mrb[48].mxu0 %v10066_v3  ;;  %v15714_v3 = vld [vmem:[#allocation53_spill] sm:$0xff] }
 0x20b   : > { %1468 = vmatprep.mubr.f32.mxu0 %v15605_v39 }
 0x20e   : > { %1470 = vmatmul.mubr.f32.gmra.mrb[50].mxu0 %v10077_v58  ;;  %v15713_v58 = vld [vmem:[#allocation80_spill] sm:$0xff] }
 0x20f   : > { %1475 = vmatprep.mubr.f32.mxu0 %v15605_v39 }
 0x212   : > { %1477 = vmatmul.mubr.f32.gmra.mrb[52].mxu0 %v10089_v28  ;;  %v15712_v28 = vld [vmem:[#allocation46_spill] sm:$0xff] }
 0x213   : > { %1482 = vmatprep.mubr.f32.mxu0 %v15605_v39 }
 0x216   : > { %1484 = vmatmul.mubr.f32.gmra.mrb[54].mxu0 %v10092_v45  ;;  %v15711_v45 = vld [vmem:[#allocation44_spill] sm:$0xff] }
 0x217   : > { %1489 = vmatprep.mubr.f32.mxu0 %v15605_v39 }
 0x21a   : > { %1491 = vmatmul.mubr.f32.gmra.mrb[56].mxu0 %v10111_v56  ;;  %v15710_v56 = vld [vmem:[#allocation77_spill] sm:$0xff] }
 0x21b   : > { %1496 = vmatprep.mubr.f32.mxu0 %v15605_v39 }
 0x21e   : > { %1498 = vmatmul.mubr.f32.gmra.mrb[58].mxu0 %v10115_v41  ;;  %v15709_v41 = vld [vmem:[#allocation38_spill] sm:$0xff] }
 0x21f   : > { %1503 = vmatprep.mubr.f32.mxu0 %v15605_v39 }
 0x222   : > { %1505 = vmatmul.mubr.f32.gmra.mrb[60].mxu0 %v10132_v19  ;;  %v15707_v19 = vld [vmem:[#allocation31_spill] sm:$0xff] }
 0x223   : > { %1510 = vmatprep.mubr.f32.mxu0 %v15605_v39 }
 0x226   : > { %1512 = vmatmul.mubr.f32.gmra.mrb[62].mxu0 %v10143_v26  ;;  %v15708_v26 = vld [vmem:[#allocation37_spill] sm:$0xff] }
 0x227   : > { %1646 = vmatprep.mubr.f32.mxu0 %v15605_v39 }
 0x22a   : > { %1649 = vmatmul.mubr.f32.vlgmr.msra.gmra.mrb[0].mxu0 %v15702_v57 }
 0x22b   : > { %7624 = vmatpush1.bf16.msra.mxu0 %v15703_v43  ;;  %1654 = vmatprep.mubr.f32.mxu0 %v15605_v39  ;;  %v15753_v43 = vld [vmem:[#allocation26_spill] sm:$0xff] }
 0x22c   : > { %7626 = vmatprep.subr.bf16.mxu0 %v15704_v0  ;;  %v15752_v0 = vand.u32 4294901760, %v15687_v17 }
 0x22e   : > { %1657 = vmatmul.mubr.f32.gmra.mrb[2].mxu0 %v15705_v12 }
 0x22f   : > { %1662 = vmatprep.mubr.f32.mxu0 %v15605_v39  ;;  %7628 = vmatpush1.bf16.msra.mxu0 %v15706_v35 }
 0x230   : > { %7630 = vmatprep.subr.bf16.mxu0 %v15707_v19 }
 0x232   : > { %1665 = vmatmul.mubr.f32.gmra.mrb[4].mxu0 %v9758_v63 }
 0x233   : > { %1670 = vmatprep.mubr.f32.mxu0 %v15605_v39  ;;  %7632 = vmatpush1.bf16.msra.mxu0 %v15708_v26  ;;  %v15750_v26 = vld [vmem:[#allocation22_spill] sm:$0xff] }
 0x234   : > { %7634 = vmatprep.subr.bf16.mxu0 %v15709_v41  ;;  %v15749_v41 = vand.u32 4294901760, %v15748_v23  ;;  %v15751_v19 = vand.u32 4294901760, %v15750_v26  ;;  %v15758_v26 = vand.u32 4294901760, %v15691_v1  ;;  %v15763_v23 = vld [vmem:[#allocation36_spill] sm:$0xff] }
 0x236   : > { %1673 = vmatmul.mubr.f32.gmra.mrb[6].mxu0 %v15710_v56  ;;  %v7655_v35 = vpack.c.bf16 %v15751_v19, %v15749_v41  ;;  %v15759_v19 = vand.u32 4294901760, %v15692_v32  ;;  %v15760_v41 = vand.u32 4294901760, %v15705_v12  ;;  %v15769_v32 = vand.u32 4294901760, %v9758_v63 }
 0x237   : > { %1678 = vmatprep.mubr.f32.mxu0 %v15605_v39  ;;  %7636 = vmatpush1.bf16.msra.mxu0 %v15711_v45  ;;  %v15747_v45 = vld [vmem:[#allocation114_spill] sm:$0xff]  ;;  %v15772_v12 = vand.u32 4294901760, %v9491_v50  ;;  %v15775_v63 = vand.u32 4294901760, %v15697_v4 }
 0x238   : > { %7638 = vmatprep.subr.bf16.mxu0 %v15712_v28  ;;  %v15746_v28 = vld [vmem:[#allocation70_spill] sm:$0xff]  ;;  %v7661_v17 = vpack.c.bf16 %v15759_v19, %v15758_v26  ;;  %v15774_v19 = vand.u32 4294901760, %v15710_v56  ;;  %v15780_v56 = vand.u32 4294901760, %v9532_v38 }
 0x23a   : > { %1681 = vmatmul.mubr.f32.gmra.mrb[8].mxu0 %v15713_v58 }
 0x23b   : > { %1686 = vmatprep.mubr.f32.mxu0 %v15605_v39  ;;  %7640 = vmatpush1.bf16.msra.mxu0 %v15714_v3  ;;  %v15744_v3 = vld [vmem:[#allocation65_spill] sm:$0xff] }
 0x23c   : > { %7642 = vmatprep.subr.bf16.mxu0 %v15715_v27  ;;  %v15743_v27 = vld [vmem:[#allocation64_spill] sm:$0xff] }
 0x23e   : > { %1689 = vmatmul.mubr.f32.gmra.mrb[10].mxu0 %v9826_v2 }
 0x23f   : > { %1694 = vmatprep.mubr.f32.mxu0 %v15605_v39  ;;  %7644 = vmatpush1.bf16.msra.mxu0 %v15716_v7  ;;  %v15741_v7 = vld [vmem:[#allocation105_spill] sm:$0xff] }
 0x240   : > { %7646 = vmatprep.subr.bf16.mxu0 %v15717_v53  ;;  %v15740_v53 = vld [vmem:[#allocation60_spill] sm:$0xff] }
 0x242   : > { %1697 = vmatmul.mubr.f32.gmra.mrb[12].mxu0 %v15718_v14 }
 0x243   : > { %1702 = vmatprep.mubr.f32.mxu0 %v15605_v39  ;;  %7648 = vmatpush1.bf16.msra.mxu0 %v15719_v16  ;;  %v15738_v16 = vld [vmem:[#allocation100_spill] sm:$0xff] }
 0x244   : > { %7650 = vmatprep.subr.bf16.mxu0 %v15720_v55  ;;  %v15737_v55 = vld [vmem:[#allocation98_spill] sm:$0xff] }
 0x246   : > { %1705 = vmatmul.mubr.f32.gmra.mrb[14].mxu0 %v15725_v33 }
 0x247   : > { %1710 = vmatprep.mubr.f32.mxu0 %v15605_v39  ;;  %7652 = vmatpush1.bf16.msra.mxu0 %v15726_v9  ;;  %v15735_v9 = vld [vmem:[#allocation96_spill] sm:$0xff] }
 0x248   : > { %7654 = vmatprep.subr.bf16.mxu0 %v7653_v8  ;;  %v15732_v8 = vld [vmem:[#allocation39_spill] sm:$0xff] }
 0x24a   : > { %1713 = vmatmul.mubr.f32.gmra.mrb[16].mxu0 %v15727_v21 }
 0x24b   : > { %1718 = vmatprep.mubr.f32.mxu0 %v15605_v39 }
 0x24e   : > { %1721 = vmatmul.mubr.f32.gmra.mrb[18].mxu0 %v15728_v31 }
 0x24f   : > { %1726 = vmatprep.mubr.f32.mxu0 %v15605_v39 }
 0x252   : > { %1729 = vmatmul.mubr.f32.gmra.mrb[20].mxu0 %v15729_v40 }
 0x253   : > { %1734 = vmatprep.mubr.f32.mxu0 %v15605_v39 }
 0x256   : > { %1737 = vmatmul.mubr.f32.gmra.mrb[22].mxu0 %v15730_v49 }
 0x257   : > { %1742 = vmatprep.mubr.f32.mxu0 %v15605_v39 }
 0x25a   : > { %1745 = vmatmul.mubr.f32.gmra.mrb[24].mxu0 %v15731_v29 }
 0x25b   : > { %1750 = vmatprep.mubr.f32.mxu0 %v15605_v39 }
 0x25e   : > { %1753 = vmatmul.mubr.f32.gmra.mrb[26].mxu0 %v15732_v8 }
 0x25f   : > { %1758 = vmatprep.mubr.f32.mxu0 %v15605_v39 }
 0x262   : > { %1761 = vmatmul.mubr.f32.gmra.mrb[28].mxu0 %v15733_v52 }
 0x263   : > { %1766 = vmatprep.mubr.f32.mxu0 %v15605_v39 }
 0x266   : > { %1769 = vmatmul.mubr.f32.gmra.mrb[30].mxu0 %v15734_v15 }
 0x267   : > { %1774 = vmatprep.mubr.f32.mxu0 %v15605_v39 }
 0x26a   : > { %1777 = vmatmul.mubr.f32.gmra.mrb[32].mxu0 %v15735_v9 }
 0x26b   : > { %1782 = vmatprep.mubr.f32.mxu0 %v15605_v39 }
 0x26e   : > { %1785 = vmatmul.mubr.f32.gmra.mrb[34].mxu0 %v15736_v24 }
 0x26f   : > { %1790 = vmatprep.mubr.f32.mxu0 %v15605_v39 }
 0x272   : > { %1793 = vmatmul.mubr.f32.gmra.mrb[36].mxu0 %v15737_v55 }
 0x273   : > { %1798 = vmatprep.mubr.f32.mxu0 %v15605_v39 }
 0x276   : > { %1801 = vmatmul.mubr.f32.gmra.mrb[38].mxu0 %v15738_v16 }
 0x277   : > { %1806 = vmatprep.mubr.f32.mxu0 %v15605_v39 }
 0x27a   : > { %1809 = vmatmul.mubr.f32.gmra.mrb[40].mxu0 %v15739_v44 }
 0x27b   : > { %1814 = vmatprep.mubr.f32.mxu0 %v15605_v39 }
 0x27e   : > { %1817 = vmatmul.mubr.f32.gmra.mrb[42].mxu0 %v15740_v53 }
 0x27f   : > { %1822 = vmatprep.mubr.f32.mxu0 %v15605_v39 }
 0x282   : > { %1825 = vmatmul.mubr.f32.gmra.mrb[44].mxu0 %v15741_v7 }
 0x283   : > { %1830 = vmatprep.mubr.f32.mxu0 %v15605_v39 }
 0x286   : > { %1833 = vmatmul.mubr.f32.gmra.mrb[46].mxu0 %v15742_v5 }
 0x287   : > { %1838 = vmatprep.mubr.f32.mxu0 %v15605_v39 }
 0x28a   : > { %1841 = vmatmul.mubr.f32.gmra.mrb[48].mxu0 %v15743_v27 }
 0x28b   : > { %1846 = vmatprep.mubr.f32.mxu0 %v15605_v39 }
 0x28e   : > { %1849 = vmatmul.mubr.f32.gmra.mrb[50].mxu0 %v15744_v3 }
 0x28f   : > { %1854 = vmatprep.mubr.f32.mxu0 %v15605_v39 }
 0x292   : > { %1857 = vmatmul.mubr.f32.gmra.mrb[52].mxu0 %v15745_v34 }
 0x293   : > { %1862 = vmatprep.mubr.f32.mxu0 %v15605_v39 }
 0x296   : > { %1865 = vmatmul.mubr.f32.gmra.mrb[54].mxu0 %v10104_v6  ;;  %v15755_v6 = vand.u32 4294901760, %v15702_v57  ;;  %v15764_v57 = vand.u32 4294901760, %v15763_v23  ;;  %v15786_v23 = vand.u32 4294901760, %v9562_v60  ;;  %v15792_v60 = vand.u32 4294901760, %v15725_v33 }
 0x297   : > { %1870 = vmatprep.mubr.f32.mxu0 %v15605_v39  ;;  %v15800_v33 = vand.u32 4294901760, %v15734_v15  ;;  %v15815_v15 = vld [vmem:[#allocation111_spill] sm:$0xff] }
 0x29a   : > { %1873 = vmatmul.mubr.f32.gmra.mrb[56].mxu0 %v10121_v11  ;;  %v15754_v11 = vand.u32 4294901760, %v15753_v43  ;;  %v15770_v43 = vand.u32 4294901760, %v9484_v36 }
 0x29b   : > { %1878 = vmatprep.mubr.f32.mxu0 %v15605_v39 }
 0x29e   : > { %1881 = vmatmul.mubr.f32.gmra.mrb[58].mxu0 %v10129_v42  ;;  %v7657_v42 = vpack.c.bf16 %v15754_v11, %v15752_v0 }
 0x29f   : > { %1886 = vmatprep.mubr.f32.mxu0 %v15605_v39 }
 0x2a2   : > { %1889 = vmatmul.mubr.f32.gmra.mrb[60].mxu0 %v15746_v28  ;;  %v15757_v28 = vand.u32 4294901760, %v15690_v13  ;;  %v15765_v13 = vld [vmem:[#allocation40_spill] sm:$0xff] }
 0x2a3   : > { %1894 = vmatprep.mubr.f32.mxu0 %v15605_v39 }
 0x2a6   : > { %1897 = vmatmul.mubr.f32.gmra.mrb[62].mxu0 %v15747_v45  ;;  %v15756_v45 = vand.u32 4294901760, %v15689_v18 }
 0x2a7   : > { %1999 = vmatprep.mubr.f32.mxu0 %v15605_v39 }
 0x2a8   : > { %v7659_v34 = vpack.c.bf16 %v15757_v28, %v15756_v45  ;;  %v15766_v28 = vand.u32 4294901760, %v15765_v13  ;;  %v15817_v13 = vld [vmem:[#allocation69_spill] sm:$0xff] }
 0x2aa   : > { %2003 = vmatmul.mubr.f32.vlgmr.msra.gmra.mrb[0].mxu0 %v15755_v6  ;;  %v15761_v6 = vld [vmem:[#allocation35_spill] sm:$0xff] }
 0x2ab   : > { %7656 = vmatpush1.bf16.msra.mxu0 %v7655_v35  ;;  %2008 = vmatprep.mubr.f32.mxu0 %v15605_v39  ;;  %v15762_v11 = vand.u32 4294901760, %v15761_v6  ;;  %v15773_v35 = vand.u32 4294901760, %v9493_v51  ;;  %v15779_v51 = vand.u32 4294901760, %v15713_v58  ;;  %v15781_v6 = vand.u32 4294901760, %v9534_v37 }
 0x2ac   : > { %7658 = vmatprep.subr.bf16.mxu0 %v7657_v42  ;;  %v15767_v42 = vld [vmem:[#allocation41_spill] sm:$0xff]  ;;  %v15785_v58 = vand.u32 4294901760, %v9559_v22  ;;  %v15787_v37 = vand.u32 4294901760, %v9569_v54  ;;  %v15793_v54 = vand.u32 4294901760, %v15727_v21  ;;  %v15797_v21 = vand.u32 4294901760, %v15731_v29 }
 0x2ad   : > { %v7663_v18 = vpack.c.bf16 %v15764_v57, %v15762_v11  ;;  %v15768_v45 = vand.u32 4294901760, %v15767_v42  ;;  %v7669_v26 = vpack.c.bf16 %v15773_v35, %v15772_v12  ;;  %v7675_v4 = vpack.c.bf16 %v15781_v6, %v15780_v56  ;;  %v15827_v12 = vld [vmem:[#allocation28_spill] sm:$0xff]  ;;  %v15828_v35 = vld [vmem:[#allocation31_spill] sm:$0xff] }
 0x2ae   : > { %2012 = vmatmul.mubr.f32.gmra.mrb[2].mxu0 %v15760_v41  ;;  %v15778_v41 = vand.u32 4294901760, %v15700_v48  ;;  %v15783_v11 = vand.u32 4294901760, %v9557_v62  ;;  %v15784_v48 = vand.u32 4294901760, %v9826_v2  ;;  %v7679_v38 = vpack.c.bf16 %v15786_v23, %v15785_v58  ;;  %v15838_v56 = vld [vmem:[#allocation79_spill] sm:$0xff]  ;;  %v15839_v6 = vld [vmem:[#allocation56_spill] sm:$0xff]  ;;  %v15845_v58 = vld [vmem:[#allocation62_spill] sm:$0xff] }
 0x2af   : > { %2017 = vmatprep.mubr.f32.mxu0 %v15605_v39  ;;  %7660 = vmatpush1.bf16.msra.mxu0 %v7659_v34  ;;  %v7665_v1 = vpack.c.bf16 %v15768_v45, %v15766_v28  ;;  %v15771_v34 = vand.u32 4294901760, %v9489_v46  ;;  %v15777_v46 = vand.u32 4294901760, %v15699_v59  ;;  %v15788_v57 = vand.u32 4294901760, %v9571_v30  ;;  %v15819_v28 = vld [vmem:[#allocation70_spill] sm:$0xff]  ;;  %v15846_v23 = vld [vmem:[#allocation85_spill] sm:$0xff] }
 0x2b0   : > { %7662 = vmatprep.subr.bf16.mxu0 %v7661_v17  ;;  %v15776_v17 = vand.u32 4294901760, %v15698_v20  ;;  %v15782_v20 = vand.u32 4294901760, %v9548_v25  ;;  %v15789_v62 = vand.u32 4294901760, %v15718_v14  ;;  %v15790_v2 = vand.u32 4294901760, %v9579_v47  ;;  %v15821_v45 = vld [vmem:[#allocation114_spill] sm:$0xff] }
 0x2b1   : > { %v7667_v0 = vpack.c.bf16 %v15771_v34, %v15770_v43  ;;  %v7673_v50 = vpack.c.bf16 %v15778_v41, %v15777_v46  ;;  %v7681_v25 = vpack.c.bf16 %v15788_v57, %v15787_v37  ;;  %v15794_v30 = vand.u32 4294901760, %v15728_v31  ;;  %v15824_v43 = vld [vmem:[#allocation20_spill] sm:$0xff]  ;;  %v15825_v34 = vld [vmem:[#allocation23_spill] sm:$0xff]  ;;  %v15834_v46 = vld [vmem:[#allocation46_spill] sm:$0xff] }
 0x2b2   : > { %2021 = vmatmul.mubr.f32.gmra.mrb[4].mxu0 %v15769_v32  ;;  %v7671_v36 = vpack.c.bf16 %v15776_v17, %v15775_v63  ;;  %v7677_v59 = vpack.c.bf16 %v15783_v11, %v15782_v20  ;;  %v15795_v47 = vand.u32 4294901760, %v15729_v40  ;;  %v15798_v31 = vand.u32 4294901760, %v15732_v8  ;;  %v15811_v8 = vld [vmem:[#allocation109_spill] sm:$0xff]  ;;  %v15823_v32 = vld [vmem:[#allocation71_spill] sm:$0xff]  ;;  %v15831_v63 = vld [vmem:[#allocation38_spill] sm:$0xff] }
 0x2b3   : > { %2026 = vmatprep.mubr.f32.mxu0 %v15605_v39  ;;  %7664 = vmatpush1.bf16.msra.mxu0 %v7663_v18  ;;  %v15791_v18 = vand.u32 4294901760, %v9581_v61  ;;  %v15796_v61 = vand.u32 4294901760, %v15730_v49  ;;  %v15799_v40 = vand.u32 4294901760, %v15733_v52  ;;  %v15801_v14 = vand.u32 4294901760, %v15735_v9  ;;  %v15813_v52 = vld [vmem:[#allocation67_spill] sm:$0xff]  ;;  %v15835_v41 = vld [vmem:[#allocation78_spill] sm:$0xff] }
 0x2b4   : > { %7666 = vmatprep.subr.bf16.mxu0 %v7665_v1  ;;  %v15803_v49 = vand.u32 4294901760, %v15737_v55  ;;  %v15804_v29 = vand.u32 4294901760, %v15738_v16  ;;  %v15805_v9 = vand.u32 4294901760, %v15739_v44  ;;  %v15807_v55 = vand.u32 4294901760, %v15741_v7  ;;  %v15832_v17 = vld [vmem:[#allocation75_spill] sm:$0xff]  ;;  %v15841_v20 = vld [vmem:[#allocation81_spill] sm:$0xff] }
 0x2b5   : > { %v7683_v22 = vpack.c.bf16 %v15791_v18, %v15790_v2  ;;  %v15808_v16 = vand.u32 4294901760, %v15742_v5  ;;  %v15809_v44 = vand.u32 4294901760, %v15743_v27  ;;  %v15812_v7 = vand.u32 4294901760, %v15811_v8  ;;  %v15842_v11 = vld [vmem:[#allocation58_spill] sm:$0xff]  ;;  %v15848_v37 = vld [vmem:[#allocation25_spill] sm:$0xff] }
 0x2b6   : > { %2030 = vmatmul.mubr.f32.gmra.mrb[6].mxu0 %v15774_v19  ;;  %v15814_v5 = vand.u32 4294901760, %v15813_v52  ;;  %v15816_v27 = vand.u32 4294901760, %v15815_v15  ;;  %v15820_v42 = vand.u32 4294901760, %v15819_v28  ;;  %v15822_v1 = vand.u32 4294901760, %v15821_v45  ;;  %v15830_v19 = vld [vmem:[#allocation37_spill] sm:$0xff]  ;;  %v15852_v2 = vld [vmem:[#allocation42_spill] sm:$0xff] }
 0x2b7   : > { %2035 = vmatprep.mubr.f32.mxu0 %v15605_v39  ;;  %7668 = vmatpush1.bf16.msra.mxu0 %v7667_v0  ;;  %v15826_v0 = vld [vmem:[#allocation74_spill] sm:$0xff]  ;;  %v15849_v57 = vld [vmem:[#allocation89_spill] sm:$0xff] }
 0x2b8   : > { %7670 = vmatprep.subr.bf16.mxu0 %v7669_v26  ;;  %v15829_v26 = vld [vmem:[#allocation72_spill] sm:$0xff]  ;;  %v15853_v18 = vld [vmem:[#allocation93_spill] sm:$0xff] }
 0x2ba   : > { %2039 = vmatmul.mubr.f32.gmra.mrb[8].mxu0 %v15779_v51  ;;  %v15837_v51 = vld [vmem:[#allocation55_spill] sm:$0xff] }
 0x2bb   : > { %2044 = vmatprep.mubr.f32.mxu0 %v15605_v39  ;;  %7672 = vmatpush1.bf16.msra.mxu0 %v7671_v36  ;;  %v15833_v36 = vld [vmem:[#allocation44_spill] sm:$0xff] }
 0x2bc   : > { %7674 = vmatprep.subr.bf16.mxu0 %v7673_v50  ;;  %v15836_v50 = vld [vmem:[#allocation53_spill] sm:$0xff] }
 0x2be   : > { %2048 = vmatmul.mubr.f32.gmra.mrb[10].mxu0 %v15784_v48  ;;  %v15844_v48 = vld [vmem:[#allocation83_spill] sm:$0xff] }
 0x2bf   : > { %2053 = vmatprep.mubr.f32.mxu0 %v15605_v39  ;;  %7676 = vmatpush1.bf16.msra.mxu0 %v7675_v4  ;;  %v15840_v4 = vld [vmem:[#allocation57_spill] sm:$0xff] }
 0x2c0   : > { %7678 = vmatprep.subr.bf16.mxu0 %v7677_v59  ;;  %v15843_v59 = vld [vmem:[#allocation59_spill] sm:$0xff] }
 0x2c2   : > { %2057 = vmatmul.mubr.f32.gmra.mrb[12].mxu0 %v15789_v62  ;;  %v15851_v62 = vld [vmem:[#allocation92_spill] sm:$0xff] }
 0x2c3   : > { %2062 = vmatprep.mubr.f32.mxu0 %v15605_v39  ;;  %7680 = vmatpush1.bf16.msra.mxu0 %v7679_v38  ;;  %v15847_v38 = vld [vmem:[#allocation86_spill] sm:$0xff] }
 0x2c4   : > { %7682 = vmatprep.subr.bf16.mxu0 %v7681_v25  ;;  %v15850_v25 = vld [vmem:[#allocation91_spill] sm:$0xff] }
 0x2c6   : > { %2066 = vmatmul.mubr.f32.gmra.mrb[14].mxu0 %v15792_v60  ;;  %v15855_v60 = vld [vmem:[#allocation95_spill] sm:$0xff] }
 0x2c7   : > { %2071 = vmatprep.mubr.f32.mxu0 %v15605_v39  ;;  %7684 = vmatpush1.bf16.msra.mxu0 %v7683_v22  ;;  %v15854_v22 = vld [vmem:[#allocation47_spill] sm:$0xff] }
 0x2c8   : > { %7686 = vmatprep.subr.bf16.mxu0 %v15701_v10  ;;  %v15802_v10 = vand.u32 4294901760, %v15736_v24  ;;  %v15806_v24 = vand.u32 4294901760, %v15740_v53  ;;  %v15810_v53 = vand.u32 4294901760, %v15744_v3  ;;  %v15818_v3 = vand.u32 4294901760, %v15817_v13 }
 0x2ca   : > { %2075 = vmatmul.mubr.f32.gmra.mrb[16].mxu0 %v15793_v54  ;;  %v15856_v54 = vld [vmem:[#allocation97_spill] sm:$0xff] }
 0x2cb   : > { %2080 = vmatprep.mubr.f32.mxu0 %v15605_v39 }
 0x2ce   : > { %2084 = vmatmul.mubr.f32.gmra.mrb[18].mxu0 %v15794_v30  ;;  %v15857_v30 = vld [vmem:[#allocation99_spill] sm:$0xff] }
 0x2cf   : > { %2089 = vmatprep.mubr.f32.mxu0 %v15605_v39 }
 0x2d2   : > { %2093 = vmatmul.mubr.f32.gmra.mrb[20].mxu0 %v15795_v47  ;;  %v15858_v47 = vld [vmem:[#allocation101_spill] sm:$0xff] }
 0x2d3   : > { %2098 = vmatprep.mubr.f32.mxu0 %v15605_v39 }
 0x2d6   : > { %2102 = vmatmul.mubr.f32.gmra.mrb[22].mxu0 %v15796_v61  ;;  %v15859_v61 = vld [vmem:[#allocation102_spill] sm:$0xff] }
 0x2d7   : > { %2107 = vmatprep.mubr.f32.mxu0 %v15605_v39 }
 0x2da   : > { %2111 = vmatmul.mubr.f32.gmra.mrb[24].mxu0 %v15797_v21  ;;  %v15860_v21 = vld [vmem:[#allocation61_spill] sm:$0xff] }
 0x2db   : > { %2116 = vmatprep.mubr.f32.mxu0 %v15605_v39 }
 0x2de   : > { %2120 = vmatmul.mubr.f32.gmra.mrb[26].mxu0 %v15798_v31  ;;  %v15861_v31 = vld [vmem:[#allocation104_spill] sm:$0xff] }
 0x2df   : > { %2125 = vmatprep.mubr.f32.mxu0 %v15605_v39 }
 0x2e2   : > { %2129 = vmatmul.mubr.f32.gmra.mrb[28].mxu0 %v15799_v40  ;;  %v15862_v40 = vld [vmem:[#allocation106_spill] sm:$0xff] }
 0x2e3   : > { %2134 = vmatprep.mubr.f32.mxu0 %v15605_v39 }
 0x2e6   : > { %2138 = vmatmul.mubr.f32.gmra.mrb[30].mxu0 %v15800_v33  ;;  %v15863_v33 = vld [vmem:[#allocation107_spill] sm:$0xff] }
 0x2e7   : > { %2143 = vmatprep.mubr.f32.mxu0 %v15605_v39 }
 0x2ea   : > { %2147 = vmatmul.mubr.f32.gmra.mrb[32].mxu0 %v15801_v14  ;;  %v15864_v14 = vld [vmem:[#allocation66_spill] sm:$0xff] }
 0x2eb   : > { %2152 = vmatprep.mubr.f32.mxu0 %v15605_v39 }
 0x2ee   : > { %2156 = vmatmul.mubr.f32.gmra.mrb[34].mxu0 %v15802_v10  ;;  %v15865_v10 = vld [vmem:[#allocation108_spill] sm:$0xff] }
 0x2ef   : > { %2161 = vmatprep.mubr.f32.mxu0 %v15605_v39 }
 0x2f2   : > { %2165 = vmatmul.mubr.f32.gmra.mrb[36].mxu0 %v15803_v49  ;;  %v15866_v49 = vld [vmem:[#allocation68_spill] sm:$0xff] }
 0x2f3   : > { %2170 = vmatprep.mubr.f32.mxu0 %v15605_v39 }
 0x2f6   : > { %2174 = vmatmul.mubr.f32.gmra.mrb[38].mxu0 %v15804_v29  ;;  %v15867_v29 = vld [vmem:[#allocation110_spill] sm:$0xff] }
 0x2f7   : > { %2179 = vmatprep.mubr.f32.mxu0 %v15605_v39 }
 0x2fa   : > { %2183 = vmatmul.mubr.f32.gmra.mrb[40].mxu0 %v15805_v9  ;;  %v15868_v9 = vld [vmem:[#allocation112_spill] sm:$0xff] }
 0x2fb   : > { %2188 = vmatprep.mubr.f32.mxu0 %v15605_v39 }
 0x2fe   : > { %2192 = vmatmul.mubr.f32.gmra.mrb[42].mxu0 %v15806_v24  ;;  %v15869_v24 = vld [vmem:[#allocation113_spill] sm:$0xff] }
 0x2ff   : > { %2197 = vmatprep.mubr.f32.mxu0 %v15605_v39 }
 0x302   : > { %2201 = vmatmul.mubr.f32.gmra.mrb[44].mxu0 %v15807_v55 }
 0x303   : > { %2206 = vmatprep.mubr.f32.mxu0 %v15605_v39 }
 0x306   : > { %2210 = vmatmul.mubr.f32.gmra.mrb[46].mxu0 %v15808_v16 }
 0x307   : > { %2215 = vmatprep.mubr.f32.mxu0 %v15605_v39 }
 0x30a   : > { %2219 = vmatmul.mubr.f32.gmra.mrb[48].mxu0 %v15809_v44 }
 0x30b   : > { %2224 = vmatprep.mubr.f32.mxu0 %v15605_v39 }
 0x30e   : > { %2228 = vmatmul.mubr.f32.gmra.mrb[50].mxu0 %v15810_v53 }
 0x30f   : > { %2233 = vmatprep.mubr.f32.mxu0 %v15605_v39 }
 0x312   : > { %2237 = vmatmul.mubr.f32.gmra.mrb[52].mxu0 %v15812_v7 }
 0x313   : > { %2242 = vmatprep.mubr.f32.mxu0 %v15605_v39 }
 0x316   : > { %2246 = vmatmul.mubr.f32.gmra.mrb[54].mxu0 %v15814_v5 }
 0x317   : > { %2251 = vmatprep.mubr.f32.mxu0 %v15605_v39 }
 0x31a   : > { %2255 = vmatmul.mubr.f32.gmra.mrb[56].mxu0 %v15816_v27 }
 0x31b   : > { %2260 = vmatprep.mubr.f32.mxu0 %v15605_v39 }
 0x31e   : > { %2264 = vmatmul.mubr.f32.gmra.mrb[58].mxu0 %v15818_v3 }
 0x31f   : > { %2269 = vmatprep.mubr.f32.mxu0 %v15605_v39 }
 0x322   : > { %2273 = vmatmul.mubr.f32.gmra.mrb[60].mxu0 %v15820_v42 }
 0x323   : > { %2278 = vmatprep.mubr.f32.mxu0 %v15605_v39 }
 0x326   : > { %2282 = vmatmul.mubr.f32.gmra.mrb[62].mxu0 %v15822_v1 }
 0x327   : > { %2448 = vmatprep.mubr.f32.mxu0 %v15605_v39 }
 0x32a   : > { %2450 = vmatmul.mubr.f32.vlgmr.msra.gmra.mrb[0].mxu0 %v15823_v32 }
 0x32b   : > { %7688 = vmatpush1.bf16.msra.mxu0 %v15824_v43  ;;  %2455 = vmatprep.mubr.f32.mxu0 %v15605_v39 }
 0x32c   : > { %7690 = vmatprep.subr.bf16.mxu0 %v15825_v34 }
 0x32e   : > { %2457 = vmatmul.mubr.f32.gmra.mrb[2].mxu0 %v15826_v0 }
 0x32f   : > { %2462 = vmatprep.mubr.f32.mxu0 %v15605_v39  ;;  %7692 = vmatpush1.bf16.msra.mxu0 %v15827_v12 }
 0x330   : > { %7694 = vmatprep.subr.bf16.mxu0 %v15828_v35 }
 0x332   : > { %2464 = vmatmul.mubr.f32.gmra.mrb[4].mxu0 %v15829_v26 }
 0x333   : > { %2469 = vmatprep.mubr.f32.mxu0 %v15605_v39  ;;  %7696 = vmatpush1.bf16.msra.mxu0 %v15830_v19 }
 0x334   : > { %7698 = vmatprep.subr.bf16.mxu0 %v15831_v63 }
 0x336   : > { %2471 = vmatmul.mubr.f32.gmra.mrb[6].mxu0 %v15832_v17 }
 0x337   : > { %2476 = vmatprep.mubr.f32.mxu0 %v15605_v39  ;;  %7700 = vmatpush1.bf16.msra.mxu0 %v15833_v36 }
 0x338   : > { %7702 = vmatprep.subr.bf16.mxu0 %v15834_v46 }
 0x33a   : > { %2478 = vmatmul.mubr.f32.gmra.mrb[8].mxu0 %v15835_v41 }
 0x33b   : > { %2483 = vmatprep.mubr.f32.mxu0 %v15605_v39  ;;  %7704 = vmatpush1.bf16.msra.mxu0 %v15836_v50 }
 0x33c   : > { %7706 = vmatprep.subr.bf16.mxu0 %v15837_v51 }
 0x33e   : > { %2485 = vmatmul.mubr.f32.gmra.mrb[10].mxu0 %v15838_v56 }
 0x33f   : > { %2490 = vmatprep.mubr.f32.mxu0 %v15605_v39  ;;  %7708 = vmatpush1.bf16.msra.mxu0 %v15839_v6 }
 0x340   : > { %7710 = vmatprep.subr.bf16.mxu0 %v15840_v4 }
 0x342   : > { %2492 = vmatmul.mubr.f32.gmra.mrb[12].mxu0 %v15841_v20 }
 0x343   : > { %2497 = vmatprep.mubr.f32.mxu0 %v15605_v39  ;;  %7712 = vmatpush1.bf16.msra.mxu0 %v15842_v11 }
 0x344   : > { %7714 = vmatprep.subr.bf16.mxu0 %v15843_v59 }
 0x346   : > { %2499 = vmatmul.mubr.f32.gmra.mrb[14].mxu0 %v15844_v48 }
 0x347   : > { %2504 = vmatprep.mubr.f32.mxu0 %v15605_v39  ;;  %7716 = vmatpush1.bf16.msra.mxu0 %v15845_v58 }
 0x34a   : > { %2506 = vmatmul.mubr.f32.gmra.mrb[16].mxu0 %v15846_v23 }
 0x34b   : > { %2511 = vmatprep.mubr.f32.mxu0 %v15605_v39 }
 0x34e   : > { %2513 = vmatmul.mubr.f32.gmra.mrb[18].mxu0 %v15847_v38 }
 0x34f   : > { %2518 = vmatprep.mubr.f32.mxu0 %v15605_v39 }
 0x352   : > { %2520 = vmatmul.mubr.f32.gmra.mrb[20].mxu0 %v15848_v37 }
 0x353   : > { %2525 = vmatprep.mubr.f32.mxu0 %v15605_v39 }
 0x356   : > { %2527 = vmatmul.mubr.f32.gmra.mrb[22].mxu0 %v15849_v57 }
 0x357   : > { %2532 = vmatprep.mubr.f32.mxu0 %v15605_v39 }
 0x35a   : > { %2534 = vmatmul.mubr.f32.gmra.mrb[24].mxu0 %v15850_v25 }
 0x35b   : > { %2539 = vmatprep.mubr.f32.mxu0 %v15605_v39 }
 0x35e   : > { %2541 = vmatmul.mubr.f32.gmra.mrb[26].mxu0 %v15851_v62 }
 0x35f   : > { %2546 = vmatprep.mubr.f32.mxu0 %v15605_v39 }
 0x362   : > { %2548 = vmatmul.mubr.f32.gmra.mrb[28].mxu0 %v15852_v2 }
 0x363   : > { %2553 = vmatprep.mubr.f32.mxu0 %v15605_v39 }
 0x366   : > { %2555 = vmatmul.mubr.f32.gmra.mrb[30].mxu0 %v15853_v18 }
 0x367   : > { %2560 = vmatprep.mubr.f32.mxu0 %v15605_v39 }
 0x36a   : > { %2562 = vmatmul.mubr.f32.gmra.mrb[32].mxu0 %v15854_v22 }
 0x36b   : > { %2567 = vmatprep.mubr.f32.mxu0 %v15605_v39 }
 0x36e   : > { %2569 = vmatmul.mubr.f32.gmra.mrb[34].mxu0 %v15855_v60 }
 0x36f   : > { %2574 = vmatprep.mubr.f32.mxu0 %v15605_v39 }
 0x372   : > { %2576 = vmatmul.mubr.f32.gmra.mrb[36].mxu0 %v15856_v54 }
 0x373   : > { %2581 = vmatprep.mubr.f32.mxu0 %v15605_v39 }
 0x376   : > { %2583 = vmatmul.mubr.f32.gmra.mrb[38].mxu0 %v15857_v30 }
 0x377   : > { %2588 = vmatprep.mubr.f32.mxu0 %v15605_v39 }
 0x37a   : > { %2590 = vmatmul.mubr.f32.gmra.mrb[40].mxu0 %v15858_v47 }
 0x37b   : > { %2595 = vmatprep.mubr.f32.mxu0 %v15605_v39 }
 0x37e   : > { %2597 = vmatmul.mubr.f32.gmra.mrb[42].mxu0 %v15859_v61 }
 0x37f   : > { %2602 = vmatprep.mubr.f32.mxu0 %v15605_v39 }
 0x382   : > { %2604 = vmatmul.mubr.f32.gmra.mrb[44].mxu0 %v15860_v21 }
 0x383   : > { %2609 = vmatprep.mubr.f32.mxu0 %v15605_v39 }
 0x386   : > { %2611 = vmatmul.mubr.f32.gmra.mrb[46].mxu0 %v15861_v31 }
 0x387   : > { %2616 = vmatprep.mubr.f32.mxu0 %v15605_v39 }
 0x38a   : > { %2618 = vmatmul.mubr.f32.gmra.mrb[48].mxu0 %v15862_v40 }
 0x38b   : > { %2623 = vmatprep.mubr.f32.mxu0 %v15605_v39 }
 0x38e   : > { %2625 = vmatmul.mubr.f32.gmra.mrb[50].mxu0 %v15863_v33 }
 0x38f   : > { %2630 = vmatprep.mubr.f32.mxu0 %v15605_v39 }
 0x392   : > { %2632 = vmatmul.mubr.f32.gmra.mrb[52].mxu0 %v15864_v14 }
 0x393   : > { %2637 = vmatprep.mubr.f32.mxu0 %v15605_v39 }
 0x396   : > { %2639 = vmatmul.mubr.f32.gmra.mrb[54].mxu0 %v15865_v10 }
 0x397   : > { %2644 = vmatprep.mubr.f32.mxu0 %v15605_v39 }
 0x39a   : > { %2646 = vmatmul.mubr.f32.gmra.mrb[56].mxu0 %v15866_v49 }
 0x39b   : > { %2651 = vmatprep.mubr.f32.mxu0 %v15605_v39 }
 0x39e   : > { %2653 = vmatmul.mubr.f32.gmra.mrb[58].mxu0 %v15867_v29 }
 0x39f   : > { %2658 = vmatprep.mubr.f32.mxu0 %v15605_v39 }
 0x3a2   : > { %2660 = vmatmul.mubr.f32.gmra.mrb[60].mxu0 %v15868_v9 }
 0x3a3   : > { %2665 = vmatprep.mubr.f32.mxu0 %v15605_v39 }
 0x3a6   : > { %2667 = vmatmul.mubr.f32.gmra.mrb[62].mxu0 %v15869_v24 }
 0x3a7   : > { %2769 = vmatprep.mubr.f32.mxu0 %v15605_v39 }
 0x3aa   : > { %2771 = vmatmul.mubr.f32.vlgmr.msra.gmra.mrb[0].mxu0 %v15823_v32 }
 0x3ab   : > { %2776 = vmatprep.mubr.f32.mxu0 %v15605_v39 }
 0x3ae   : > { %2778 = vmatmul.mubr.f32.gmra.mrb[2].mxu0 %v15826_v0 }
 0x3af   : > { %2783 = vmatprep.mubr.f32.mxu0 %v15605_v39 }
 0x3b2   : > { %2785 = vmatmul.mubr.f32.gmra.mrb[4].mxu0 %v15829_v26 }
 0x3b3   : > { %2790 = vmatprep.mubr.f32.mxu0 %v15605_v39 }
 0x3b6   : > { %2792 = vmatmul.mubr.f32.gmra.mrb[6].mxu0 %v15832_v17 }
 0x3b7   : > { %2797 = vmatprep.mubr.f32.mxu0 %v15605_v39 }
 0x3ba   : > { %2799 = vmatmul.mubr.f32.gmra.mrb[8].mxu0 %v15835_v41 }
 0x3bb   : > { %2804 = vmatprep.mubr.f32.mxu0 %v15605_v39 }
 0x3be   : > { %2806 = vmatmul.mubr.f32.gmra.mrb[10].mxu0 %v15838_v56 }
 0x3bf   : > { %2811 = vmatprep.mubr.f32.mxu0 %v15605_v39 }
 0x3c2   : > { %2813 = vmatmul.mubr.f32.gmra.mrb[12].mxu0 %v15841_v20 }
 0x3c3   : > { %2818 = vmatprep.mubr.f32.mxu0 %v15605_v39 }
 0x3c6   : > { %2820 = vmatmul.mubr.f32.gmra.mrb[14].mxu0 %v15844_v48 }
 0x3c7   : > { %2825 = vmatprep.mubr.f32.mxu0 %v15605_v39 }
 0x3ca   : > { %2827 = vmatmul.mubr.f32.gmra.mrb[16].mxu0 %v15846_v23 }
 0x3cb   : > { %2832 = vmatprep.mubr.f32.mxu0 %v15605_v39 }
 0x3ce   : > { %2834 = vmatmul.mubr.f32.gmra.mrb[18].mxu0 %v15847_v38 }
 0x3cf   : > { %2839 = vmatprep.mubr.f32.mxu0 %v15605_v39 }
 0x3d2   : > { %2841 = vmatmul.mubr.f32.gmra.mrb[20].mxu0 %v15848_v37 }
 0x3d3   : > { %2846 = vmatprep.mubr.f32.mxu0 %v15605_v39 }
 0x3d6   : > { %2848 = vmatmul.mubr.f32.gmra.mrb[22].mxu0 %v15849_v57 }
 0x3d7   : > { %2853 = vmatprep.mubr.f32.mxu0 %v15605_v39 }
 0x3da   : > { %2855 = vmatmul.mubr.f32.gmra.mrb[24].mxu0 %v15850_v25 }
 0x3db   : > { %2860 = vmatprep.mubr.f32.mxu0 %v15605_v39 }
 0x3de   : > { %2862 = vmatmul.mubr.f32.gmra.mrb[26].mxu0 %v15851_v62 }
 0x3df   : > { %2867 = vmatprep.mubr.f32.mxu0 %v15605_v39 }
 0x3e2   : > { %2869 = vmatmul.mubr.f32.gmra.mrb[28].mxu0 %v15852_v2 }
 0x3e3   : > { %2874 = vmatprep.mubr.f32.mxu0 %v15605_v39 }
 0x3e6   : > { %2876 = vmatmul.mubr.f32.gmra.mrb[30].mxu0 %v15853_v18 }
 0x3e7   : > { %2881 = vmatprep.mubr.f32.mxu0 %v15605_v39 }
 0x3ea   : > { %2883 = vmatmul.mubr.f32.gmra.mrb[32].mxu0 %v15854_v22 }
 0x3eb   : > { %2888 = vmatprep.mubr.f32.mxu0 %v15605_v39 }
 0x3ee   : > { %2890 = vmatmul.mubr.f32.gmra.mrb[34].mxu0 %v15855_v60 }
 0x3ef   : > { %2895 = vmatprep.mubr.f32.mxu0 %v15605_v39 }
 0x3f2   : > { %2897 = vmatmul.mubr.f32.gmra.mrb[36].mxu0 %v15856_v54 }
 0x3f3   : > { %2902 = vmatprep.mubr.f32.mxu0 %v15605_v39 }
 0x3f6   : > { %2904 = vmatmul.mubr.f32.gmra.mrb[38].mxu0 %v15857_v30 }
 0x3f7   : > { %2909 = vmatprep.mubr.f32.mxu0 %v15605_v39 }
 0x3fa   : > { %2911 = vmatmul.mubr.f32.gmra.mrb[40].mxu0 %v15858_v47 }
 0x3fb   : > { %2916 = vmatprep.mubr.f32.mxu0 %v15605_v39 }
 0x3fe   : > { %2918 = vmatmul.mubr.f32.gmra.mrb[42].mxu0 %v15859_v61 }
 0x3ff   : > { %2923 = vmatprep.mubr.f32.mxu0 %v15605_v39 }
 0x402   : > { %2925 = vmatmul.mubr.f32.gmra.mrb[44].mxu0 %v15860_v21 }
 0x403   : > { %2930 = vmatprep.mubr.f32.mxu0 %v15605_v39 }
 0x406   : > { %2932 = vmatmul.mubr.f32.gmra.mrb[46].mxu0 %v15861_v31 }
 0x407   : > { %2937 = vmatprep.mubr.f32.mxu0 %v15605_v39 }
 0x40a   : > { %2939 = vmatmul.mubr.f32.gmra.mrb[48].mxu0 %v15862_v40 }
 0x40b   : > { %2944 = vmatprep.mubr.f32.mxu0 %v15605_v39 }
 0x40e   : > { %2946 = vmatmul.mubr.f32.gmra.mrb[50].mxu0 %v15863_v33 }
 0x40f   : > { %2951 = vmatprep.mubr.f32.mxu0 %v15605_v39 }
 0x412   : > { %2953 = vmatmul.mubr.f32.gmra.mrb[52].mxu0 %v15864_v14 }
 0x413   : > { %2958 = vmatprep.mubr.f32.mxu0 %v15605_v39 }
 0x416   : > { %2960 = vmatmul.mubr.f32.gmra.mrb[54].mxu0 %v15865_v10 }
 0x417   : > { %2965 = vmatprep.mubr.f32.mxu0 %v15605_v39 }
 0x41a   : > { %2967 = vmatmul.mubr.f32.gmra.mrb[56].mxu0 %v15866_v49 }
 0x41b   : > { %2972 = vmatprep.mubr.f32.mxu0 %v15605_v39 }
 0x41e   : > { %2974 = vmatmul.mubr.f32.gmra.mrb[58].mxu0 %v15867_v29 }
 0x41f   : > { %2979 = vmatprep.mubr.f32.mxu0 %v15605_v39 }
 0x422   : > { %2981 = vmatmul.mubr.f32.gmra.mrb[60].mxu0 %v15868_v9 }
 0x423   : > { %2986 = vmatprep.mubr.f32.mxu0 %v15605_v39 }
 0x426   : > { %2988 = vmatmul.mubr.f32.gmra.mrb[62].mxu0 %v15869_v24 }
 0x47d   : > { %v10641_v55 = vpop.f32.mrb[0].mxu0 }
 0x47e   : > { %15870 = vst [vmem:[#allocation24_spill] sm:$0xff] %v10641_v55  ;;  %v10643_v16 = vpop.f32.mrb[1].mxu0 }
 0x47f   : > { %15871 = vst [vmem:[#allocation27_spill] sm:$0xff] %v10643_v16 }
 0x481   : > { %v10647_v53 = vpop.f32.mrb[2].mxu0 }
 0x482   : > { %15872 = vst [vmem:[#allocation29_spill] sm:$0xff] %v10647_v53  ;;  %v10649_v8 = vpop.f32.mrb[3].mxu0 }
 0x483   : > { %15873 = vst [vmem:[#allocation33_spill] sm:$0xff] %v10649_v8 }
 0x485   : > { %v10653_v52 = vpop.f32.mrb[4].mxu0 }
 0x486   : > { %15874 = vst [vmem:[#allocation34_spill] sm:$0xff] %v10653_v52  ;;  %v10655_v5 = vpop.f32.mrb[5].mxu0 }
 0x487   : > { %15875 = vst [vmem:[#allocation45_spill] sm:$0xff] %v10655_v5 }
 0x489   : > { %v10659_v27 = vpop.f32.mrb[6].mxu0 }
 0x48a   : > { %15876 = vst [vmem:[#allocation49_spill] sm:$0xff] %v10659_v27  ;;  %v10661_v13 = vpop.f32.mrb[7].mxu0 }
 0x48b   : > { %15877 = vst [vmem:[#allocation51_spill] sm:$0xff] %v10661_v13 }
 0x48d   : > { %v10665_v28 = vpop.f32.mrb[8].mxu0 }
 0x48e   : > { %15878 = vst [vmem:[#allocation52_spill] sm:$0xff] %v10665_v28  ;;  %v10667_v42 = vpop.f32.mrb[9].mxu0 }
 0x48f   : > { %15879 = vst [vmem:[#allocation19_spill] sm:$0xff] %v10667_v42  ;;  %v3006_v45 = vmax.f32 %v10665_v28, %v10667_v42 }
 0x491   : > { %3007 = vmax.xlane.f32.xlu0 %v3006_v45  ;;  %v10671_v1 = vpop.f32.mrb[10].mxu0 }
 0x492   : > { %15880 = vst [vmem:[#allocation73_spill] sm:$0xff] %v10671_v1  ;;  %v10673_v32 = vpop.f32.mrb[11].mxu0 }
 0x493   : > { %15881 = vst [vmem:[#allocation76_spill] sm:$0xff] %v10673_v32  ;;  %v3009_v43 = vmax.f32 %v10671_v1, %v10673_v32 }
 0x495   : > { %3010 = vmax.xlane.f32.xlu1 %v3009_v43  ;;  %v10677_v34 = vpop.f32.mrb[12].mxu0 }
 0x496   : > { %15882 = vst [vmem:[#allocation77_spill] sm:$0xff] %v10677_v34  ;;  %v10679_v0 = vpop.f32.mrb[13].mxu0 }
 0x497   : > { %15883 = vst [vmem:[#allocation80_spill] sm:$0xff] %v10679_v0  ;;  %v3012_v12 = vmax.f32 %v10677_v34, %v10679_v0 }
 0x499   : > { %3013 = vmax.xlane.f32.xlu0 %v3012_v12  ;;  %v10683_v35 = vpop.f32.mrb[14].mxu0 }
 0x49a   : > { %15884 = vst [vmem:[#allocation82_spill] sm:$0xff] %v10683_v35  ;;  %v10685_v26 = vpop.f32.mrb[15].mxu0 }
 0x49b   : > { %15885 = vst [vmem:[#allocation50_spill] sm:$0xff] %v10685_v26  ;;  %v3015_v19 = vmax.f32 %v10683_v35, %v10685_v26 }
 0x49d   : > { %3016 = vmax.xlane.f32.xlu1 %v3015_v19  ;;  %v10689_v63 = vpop.f32.mrb[16].mxu0 }
 0x49e   : > { %15886 = vst [vmem:[#allocation54_spill] sm:$0xff] %v10689_v63  ;;  %v10691_v17 = vpop.f32.mrb[17].mxu0 }
 0x49f   : > { %15887 = vst [vmem:[#allocation84_spill] sm:$0xff] %v10691_v17  ;;  %v3018_v36 = vmax.f32 %v10689_v63, %v10691_v17 }
 0x4a1   : > { %3019 = vmax.xlane.f32.xlu0 %v3018_v36  ;;  %v10695_v46 = vpop.f32.mrb[18].mxu0 }
 0x4a2   : > { %15888 = vst [vmem:[#allocation87_spill] sm:$0xff] %v10695_v46  ;;  %v10697_v41 = vpop.f32.mrb[19].mxu0 }
 0x4a3   : > { %15889 = vst [vmem:[#allocation88_spill] sm:$0xff] %v10697_v41  ;;  %v3021_v50 = vmax.f32 %v10695_v46, %v10697_v41 }
 0x4a5   : > { %3022 = vmax.xlane.f32.xlu1 %v3021_v50  ;;  %v10701_v51 = vpop.f32.mrb[20].mxu0 }
 0x4a6   : > { %15890 = vst [vmem:[#allocation90_spill] sm:$0xff] %v10701_v51  ;;  %v10703_v56 = vpop.f32.mrb[21].mxu0 }
 0x4a7   : > { %15891 = vst [vmem:[#allocation30_spill] sm:$0xff] %v10703_v56  ;;  %v3024_v6 = vmax.f32 %v10701_v51, %v10703_v56 }
 0x4a9   : > { %3025 = vmax.xlane.f32.xlu0 %v3024_v6  ;;  %v10707_v4 = vpop.f32.mrb[22].mxu0 }
 0x4aa   : > { %15892 = vst [vmem:[#allocation32_spill] sm:$0xff] %v10707_v4  ;;  %v10709_v20 = vpop.f32.mrb[23].mxu0 }
 0x4ab   : > { %15893 = vst [vmem:[#allocation39_spill] sm:$0xff] %v10709_v20  ;;  %v3027_v11 = vmax.f32 %v10707_v4, %v10709_v20 }
 0x4ad   : > { %3028 = vmax.xlane.f32.xlu1 %v3027_v11  ;;  %v10713_v59 = vpop.f32.mrb[24].mxu0 }
 0x4ae   : > { %15894 = vst [vmem:[#allocation94_spill] sm:$0xff] %v10713_v59  ;;  %v10715_v48 = vpop.f32.mrb[25].mxu0 }
 0x4af   : > { %15895 = vst [vmem:[#allocation43_spill] sm:$0xff] %v10715_v48  ;;  %v3030_v58 = vmax.f32 %v10713_v59, %v10715_v48 }
 0x4b1   : > { %3031 = vmax.xlane.f32.xlu0 %v3030_v58  ;;  %v10719_v23 = vpop.f32.mrb[26].mxu0 }
 0x4b2   : > { %15896 = vst [vmem:[#allocation96_spill] sm:$0xff] %v10719_v23  ;;  %v10721_v38 = vpop.f32.mrb[27].mxu0 }
 0x4b3   : > { %15897 = vst [vmem:[#allocation48_spill] sm:$0xff] %v10721_v38  ;;  %v3033_v37 = vmax.f32 %v10719_v23, %v10721_v38 }
 0x4b5   : > { %3034 = vmax.xlane.f32.xlu1 %v3033_v37  ;;  %v10725_v57 = vpop.f32.mrb[28].mxu0 }
 0x4b6   : > { %15898 = vst [vmem:[#allocation98_spill] sm:$0xff] %v10725_v57  ;;  %v10727_v25 = vpop.f32.mrb[29].mxu0 }
 0x4b7   : > { %15899 = vst [vmem:[#allocation100_spill] sm:$0xff] %v10727_v25  ;;  %v3036_v62 = vmax.f32 %v10725_v57, %v10727_v25 }
 0x4b9   : > { %3037 = vmax.xlane.f32.xlu0 %v3036_v62  ;;  %v10731_v2 = vpop.f32.mrb[30].mxu0 }
 0x4ba   : > { %15900 = vst [vmem:[#allocation103_spill] sm:$0xff] %v10731_v2  ;;  %v10733_v18 = vpop.f32.mrb[31].mxu0 }
 0x4bb   : > { %15901 = vst [vmem:[#allocation60_spill] sm:$0xff] %v10733_v18  ;;  %v3039_v22 = vmax.f32 %v10731_v2, %v10733_v18 }
 0x4bd   : > { %3040 = vmax.xlane.f32.xlu1 %v3039_v22  ;;  %v10737_v60 = vpop.f32.mrb[32].mxu0 }
 0x4be   : > { %15902 = vst [vmem:[#allocation105_spill] sm:$0xff] %v10737_v60  ;;  %v10739_v54 = vpop.f32.mrb[33].mxu0 }
 0x4bf   : > { %15903 = vst [vmem:[#allocation63_spill] sm:$0xff] %v10739_v54  ;;  %v3042_v30 = vmax.f32 %v10737_v60, %v10739_v54 }
 0x4c1   : > { %3043 = vmax.xlane.f32.xlu0 %v3042_v30  ;;  %v10743_v47 = vpop.f32.mrb[34].mxu0 }
 0x4c2   : > { %15904 = vst [vmem:[#allocation64_spill] sm:$0xff] %v10743_v47  ;;  %v10745_v61 = vpop.f32.mrb[35].mxu0 }
 0x4c3   : > { %15905 = vst [vmem:[#allocation65_spill] sm:$0xff] %v10745_v61  ;;  %v3045_v21 = vmax.f32 %v10743_v47, %v10745_v61 }
 0x4c5   : > { %3046 = vmax.xlane.f32.xlu1 %v3045_v21  ;;  %v10749_v31 = vpop.f32.mrb[36].mxu0 }
 0x4c6   : > { %15906 = vst [vmem:[#allocation21_spill] sm:$0xff] %v10749_v31  ;;  %v10751_v40 = vpop.f32.mrb[37].mxu0 }
 0x4c7   : > { %15907 = vst [vmem:[#allocation22_spill] sm:$0xff] %v10751_v40  ;;  %v3048_v33 = vmax.f32 %v10749_v31, %v10751_v40 }
 0x4c9   : > { %3049 = vmax.xlane.f32.xlu0 %v3048_v33  ;;  %v10755_v14 = vpop.f32.mrb[38].mxu0 }
 0x4ca   : > { %15908 = vst [vmem:[#allocation26_spill] sm:$0xff] %v10755_v14  ;;  %v10757_v10 = vpop.f32.mrb[39].mxu0 }
 0x4cb   : > { %15909 = vst [vmem:[#allocation35_spill] sm:$0xff] %v10757_v10  ;;  %v3051_v49 = vmax.f32 %v10755_v14, %v10757_v10 }
 0x4cd   : > { %3052 = vmax.xlane.f32.xlu1 %v3051_v49  ;;  %v10761_v29 = vpop.f32.mrb[40].mxu0 }
 0x4ce   : > { %15910 = vst [vmem:[#allocation36_spill] sm:$0xff] %v10761_v29  ;;  %v10763_v9 = vpop.f32.mrb[41].mxu0 }
 0x4cf   : > { %15911 = vst [vmem:[#allocation40_spill] sm:$0xff] %v10763_v9  ;;  %v3054_v24 = vmax.f32 %v10761_v29, %v10763_v9 }
 0x4d1   : > { %3055 = vmax.xlane.f32.xlu0 %v3054_v24  ;;  %v10767_v45 = vpop.f32.mrb[42].mxu0 }
 0x4d2   : > { %15912 = vst [vmem:[#allocation41_spill] sm:$0xff] %v10767_v45  ;;  %v10769_v43 = vpop.f32.mrb[43].mxu0 }
 0x4d3   : > { %15913 = vst [vmem:[#allocation109_spill] sm:$0xff] %v10769_v43  ;;  %v3057_v12 = vmax.f32 %v10767_v45, %v10769_v43 }
 0x4d5   : > { %3058 = vmax.xlane.f32.xlu1 %v3057_v12  ;;  %v10773_v19 = vpop.f32.mrb[44].mxu0 }
 0x4d6   : > { %15914 = vst [vmem:[#allocation67_spill] sm:$0xff] %v10773_v19  ;;  %v10775_v36 = vpop.f32.mrb[45].mxu0 }
 0x4d7   : > { %15915 = vst [vmem:[#allocation111_spill] sm:$0xff] %v10775_v36  ;;  %v3060_v50 = vmax.f32 %v10773_v19, %v10775_v36 }
 0x4d9   : > { %3061 = vmax.xlane.f32.xlu0 %v3060_v50  ;;  %v10779_v6 = vpop.f32.mrb[46].mxu0 }
 0x4da   : > { %15916 = vst [vmem:[#allocation69_spill] sm:$0xff] %v10779_v6  ;;  %v10781_v11 = vpop.f32.mrb[47].mxu0 }
 0x4db   : > { %15917 = vst [vmem:[#allocation70_spill] sm:$0xff] %v10781_v11  ;;  %v3063_v58 = vmax.f32 %v10779_v6, %v10781_v11 }
 0x4dd   : > { %3064 = vmax.xlane.f32.xlu1 %v3063_v58  ;;  %v10785_v37 = vpop.f32.mrb[48].mxu0 }
 0x4de   : > { %15918 = vst [vmem:[#allocation114_spill] sm:$0xff] %v10785_v37  ;;  %v10787_v62 = vpop.f32.mrb[49].mxu0 }
 0x4df   : > { %15919 = vst [vmem:[#allocation71_spill] sm:$0xff] %v10787_v62  ;;  %v3066_v22 = vmax.f32 %v10785_v37, %v10787_v62 }
 0x4e1   : > { %3067 = vmax.xlane.f32.xlu0 %v3066_v22  ;;  %v10791_v30 = vpop.f32.mrb[50].mxu0 }
 0x4e2   : > { %15920 = vst [vmem:[#allocation20_spill] sm:$0xff] %v10791_v30  ;;  %v10793_v21 = vpop.f32.mrb[51].mxu0 }
 0x4e3   : > { %15921 = vst [vmem:[#allocation23_spill] sm:$0xff] %v10793_v21  ;;  %v3069_v33 = vmax.f32 %v10791_v30, %v10793_v21 }
 0x4e5   : > { %3070 = vmax.xlane.f32.xlu0 %v3069_v33  ;;  %v10797_v49 = vpop.f32.mrb[52].mxu0 }
 0x4e6   : > { %15922 = vst [vmem:[#allocation74_spill] sm:$0xff] %v10797_v49  ;;  %v10799_v24 = vpop.f32.mrb[53].mxu0 }
 0x4e7   : > { %15923 = vst [vmem:[#allocation28_spill] sm:$0xff] %v10799_v24  ;;  %v3072_v12 = vmax.f32 %v10797_v49, %v10799_v24 }
 0x4e9   : > { %3073 = vmax.xlane.f32.xlu0 %v3072_v12  ;;  %v10803_v50 = vpop.f32.mrb[54].mxu0 }
 0x4ea   : > { %15924 = vst [vmem:[#allocation31_spill] sm:$0xff] %v10803_v50  ;;  %v10805_v58 = vpop.f32.mrb[55].mxu0 }
 0x4eb   : > { %15925 = vst [vmem:[#allocation72_spill] sm:$0xff] %v10805_v58  ;;  %v3075_v22 = vmax.f32 %v10803_v50, %v10805_v58 }
 0x4ed   : > { %3076 = vmax.xlane.f32.xlu0 %v3075_v22  ;;  %v10809_v3 = vpop.f32.mrb[56].mxu0 }
 0x4ee   : > { %15926 = vst [vmem:[#allocation37_spill] sm:$0xff] %v10809_v3  ;;  %v10811_v15 = vpop.f32.mrb[57].mxu0 }
 0x4ef   : > { %15927 = vst [vmem:[#allocation38_spill] sm:$0xff] %v10811_v15  ;;  %v3078_v33 = vmax.f32 %v10809_v3, %v10811_v15  ;;  %v3090_v3 = vlaneseq }
 0x4f1   : > { %3079 = vmax.xlane.f32.xlu0 %v3078_v33  ;;  %v10815_v7 = vpop.f32.mrb[58].mxu0  ;;  %v10833_v24 = vand.u32 127, %v3090_v3 }
 0x4f2   : > { %15928 = vst [vmem:[#allocation75_spill] sm:$0xff] %v10815_v7  ;;  %v10817_v44 = vpop.f32.mrb[59].mxu0 }
 0x4f3   : > { %15929 = vst [vmem:[#allocation44_spill] sm:$0xff] %v10817_v44  ;;  %v3081_v12 = vmax.f32 %v10815_v7, %v10817_v44  ;;  %15934 = vst [vmem:[#allocation79_spill] sm:$0xff] %v10833_v24 }
 0x4f5   : > { %3082 = vmax.xlane.f32.xlu0 %v3081_v12  ;;  %v10821_v39 = vpop.f32.mrb[60].mxu0  ;;  %v10836_v12 = vadd.s32 128, %v10833_v24 }
 0x4f6   : > { %15930 = vst [vmem:[#allocation46_spill] sm:$0xff] %v10821_v39  ;;  %v10823_v58 = vpop.f32.mrb[61].mxu0 }
 0x4f7   : > { %15931 = vst [vmem:[#allocation78_spill] sm:$0xff] %v10823_v58  ;;  %v3084_v22 = vmax.f32 %v10821_v39, %v10823_v58  ;;  %15935 = vst [vmem:[#allocation56_spill] sm:$0xff] %v10836_v12 }
 0x4f9   : > { %3085 = vmax.xlane.f32.xlu0 %v3084_v22  ;;  %v10827_v50 = vpop.f32.mrb[62].mxu0 }
 0x4fa   : > { %15932 = vst [vmem:[#allocation53_spill] sm:$0xff] %v10827_v50  ;;  %v10829_v15 = vpop.f32.mrb[63].mxu0 }
 0x4fb   : > { %15933 = vst [vmem:[#allocation55_spill] sm:$0xff] %v10829_v15  ;;  %v3087_v33 = vmax.f32 %v10827_v50, %v10829_v15 }
 0x4fd   : > { %3088 = vmax.xlane.f32.xlu0 %v3087_v33 }
 0x51e   : > { %v10838_v44 = vpop.xlane.xlu0 %3007 }
 0x51f   : > { %15936 = vst [vmem:[#allocation57_spill] sm:$0xff] %v10838_v44  ;;  %vm3101_vm0 = vcmp.ge.f32.partialorder %v10665_v28, %v10838_v44  ;;  %vm3102_vm1 = vcmp.ge.f32.partialorder %v10667_v42, %v10838_v44 }
 0x520   : > { %v3165_v22 = vsel %vm3101_vm0, %v10833_v24, 256  ;;  %v3166_v58 = vsel %vm3102_vm1, %v10836_v12, 256 }
 0x521   : > { %vm3285_vm2 = vcmp.lt.s32.totalorder %v3165_v22, %v3166_v58 }
 0x522   : > { %v10846_v33 = vpop.xlane.xlu1 %3010  ;;  %v10848_v3 = vsel %vm3285_vm2, %v3165_v22, %v3166_v58 }
 0x523   : > { %15937 = vst [vmem:[#allocation81_spill] sm:$0xff] %v10846_v33  ;;  %vm3103_vm3 = vcmp.ge.f32.partialorder %v10671_v1, %v10846_v33  ;;  %vm3104_vm4 = vcmp.ge.f32.partialorder %v10673_v32, %v10846_v33  ;;  %v3288_v28 = vshra.s32 %v10848_v3, 16 }
 0x524   : > { %v3167_v15 = vsel %vm3103_vm3, %v10833_v24, 256  ;;  %v3168_v44 = vsel %vm3104_vm4, %v10836_v12, 256 }
 0x525   : > { %v10857_v42 = vcvt.s32.f32 %v3288_v28  ;;  %vm3301_vm5 = vcmp.lt.s32.totalorder %v3167_v15, %v3168_v44 }
 0x526   : > { %v10859_v50 = vpop.xlane.xlu0 %3013  ;;  %v10861_v39 = vsel %vm3301_vm5, %v3167_v15, %v3168_v44 }
 0x527   : > { %15938 = vst [vmem:[#allocation58_spill] sm:$0xff] %v10859_v50  ;;  %vm3105_vm6 = vcmp.ge.f32.partialorder %v10677_v34, %v10859_v50  ;;  %vm3106_vm7 = vcmp.ge.f32.partialorder %v10679_v0, %v10859_v50  ;;  %3291 = vmin.xlane.f32.xlu1 %v10857_v42  ;;  %v3304_v58 = vshra.s32 %v10861_v39, 16 }
 0x528   : > { %v3169_v22 = vsel %vm3105_vm6, %v10833_v24, 256  ;;  %v3170_v28 = vsel %vm3106_vm7, %v10836_v12, 256 }
 0x529   : > { %v10871_v33 = vcvt.s32.f32 %v3304_v58  ;;  %vm3317_vm8 = vcmp.lt.s32.totalorder %v3169_v22, %v3170_v28 }
 0x52a   : > { %v10873_v32 = vpop.xlane.xlu1 %3016  ;;  %v10875_v44 = vsel %vm3317_vm8, %v3169_v22, %v3170_v28 }
 0x52b   : > { %15939 = vst [vmem:[#allocation59_spill] sm:$0xff] %v10873_v32  ;;  %vm3107_vm9 = vcmp.ge.f32.partialorder %v10683_v35, %v10873_v32  ;;  %vm3108_vm10 = vcmp.ge.f32.partialorder %v10685_v26, %v10873_v32  ;;  %3307 = vmin.xlane.f32.xlu1 %v10871_v33  ;;  %v3320_v15 = vshra.s32 %v10875_v44, 16 }
 0x52c   : > { %v3171_v50 = vsel %vm3107_vm9, %v10833_v24, 256  ;;  %v3172_v58 = vsel %vm3108_vm10, %v10836_v12, 256 }
 0x52d   : > { %v10885_v0 = vcvt.s32.f32 %v3320_v15  ;;  %vm3333_vm11 = vcmp.lt.s32.totalorder %v3171_v50, %v3172_v58 }
 0x52e   : > { %v10887_v34 = vpop.xlane.xlu0 %3019  ;;  %v10889_v22 = vsel %vm3333_vm11, %v3171_v50, %v3172_v58 }
 0x52f   : > { %15940 = vst [vmem:[#allocation83_spill] sm:$0xff] %v10887_v34  ;;  %vm3109_vm12 = vcmp.ge.f32.partialorder %v10689_v63, %v10887_v34  ;;  %vm3110_vm13 = vcmp.ge.f32.partialorder %v10691_v17, %v10887_v34  ;;  %3323 = vmin.xlane.f32.xlu1 %v10885_v0  ;;  %v3336_v28 = vshra.s32 %v10889_v22, 16 }
 0x530   : > { %v3173_v32 = vsel %vm3109_vm12, %v10833_v24, 256  ;;  %v3174_v15 = vsel %vm3110_vm13, %v10836_v12, 256 }
 0x531   : > { %v10899_v26 = vcvt.s32.f32 %v3336_v28  ;;  %vm3349_vm14 = vcmp.lt.s32.totalorder %v3173_v32, %v3174_v15 }
 0x532   : > { %v10901_v35 = vpop.xlane.xlu1 %3022  ;;  %v10903_v50 = vsel %vm3349_vm14, %v3173_v32, %v3174_v15 }
 0x533   : > { %15941 = vst [vmem:[#allocation62_spill] sm:$0xff] %v10901_v35  ;;  %vm3111_vm15 = vcmp.ge.f32.partialorder %v10695_v46, %v10901_v35  ;;  %vm3112_vm0 = vcmp.ge.f32.partialorder %v10697_v41, %v10901_v35  ;;  %3339 = vmin.xlane.f32.xlu1 %v10899_v26  ;;  %v3352_v58 = vshra.s32 %v10903_v50, 16 }
 0x534   : > { %v3175_v34 = vsel %vm3111_vm15, %v10833_v24, 256  ;;  %v3176_v28 = vsel %vm3112_vm0, %v10836_v12, 256 }
 0x535   : > { %v10913_v17 = vcvt.s32.f32 %v3352_v58  ;;  %vm3365_vm1 = vcmp.lt.s32.totalorder %v3175_v34, %v3176_v28 }
 0x536   : > { %v10915_v63 = vpop.xlane.xlu0 %3025  ;;  %v10917_v32 = vsel %vm3365_vm1, %v3175_v34, %v3176_v28 }
 0x537   : > { %15942 = vst [vmem:[#allocation85_spill] sm:$0xff] %v10915_v63  ;;  %vm3113_vm2 = vcmp.ge.f32.partialorder %v10701_v51, %v10915_v63  ;;  %vm3114_vm3 = vcmp.ge.f32.partialorder %v10703_v56, %v10915_v63  ;;  %3355 = vmin.xlane.f32.xlu1 %v10913_v17  ;;  %v3368_v15 = vshra.s32 %v10917_v32, 16 }
 0x538   : > { %v3177_v35 = vsel %vm3113_vm2, %v10833_v24, 256  ;;  %v3178_v58 = vsel %vm3114_vm3, %v10836_v12, 256 }
 0x539   : > { %v10927_v41 = vcvt.s32.f32 %v3368_v15  ;;  %vm3381_vm4 = vcmp.lt.s32.totalorder %v3177_v35, %v3178_v58 }
 0x53a   : > { %v10929_v46 = vpop.xlane.xlu1 %3028  ;;  %v10931_v34 = vsel %vm3381_vm4, %v3177_v35, %v3178_v58 }
 0x53b   : > { %15943 = vst [vmem:[#allocation86_spill] sm:$0xff] %v10929_v46  ;;  %vm3115_vm5 = vcmp.ge.f32.partialorder %v10707_v4, %v10929_v46  ;;  %vm3116_vm6 = vcmp.ge.f32.partialorder %v10709_v20, %v10929_v46  ;;  %3371 = vmin.xlane.f32.xlu1 %v10927_v41  ;;  %v3384_v28 = vshra.s32 %v10931_v34, 16 }
 0x53c   : > { %v3179_v63 = vsel %vm3115_vm5, %v10833_v24, 256  ;;  %v3180_v15 = vsel %vm3116_vm6, %v10836_v12, 256 }
 0x53d   : > { %v10941_v56 = vcvt.s32.f32 %v3384_v28  ;;  %vm3397_vm7 = vcmp.lt.s32.totalorder %v3179_v63, %v3180_v15 }
 0x53e   : > { %v10943_v51 = vpop.xlane.xlu0 %3031  ;;  %v10945_v35 = vsel %vm3397_vm7, %v3179_v63, %v3180_v15 }
 0x53f   : > { %15944 = vst [vmem:[#allocation25_spill] sm:$0xff] %v10943_v51  ;;  %vm3117_vm8 = vcmp.ge.f32.partialorder %v10713_v59, %v10943_v51  ;;  %vm3118_vm9 = vcmp.ge.f32.partialorder %v10715_v48, %v10943_v51  ;;  %3387 = vmin.xlane.f32.xlu1 %v10941_v56  ;;  %v3400_v58 = vshra.s32 %v10945_v35, 16 }
 0x540   : > { %v3181_v46 = vsel %vm3117_vm8, %v10833_v24, 256  ;;  %v3182_v28 = vsel %vm3118_vm9, %v10836_v12, 256 }
 0x541   : > { %v10955_v20 = vcvt.s32.f32 %v3400_v58  ;;  %vm3413_vm10 = vcmp.lt.s32.totalorder %v3181_v46, %v3182_v28 }
 0x542   : > { %v10957_v4 = vpop.xlane.xlu1 %3034  ;;  %v10959_v63 = vsel %vm3413_vm10, %v3181_v46, %v3182_v28 }
 0x543   : > { %15945 = vst [vmem:[#allocation89_spill] sm:$0xff] %v10957_v4  ;;  %vm3119_vm11 = vcmp.ge.f32.partialorder %v10719_v23, %v10957_v4  ;;  %vm3120_vm12 = vcmp.ge.f32.partialorder %v10721_v38, %v10957_v4  ;;  %3403 = vmin.xlane.f32.xlu1 %v10955_v20  ;;  %v3416_v15 = vshra.s32 %v10959_v63, 16 }
 0x544   : > { %v3183_v51 = vsel %vm3119_vm11, %v10833_v24, 256  ;;  %v3184_v58 = vsel %vm3120_vm12, %v10836_v12, 256 }
 0x545   : > { %v10969_v48 = vcvt.s32.f32 %v3416_v15  ;;  %vm3429_vm13 = vcmp.lt.s32.totalorder %v3183_v51, %v3184_v58 }
 0x546   : > { %v10971_v59 = vpop.xlane.xlu0 %3037  ;;  %v10973_v46 = vsel %vm3429_vm13, %v3183_v51, %v3184_v58 }
 0x547   : > { %15946 = vst [vmem:[#allocation91_spill] sm:$0xff] %v10971_v59  ;;  %vm3121_vm14 = vcmp.ge.f32.partialorder %v10725_v57, %v10971_v59  ;;  %vm3122_vm15 = vcmp.ge.f32.partialorder %v10727_v25, %v10971_v59  ;;  %3419 = vmin.xlane.f32.xlu0 %v10969_v48  ;;  %v3432_v28 = vshra.s32 %v10973_v46, 16 }
 0x548   : > { %v3185_v4 = vsel %vm3121_vm14, %v10833_v24, 256  ;;  %v3186_v15 = vsel %vm3122_vm15, %v10836_v12, 256 }
 0x549   : > { %v10983_v38 = vcvt.s32.f32 %v3432_v28  ;;  %vm3445_vm0 = vcmp.lt.s32.totalorder %v3185_v4, %v3186_v15 }
 0x54a   : > { %v10985_v23 = vpop.xlane.xlu1 %3040  ;;  %v10987_v51 = vsel %vm3445_vm0, %v3185_v4, %v3186_v15  ;;  %v15949_v15 = vmax.f32 %v10641_v55, %v10643_v16 }
 0x54b   : > { %15947 = vst [vmem:[#allocation92_spill] sm:$0xff] %v10985_v23  ;;  %vm3123_vm1 = vcmp.ge.f32.partialorder %v10731_v2, %v10985_v23  ;;  %vm3124_vm2 = vcmp.ge.f32.partialorder %v10733_v18, %v10985_v23  ;;  %3435 = vmin.xlane.f32.xlu1 %v10983_v38  ;;  %v3448_v58 = vshra.s32 %v10987_v51, 16 }
 0x54c   : > { %v3187_v59 = vsel %vm3123_vm1, %v10833_v24, 256  ;;  %v3188_v28 = vsel %vm3124_vm2, %v10836_v12, 256 }
 0x54d   : > { %v10997_v25 = vcvt.s32.f32 %v3448_v58  ;;  %vm3461_vm3 = vcmp.lt.s32.totalorder %v3187_v59, %v3188_v28 }
 0x54e   : > { %v10999_v57 = vpop.xlane.xlu0 %3043  ;;  %v11001_v4 = vsel %vm3461_vm3, %v3187_v59, %v3188_v28 }
 0x54f   : > { %15948 = vst [vmem:[#allocation42_spill] sm:$0xff] %v10999_v57  ;;  %vm3125_vm4 = vcmp.ge.f32.partialorder %v10737_v60, %v10999_v57  ;;  %vm3126_vm5 = vcmp.ge.f32.partialorder %v10739_v54, %v10999_v57  ;;  %2995 = vmax.xlane.f32.xlu1 %v15949_v15  ;;  %3451 = vmin.xlane.f32.xlu0 %v10997_v25  ;;  %v3464_v58 = vshra.s32 %v11001_v4, 16 }
 0x550   : > { %v3189_v23 = vsel %vm3125_vm4, %v10833_v24, 256  ;;  %v3190_v18 = vsel %vm3126_vm5, %v10836_v12, 256  ;;  %v15951_v15 = vmax.f32 %v10647_v53, %v10649_v8 }
 0x551   : > { %v11014_v59 = vcvt.s32.f32 %v3464_v58  ;;  %vm3477_vm6 = vcmp.lt.s32.totalorder %v3189_v23, %v3190_v18 }
 0x552   : > { %v11016_v28 = vpop.xlane.xlu1 %3046  ;;  %v11018_v60 = vsel %vm3477_vm6, %v3189_v23, %v3190_v18 }
 0x553   : > { %15950 = vst [vmem:[#allocation93_spill] sm:$0xff] %v11016_v28  ;;  %vm3127_vm7 = vcmp.ge.f32.partialorder %v10743_v47, %v11016_v28  ;;  %vm3128_vm8 = vcmp.ge.f32.partialorder %v10745_v61, %v11016_v28  ;;  %2998 = vmax.xlane.f32.xlu1 %v15951_v15  ;;  %3467 = vmin.xlane.f32.xlu0 %v11014_v59  ;;  %v3480_v58 = vshra.s32 %v11018_v60, 16 }
 0x554   : > { %v3191_v57 = vsel %vm3127_vm7, %v10833_v24, 256  ;;  %v3192_v54 = vsel %vm3128_vm8, %v10836_v12, 256  ;;  %v15953_v15 = vmax.f32 %v10653_v52, %v10655_v5 }
 0x555   : > { %v11031_v23 = vcvt.s32.f32 %v3480_v58  ;;  %vm3493_vm9 = vcmp.lt.s32.totalorder %v3191_v57, %v3192_v54 }
 0x556   : > { %v11033_v18 = vpop.xlane.xlu0 %3049  ;;  %v11035_v47 = vsel %vm3493_vm9, %v3191_v57, %v3192_v54 }
 0x557   : > { %15952 = vst [vmem:[#allocation47_spill] sm:$0xff] %v11033_v18  ;;  %vm3129_vm10 = vcmp.ge.f32.partialorder %v10749_v31, %v11033_v18  ;;  %vm3130_vm11 = vcmp.ge.f32.partialorder %v10751_v40, %v11033_v18  ;;  %3001 = vmax.xlane.f32.xlu1 %v15953_v15  ;;  %3483 = vmin.xlane.f32.xlu0 %v11031_v23  ;;  %v3496_v58 = vshra.s32 %v11035_v47, 16 }
 0x558   : > { %v3193_v28 = vsel %vm3129_vm10, %v10833_v24, 256  ;;  %v3194_v61 = vsel %vm3130_vm11, %v10836_v12, 256  ;;  %v15956_v15 = vmax.f32 %v10659_v27, %v10661_v13  ;;  %v417_v13 = vld [vmem:[#allocation7 + $0xa8] sm:$0xff]  ;;  %v418_v27 = vld [vmem:[#allocation7 + $0xb0] sm:$0xff] }
 0x559   : > { %v11048_v57 = vcvt.s32.f32 %v3496_v58  ;;  %vm3509_vm12 = vcmp.lt.s32.totalorder %v3193_v28, %v3194_v61 }
 0x55a   : > { %v11050_v54 = vpop.xlane.xlu1 %3052  ;;  %v11052_v31 = vsel %vm3509_vm12, %v3193_v28, %v3194_v61 }
 0x55b   : > { %15954 = vst [vmem:[#allocation95_spill] sm:$0xff] %v11048_v57  ;;  %15955 = vst [vmem:[#allocation97_spill] sm:$0xff] %v11050_v54  ;;  %vm3131_vm13 = vcmp.ge.f32.partialorder %v10755_v14, %v11050_v54  ;;  %vm3132_vm14 = vcmp.ge.f32.partialorder %v10757_v10, %v11050_v54  ;;  %3004 = vmax.xlane.f32.xlu1 %v15956_v15  ;;  %3499 = vmin.xlane.f32.xlu0 %v11048_v57  ;;  %v3512_v58 = vshra.s32 %v11052_v31, 16 }
 0x55c   : > { %v3195_v18 = vsel %vm3131_vm13, %v10833_v24, 256  ;;  %v3196_v40 = vsel %vm3132_vm14, %v10836_v12, 256 }
 0x55d   : > { %v11065_v61 = vcvt.s32.f32 %v3512_v58  ;;  %vm3525_vm15 = vcmp.lt.s32.totalorder %v3195_v18, %v3196_v40 }
 0x55e   : > { %v11067_v28 = vpop.xlane.xlu0 %3055  ;;  %v11069_v14 = vsel %vm3525_vm15, %v3195_v18, %v3196_v40 }
 0x55f   : > { %15957 = vst [vmem:[#allocation99_spill] sm:$0xff] %v11065_v61  ;;  %15958 = vst [vmem:[#allocation101_spill] sm:$0xff] %v11067_v28  ;;  %vm3133_vm0 = vcmp.ge.f32.partialorder %v10761_v29, %v11067_v28  ;;  %vm3134_vm1 = vcmp.ge.f32.partialorder %v10763_v9, %v11067_v28  ;;  %3515 = vmin.xlane.f32.xlu0 %v11065_v61  ;;  %v3528_v15 = vshra.s32 %v11069_v14, 16  ;;  %v415_v61 = vld [vmem:[#allocation7 + $0x98] sm:$0xff] }
 0x560   : > { %15959 = vst [vmem:[#allocation102_spill] sm:$0xff] %v11069_v14  ;;  %v3197_v54 = vsel %vm3133_vm0, %v10833_v24, 256  ;;  %v3198_v58 = vsel %vm3134_vm1, %v10836_v12, 256  ;;  %v416_v14 = vld [vmem:[#allocation7 + $0xa0] sm:$0xff] }
 0x561   : > { %v11079_v10 = vcvt.s32.f32 %v3528_v15  ;;  %vm3541_vm2 = vcmp.lt.s32.totalorder %v3197_v54, %v3198_v58 }
 0x562   : > { %v11081_v2 = vpop.xlane.xlu1 %3058  ;;  %v11083_v40 = vsel %vm3541_vm2, %v3197_v54, %v3198_v58 }
 0x563   : > { %15960 = vst [vmem:[#allocation61_spill] sm:$0xff] %v11079_v10  ;;  %15961 = vst [vmem:[#allocation104_spill] sm:$0xff] %v11081_v2  ;;  %vm3135_vm3 = vcmp.ge.f32.partialorder %v10767_v45, %v11081_v2  ;;  %vm3136_vm4 = vcmp.ge.f32.partialorder %v10769_v43, %v11081_v2  ;;  %3531 = vmin.xlane.f32.xlu1 %v11079_v10  ;;  %v3544_v18 = vshra.s32 %v11083_v40, 16 }
 0x564   : > { %15962 = vst [vmem:[#allocation106_spill] sm:$0xff] %v11083_v40  ;;  %v3199_v28 = vsel %vm3135_vm3, %v10833_v24, 256  ;;  %v3200_v15 = vsel %vm3136_vm4, %v10836_v12, 256 }
 0x565   : > { %v11093_v9 = vcvt.s32.f32 %v3544_v18  ;;  %vm3557_vm5 = vcmp.lt.s32.totalorder %v3199_v28, %v3200_v15 }
 0x566   : > { %v11095_v29 = vpop.xlane.xlu0 %3061  ;;  %v11097_v54 = vsel %vm3557_vm5, %v3199_v28, %v3200_v15 }
 0x567   : > { %15963 = vst [vmem:[#allocation107_spill] sm:$0xff] %v11093_v9  ;;  %15964 = vst [vmem:[#allocation66_spill] sm:$0xff] %v11095_v29  ;;  %vm3137_vm6 = vcmp.ge.f32.partialorder %v10773_v19, %v11095_v29  ;;  %vm3138_vm7 = vcmp.ge.f32.partialorder %v10775_v36, %v11095_v29  ;;  %3547 = vmin.xlane.f32.xlu0 %v11093_v9  ;;  %v3560_v58 = vshra.s32 %v11097_v54, 16  ;;  %v409_v9 = vld [vmem:[#allocation7 + $0x68] sm:$0xff] }
 0x568   : > { %15965 = vst [vmem:[#allocation108_spill] sm:$0xff] %v11097_v54  ;;  %v3201_v2 = vsel %vm3137_vm6, %v10833_v24, 256  ;;  %v3202_v18 = vsel %vm3138_vm7, %v10836_v12, 256 }
 0x569   : > { %v11107_v43 = vcvt.s32.f32 %v3560_v58  ;;  %vm3573_vm8 = vcmp.lt.s32.totalorder %v3201_v2, %v3202_v18 }
 0x56a   : > { %v11109_v45 = vpop.xlane.xlu1 %3064  ;;  %v11111_v28 = vsel %vm3573_vm8, %v3201_v2, %v3202_v18 }
 0x56b   : > { %15966 = vst [vmem:[#allocation68_spill] sm:$0xff] %v11107_v43  ;;  %15967 = vst [vmem:[#allocation110_spill] sm:$0xff] %v11109_v45  ;;  %vm3139_vm9 = vcmp.ge.f32.partialorder %v10779_v6, %v11109_v45  ;;  %vm3140_vm10 = vcmp.ge.f32.partialorder %v10781_v11, %v11109_v45  ;;  %3563 = vmin.xlane.f32.xlu1 %v11107_v43  ;;  %v3576_v15 = vshra.s32 %v11111_v28, 16 }
 0x56c   : > { %15968 = vst [vmem:[#allocation112_spill] sm:$0xff] %v11111_v28  ;;  %v3203_v29 = vsel %vm3139_vm9, %v10833_v24, 256  ;;  %v3204_v58 = vsel %vm3140_vm10, %v10836_v12, 256 }
 0x56d   : > { %v11121_v36 = vcvt.s32.f32 %v3576_v15  ;;  %vm3589_vm11 = vcmp.lt.s32.totalorder %v3203_v29, %v3204_v58 }
 0x56e   : > { %v11123_v19 = vpop.xlane.xlu0 %3067  ;;  %v11125_v2 = vsel %vm3589_vm11, %v3203_v29, %v3204_v58 }
 0x56f   : > { %15969 = vst [vmem:[#allocation113_spill] sm:$0xff] %v11121_v36  ;;  %15970 = vst [vmem:[#allocation115_spill] sm:$0xff] %v11123_v19  ;;  %vm3141_vm12 = vcmp.ge.f32.partialorder %v10785_v37, %v11123_v19  ;;  %vm3142_vm13 = vcmp.ge.f32.partialorder %v10787_v62, %v11123_v19  ;;  %3579 = vmin.xlane.f32.xlu0 %v11121_v36  ;;  %v3592_v18 = vshra.s32 %v11125_v2, 16 }
 0x570   : > { %15971 = vst [vmem:[#allocation116_spill] sm:$0xff] %v11125_v2  ;;  %v3205_v45 = vsel %vm3141_vm12, %v10833_v24, 256  ;;  %v3206_v15 = vsel %vm3142_vm13, %v10836_v12, 256 }
 0x571   : > { %v11135_v11 = vcvt.s32.f32 %v3592_v18  ;;  %vm3605_vm14 = vcmp.lt.s32.totalorder %v3205_v45, %v3206_v15 }
 0x572   : > { %v11137_v6 = vpop.xlane.xlu0 %3070  ;;  %v11139_v29 = vsel %vm3605_vm14, %v3205_v45, %v3206_v15  ;;  %v15978_v15 = vld [vmem:[#allocation28_spill] sm:$0xff] }
 0x573   : > { %15972 = vst [vmem:[#allocation117_spill] sm:$0xff] %v11135_v11  ;;  %15973 = vst [vmem:[#allocation118_spill] sm:$0xff] %v11137_v6  ;;  %vm3143_vm15 = vcmp.ge.f32.partialorder %v10791_v30, %v11137_v6  ;;  %vm3144_vm0 = vcmp.ge.f32.partialorder %v10793_v21, %v11137_v6  ;;  %3595 = vmin.xlane.f32.xlu0 %v11135_v11  ;;  %v3608_v58 = vshra.s32 %v11139_v29, 16  ;;  %v400_v11 = vld [vmem:[#allocation7 + $0x20] sm:$0xff] }
 0x574   : > { %15974 = vst [vmem:[#allocation119_spill] sm:$0xff] %v11139_v29  ;;  %v3207_v19 = vsel %vm3143_vm15, %v10833_v24, 256  ;;  %v3208_v18 = vsel %vm3144_vm0, %v10836_v12, 256  ;;  %v401_v29 = vld [vmem:[#allocation7 + $0x28] sm:$0xff]  ;;  %v3938_v36 = vand.u32 4294901760, %v400_v11 }
 0x575   : > { %v11149_v62 = vcvt.s32.f32 %v3608_v58  ;;  %vm3621_vm1 = vcmp.lt.s32.totalorder %v3207_v19, %v3208_v18  ;;  %v3941_v2 = vand.u32 4294901760, %v401_v29 }
 0x576   : > { %v11151_v37 = vpop.xlane.xlu0 %3073  ;;  %v11153_v45 = vsel %vm3621_vm1, %v3207_v19, %v3208_v18  ;;  %v15982_v18 = vld [vmem:[#allocation31_spill] sm:$0xff] }
 0x577   : > { %15975 = vst [vmem:[#allocation120_spill] sm:$0xff] %v11149_v62  ;;  %15976 = vst [vmem:[#allocation121_spill] sm:$0xff] %v11151_v37  ;;  %vm3145_vm2 = vcmp.ge.f32.partialorder %v10797_v49, %v11151_v37  ;;  %vm3146_vm3 = vcmp.ge.f32.partialorder %v15978_v15, %v11151_v37  ;;  %3611 = vmin.xlane.f32.xlu0 %v11149_v62  ;;  %v3624_v6 = vshra.s32 %v11153_v45, 16  ;;  %v15983_v37 = vld [vmem:[#allocation72_spill] sm:$0xff] }
 0x578   : > { %15977 = vst [vmem:[#allocation122_spill] sm:$0xff] %v11153_v45  ;;  %v3209_v21 = vsel %vm3145_vm2, %v10833_v24, 256  ;;  %v3210_v58 = vsel %vm3146_vm3, %v10836_v12, 256 }
 0x579   : > { %v11163_v30 = vcvt.s32.f32 %v3624_v6  ;;  %vm3637_vm4 = vcmp.lt.s32.totalorder %v3209_v21, %v3210_v58 }
 0x57a   : > { %v11165_v1 = vpop.xlane.xlu0 %3076  ;;  %v11167_v19 = vsel %vm3637_vm4, %v3209_v21, %v3210_v58  ;;  %v15987_v58 = vld [vmem:[#allocation37_spill] sm:$0xff] }
 0x57b   : > { %15979 = vst [vmem:[#allocation123_spill] sm:$0xff] %v11163_v30  ;;  %15980 = vst [vmem:[#allocation124_spill] sm:$0xff] %v11165_v1  ;;  %vm3147_vm5 = vcmp.ge.f32.partialorder %v15982_v18, %v11165_v1  ;;  %vm3148_vm6 = vcmp.ge.f32.partialorder %v15983_v37, %v11165_v1  ;;  %3627 = vmin.xlane.f32.xlu0 %v11163_v30  ;;  %v3640_v15 = vshra.s32 %v11167_v19, 16  ;;  %v15988_v1 = vld [vmem:[#allocation38_spill] sm:$0xff] }
 0x57c   : > { %15981 = vst [vmem:[#allocation125_spill] sm:$0xff] %v11167_v19  ;;  %v3211_v49 = vsel %vm3147_vm5, %v10833_v24, 256  ;;  %v3212_v6 = vsel %vm3148_vm6, %v10836_v12, 256 }
 0x57d   : > { %v11177_v62 = vcvt.s32.f32 %v3640_v15  ;;  %vm3653_vm7 = vcmp.lt.s32.totalorder %v3211_v49, %v3212_v6 }
 0x57e   : > { %v11179_v45 = vpop.xlane.xlu0 %3079  ;;  %v11181_v21 = vsel %vm3653_vm7, %v3211_v49, %v3212_v6  ;;  %v15992_v6 = vld [vmem:[#allocation44_spill] sm:$0xff] }
 0x57f   : > { %15984 = vst [vmem:[#allocation126_spill] sm:$0xff] %v11177_v62  ;;  %15985 = vst [vmem:[#allocation127_spill] sm:$0xff] %v11179_v45  ;;  %vm3149_vm8 = vcmp.ge.f32.partialorder %v15987_v58, %v11179_v45  ;;  %vm3150_vm9 = vcmp.ge.f32.partialorder %v15988_v1, %v11179_v45  ;;  %3643 = vmin.xlane.f32.xlu0 %v11177_v62  ;;  %v3656_v37 = vshra.s32 %v11181_v21, 16 }
 0x580   : > { %15986 = vst [vmem:[#allocation128_spill] sm:$0xff] %v11181_v21  ;;  %v3213_v18 = vsel %vm3149_vm8, %v10833_v24, 256  ;;  %v3214_v15 = vsel %vm3150_vm9, %v10836_v12, 256 }
 0x581   : > { %v11191_v30 = vcvt.s32.f32 %v3656_v37  ;;  %vm3669_vm10 = vcmp.lt.s32.totalorder %v3213_v18, %v3214_v15 }
 0x582   : > { %v11193_v19 = vpop.xlane.xlu0 %3082  ;;  %v11195_v49 = vsel %vm3669_vm10, %v3213_v18, %v3214_v15  ;;  %v15996_v15 = vld [vmem:[#allocation46_spill] sm:$0xff] }
 0x583   : > { %15989 = vst [vmem:[#allocation129_spill] sm:$0xff] %v11191_v30  ;;  %15990 = vst [vmem:[#allocation130_spill] sm:$0xff] %v11193_v19  ;;  %vm3151_vm11 = vcmp.ge.f32.partialorder %v10815_v7, %v11193_v19  ;;  %vm3152_vm12 = vcmp.ge.f32.partialorder %v15992_v6, %v11193_v19  ;;  %3659 = vmin.xlane.f32.xlu0 %v11191_v30  ;;  %v3672_v45 = vshra.s32 %v11195_v49, 16  ;;  %v15997_v19 = vld [vmem:[#allocation78_spill] sm:$0xff] }
 0x584   : > { %15991 = vst [vmem:[#allocation131_spill] sm:$0xff] %v11195_v49  ;;  %v3215_v1 = vsel %vm3151_vm11, %v10833_v24, 256  ;;  %v3216_v37 = vsel %vm3152_vm12, %v10836_v12, 256 }
 0x585   : > { %v11205_v58 = vcvt.s32.f32 %v3672_v45  ;;  %vm3685_vm13 = vcmp.lt.s32.totalorder %v3215_v1, %v3216_v37 }
 0x586   : > { %v11207_v62 = vpop.xlane.xlu0 %3085  ;;  %v11209_v18 = vsel %vm3685_vm13, %v3215_v1, %v3216_v37  ;;  %v16001_v37 = vld [vmem:[#allocation53_spill] sm:$0xff] }
 0x587   : > { %15993 = vst [vmem:[#allocation132_spill] sm:$0xff] %v11205_v58  ;;  %15994 = vst [vmem:[#allocation133_spill] sm:$0xff] %v11207_v62  ;;  %vm3153_vm14 = vcmp.ge.f32.partialorder %v15996_v15, %v11207_v62  ;;  %vm3154_vm15 = vcmp.ge.f32.partialorder %v15997_v19, %v11207_v62  ;;  %3675 = vmin.xlane.f32.xlu0 %v11205_v58  ;;  %v3688_v6 = vshra.s32 %v11209_v18, 16  ;;  %v16002_v62 = vld [vmem:[#allocation55_spill] sm:$0xff] }
 0x588   : > { %15995 = vst [vmem:[#allocation134_spill] sm:$0xff] %v11209_v18  ;;  %v3217_v7 = vsel %vm3153_vm14, %v10833_v24, 256  ;;  %v3218_v45 = vsel %vm3154_vm15, %v10836_v12, 256 }
 0x589   : > { %v11219_v30 = vcvt.s32.f32 %v3688_v6  ;;  %vm3701_vm0 = vcmp.lt.s32.totalorder %v3217_v7, %v3218_v45 }
 0x58a   : > { %v11221_v49 = vpop.xlane.xlu0 %3088  ;;  %v11223_v1 = vsel %vm3701_vm0, %v3217_v7, %v3218_v45 }
 0x58b   : > { %15998 = vst [vmem:[#allocation135_spill] sm:$0xff] %v11219_v30  ;;  %15999 = vst [vmem:[#allocation136_spill] sm:$0xff] %v11221_v49  ;;  %vm3155_vm1 = vcmp.ge.f32.partialorder %v16001_v37, %v11221_v49  ;;  %vm3156_vm2 = vcmp.ge.f32.partialorder %v16002_v62, %v11221_v49  ;;  %3691 = vmin.xlane.f32.xlu0 %v11219_v30  ;;  %v3704_v19 = vshra.s32 %v11223_v1, 16  ;;  %v396_v49 = vld [vmem:[#allocation7] sm:$0xff]  ;;  %v397_v62 = vld [vmem:[#allocation7 + $0x8] sm:$0xff] }
 0x58c   : > { %16000 = vst [vmem:[#allocation137_spill] sm:$0xff] %v11223_v1  ;;  %v3219_v15 = vsel %vm3155_vm1, %v10833_v24, 256  ;;  %v3220_v6 = vsel %vm3156_vm2, %v10836_v12, 256  ;;  %v3926_v37 = vand.u32 4294901760, %v396_v49  ;;  %v3929_v30 = vand.u32 4294901760, %v397_v62 }
 0x58d   : > { %v11233_v58 = vcvt.s32.f32 %v3704_v19  ;;  %vm3717_vm3 = vcmp.lt.s32.totalorder %v3219_v15, %v3220_v6  ;;  %v14956_v1 = vmov 0.0|0.0  }
 0x58e   : > { %v11235_v18 = vsel %vm3717_vm3, %v3219_v15, %v3220_v6  ;;  %8005 = vmatprep.subr.bf16.mxu1 %v14956_v1  ;;  %v11243_v19 = vpack.c.bf16 %v3929_v30, %v3926_v37  ;;  %7717 = vmatprep.subr.bf16.mxu0 %v14956_v1  ;;  %v398_v15 = vld [vmem:[#allocation7 + $0x10] sm:$0xff]  ;;  %v399_v6 = vld [vmem:[#allocation7 + $0x18] sm:$0xff]  ;;  %v11250_v21 = vsub.f32 %v397_v62, %v3929_v30 }
 0x58f   : > { %16003 = vst [vmem:[#allocation138_spill] sm:$0xff] %v11233_v58  ;;  %16004 = vst [vmem:[#allocation139_spill] sm:$0xff] %v11235_v18  ;;  %3707 = vmin.xlane.f32.xlu0 %v11233_v58  ;;  %v3720_v7 = vshra.s32 %v11235_v18, 16  ;;  %v3932_v58 = vand.u32 4294901760, %v398_v15  ;;  %v11248_v18 = vsub.f32 %v396_v49, %v3926_v37  ;;  %v11264_v62 = vpack.c.bf16 %v3941_v2, %v3938_v36  ;;  %v402_v30 = vld [vmem:[#allocation7 + $0x30] sm:$0xff]  ;;  %v403_v37 = vld [vmem:[#allocation7 + $0x38] sm:$0xff] }
 0x590   : > { %16006 = vst [vmem:[#allocation141_spill] sm:$0xff] %v11243_v19  ;;  %8021 = vmatpush1.bf16.msra.mxu1 %v11243_v19  ;;  %7719 = vmatpush1.bf16.msra.mxu0 %v11243_v19  ;;  %16008 = vst [vmem:[#allocation143_spill] sm:$0xff] %v11250_v21  ;;  %v3944_v19 = vand.u32 4294901760, %v402_v30  ;;  %v3947_v21 = vand.u32 4294901760, %v403_v37 }
 0x591   : > { %v11239_v45 = vcvt.s32.f32 %v3720_v7  ;;  %v3935_v7 = vand.u32 4294901760, %v399_v6  ;;  %16007 = vst [vmem:[#allocation142_spill] sm:$0xff] %v11248_v18  ;;  %8006 = vmatprep.subr.bf16.mxu1 %v14956_v1  ;;  %7720 = vmatprep.subr.bf16.mxu0 %v14956_v1  ;;  %v11258_v43 = vsub.f32 %v398_v15, %v3932_v58  ;;  %16012 = vst [vmem:[#allocation147_spill] sm:$0xff] %v11264_v62 }
 0x592   : > { %v11268_v18 = vsub.f32 %v400_v11, %v3938_v36  ;;  %v11274_v15 = vpack.c.bf16 %v3947_v21, %v3944_v19  ;;  %v11280_v36 = vsub.f32 %v403_v37, %v3947_v21  ;;  %v406_v11 = vld [vmem:[#allocation7 + $0x50] sm:$0xff]  ;;  %v3965_v37 = vand.u32 4294901760, %v409_v9 }
 0x593   : > { %16005 = vst [vmem:[#allocation140_spill] sm:$0xff] %v11239_v45  ;;  %3723 = vmin.xlane.f32.xlu0 %v11239_v45  ;;  %v11254_v45 = vpack.c.bf16 %v3935_v7, %v3932_v58  ;;  %16010 = vst [vmem:[#allocation145_spill] sm:$0xff] %v11258_v43  ;;  %v11260_v49 = vsub.f32 %v399_v6, %v3935_v7  ;;  %v11270_v58 = vsub.f32 %v401_v29, %v3941_v2  ;;  %v404_v6 = vld [vmem:[#allocation7 + $0x40] sm:$0xff]  ;;  %v405_v7 = vld [vmem:[#allocation7 + $0x48] sm:$0xff] }
 0x594   : > { %16013 = vst [vmem:[#allocation148_spill] sm:$0xff] %v11268_v18  ;;  %16015 = vst [vmem:[#allocation150_spill] sm:$0xff] %v11274_v15  ;;  %v11278_v43 = vsub.f32 %v402_v30, %v3944_v19  ;;  %v407_v2 = vld [vmem:[#allocation7 + $0x58] sm:$0xff]  ;;  %v408_v29 = vld [vmem:[#allocation7 + $0x60] sm:$0xff]  ;;  %v3956_v28 = vand.u32 4294901760, %v406_v11  ;;  %v11301_v57 = vsub.f32 %v409_v9, %v3965_v37  ;;  %v3983_v9 = vand.u32 4294901760, %v415_v61 }
 0x595   : > { %16009 = vst [vmem:[#allocation144_spill] sm:$0xff] %v11254_v45  ;;  %8022 = vmatpush1.bf16.msra.mxu1 %v11254_v45  ;;  %7722 = vmatpush1.bf16.msra.mxu0 %v11254_v45  ;;  %16011 = vst [vmem:[#allocation146_spill] sm:$0xff] %v11260_v49  ;;  %v3950_v45 = vand.u32 4294901760, %v404_v6  ;;  %v3953_v49 = vand.u32 4294901760, %v405_v7  ;;  %v411_v19 = vld [vmem:[#allocation7 + $0x78] sm:$0xff]  ;;  %v3959_v30 = vand.u32 4294901760, %v407_v2 }
 0x596   : > { %8007 = vmatprep.subr.bf16.mxu1 %v14956_v1  ;;  %7723 = vmatprep.subr.bf16.mxu0 %v14956_v1  ;;  %16014 = vst [vmem:[#allocation149_spill] sm:$0xff] %v11270_v58  ;;  %16016 = vst [vmem:[#allocation151_spill] sm:$0xff] %v11278_v43  ;;  %v3962_v21 = vand.u32 4294901760, %v408_v29  ;;  %v413_v43 = vld [vmem:[#allocation7 + $0x88] sm:$0xff]  ;;  %v11291_v54 = vsub.f32 %v406_v11, %v3956_v28  ;;  %v3971_v10 = vand.u32 4294901760, %v411_v19 }
 0x597   : > { %16017 = vst [vmem:[#allocation152_spill] sm:$0xff] %v11280_v36  ;;  %v11286_v58 = vsub.f32 %v404_v6, %v3950_v45  ;;  %v11288_v18 = vsub.f32 %v405_v7, %v3953_v49  ;;  %v412_v36 = vld [vmem:[#allocation7 + $0x80] sm:$0xff]  ;;  %v11295_v6 = vpack.c.bf16 %v3959_v30, %v3956_v28  ;;  %v11297_v7 = vsub.f32 %v407_v2, %v3959_v30 }
 0x598   : > { %16021 = vst [vmem:[#allocation156_spill] sm:$0xff] %v11291_v54  ;;  %v3974_v40 = vand.u32 4294901760, %v412_v36  ;;  %16026 = vst [vmem:[#allocation160_spill] sm:$0xff] %v11301_v57  ;;  %v11305_v54 = vsub.f32 %v411_v19, %v3971_v10  ;;  %v11313_v30 = vpack.c.bf16 %v3965_v37, %v3962_v21  ;;  %v3986_v57 = vand.u32 4294901760, %v416_v14 }
 0x599   : > { %8023 = vmatpush1.bf16.msra.mxu1 %v11264_v62  ;;  %7725 = vmatpush1.bf16.msra.mxu0 %v11264_v62  ;;  %v11284_v62 = vpack.c.bf16 %v3953_v49, %v3950_v45  ;;  %16019 = vst [vmem:[#allocation154_spill] sm:$0xff] %v11286_v58  ;;  %16020 = vst [vmem:[#allocation155_spill] sm:$0xff] %v11288_v18  ;;  %v414_v45 = vld [vmem:[#allocation7 + $0x90] sm:$0xff]  ;;  %v16022_v49 = vmov 0.0|0.0   ;;  %v11299_v18 = vsub.f32 %v408_v29, %v3962_v21  ;;  %v3977_v58 = vand.u32 4294901760, %v413_v43 }
 0x59a   : > { %8008 = vmatprep.subr.bf16.mxu1 %v14956_v1  ;;  %7726 = vmatprep.subr.bf16.mxu0 %v14956_v1  ;;  %16023 = vst [vmem:[#allocation157_spill] sm:$0xff] %v11295_v6  ;;  %16024 = vst [vmem:[#allocation158_spill] sm:$0xff] %v11297_v7  ;;  %v11308_v28 = vsub.f32 %v412_v36, %v3974_v40  ;;  %v3980_v29 = vand.u32 4294901760, %v414_v45  ;;  %v3989_v19 = vand.u32 4294901760, %v417_v13 }
 0x59b   : > { %16018 = vst [vmem:[#allocation153_spill] sm:$0xff] %v11284_v62  ;;  %16025 = vst [vmem:[#allocation159_spill] sm:$0xff] %v11299_v18  ;;  %v11310_v2 = vsub.f32 %v413_v43, %v3977_v58  ;;  %v11320_v43 = vsub.f32 %v415_v61, %v3983_v9  ;;  %v11322_v36 = vsub.f32 %v416_v14, %v3986_v57  ;;  %v3287_v61 = vand.u32 65535, %v10848_v3 }
 0x59c   : > { %16028 = vst [vmem:[#allocation162_spill] sm:$0xff] %v11305_v54  ;;  %16029 = vst [vmem:[#allocation163_spill] sm:$0xff] %v11308_v28  ;;  %v3992_v54 = vand.u32 4294901760, %v418_v27  ;;  %v11349_v3 = vpack.c.bf16 %v3983_v9, %v3980_v29 }
 0x59d   : > { %8024 = vmatpush1.bf16.msra.mxu1 %v11274_v15  ;;  %7728 = vmatpush1.bf16.msra.mxu0 %v11274_v15  ;;  %v410_v15 = vld [vmem:[#allocation7 + $0x70] sm:$0xff]  ;;  %16030 = vst [vmem:[#allocation164_spill] sm:$0xff] %v11310_v2  ;;  %16031 = vst [vmem:[#allocation165_spill] sm:$0xff] %v11313_v30  ;;  %v11324_v2 = vsub.f32 %v417_v13, %v3989_v19  ;;  %v11338_v13 = vpack.c.bf16 %v3977_v58, %v3974_v40  ;;  %v3289_v14 = vcvt.s32.f32 %v3287_v61  ;;  %v421_v61 = vld [vmem:[#allocation7 + $0xc8] sm:$0xff] }
 0x59e   : > { %8009 = vmatprep.subr.bf16.mxu1 %v14956_v1  ;;  %7729 = vmatprep.subr.bf16.mxu0 %v14956_v1  ;;  %v3968_v1 = vand.u32 4294901760, %v410_v15  ;;  %16033 = vst [vmem:[#allocation167_spill] sm:$0xff] %v11320_v43  ;;  %16034 = vst [vmem:[#allocation168_spill] sm:$0xff] %v11322_v36  ;;  %v11326_v21 = vsub.f32 %v418_v27, %v3992_v54  ;;  %v3319_v58 = vand.u32 65535, %v10875_v44  ;;  %v3335_v44 = vand.u32 65535, %v10889_v22 }
 0x59f   : > { %16035 = vst [vmem:[#allocation169_spill] sm:$0xff] %v11324_v2  ;;  %16039 = vst [vmem:[#allocation173_spill] sm:$0xff] %v11338_v13  ;;  %v3351_v22 = vand.u32 65535, %v10903_v50 }
 0x5a0   : > { %v11303_v11 = vsub.f32 %v410_v15, %v3968_v1  ;;  %v11317_v15 = vsub.f32 %v414_v45, %v3980_v29  ;;  %16036 = vst [vmem:[#allocation170_spill] sm:$0xff] %v11326_v21  ;;  %16040 = vst [vmem:[#allocation174_spill] sm:$0xff] %v11349_v3  ;;  %v3321_v29 = vcvt.s32.f32 %v3319_v58  ;;  %v423_v58 = vld [vmem:[#allocation7 + $0xd8] sm:$0xff] }
 0x5a1   : > { %8025 = vmatpush1.bf16.msra.mxu1 %v11284_v62  ;;  %7731 = vmatpush1.bf16.msra.mxu0 %v11284_v62  ;;  %v419_v62 = vld [vmem:[#allocation7 + $0xb8] sm:$0xff]  ;;  %v3353_v50 = vcvt.s32.f32 %v3351_v22 }
 0x5a2   : > { %8010 = vmatprep.subr.bf16.mxu1 %v16022_v49  ;;  %16027 = vst [vmem:[#allocation161_spill] sm:$0xff] %v11303_v11  ;;  %7732 = vmatprep.subr.bf16.mxu0 %v16022_v49  ;;  %16032 = vst [vmem:[#allocation166_spill] sm:$0xff] %v11317_v15  ;;  %v3995_v11 = vand.u32 4294901760, %v419_v62 }
 0x5a4   : > { %v11328_v37 = vsub.f32 %v419_v62, %v3995_v11 }
 0x5a5   : > { %8026 = vmatpush1.bf16.msra.mxu1 %v11295_v6  ;;  %7734 = vmatpush1.bf16.msra.mxu0 %v11295_v6  ;;  %v11331_v6 = vpack.c.bf16 %v3971_v10, %v3968_v1  ;;  %v3303_v10 = vand.u32 65535, %v10861_v39 }
 0x5a6   : > { %8011 = vmatprep.subr.bf16.mxu1 %v16022_v49  ;;  %7735 = vmatprep.subr.bf16.mxu0 %v16022_v49  ;;  %16037 = vst [vmem:[#allocation171_spill] sm:$0xff] %v11328_v37 }
 0x5a7   : > { %16038 = vst [vmem:[#allocation172_spill] sm:$0xff] %v11331_v6  ;;  %v3305_v62 = vcvt.s32.f32 %v3303_v10 }
 0x5a9   : > { %8027 = vmatpush1.bf16.msra.mxu1 %v11313_v30  ;;  %7737 = vmatpush1.bf16.msra.mxu0 %v11313_v30 }
 0x5aa   : > { %8012 = vmatprep.subr.bf16.mxu1 %v16022_v49  ;;  %7738 = vmatprep.subr.bf16.mxu0 %v16022_v49 }
 0x5ad   : > { %8028 = vmatpush1.bf16.msra.mxu1 %v11331_v6  ;;  %7740 = vmatpush1.bf16.msra.mxu0 %v11331_v6 }
 0x5ae   : > { %8013 = vmatprep.subr.bf16.mxu1 %v16022_v49  ;;  %7741 = vmatprep.subr.bf16.mxu0 %v16022_v49 }
 0x5b1   : > { %8029 = vmatpush1.bf16.msra.mxu1 %v11338_v13  ;;  %7743 = vmatpush1.bf16.msra.mxu0 %v11338_v13 }
 0x5b2   : > { %8014 = vmatprep.subr.bf16.mxu1 %v16022_v49  ;;  %7744 = vmatprep.subr.bf16.mxu0 %v16022_v49 }
 0x5b4   : > { %v11343_v27 = vpop.xlane.xlu1 %3291 }
 0x5b5   : > { %vm3293_vm4 = vcmp.eq.f32.partialorder %v10857_v42, %v11343_v27  ;;  %8030 = vmatpush1.bf16.msra.mxu1 %v11349_v3  ;;  %v11360_v42 = vpack.c.bf16 %v3989_v19, %v3986_v57  ;;  %7746 = vmatpush1.bf16.msra.mxu0 %v11349_v3  ;;  %v11371_v57 = vpack.c.bf16 %v3995_v11, %v3992_v54  ;;  %v3337_v19 = vcvt.s32.f32 %v3335_v44 }
 0x5b6   : > { %v3294_v1 = vsel %vm3293_vm4, %v3289_v14, inf  ;;  %8015 = vmatprep.subr.bf16.mxu1 %v16022_v49  ;;  %7747 = vmatprep.subr.bf16.mxu0 %v16022_v49  ;;  %v4001_v11 = vand.u32 4294901760, %v421_v61  ;;  %v4007_v44 = vand.u32 4294901760, %v423_v58 }
 0x5b7   : > { %3295 = vmin.xlane.f32.xlu1 %v3294_v1  ;;  %16041 = vst [vmem:[#allocation175_spill] sm:$0xff] %v11360_v42  ;;  %16042 = vst [vmem:[#allocation176_spill] sm:$0xff] %v11371_v57  ;;  %v3367_v1 = vand.u32 65535, %v10917_v32 }
 0x5b8   : > { %v11353_v40 = vpop.xlane.xlu1 %3307 }
 0x5b9   : > { %vm3309_vm5 = vcmp.eq.f32.partialorder %v10871_v33, %v11353_v40  ;;  %8031 = vmatpush1.bf16.msra.mxu1 %v11360_v42  ;;  %7749 = vmatpush1.bf16.msra.mxu0 %v11360_v42 }
 0x5ba   : > { %v3310_v39 = vsel %vm3309_vm5, %v3305_v62, inf  ;;  %8016 = vmatprep.subr.bf16.mxu1 %v16022_v49  ;;  %7750 = vmatprep.subr.bf16.mxu0 %v16022_v49 }
 0x5bb   : > { %3311 = vmin.xlane.f32.xlu1 %v3310_v39 }
 0x5bc   : > { %v11364_v45 = vpop.xlane.xlu1 %3323 }
 0x5bd   : > { %vm3325_vm6 = vcmp.eq.f32.partialorder %v10885_v0, %v11364_v45  ;;  %v420_v0 = vld [vmem:[#allocation7 + $0xc0] sm:$0xff]  ;;  %8032 = vmatpush1.bf16.msra.mxu1 %v11371_v57  ;;  %7752 = vmatpush1.bf16.msra.mxu0 %v11371_v57 }
 0x5be   : > { %v3326_v33 = vsel %vm3325_vm6, %v3321_v29, inf  ;;  %v3998_v54 = vand.u32 4294901760, %v420_v0  ;;  %8017 = vmatprep.subr.bf16.mxu1 %v16022_v49  ;;  %7753 = vmatprep.subr.bf16.mxu0 %v16022_v49 }
 0x5bf   : > { %3327 = vmin.xlane.f32.xlu1 %v3326_v33  ;;  %v3369_v33 = vcvt.s32.f32 %v3367_v1 }
 0x5c0   : > { %v11375_v9 = vpop.xlane.xlu1 %3339  ;;  %v11387_v62 = vpack.c.bf16 %v4001_v11, %v3998_v54 }
 0x5c1   : > { %vm3341_vm7 = vcmp.eq.f32.partialorder %v10899_v26, %v11375_v9  ;;  %v422_v26 = vld [vmem:[#allocation7 + $0xd0] sm:$0xff] }
 0x5c2   : > { %v3342_v14 = vsel %vm3341_vm7, %v3337_v19, inf  ;;  %16043 = vst [vmem:[#allocation177_spill] sm:$0xff] %v11387_v62  ;;  %8033 = vmatpush1.bf16.msra.mxu1 %v11387_v62  ;;  %v4004_v29 = vand.u32 4294901760, %v422_v26  ;;  %7755 = vmatpush1.bf16.msra.mxu0 %v11387_v62  ;;  %v3383_v19 = vand.u32 65535, %v10931_v34 }
 0x5c3   : > { %3343 = vmin.xlane.f32.xlu1 %v3342_v14  ;;  %8018 = vmatprep.subr.bf16.mxu1 %v16022_v49  ;;  %v11405_v14 = vsub.f32 %v421_v61, %v4001_v11  ;;  %v426_v11 = vld [vmem:[#allocation7 + $0xf0] sm:$0xff] }
 0x5c4   : > { %v11384_v10 = vpop.xlane.xlu1 %3355  ;;  %v11398_v22 = vpack.c.bf16 %v4007_v44, %v4004_v29  ;;  %7756 = vmatprep.subr.bf16.mxu0 %v16022_v49  ;;  %v3385_v42 = vcvt.s32.f32 %v3383_v19  ;;  %v11418_v61 = vsub.f32 %v422_v26, %v4004_v29 }
 0x5c5   : > { %vm3357_vm8 = vcmp.eq.f32.partialorder %v10913_v17, %v11384_v10  ;;  %v11403_v17 = vsub.f32 %v420_v0, %v3998_v54  ;;  %16046 = vst [vmem:[#allocation180_spill] sm:$0xff] %v11405_v14  ;;  %v11420_v54 = vsub.f32 %v423_v58, %v4007_v44  ;;  %v16096_v14 = vld [vmem:[#allocation148_spill] sm:$0xff] }
 0x5c6   : > { %v3358_v39 = vsel %vm3357_vm8, %v3353_v50, inf  ;;  %16044 = vst [vmem:[#allocation178_spill] sm:$0xff] %v11398_v22  ;;  %v424_v50 = vld [vmem:[#allocation7 + $0xe0] sm:$0xff]  ;;  %8034 = vmatpush1.bf16.msra.mxu1 %v11398_v22  ;;  %7758 = vmatpush1.bf16.msra.mxu0 %v11398_v22  ;;  %16048 = vst [vmem:[#allocation182_spill] sm:$0xff] %v11418_v61  ;;  %v4016_v22 = vand.u32 4294901760, %v426_v11 }
 0x5c7   : > { %3359 = vmin.xlane.f32.xlu1 %v3358_v39  ;;  %16045 = vst [vmem:[#allocation179_spill] sm:$0xff] %v11403_v17  ;;  %v425_v39 = vld [vmem:[#allocation7 + $0xe8] sm:$0xff]  ;;  %v4010_v57 = vand.u32 4294901760, %v424_v50  ;;  %8019 = vmatprep.subr.bf16.mxu1 %v16022_v49  ;;  %16049 = vst [vmem:[#allocation183_spill] sm:$0xff] %v11420_v54  ;;  %v16094_v54 = vld [vmem:[#allocation145_spill] sm:$0xff] }
 0x5c8   : > { %v11395_v32 = vpop.xlane.xlu1 %3371  ;;  %v4013_v1 = vand.u32 4294901760, %v425_v39  ;;  %7759 = vmatprep.subr.bf16.mxu0 %v16022_v49  ;;  %v16097_v17 = vld [vmem:[#allocation149_spill] sm:$0xff] }
 0x5c9   : > { %vm3373_vm9 = vcmp.eq.f32.partialorder %v10927_v41, %v11395_v32  ;;  %v3399_v41 = vand.u32 65535, %v10945_v35  ;;  %v3415_v35 = vand.u32 65535, %v10959_v63  ;;  %v3431_v63 = vand.u32 65535, %v10973_v46 }
 0x5ca   : > { %v3374_v62 = vsel %vm3373_vm9, %v3369_v33, inf  ;;  %v11413_v0 = vpack.c.bf16 %v4013_v1, %v4010_v57  ;;  %v11435_v58 = vsub.f32 %v425_v39, %v4013_v1  ;;  %v3447_v39 = vand.u32 65535, %v10987_v51 }
 0x5cb   : > { %3375 = vmin.xlane.f32.xlu1 %v3374_v62  ;;  %v427_v62 = vld [vmem:[#allocation7 + $0xf8] sm:$0xff] }
 0x5cc   : > { %v11410_v34 = vpop.xlane.xlu1 %3387  ;;  %16047 = vst [vmem:[#allocation181_spill] sm:$0xff] %v11413_v0  ;;  %8035 = vmatpush1.bf16.msra.mxu1 %v11413_v0  ;;  %v4019_v19 = vand.u32 4294901760, %v427_v62  ;;  %7761 = vmatpush1.bf16.msra.mxu0 %v11413_v0  ;;  %16052 = vst [vmem:[#allocation186_spill] sm:$0xff] %v11435_v58  ;;  %v16085_v58 = vld [vmem:[#allocation135_spill] sm:$0xff] }
 0x5cd   : > { %vm3389_vm10 = vcmp.eq.f32.partialorder %v10941_v56, %v11410_v34  ;;  %8020 = vmatprep.subr.bf16.mxu1 %v16022_v49  ;;  %v3401_v56 = vcvt.s32.f32 %v3399_v41  ;;  %7762 = vmatprep.subr.bf16.mxu0 %v16022_v49  ;;  %v3417_v41 = vcvt.s32.f32 %v3415_v35  ;;  %v3463_v35 = vand.u32 65535, %v11001_v4 }
 0x5ce   : > { %v3390_v33 = vsel %vm3389_vm10, %v3385_v42, inf  ;;  %v11428_v26 = vpack.c.bf16 %v4019_v19, %v4016_v22  ;;  %v11433_v42 = vsub.f32 %v424_v50, %v4010_v57  ;;  %v11447_v57 = vsub.f32 %v427_v62, %v4019_v19 }
 0x5cf   : > { %3391 = vmin.xlane.f32.xlu1 %v3390_v33  ;;  %v3433_v33 = vcvt.s32.f32 %v3431_v63  ;;  %v3479_v4 = vand.u32 65535, %v11018_v60 }
 0x5d0   : > { %v11426_v3 = vpop.xlane.xlu1 %3403  ;;  %16050 = vst [vmem:[#allocation184_spill] sm:$0xff] %v11428_v26  ;;  %16051 = vst [vmem:[#allocation185_spill] sm:$0xff] %v11433_v42  ;;  %8036 = vmatpush1.bf16.msra.mxu1 %v11428_v26  ;;  %7764 = vmatpush1.bf16.msra.mxu0 %v11428_v26  ;;  %v16087_v42 = vld [vmem:[#allocation138_spill] sm:$0xff] }
 0x5d1   : > { %vm3405_vm11 = vcmp.eq.f32.partialorder %v10955_v20, %v11426_v3  ;;  %7765 = vmatprep.subr.bf16.mxu1 %v16022_v49  ;;  %v11445_v20 = vsub.f32 %v426_v11, %v4016_v22  ;;  %16054 = vst [vmem:[#allocation188_spill] sm:$0xff] %v11447_v57  ;;  %v3449_v22 = vcvt.s32.f32 %v3447_v39  ;;  %v3495_v39 = vand.u32 65535, %v11035_v47  ;;  %v16081_v57 = vld [vmem:[#allocation129_spill] sm:$0xff] }
 0x5d2   : > { %v3406_v29 = vsel %vm3405_vm11, %v3401_v56, inf }
 0x5d3   : > { %3407 = vmin.xlane.f32.xlu1 %v3406_v29  ;;  %16053 = vst [vmem:[#allocation187_spill] sm:$0xff] %v11445_v20  ;;  %v3465_v29 = vcvt.s32.f32 %v3463_v35  ;;  %v16083_v20 = vld [vmem:[#allocation132_spill] sm:$0xff] }
 0x5d4   : > { %v11441_v44 = vpop.xlane.xlu0 %3419 }
 0x5d5   : > { %vm3421_vm12 = vcmp.eq.f32.partialorder %v10969_v48, %v11441_v44 }
 0x5d6   : > { %v3422_v50 = vsel %vm3421_vm12, %v3417_v41, inf }
 0x5d7   : > { %3423 = vmin.xlane.f32.xlu1 %v3422_v50 }
 0x5d8   : > { %v11450_v1 = vpop.xlane.xlu1 %3435 }
 0x5d9   : > { %vm3437_vm13 = vcmp.eq.f32.partialorder %v10983_v38, %v11450_v1 }
 0x5da   : > { %v3438_v46 = vsel %vm3437_vm13, %v3433_v33, inf }
 0x5db   : > { %3439 = vmin.xlane.f32.xlu1 %v3438_v46 }
 0x5dc   : > { %v11455_v56 = vpop.xlane.xlu1 %2995  ;;  %v11457_v48 = vpop.xlane.xlu0 %3451 }
 0x5dd   : > { %16055 = vst [vmem:[#allocation189_spill] sm:$0xff] %v11455_v56  ;;  %vm3093_vm14 = vcmp.ge.f32.partialorder %v10641_v55, %v11455_v56  ;;  %vm3094_vm15 = vcmp.ge.f32.partialorder %v10643_v16, %v11455_v56  ;;  %vm3453_vm0 = vcmp.eq.f32.partialorder %v10997_v25, %v11457_v48  ;;  %v16077_v16 = vld [vmem:[#allocation123_spill] sm:$0xff]  ;;  %v16079_v55 = vld [vmem:[#allocation126_spill] sm:$0xff] }
 0x5de   : > { %v3157_v38 = vsel %vm3093_vm14, %v10833_v24, 256  ;;  %v3158_v51 = vsel %vm3094_vm15, %v10836_v12, 256  ;;  %v3454_v11 = vsel %vm3453_vm0, %v3449_v22, inf  ;;  %v3481_v22 = vcvt.s32.f32 %v3479_v4 }
 0x5df   : > { %3455 = vmin.xlane.f32.xlu0 %v3454_v11  ;;  %vm3221_vm1 = vcmp.lt.s32.totalorder %v3157_v38, %v3158_v51  ;;  %v3511_v4 = vand.u32 65535, %v11052_v31 }
 0x5e0   : > { %v11468_v62 = vpop.xlane.xlu1 %2998  ;;  %v11470_v19 = vpop.xlane.xlu0 %3467  ;;  %v11472_v63 = vsel %vm3221_vm1, %v3157_v38, %v3158_v51 }
 0x5e1   : > { %16056 = vst [vmem:[#allocation190_spill] sm:$0xff] %v11468_v62  ;;  %vm3095_vm2 = vcmp.ge.f32.partialorder %v10647_v53, %v11468_v62  ;;  %vm3096_vm3 = vcmp.ge.f32.partialorder %v10649_v8, %v11468_v62  ;;  %vm3469_vm4 = vcmp.eq.f32.partialorder %v11014_v59, %v11470_v19  ;;  %v3224_v50 = vshra.s32 %v11472_v63, 16  ;;  %v16073_v8 = vld [vmem:[#allocation117_spill] sm:$0xff]  ;;  %v16075_v53 = vld [vmem:[#allocation120_spill] sm:$0xff] }
 0x5e2   : > { %v3159_v25 = vsel %vm3095_vm2, %v10833_v24, 256  ;;  %v3160_v60 = vsel %vm3096_vm3, %v10836_v12, 256  ;;  %v3470_v41 = vsel %vm3469_vm4, %v3465_v29, inf  ;;  %v3513_v6 = vcvt.s32.f32 %v3511_v4  ;;  %v16065_v4 = vld [vmem:[#allocation61_spill] sm:$0xff] }
 0x5e3   : > { %3471 = vmin.xlane.f32.xlu1 %v3470_v41  ;;  %vm3237_vm5 = vcmp.lt.s32.totalorder %v3159_v25, %v3160_v60  ;;  %v11488_v35 = vcvt.s32.f32 %v3224_v50  ;;  %v16059_v50 = vld [vmem:[#allocation49_spill] sm:$0xff] }
 0x5e4   : > { %v11484_v33 = vpop.xlane.xlu1 %3001  ;;  %v11486_v46 = vpop.xlane.xlu0 %3483  ;;  %v11490_v38 = vsel %vm3237_vm5, %v3159_v25, %v3160_v60 }
 0x5e5   : > { %16057 = vst [vmem:[#allocation191_spill] sm:$0xff] %v11484_v33  ;;  %vm3097_vm6 = vcmp.ge.f32.partialorder %v10653_v52, %v11484_v33  ;;  %vm3098_vm7 = vcmp.ge.f32.partialorder %v10655_v5, %v11484_v33  ;;  %vm3485_vm8 = vcmp.eq.f32.partialorder %v11031_v23, %v11486_v46  ;;  %3227 = vmin.xlane.f32.xlu0 %v11488_v35  ;;  %v3240_v11 = vshra.s32 %v11490_v38, 16  ;;  %v16064_v33 = vld [vmem:[#allocation106_spill] sm:$0xff]  ;;  %v16071_v52 = vld [vmem:[#allocation113_spill] sm:$0xff] }
 0x5e6   : > { %v3161_v47 = vsel %vm3097_vm6, %v10833_v24, 256  ;;  %v3162_v59 = vsel %vm3098_vm7, %v10836_v12, 256  ;;  %v3486_v51 = vsel %vm3485_vm8, %v3481_v22, inf  ;;  %v3497_v23 = vcvt.s32.f32 %v3495_v39  ;;  %v16060_v22 = vld [vmem:[#allocation51_spill] sm:$0xff] }
 0x5e7   : > { %3487 = vmin.xlane.f32.xlu1 %v3486_v51  ;;  %vm3253_vm9 = vcmp.lt.s32.totalorder %v3161_v47, %v3162_v59  ;;  %v11507_v60 = vcvt.s32.f32 %v3240_v11  ;;  %v16061_v51 = vld [vmem:[#allocation95_spill] sm:$0xff] }
 0x5e8   : > { %v11503_v29 = vpop.xlane.xlu1 %3004  ;;  %v11505_v25 = vpop.xlane.xlu0 %3499  ;;  %v11509_v41 = vsel %vm3253_vm9, %v3161_v47, %v3162_v59  ;;  %v16062_v47 = vld [vmem:[#allocation102_spill] sm:$0xff] }
 0x5e9   : > { %16058 = vst [vmem:[#allocation192_spill] sm:$0xff] %v11503_v29  ;;  %vm3099_vm10 = vcmp.ge.f32.partialorder %v16059_v50, %v11503_v29  ;;  %vm3100_vm11 = vcmp.ge.f32.partialorder %v16060_v22, %v11503_v29  ;;  %vm3501_vm12 = vcmp.eq.f32.partialorder %v16061_v51, %v11505_v25  ;;  %3243 = vmin.xlane.f32.xlu0 %v11507_v60  ;;  %v3256_v39 = vshra.s32 %v11509_v41, 16  ;;  %v16063_v51 = vld [vmem:[#allocation99_spill] sm:$0xff] }
 0x5ea   : > { %v3163_v31 = vsel %vm3099_vm10, %v10833_v24, 256  ;;  %v3164_v26 = vsel %vm3100_vm11, %v10836_v12, 256  ;;  %v3502_v11 = vsel %vm3501_vm12, %v3497_v23, inf  ;;  %v3527_v59 = vand.u32 65535, %v16062_v47 }
 0x5eb   : > { %3503 = vmin.xlane.f32.xlu1 %v3502_v11  ;;  %vm3269_vm13 = vcmp.lt.s32.totalorder %v3163_v31, %v3164_v26  ;;  %v11524_v13 = vcvt.s32.f32 %v3256_v39  ;;  %v3543_v47 = vand.u32 65535, %v16064_v33  ;;  %v16068_v33 = vld [vmem:[#allocation112_spill] sm:$0xff]  ;;  %vm15075_vm12 = vcmask 7168  }
 0x5ec   : > { %v11522_v0 = vpop.xlane.xlu0 %3515  ;;  %v11526_v29 = vsel %vm3269_vm13, %v3163_v31, %v3164_v26  ;;  %v3529_v39 = vcvt.s32.f32 %v3527_v59  ;;  %v16066_v31 = vld [vmem:[#allocation108_spill] sm:$0xff]  ;;  %v3575_v22 = vand.u32 65535, %v16068_v33 }
 0x5ed   : > { %vm3517_vm14 = vcmp.eq.f32.partialorder %v16063_v51, %v11522_v0  ;;  %v3272_v30 = vshra.s32 %v11526_v29, 16  ;;  %3259 = vmin.xlane.f32.xlu0 %v11524_v13  ;;  %v3559_v51 = vand.u32 65535, %v16066_v31 }
 0x5ee   : > { %v3518_v23 = vsel %vm3517_vm14, %v3513_v6, inf  ;;  %v3545_v6 = vcvt.s32.f32 %v3543_v47  ;;  %v3577_v47 = vcvt.s32.f32 %v3575_v22 }
 0x5ef   : > { %3519 = vmin.xlane.f32.xlu1 %v3518_v23  ;;  %v11532_v11 = vcvt.s32.f32 %v3272_v30  ;;  %v16067_v30 = vld [vmem:[#allocation107_spill] sm:$0xff]  ;;  %v3561_v50 = vcvt.s32.f32 %v3559_v51 }
 0x5f0   : > { %v11535_v62 = vpop.xlane.xlu1 %3531 }
 0x5f1   : > { %vm3533_vm15 = vcmp.eq.f32.partialorder %v16065_v4, %v11535_v62  ;;  %3275 = vmin.xlane.f32.xlu0 %v11532_v11  ;;  %v16069_v4 = vld [vmem:[#allocation68_spill] sm:$0xff] }
 0x5f2   : > { %v3534_v26 = vsel %vm3533_vm15, %v3529_v39, inf }
 0x5f3   : > { %3535 = vmin.xlane.f32.xlu1 %v3534_v26  ;;  %v16070_v26 = vld [vmem:[#allocation116_spill] sm:$0xff] }
 0x5f4   : > { %v11541_v56 = vpop.xlane.xlu0 %3547  ;;  %v3591_v31 = vand.u32 65535, %v16070_v26 }
 0x5f5   : > { %vm3549_vm0 = vcmp.eq.f32.partialorder %v16067_v30, %v11541_v56  ;;  %v16072_v30 = vld [vmem:[#allocation119_spill] sm:$0xff] }
 0x5f6   : > { %v3550_v23 = vsel %vm3549_vm0, %v3545_v6, inf  ;;  %v3593_v51 = vcvt.s32.f32 %v3591_v31 }
 0x5f7   : > { %3551 = vmin.xlane.f32.xlu0 %v3550_v23  ;;  %v3607_v23 = vand.u32 65535, %v16072_v30 }
 0x5f8   : > { %v11546_v59 = vpop.xlane.xlu1 %3563 }
 0x5f9   : > { %vm3565_vm1 = vcmp.eq.f32.partialorder %v16069_v4, %v11546_v59  ;;  %v16074_v4 = vld [vmem:[#allocation122_spill] sm:$0xff]  ;;  %v3609_v22 = vcvt.s32.f32 %v3607_v23 }
 0x5fa   : > { %v3566_v39 = vsel %vm3565_vm1, %v3561_v50, inf }
 0x5fb   : > { %3567 = vmin.xlane.f32.xlu1 %v3566_v39  ;;  %v3623_v39 = vand.u32 65535, %v16074_v4 }
 0x5fc   : > { %v11551_v5 = vpop.xlane.xlu0 %3579 }
 0x5fd   : > { %vm3581_vm2 = vcmp.eq.f32.partialorder %v16071_v52, %v11551_v5  ;;  %v3625_v31 = vcvt.s32.f32 %v3623_v39 }
 0x5fe   : > { %v3582_v6 = vsel %vm3581_vm2, %v3577_v47, inf  ;;  %v16076_v47 = vld [vmem:[#allocation125_spill] sm:$0xff] }
 0x5ff   : > { %3583 = vmin.xlane.f32.xlu0 %v3582_v6  ;;  %v3639_v6 = vand.u32 65535, %v16076_v47 }
 0x600   : > { %v11556_v33 = vpop.xlane.xlu0 %3595 }
 0x601   : > { %vm3597_vm3 = vcmp.eq.f32.partialorder %v16073_v8, %v11556_v33  ;;  %v3641_v23 = vcvt.s32.f32 %v3639_v6 }
 0x602   : > { %v3598_v50 = vsel %vm3597_vm3, %v3593_v51, inf  ;;  %v16078_v51 = vld [vmem:[#allocation128_spill] sm:$0xff] }
 0x603   : > { %3599 = vmin.xlane.f32.xlu1 %v3598_v50  ;;  %v3655_v50 = vand.u32 65535, %v16078_v51 }
 0x604   : > { %v11561_v26 = vpop.xlane.xlu0 %3611 }
 0x605   : > { %vm3613_vm4 = vcmp.eq.f32.partialorder %v16075_v53, %v11561_v26  ;;  %v3657_v39 = vcvt.s32.f32 %v3655_v50 }
 0x606   : > { %v3614_v52 = vsel %vm3613_vm4, %v3609_v22, inf  ;;  %v16080_v22 = vld [vmem:[#allocation131_spill] sm:$0xff] }
 0x607   : > { %3615 = vmin.xlane.f32.xlu0 %v3614_v52  ;;  %v3671_v52 = vand.u32 65535, %v16080_v22  ;;  %v16084_v22 = vld [vmem:[#allocation137_spill] sm:$0xff] }
 0x608   : > { %v11566_v30 = vpop.xlane.xlu0 %3627  ;;  %v3703_v50 = vand.u32 65535, %v16084_v22 }
 0x609   : > { %vm3629_vm5 = vcmp.eq.f32.partialorder %v16077_v16, %v11566_v30  ;;  %v3673_v6 = vcvt.s32.f32 %v3671_v52 }
 0x60a   : > { %v3630_v8 = vsel %vm3629_vm5, %v3625_v31, inf  ;;  %v16082_v31 = vld [vmem:[#allocation134_spill] sm:$0xff] }
 0x60b   : > { %3631 = vmin.xlane.f32.xlu1 %v3630_v8  ;;  %v3687_v8 = vand.u32 65535, %v16082_v31  ;;  %v16086_v31 = vld [vmem:[#allocation139_spill] sm:$0xff] }
 0x60c   : > { %v11571_v4 = vpop.xlane.xlu0 %3643  ;;  %v3719_v52 = vand.u32 65535, %v16086_v31 }
 0x60d   : > { %vm3645_vm6 = vcmp.eq.f32.partialorder %v16079_v55, %v11571_v4 }
 0x60e   : > { %v3646_v53 = vsel %vm3645_vm6, %v3641_v23, inf }
 0x60f   : > { %3647 = vmin.xlane.f32.xlu0 %v3646_v53  ;;  %v3689_v53 = vcvt.s32.f32 %v3687_v8  ;;  %v3721_v8 = vcvt.s32.f32 %v3719_v52 }
 0x610   : > { %v11576_v47 = vpop.xlane.xlu0 %3659 }
 0x611   : > { %vm3661_vm7 = vcmp.eq.f32.partialorder %v16081_v57, %v11576_v47 }
 0x612   : > { %v3662_v16 = vsel %vm3661_vm7, %v3657_v39, inf }
 0x613   : > { %3663 = vmin.xlane.f32.xlu1 %v3662_v16  ;;  %v3705_v16 = vcvt.s32.f32 %v3703_v50  ;;  %v3330_v50 = vcvt.f32.s32 %v11364_v45  ;;  %v3426_v45 = vcvt.f32.s32 %v11441_v44  ;;  %v3255_v44 = vand.u32 65535, %v11509_v41 }
 0x614   : > { %v11581_v51 = vpop.xlane.xlu0 %3675  ;;  %v3554_v41 = vcvt.f32.s32 %v11541_v56  ;;  %v3602_v56 = vcvt.f32.s32 %v11556_v33 }
 0x615   : > { %vm3677_vm8 = vcmp.eq.f32.partialorder %v16083_v20, %v11581_v51 }
 0x616   : > { %v3678_v55 = vsel %vm3677_vm8, %v3673_v6, inf }
 0x617   : > { %3679 = vmin.xlane.f32.xlu0 %v3678_v55  ;;  %v16088_v55 = vld [vmem:[#allocation140_spill] sm:$0xff] }
 0x618   : > { %v11585_v23 = vpop.xlane.xlu0 %3691 }
 0x619   : > { %vm3693_vm9 = vcmp.eq.f32.partialorder %v16085_v58, %v11585_v23  ;;  %v3298_v58 = vcvt.f32.s32 %v11343_v27  ;;  %v3394_v27 = vcvt.f32.s32 %v11410_v34  ;;  %v3223_v34 = vand.u32 65535, %v11472_v63 }
 0x61a   : > { %v3694_v57 = vsel %vm3693_vm9, %v3689_v53, inf  ;;  %v3314_v53 = vcvt.f32.s32 %v11353_v40  ;;  %v3410_v40 = vcvt.f32.s32 %v11426_v3  ;;  %v3239_v3 = vand.u32 65535, %v11490_v38 }
 0x61b   : > { %3695 = vmin.xlane.f32.xlu1 %v3694_v57  ;;  %v3346_v57 = vcvt.f32.s32 %v11375_v9  ;;  %v11605_v31 = vshll.u32 %v3298_v58, 16  ;;  %v3442_v9 = vcvt.f32.s32 %v11450_v1  ;;  %v3490_v58 = vcvt.f32.s32 %v11486_v46 }
 0x61c   : > { %v11590_v39 = vpop.xlane.xlu0 %3707  ;;  %v11607_v52 = vshll.u32 %v3314_v53, 16  ;;  %v3506_v53 = vcvt.f32.s32 %v11505_v25  ;;  %v3522_v1 = vcvt.f32.s32 %v11522_v0  ;;  %v3570_v0 = vcvt.f32.s32 %v11546_v59 }
 0x61d   : > { %vm3709_vm10 = vcmp.eq.f32.partialorder %v16087_v42, %v11590_v39  ;;  %v3362_v42 = vcvt.f32.s32 %v11384_v10  ;;  %v3458_v10 = vcvt.f32.s32 %v11457_v48  ;;  %v3538_v48 = vcvt.f32.s32 %v11535_v62 }
 0x61e   : > { %v3710_v20 = vsel %vm3709_vm10, %v3705_v16, inf  ;;  %v3378_v16 = vcvt.f32.s32 %v11395_v32  ;;  %v11637_v46 = vshll.u32 %v3442_v9, 16  ;;  %v11643_v38 = vshll.u32 %v3490_v58, 16 }
 0x61f   : > { %3711 = vmin.xlane.f32.xlu0 %v3710_v20  ;;  %v11609_v20 = vshll.u32 %v3330_v50, 16  ;;  %v11628_v50 = vshll.u32 %v3394_v27, 16  ;;  %v11639_v25 = vshll.u32 %v3458_v10, 16  ;;  %v11649_v62 = vcvt.s32.f32 %v3223_v34 }
 0x620   : > { %v11595_v6 = vpop.xlane.xlu0 %3723  ;;  %v11620_v32 = vshll.u32 %v3378_v16, 16  ;;  %v11647_v16 = vshll.u32 %v3506_v53, 16  ;;  %v11653_v27 = vcvt.s32.f32 %v3255_v44  ;;  %v3586_v9 = vcvt.f32.s32 %v11551_v5  ;;  %v16091_v53 = vld [vmem:[#allocation143_spill] sm:$0xff] }
 0x621   : > { %vm3725_vm11 = vcmp.eq.f32.partialorder %v16088_v55, %v11595_v6  ;;  %v11618_v55 = vshll.u32 %v3362_v42, 16  ;;  %v11633_v42 = vshll.u32 %v3410_v40, 16  ;;  %v11655_v40 = vshll.u32 %v3522_v1, 16 }
 0x622   : > { %v3726_v22 = vsel %vm3725_vm11, %v3721_v8, inf  ;;  %v11611_v8 = vshll.u32 %v3346_v57, 16  ;;  %v3271_v57 = vand.u32 65535, %v11526_v29  ;;  %v11651_v29 = vcvt.s32.f32 %v3239_v3 }
 0x623   : > { %3727 = vmin.xlane.f32.xlu1 %v3726_v22  ;;  %v3474_v22 = vcvt.f32.s32 %v11470_v19  ;;  %v11635_v19 = vshll.u32 %v3426_v45, 16  ;;  %v11657_v45 = vshll.u32 %v3538_v48, 16  ;;  %v3618_v59 = vcvt.f32.s32 %v11561_v26 }
 0x624   : > { %v11660_v10 = vcvt.s32.f32 %v3271_v57  ;;  %v11666_v3 = vshll.u32 %v3554_v41, 16  ;;  %v11668_v44 = vshll.u32 %v3570_v0, 16  ;;  %v3634_v1 = vcvt.f32.s32 %v11566_v30  ;;  %v16095_v57 = vld [vmem:[#allocation146_spill] sm:$0xff]  ;;  %v16099_v41 = vld [vmem:[#allocation151_spill] sm:$0xff]  ;;  %v16100_v0 = vld [vmem:[#allocation152_spill] sm:$0xff] }
 0x625   : > { %v11641_v63 = vshll.u32 %v3474_v22, 16  ;;  %16089 = vst [vmem:[#allocation95_spill] sm:$0xff] %v11657_v45  ;;  %v16090_v22 = vld [vmem:[#allocation142_spill] sm:$0xff]  ;;  %v3650_v48 = vcvt.f32.s32 %v11571_v4  ;;  %v11676_v45 = vshll.u32 %v3586_v9, 16  ;;  %v3666_v34 = vcvt.f32.s32 %v11576_v47 }
 0x626   : > { %16092 = vst [vmem:[#allocation102_spill] sm:$0xff] %v11666_v3  ;;  %16093 = vst [vmem:[#allocation99_spill] sm:$0xff] %v11668_v44  ;;  %v11681_v3 = vshll.u32 %v3602_v56, 16  ;;  %v11683_v30 = vshll.u32 %v3618_v59, 16  ;;  %v16103_v4 = vand.u32 4294901760, %v16090_v22  ;;  %v16104_v33 = vand.u32 4294901760, %v16091_v53 }
 0x627   : > { %16098 = vst [vmem:[#allocation106_spill] sm:$0xff] %v11676_v45  ;;  %v11691_v9 = vshll.u32 %v3634_v1, 16  ;;  %v11693_v5 = vshll.u32 %v3650_v48, 16  ;;  %v16107_v47 = vld [vmem:[#allocation154_spill] sm:$0xff]  ;;  %v16108_v45 = vld [vmem:[#allocation155_spill] sm:$0xff]  ;;  %v16109_v56 = vand.u32 4294901760, %v16094_v54  ;;  %v3682_v44 = vcvt.f32.s32 %v11581_v51 }
 0x628   : > { %16101 = vst [vmem:[#allocation61_spill] sm:$0xff] %v11681_v3  ;;  %16102 = vst [vmem:[#allocation108_spill] sm:$0xff] %v11683_v30  ;;  %v4506_v61 = vsub.f32 %v16090_v22, %v16103_v4  ;;  %v4513_v26 = vsub.f32 %v16091_v53, %v16104_v33  ;;  %v16110_v30 = vand.u32 4294901760, %v16095_v57  ;;  %v16111_v22 = vand.u32 4294901760, %v16096_v14 }
 0x629   : > { %16105 = vst [vmem:[#allocation107_spill] sm:$0xff] %v11691_v9  ;;  %16106 = vst [vmem:[#allocation112_spill] sm:$0xff] %v11693_v5  ;;  %v4520_v59 = vsub.f32 %v16094_v54, %v16109_v56  ;;  %v16112_v48 = vand.u32 4294901760, %v16097_v17  ;;  %v11709_v58 = vshll.u32 %v3666_v34, 16  ;;  %v16114_v53 = vand.u32 4294901760, %v16099_v41 }
 0x62a   : > { %v4527_v4 = vsub.f32 %v16095_v57, %v16110_v30  ;;  %v4534_v1 = vsub.f32 %v16096_v14, %v16111_v22  ;;  %v16115_v54 = vand.u32 4294901760, %v16100_v0  ;;  %v3698_v57 = vcvt.f32.s32 %v11585_v23 }
 0x62b   : > { %v4541_v33 = vsub.f32 %v16097_v17, %v16112_v48  ;;  %16113 = vst [vmem:[#allocation68_spill] sm:$0xff] %v11709_v58  ;;  %v4548_v56 = vsub.f32 %v16099_v41, %v16114_v53  ;;  %v3714_v22 = vcvt.f32.s32 %v11590_v39  ;;  %v4507_v14 = vand.u32 4294901760, %v4506_v61  ;;  %v16118_v58 = vld [vmem:[#allocation156_spill] sm:$0xff] }
 0x62c   : > { %v4555_v30 = vsub.f32 %v16100_v0, %v16115_v54  ;;  %v4514_v5 = vand.u32 4294901760, %v4513_v26  ;;  %v16116_v48 = vand.u32 4294901760, %v16107_v47  ;;  %v16117_v51 = vand.u32 4294901760, %v16108_v45 }
 0x62d   : > { %v15025_v53 = vand.u32 4294901760, %v16118_v58  ;;  %v15028_v41 = vand.u32 4294901760, %v11297_v7  ;;  %v4521_v9 = vand.u32 4294901760, %v4520_v59  ;;  %v4528_v54 = vand.u32 4294901760, %v4527_v4 }
 0x62e   : > { %v4562_v34 = vsub.f32 %v16107_v47, %v16116_v48  ;;  %v4569_v17 = vsub.f32 %v16108_v45, %v16117_v51  ;;  %v4535_v0 = vand.u32 4294901760, %v4534_v1  ;;  %v4542_v23 = vand.u32 4294901760, %v4541_v33 }
 0x62f   : > { %v4549_v3 = vand.u32 4294901760, %v4548_v56  ;;  %v4556_v39 = vand.u32 4294901760, %v4555_v30  ;;  %v4576_v61 = vsub.f32 %v16118_v58, %v15025_v53  ;;  %v4583_v26 = vsub.f32 %v11297_v7, %v15028_v41  ;;  %v16119_v41 = vld [vmem:[#allocation160_spill] sm:$0xff] }
 0x630   : > { %v11734_v48 = vshll.u32 %v3682_v44, 16  ;;  %v11736_v51 = vshll.u32 %v3698_v57, 16  ;;  %v11738_v45 = vshll.u32 %v3714_v22, 16  ;;  %v4563_v33 = vand.u32 4294901760, %v4562_v34 }
 0x631   : > { %v4570_v56 = vand.u32 4294901760, %v4569_v17  ;;  %v15032_v30 = vand.u32 4294901760, %v11299_v18  ;;  %v11742_v53 = vpack.c.bf16 %v4514_v5, %v4507_v14  ;;  %v4577_v58 = vand.u32 4294901760, %v4576_v61  ;;  %v16120_v5 = vld [vmem:[#allocation161_spill] sm:$0xff]  ;;  %v16121_v61 = vld [vmem:[#allocation162_spill] sm:$0xff] }
 0x632   : > { %v4584_v47 = vand.u32 4294901760, %v4583_v26  ;;  %v15031_v44 = vand.u32 4294901760, %v16119_v41  ;;  %v11746_v7 = vpack.c.bf16 %v4528_v54, %v4521_v9  ;;  %v11748_v22 = vpack.c.bf16 %v4542_v23, %v4535_v0 }
 0x633   : > { %v11750_v59 = vpack.c.bf16 %v4556_v39, %v4549_v3  ;;  %v4590_v17 = vsub.f32 %v11299_v18, %v15032_v30  ;;  %v16125_v3 = vmov 0  ;;  %v11775_v9 = vpack.c.bf16 %v4570_v56, %v4563_v33  ;;  %v16131_v33 = vld [vmem:[#allocation164_spill] sm:$0xff] }
 0x634   : > { %v4597_v14 = vsub.f32 %v16119_v41, %v15031_v44  ;;  %v16128_v54 = vmov 0.0   ;;  %v15046_v44 = vand.u32 4294901760, %v11308_v28  ;;  %v16132_v18 = vand.u32 4294901760, %v16120_v5 }
 0x635   : > { %v4591_v34 = vand.u32 4294901760, %v4590_v17 }
 0x636   : > { %v4598_v41 = vand.u32 4294901760, %v4597_v14 }
 0x644   : > { %v3296_v4 = vpop.xlane.xlu1 %3295 }
 0x645   : > { %v3297_v1 = vcvt.f32.s32 %v3296_v4 }
 0x647   : > { %v3300_v57 = vadd.s32 %v11605_v31, %v3297_v1  ;;  %v16122_v31 = vmov 0  ;;  %v11783_v1 = vpack.c.bf16 %v4584_v47, %v4577_v58  ;;  %v16133_v58 = vand.u32 4294901760, %v16121_v61 }
 0x648   : > { %v3312_v4 = vpop.xlane.xlu1 %3311 }
 0x649   : > { %vm11761_vm13 = vcmp.eq.s32.totalorder %v10833_v24, %v3300_v57  ;;  %vm11766_vm14 = vcmp.eq.s32.totalorder %v10836_v12, %v3300_v57  ;;  %6848 = vst.msk [vmem:[%s11771_s27 + $0x20] sm:$0xff] %vm15075_vm12, %v3300_v57  ;;  %v3313_v0 = vcvt.f32.s32 %v3312_v4  ;;  %v4611_v47 = vsub.f32 %v16121_v61, %v16133_v58 }
 0x64a   : > { %v16123_v31 = vsel %vm11761_vm13, 4294967295, %v16122_v31  ;;  %v16126_v3 = vsel %vm11766_vm14, 4294967295, %v16125_v3  ;;  %v7259_v23 = vsel %vm11766_vm14, 1.0, %v16128_v54  ;;  %v7258_v39 = vsel %vm11761_vm13, 1.0, %v16128_v54 }
 0x64b   : > { %16124 = vst [vmem:[#allocation116_spill] sm:$0xff] %v16123_v31  ;;  %16127 = vst [vmem:[#allocation113_spill] sm:$0xff] %v16126_v3  ;;  %v3316_v30 = vadd.s32 %v11607_v52, %v3313_v0  ;;  %v11787_v26 = vsub.f32 %v7259_v23, %v7259_v23  ;;  %v11789_v57 = vsub.f32 %v7258_v39, %v7258_v39  ;;  %v16134_v52 = vmov 0 }
 0x64c   : > { %v3328_v4 = vpop.xlane.xlu1 %3327  ;;  %v4604_v3 = vsub.f32 %v16120_v5, %v16132_v18  ;;  %v16137_v0 = vmov 0  ;;  %v11821_v58 = vsub.f32 %v11308_v28, %v15046_v44  ;;  %v4612_v44 = vand.u32 4294901760, %v4611_v47 }
 0x64d   : > { %16129 = vst [vmem:[#allocation119_spill] sm:$0xff] %v11787_v26  ;;  %16130 = vst [vmem:[#allocation117_spill] sm:$0xff] %v11789_v57  ;;  %vm11799_vm15 = vcmp.eq.s32.totalorder %v10833_v24, %v3316_v30  ;;  %vm11804_vm0 = vcmp.eq.s32.totalorder %v10836_v12, %v3316_v30  ;;  %v3329_v17 = vcvt.f32.s32 %v3328_v4  ;;  %v15047_v14 = vand.u32 4294901760, %v11787_v26 }
 0x64e   : > { %v16135_v52 = vsel %vm11799_vm15, 4294967295, %v16134_v52  ;;  %v16138_v0 = vsel %vm11804_vm0, 4294967295, %v16137_v0  ;;  %6849 = vst.msk [vmem:[%s11771_s27 + $0x28] sm:$0xff] %vm15075_vm12, %v3316_v30  ;;  %v7261_v23 = vsel %vm11804_vm0, 1.0, %v16128_v54  ;;  %v7260_v39 = vsel %vm11799_vm15, 1.0, %v16128_v54 }
 0x64f   : > { %16136 = vst [vmem:[#allocation122_spill] sm:$0xff] %v16135_v52  ;;  %16139 = vst [vmem:[#allocation120_spill] sm:$0xff] %v16138_v0  ;;  %v3332_v30 = vadd.s32 %v11609_v20, %v3329_v17  ;;  %v4084_v4 = vsub.f32 %v11787_v26, %v15047_v14  ;;  %v11827_v56 = vsub.f32 %v7261_v23, %v7261_v23  ;;  %v16142_v5 = vand.u32 4294901760, %v11789_v57 }
 0x650   : > { %v11829_v18 = vsub.f32 %v7260_v39, %v7260_v39  ;;  %v3344_v61 = vpop.xlane.xlu1 %3343  ;;  %v11834_v52 = vpack.c.bf16 %v4598_v41, %v4591_v34  ;;  %v4605_v31 = vand.u32 4294901760, %v4604_v3  ;;  %v16143_v20 = vmov 0 }
 0x651   : > { %16140 = vst [vmem:[#allocation125_spill] sm:$0xff] %v11827_v56  ;;  %v4090_v0 = vsub.f32 %v11789_v57, %v16142_v5  ;;  %vm11837_vm1 = vcmp.eq.s32.totalorder %v10833_v24, %v3332_v30  ;;  %vm11842_vm2 = vcmp.eq.s32.totalorder %v10836_v12, %v3332_v30  ;;  %v16146_v17 = vmov 0  ;;  %6850 = vst.msk [vmem:[%s11771_s27 + $0x30] sm:$0xff] %vm15075_vm12, %v3332_v30 }
 0x652   : > { %16141 = vst [vmem:[#allocation123_spill] sm:$0xff] %v11829_v18  ;;  %v16144_v20 = vsel %vm11837_vm1, 4294967295, %v16143_v20  ;;  %v16147_v17 = vsel %vm11842_vm2, 4294967295, %v16146_v17  ;;  %v3345_v23 = vcvt.f32.s32 %v3344_v61  ;;  %v4085_v39 = vand.u32 4294901760, %v4084_v4 }
 0x653   : > { %16145 = vst [vmem:[#allocation128_spill] sm:$0xff] %v16144_v20  ;;  %16148 = vst [vmem:[#allocation126_spill] sm:$0xff] %v16147_v17  ;;  %v4091_v14 = vand.u32 4294901760, %v4090_v0  ;;  %v15051_v41 = vand.u32 4294901760, %v11827_v56  ;;  %v15050_v5 = vand.u32 4294901760, %v11829_v18  ;;  %v7263_v34 = vsel %vm11842_vm2, 1.0, %v16128_v54 }
 0x654   : > { %v3348_v3 = vadd.s32 %v11611_v8, %v3345_v23  ;;  %4086 = vmatprep.mubr.f32.mxu1 %v4085_v39  ;;  %v11854_v47 = vsub.f32 %v7263_v34, %v7263_v34  ;;  %v7262_v61 = vsel %vm11837_vm1, 1.0, %v16128_v54  ;;  %v3360_v30 = vpop.xlane.xlu1 %3359  ;;  %v16151_v23 = vand.u32 4294901760, %v16131_v33  ;;  %v16707_v20 = vld [vmem:[#allocation192_spill] sm:$0xff] }
 0x655   : > { %4092 = vmatmul.mubr.f32.vlgmr.msra.gmra.mrb[0].mxu1 %v4091_v14  ;;  %v4099_v4 = vsub.f32 %v11827_v56, %v15051_v41  ;;  %v4105_v57 = vsub.f32 %v11829_v18, %v15050_v5  ;;  %v11866_v8 = vsub.f32 %v7262_v61, %v7262_v61  ;;  %v16152_v34 = vmov 0 }
 0x656   : > { %16149 = vst [vmem:[#allocation131_spill] sm:$0xff] %v11854_v47  ;;  %v11871_v39 = vsub.f32 %v16131_v33, %v16151_v23  ;;  %vm11874_vm3 = vcmp.eq.s32.totalorder %v10833_v24, %v3348_v3  ;;  %vm11879_vm4 = vcmp.eq.s32.totalorder %v10836_v12, %v3348_v3  ;;  %v16155_v14 = vmov 0  ;;  %6851 = vst.msk [vmem:[%s11771_s27 + $0x38] sm:$0xff] %vm15075_vm12, %v3348_v3  ;;  %7767 = vmatpush1.bf16.msra.mxu1 %v11742_v53 }
 0x657   : > { %16150 = vst [vmem:[#allocation129_spill] sm:$0xff] %v11866_v8  ;;  %v16153_v34 = vsel %vm11874_vm3, 4294967295, %v16152_v34  ;;  %v16156_v14 = vsel %vm11879_vm4, 4294967295, %v16155_v14  ;;  %v3361_v5 = vcvt.f32.s32 %v3360_v30  ;;  %v15060_v61 = vand.u32 4294901760, %v11854_v47  ;;  %7768 = vmatprep.subr.bf16.mxu1 %v16022_v49 }
 0x658   : > { %16154 = vst [vmem:[#allocation134_spill] sm:$0xff] %v16153_v34  ;;  %16157 = vst [vmem:[#allocation132_spill] sm:$0xff] %v16156_v14  ;;  %v4100_v41 = vand.u32 4294901760, %v4099_v4  ;;  %v4106_v23 = vand.u32 4294901760, %v4105_v57  ;;  %v15059_v0 = vand.u32 4294901760, %v11866_v8  ;;  %v7265_v18 = vsel %vm11879_vm4, 1.0, %v16128_v54  ;;  %v3376_v57 = vpop.xlane.xlu1 %3375 }
 0x659   : > { %v3364_v56 = vadd.s32 %v11618_v55, %v3361_v5  ;;  %v4114_v3 = vsub.f32 %v11854_v47, %v15060_v61  ;;  %v11896_v30 = vsub.f32 %v7265_v18, %v7265_v18  ;;  %v7264_v53 = vsel %vm11874_vm3, 1.0, %v16128_v54 }
 0x65a   : > { %4101 = vmatprep.mubr.f32.mxu1 %v4100_v41  ;;  %v4120_v4 = vsub.f32 %v11866_v8, %v15059_v0  ;;  %v11904_v26 = vsub.f32 %v7264_v53, %v7264_v53  ;;  %v11906_v33 = vpack.c.bf16 %v4612_v44, %v4605_v31  ;;  %v16160_v18 = vmov 0  ;;  %7770 = vmatpush1.bf16.msra.mxu1 %v11746_v7 }
 0x65b   : > { %16158 = vst [vmem:[#allocation137_spill] sm:$0xff] %v11896_v30  ;;  %vm11910_vm5 = vcmp.eq.s32.totalorder %v10833_v24, %v3364_v56  ;;  %vm11915_vm6 = vcmp.eq.s32.totalorder %v10836_v12, %v3364_v56  ;;  %v16163_v5 = vmov 0  ;;  %6852 = vst.msk [vmem:[%s11771_s27 + $0x40] sm:$0xff] %vm15075_vm12, %v3364_v56  ;;  %4107 = vmatmul.mubr.f32.gmra.mrb[2].mxu1 %v4106_v23  ;;  %v3377_v41 = vcvt.f32.s32 %v3376_v57  ;;  %7771 = vmatprep.subr.bf16.mxu1 %v16022_v49 }
 0x65c   : > { %16159 = vst [vmem:[#allocation135_spill] sm:$0xff] %v11904_v26  ;;  %v16161_v18 = vsel %vm11910_vm5, 4294967295, %v16160_v18  ;;  %v16164_v5 = vsel %vm11915_vm6, 4294967295, %v16163_v5  ;;  %v4115_v53 = vand.u32 4294901760, %v4114_v3  ;;  %v4121_v0 = vand.u32 4294901760, %v4120_v4  ;;  %v3392_v3 = vpop.xlane.xlu1 %3391 }
 0x65d   : > { %16162 = vst [vmem:[#allocation139_spill] sm:$0xff] %v16161_v18  ;;  %16165 = vst [vmem:[#allocation138_spill] sm:$0xff] %v16164_v5  ;;  %v15064_v44 = vand.u32 4294901760, %v11896_v30  ;;  %v15063_v31 = vand.u32 4294901760, %v11904_v26  ;;  %v7267_v61 = vsel %vm11915_vm6, 1.0, %v16128_v54  ;;  %v3380_v55 = vadd.s32 %v11620_v32, %v3377_v41 }
 0x65e   : > { %4116 = vmatprep.mubr.f32.mxu1 %v4115_v53  ;;  %v11928_v8 = vsub.f32 %v7267_v61, %v7267_v61  ;;  %v7266_v56 = vsel %vm11910_vm5, 1.0, %v16128_v54  ;;  %v4626_v23 = vand.u32 4294901760, %v11871_v39  ;;  %v16168_v4 = vmov 0  ;;  %7773 = vmatpush1.bf16.msra.mxu1 %v11748_v22 }
 0x65f   : > { %v4129_v57 = vsub.f32 %v11896_v30, %v15064_v44  ;;  %v4135_v7 = vsub.f32 %v11904_v26, %v15063_v31  ;;  %v11941_v32 = vsub.f32 %v7266_v56, %v7266_v56  ;;  %vm11945_vm7 = vcmp.eq.s32.totalorder %v10833_v24, %v3380_v55  ;;  %6853 = vst.msk [vmem:[%s11771_s27 + $0x48] sm:$0xff] %vm15075_vm12, %v3380_v55 }
 0x660   : > { %16166 = vst [vmem:[#allocation140_spill] sm:$0xff] %v11928_v8  ;;  %v16169_v4 = vsel %vm11945_vm7, 4294967295, %v16168_v4  ;;  %vm11950_vm8 = vcmp.eq.s32.totalorder %v10836_v12, %v3380_v55  ;;  %v16171_v39 = vmov 0  ;;  %4122 = vmatmul.mubr.f32.gmra.mrb[4].mxu1 %v4121_v0  ;;  %v3393_v41 = vcvt.f32.s32 %v3392_v3  ;;  %7774 = vmatprep.subr.bf16.mxu1 %v16022_v49 }
 0x661   : > { %16167 = vst [vmem:[#allocation193_spill] sm:$0xff] %v11941_v32  ;;  %16170 = vst [vmem:[#allocation194_spill] sm:$0xff] %v16169_v4  ;;  %v16172_v39 = vsel %vm11950_vm8, 4294967295, %v16171_v39  ;;  %v15067_v53 = vand.u32 4294901760, %v11928_v8  ;;  %v4130_v56 = vand.u32 4294901760, %v4129_v57  ;;  %v4136_v31 = vand.u32 4294901760, %v4135_v7  ;;  %v3408_v57 = vpop.xlane.xlu1 %3407 }
 0x662   : > { %16173 = vst [vmem:[#allocation195_spill] sm:$0xff] %v16172_v39  ;;  %v15070_v44 = vand.u32 4294901760, %v11941_v32  ;;  %v7269_v61 = vsel %vm11950_vm8, 1.0, %v16128_v54  ;;  %v3396_v26 = vadd.s32 %v11628_v50, %v3393_v41  ;;  %v7268_v3 = vsel %vm11945_vm7, 1.0, %v16128_v54  ;;  %7776 = vmatpush1.bf16.msra.mxu1 %v11750_v59 }
 0x663   : > { %v4144_v0 = vsub.f32 %v11928_v8, %v15067_v53  ;;  %v11966_v55 = vsub.f32 %v7269_v61, %v7269_v61  ;;  %4131 = vmatprep.mubr.f32.mxu1 %v4130_v56  ;;  %v11975_v7 = vsub.f32 %v7268_v3, %v7268_v3  ;;  %v16176_v50 = vand.u32 4294901760, %v11821_v58  ;;  %7777 = vmatprep.subr.bf16.mxu1 %v16022_v49  ;;  %v16708_v17 = vld [vmem:[#allocation135_spill] sm:$0xff] }
 0x664   : > { %v4150_v22 = vsub.f32 %v11941_v32, %v15070_v44  ;;  %v16177_v61 = vand.u32 4294901760, %v11317_v15  ;;  %vm11987_vm9 = vcmp.eq.s32.totalorder %v10833_v24, %v3396_v26  ;;  %v16178_v8 = vmov 0  ;;  %6854 = vst.msk [vmem:[%s11771_s27 + $0x50] sm:$0xff] %vm15075_vm12, %v3396_v26  ;;  %4137 = vmatmul.mubr.f32.gmra.mrb[6].mxu1 %v4136_v31 }
 0x665   : > { %16174 = vst [vmem:[#allocation196_spill] sm:$0xff] %v11966_v55  ;;  %16175 = vst [vmem:[#allocation197_spill] sm:$0xff] %v11975_v7  ;;  %v11979_v41 = vpack.c.bf16 %v4626_v23, %v16176_v50  ;;  %v16179_v8 = vsel %vm11987_vm9, 4294967295, %v16178_v8  ;;  %vm11992_vm10 = vcmp.eq.s32.totalorder %v10836_v12, %v3396_v26  ;;  %v16181_v56 = vmov 0 }
 0x666   : > { %v11984_v53 = vsub.f32 %v11317_v15, %v16177_v61  ;;  %16180 = vst [vmem:[#allocation198_spill] sm:$0xff] %v16179_v8  ;;  %v16182_v56 = vsel %vm11992_vm10, 4294967295, %v16181_v56  ;;  %v3409_v58 = vcvt.f32.s32 %v3408_v57  ;;  %v4145_v23 = vand.u32 4294901760, %v4144_v0  ;;  %v3424_v57 = vpop.xlane.xlu1 %3423  ;;  %7779 = vmatpush1.bf16.msra.mxu1 %v11775_v9 }
 0x667   : > { %16183 = vst [vmem:[#allocation199_spill] sm:$0xff] %v16182_v56  ;;  %v4151_v3 = vand.u32 4294901760, %v4150_v22  ;;  %v15079_v50 = vand.u32 4294901760, %v11966_v55  ;;  %v15078_v61 = vand.u32 4294901760, %v11975_v7  ;;  %v7271_v44 = vsel %vm11992_vm10, 1.0, %v16128_v54  ;;  %7780 = vmatprep.subr.bf16.mxu1 %v16022_v49 }
 0x668   : > { %v3412_v32 = vadd.s32 %v11633_v42, %v3409_v58  ;;  %4146 = vmatprep.mubr.f32.mxu1 %v4145_v23  ;;  %v12005_v30 = vsub.f32 %v7271_v44, %v7271_v44  ;;  %v7270_v26 = vsel %vm11987_vm9, 1.0, %v16128_v54  ;;  %v16185_v31 = vand.u32 4294901760, %v11320_v43 }
 0x669   : > { %v4159_v59 = vsub.f32 %v11966_v55, %v15079_v50  ;;  %v4165_v42 = vsub.f32 %v11975_v7, %v15078_v61  ;;  %v12022_v44 = vsub.f32 %v7270_v26, %v7270_v26  ;;  %v16187_v58 = vmov 0  ;;  %4152 = vmatmul.mubr.f32.gmra.mrb[8].mxu1 %v4151_v3 }
 0x66a   : > { %16184 = vst [vmem:[#allocation200_spill] sm:$0xff] %v12005_v30  ;;  %v12014_v0 = vsub.f32 %v11320_v43, %v16185_v31  ;;  %vm12026_vm11 = vcmp.eq.s32.totalorder %v10833_v24, %v3412_v32  ;;  %vm12031_vm12 = vcmp.eq.s32.totalorder %v10836_v12, %v3412_v32  ;;  %v16190_v23 = vmov 0  ;;  %7782 = vmatpush1.bf16.msra.mxu1 %v11783_v1  ;;  %v16295_v43 = vld [vmem:[#allocation106_spill] sm:$0xff] }
 0x66b   : > { %16186 = vst [vmem:[#allocation201_spill] sm:$0xff] %v12022_v44  ;;  %v16188_v58 = vsel %vm12026_vm11, 4294967295, %v16187_v58  ;;  %v16191_v23 = vsel %vm12031_vm12, 4294967295, %v16190_v23  ;;  %vm16193_vm10 = vcmask 7168   ;;  %v3425_v31 = vcvt.f32.s32 %v3424_v57  ;;  %7783 = vmatprep.subr.bf16.mxu1 %v16022_v49 }
 0x66c   : > { %16189 = vst [vmem:[#allocation202_spill] sm:$0xff] %v16188_v58  ;;  %16192 = vst [vmem:[#allocation203_spill] sm:$0xff] %v16191_v23  ;;  %v15086_v61 = vand.u32 4294901760, %v12005_v30  ;;  %v4160_v26 = vand.u32 4294901760, %v4159_v59  ;;  %v4166_v50 = vand.u32 4294901760, %v4165_v42  ;;  %v15089_v22 = vand.u32 4294901760, %v12022_v44  ;;  %v3440_v59 = vpop.xlane.xlu1 %3439 }
 0x66d   : > { %6855 = vst.msk [vmem:[%s11771_s27 + $0x58] sm:$0xff] %vm16193_vm10, %v3412_v32  ;;  %v7273_v7 = vsel %vm12031_vm12, 1.0, %v16128_v54  ;;  %v3428_v55 = vadd.s32 %v11635_v19, %v3425_v31  ;;  %v7272_v57 = vsel %vm12026_vm11, 1.0, %v16128_v54  ;;  %v4633_v19 = vand.u32 4294901760, %v11984_v53 }
 0x66e   : > { %v4174_v32 = vsub.f32 %v12005_v30, %v15086_v61  ;;  %v12047_v3 = vsub.f32 %v7273_v7, %v7273_v7  ;;  %4161 = vmatprep.mubr.f32.mxu1 %v4160_v26  ;;  %v4180_v9 = vsub.f32 %v12022_v44, %v15089_v22  ;;  %v12056_v42 = vsub.f32 %v7272_v57, %v7272_v57 }
 0x66f   : > { %v4640_v31 = vand.u32 4294901760, %v12014_v0  ;;  %vm12061_vm10 = vcmp.eq.s32.totalorder %v10833_v24, %v3428_v55  ;;  %v16196_v7 = vmov 0  ;;  %vm12066_vm12 = vcmp.eq.s32.totalorder %v10836_v12, %v3428_v55  ;;  %4167 = vmatmul.mubr.f32.gmra.mrb[10].mxu1 %v4166_v50 }
 0x670   : > { %16194 = vst [vmem:[#allocation204_spill] sm:$0xff] %v12047_v3  ;;  %16195 = vst [vmem:[#allocation205_spill] sm:$0xff] %v12056_v42  ;;  %v16197_v7 = vsel %vm12061_vm10, 4294967295, %v16196_v7  ;;  %v16199_v61 = vmov 0  ;;  %vm16202_vm11 = vcmask 7168   ;;  %v3441_v26 = vcvt.f32.s32 %v3440_v59  ;;  %v3456_v59 = vpop.xlane.xlu0 %3455  ;;  %7785 = vmatpush1.bf16.msra.mxu1 %v11834_v52 }
 0x671   : > { %16198 = vst [vmem:[#allocation206_spill] sm:$0xff] %v16197_v7  ;;  %v16200_v61 = vsel %vm12066_vm12, 4294967295, %v16199_v61  ;;  %6856 = vst.msk [vmem:[%s11771_s27 + $0x60] sm:$0xff] %vm16202_vm11, %v3428_v55  ;;  %v4175_v57 = vand.u32 4294901760, %v4174_v32  ;;  %v4181_v22 = vand.u32 4294901760, %v4180_v9  ;;  %v15101_v53 = vand.u32 4294901760, %v12047_v3  ;;  %7786 = vmatprep.subr.bf16.mxu1 %v16022_v49 }
 0x672   : > { %16201 = vst [vmem:[#allocation207_spill] sm:$0xff] %v16200_v61  ;;  %v15100_v0 = vand.u32 4294901760, %v12056_v42  ;;  %v7275_v44 = vsel %vm12066_vm12, 1.0, %v16128_v54  ;;  %v3444_v30 = vadd.s32 %v11637_v46, %v3441_v26  ;;  %v7274_v55 = vsel %vm12061_vm10, 1.0, %v16128_v54 }
 0x673   : > { %4176 = vmatprep.mubr.f32.mxu1 %v4175_v57  ;;  %v12079_v47 = vsub.f32 %v7275_v44, %v7275_v44  ;;  %v16204_v50 = vand.u32 4294901760, %v11322_v36  ;;  %v4189_v1 = vsub.f32 %v12047_v3, %v15101_v53  ;;  %v12096_v44 = vsub.f32 %v7274_v55, %v7274_v55 }
 0x674   : > { %v4195_v46 = vsub.f32 %v12056_v42, %v15100_v0  ;;  %vm12100_vm11 = vcmp.eq.s32.totalorder %v10833_v24, %v3444_v30  ;;  %v16206_v26 = vmov 0  ;;  %vm12105_vm12 = vcmp.eq.s32.totalorder %v10836_v12, %v3444_v30  ;;  %4182 = vmatmul.mubr.f32.gmra.mrb[12].mxu1 %v4181_v22 }
 0x675   : > { %16203 = vst [vmem:[#allocation208_spill] sm:$0xff] %v12079_v47  ;;  %v12088_v32 = vsub.f32 %v11322_v36, %v16204_v50  ;;  %16205 = vst [vmem:[#allocation209_spill] sm:$0xff] %v12096_v44  ;;  %v16207_v26 = vsel %vm12100_vm11, 4294967295, %v16206_v26  ;;  %v16209_v57 = vmov 0  ;;  %vm16212_vm10 = vcmask 7168   ;;  %7788 = vmatpush1.bf16.msra.mxu1 %v11906_v33 }
 0x676   : > { %16208 = vst [vmem:[#allocation210_spill] sm:$0xff] %v16207_v26  ;;  %v16210_v57 = vsel %vm12105_vm12, 4294967295, %v16209_v57  ;;  %6857 = vst.msk [vmem:[%s11771_s27 + $0x68] sm:$0xff] %vm16212_vm10, %v3444_v30  ;;  %v3457_v50 = vcvt.f32.s32 %v3456_v59  ;;  %v15106_v0 = vand.u32 4294901760, %v12079_v47  ;;  %v4190_v55 = vand.u32 4294901760, %v4189_v1  ;;  %v3472_v1 = vpop.xlane.xlu1 %3471  ;;  %7789 = vmatprep.subr.bf16.mxu1 %v16022_v49 }
 0x677   : > { %16211 = vst [vmem:[#allocation211_spill] sm:$0xff] %v16210_v57  ;;  %v4196_v53 = vand.u32 4294901760, %v4195_v46  ;;  %v15111_v9 = vand.u32 4294901760, %v12096_v44  ;;  %v7277_v42 = vsel %vm12105_vm12, 1.0, %v16128_v54  ;;  %v7276_v59 = vsel %vm12100_vm11, 1.0, %v16128_v54 }
 0x678   : > { %v3460_v3 = vadd.s32 %v11639_v25, %v3457_v50  ;;  %v4204_v30 = vsub.f32 %v12079_v47, %v15106_v0  ;;  %v12121_v22 = vsub.f32 %v7277_v42, %v7277_v42  ;;  %4191 = vmatprep.mubr.f32.mxu1 %v4190_v55  ;;  %v12130_v46 = vsub.f32 %v7276_v59, %v7276_v59 }
 0x679   : > { %v4210_v52 = vsub.f32 %v12096_v44, %v15111_v9  ;;  %v7793_v25 = vpack.c.bf16 %v4640_v31, %v4633_v19  ;;  %v16215_v50 = vand.u32 4294901760, %v11324_v2  ;;  %v16216_v0 = vmov 0  ;;  %4197 = vmatmul.mubr.f32.gmra.mrb[14].mxu1 %v4196_v53 }
 0x67a   : > { %16213 = vst [vmem:[#allocation212_spill] sm:$0xff] %v12121_v22  ;;  %16214 = vst [vmem:[#allocation213_spill] sm:$0xff] %v12130_v46  ;;  %vm12136_vm10 = vcmp.eq.s32.totalorder %v10833_v24, %v3460_v3  ;;  %vm12141_vm12 = vcmp.eq.s32.totalorder %v10836_v12, %v3460_v3  ;;  %v16219_v55 = vmov 0  ;;  %vm16222_vm11 = vcmask 7168   ;;  %7791 = vmatpush1.bf16.msra.mxu1 %v11979_v41 }
 0x67b   : > { %v4653_v42 = vsub.f32 %v11324_v2, %v16215_v50  ;;  %v16217_v0 = vsel %vm12136_vm10, 4294967295, %v16216_v0  ;;  %v16220_v55 = vsel %vm12141_vm12, 4294967295, %v16219_v55  ;;  %6858 = vst.msk [vmem:[%s11771_s27 + $0x70] sm:$0xff] %vm16222_vm11, %v3460_v3  ;;  %v3473_v59 = vcvt.f32.s32 %v3472_v1  ;;  %v12154_v2 = vpop.xlane.xlu0 %3227  ;;  %v3488_v1 = vpop.xlane.xlu1 %3487  ;;  %7792 = vmatprep.subr.bf16.mxu1 %v16022_v49 }
 0x67c   : > { %16218 = vst [vmem:[#allocation214_spill] sm:$0xff] %v16217_v0  ;;  %16221 = vst [vmem:[#allocation215_spill] sm:$0xff] %v16220_v55  ;;  %v4205_v9 = vand.u32 4294901760, %v4204_v30  ;;  %v4211_v19 = vand.u32 4294901760, %v4210_v52  ;;  %v15125_v31 = vand.u32 4294901760, %v12121_v22  ;;  %v15124_v50 = vand.u32 4294901760, %v12130_v46 }
 0x67d   : > { %v7279_v44 = vsel %vm12141_vm12, 1.0, %v16128_v54  ;;  %v3476_v47 = vadd.s32 %v11641_v63, %v3473_v59  ;;  %16223 = vst [vmem:[#allocation216_spill] sm:$0xff] %v12154_v2  ;;  %v4647_v53 = vand.u32 4294901760, %v12088_v32  ;;  %vm3229_vm11 = vcmp.eq.f32.partialorder %v11488_v35, %v12154_v2 }
 0x67e   : > { %4206 = vmatprep.mubr.f32.mxu1 %v4205_v9  ;;  %v12156_v3 = vsub.f32 %v7279_v44, %v7279_v44  ;;  %v4219_v33 = vsub.f32 %v12121_v22, %v15125_v31  ;;  %v4225_v63 = vsub.f32 %v12130_v46, %v15124_v50  ;;  %v7278_v44 = vsel %vm12136_vm10, 1.0, %v16128_v54  ;;  %7794 = vmatpush1.bf16.msra.mxu1 %v7793_v25 }
 0x67f   : > { %vm12173_vm12 = vcmp.eq.s32.totalorder %v10833_v24, %v3476_v47  ;;  %v16225_v32 = vmov 0  ;;  %vm12178_vm9 = vcmp.eq.s32.totalorder %v10836_v12, %v3476_v47  ;;  %v16228_v35 = vmov 0  ;;  %4212 = vmatmul.mubr.f32.gmra.mrb[16].mxu1 %v4211_v19  ;;  %v12188_v22 = vpop.xlane.xlu0 %3243  ;;  %7795 = vmatprep.subr.bf16.mxu1 %v16022_v49 }
 0x680   : > { %16224 = vst [vmem:[#allocation217_spill] sm:$0xff] %v12156_v3  ;;  %v16226_v32 = vsel %vm12173_vm12, 4294967295, %v16225_v32  ;;  %v16229_v35 = vsel %vm12178_vm9, 4294967295, %v16228_v35  ;;  %vm16231_vm8 = vcmask 7168   ;;  %v3489_v9 = vcvt.f32.s32 %v3488_v1  ;;  %16232 = vst [vmem:[#allocation220_spill] sm:$0xff] %v12188_v22 }
 0x681   : > { %16227 = vst [vmem:[#allocation218_spill] sm:$0xff] %v16226_v32  ;;  %16230 = vst [vmem:[#allocation219_spill] sm:$0xff] %v16229_v35  ;;  %v3230_v52 = vsel %vm3229_vm11, %v11649_v62, inf  ;;  %v4220_v59 = vand.u32 4294901760, %v4219_v33  ;;  %v4226_v50 = vand.u32 4294901760, %v4225_v63  ;;  %v15136_v31 = vand.u32 4294901760, %v12156_v3 }
 0x682   : > { %6859 = vst.msk [vmem:[%s11771_s27 + $0x78] sm:$0xff] %vm16231_vm8, %v3476_v47  ;;  %3231 = vmin.xlane.f32.xlu0 %v3230_v52  ;;  %v4654_v30 = vand.u32 4294901760, %v4653_v42  ;;  %v3492_v46 = vadd.s32 %v11643_v38, %v3489_v9  ;;  %v12190_v36 = vsub.f32 %v7278_v44, %v7278_v44  ;;  %v7281_v47 = vsel %vm12178_vm9, 1.0, %v16128_v54  ;;  %v3504_v38 = vpop.xlane.xlu1 %3503 }
 0x683   : > { %v16234_v62 = vand.u32 4294901760, %v11326_v21  ;;  %vm3245_vm8 = vcmp.eq.f32.partialorder %v11507_v60, %v12188_v22  ;;  %4221 = vmatprep.mubr.f32.mxu1 %v4220_v59  ;;  %v4234_v41 = vsub.f32 %v12156_v3, %v15136_v31  ;;  %v12206_v42 = vsub.f32 %v7281_v47, %v7281_v47  ;;  %v16316_v22 = vld [vmem:[#allocation108_spill] sm:$0xff] }
 0x684   : > { %16233 = vst [vmem:[#allocation221_spill] sm:$0xff] %v12190_v36  ;;  %v7280_v1 = vsel %vm12173_vm12, 1.0, %v16128_v54  ;;  %vm12212_vm11 = vcmp.eq.s32.totalorder %v10833_v24, %v3492_v46  ;;  %v16236_v33 = vmov 0  ;;  %vm12217_vm9 = vcmp.eq.s32.totalorder %v10836_v12, %v3492_v46  ;;  %4227 = vmatmul.mubr.f32.gmra.mrb[18].mxu1 %v4226_v50 }
 0x685   : > { %v12199_v19 = vsub.f32 %v11326_v21, %v16234_v62  ;;  %16235 = vst [vmem:[#allocation222_spill] sm:$0xff] %v12206_v42  ;;  %v16237_v33 = vsel %vm12212_vm11, 4294967295, %v16236_v33  ;;  %v16239_v60 = vmov 0  ;;  %vm16242_vm10 = vcmask 7168  }
 0x686   : > { %16238 = vst [vmem:[#allocation223_spill] sm:$0xff] %v16237_v33  ;;  %v16240_v60 = vsel %vm12217_vm9, 4294967295, %v16239_v60  ;;  %6860 = vst.msk [vmem:[%s11771_s27 + $0x80] sm:$0xff] %vm16242_vm10, %v3492_v46  ;;  %v3505_v63 = vcvt.f32.s32 %v3504_v38  ;;  %v3246_v44 = vsel %vm3245_vm8, %v11651_v29, inf  ;;  %v4235_v9 = vand.u32 4294901760, %v4234_v41  ;;  %v12231_v46 = vpop.xlane.xlu0 %3259  ;;  %v3520_v25 = vpop.xlane.xlu1 %3519 }
 0x687   : > { %16241 = vst [vmem:[#allocation224_spill] sm:$0xff] %v16240_v60  ;;  %3247 = vmin.xlane.f32.xlu1 %v3246_v44  ;;  %v15142_v52 = vand.u32 4294901760, %v12190_v36  ;;  %v15141_v59 = vand.u32 4294901760, %v12206_v42  ;;  %v7796_v47 = vpack.c.bf16 %v4654_v30, %v4647_v53  ;;  %v16243_v62 = vcvt.f32.s32 %v11595_v6  ;;  %16244 = vst [vmem:[#allocation225_spill] sm:$0xff] %v12231_v46 }
 0x688   : > { %v3508_v3 = vadd.s32 %v11647_v16, %v3505_v63  ;;  %v12233_v50 = vsub.f32 %v7280_v1, %v7280_v1  ;;  %v7283_v29 = vsel %vm12217_vm9, 1.0, %v16128_v54  ;;  %vm3261_vm10 = vcmp.eq.f32.partialorder %v11524_v13, %v12231_v46  ;;  %4236 = vmatprep.mubr.f32.mxu1 %v4235_v9 }
 0x689   : > { %v12228_v31 = vshll.u32 %v16243_v62, 16  ;;  %v4240_v6 = vsub.f32 %v12190_v36, %v15142_v52  ;;  %v4249_v16 = vsub.f32 %v12206_v42, %v15141_v59  ;;  %v7282_v53 = vsel %vm12212_vm11, 1.0, %v16128_v54  ;;  %7797 = vmatpush1.bf16.msra.mxu1 %v7796_v47 }
 0x68a   : > { %16245 = vst [vmem:[#allocation226_spill] sm:$0xff] %v12233_v50  ;;  %vm12251_vm8 = vcmp.eq.s32.totalorder %v10836_v12, %v3508_v3  ;;  %v16246_v30 = vmov 0  ;;  %vm16249_vm9 = vcmask 7168   ;;  %v3521_v13 = vcvt.f32.s32 %v3520_v25  ;;  %v12262_v59 = vpop.xlane.xlu0 %3275  ;;  %7798 = vmatprep.subr.bf16.mxu1 %v16022_v49 }
 0x68b   : > { %v16247_v30 = vsel %vm12251_vm8, 4294967295, %v16246_v30  ;;  %6861 = vst.msk [vmem:[%s11771_s27 + $0x88] sm:$0xff] %vm16249_vm9, %v3508_v3  ;;  %v3262_v38 = vsel %vm3261_vm10, %v11653_v27, inf  ;;  %v15150_v41 = vand.u32 4294901760, %v11328_v37  ;;  %v4241_v1 = vand.u32 4294901760, %v4240_v6  ;;  %16250 = vst [vmem:[#allocation228_spill] sm:$0xff] %v12262_v59 }
 0x68c   : > { %16248 = vst [vmem:[#allocation227_spill] sm:$0xff] %v16247_v30  ;;  %3263 = vmin.xlane.f32.xlu0 %v3262_v38  ;;  %v4250_v63 = vand.u32 4294901760, %v4249_v16  ;;  %v15149_v44 = vand.u32 4294901760, %v12233_v50  ;;  %v3524_v62 = vadd.s32 %v11655_v40, %v3521_v13  ;;  %v12264_v52 = vsub.f32 %v7283_v29, %v7283_v29  ;;  %v3536_v40 = vpop.xlane.xlu1 %3535 }
 0x68d   : > { %v12266_v25 = vsub.f32 %v7282_v53, %v7282_v53  ;;  %v7285_v27 = vsel %vm12251_vm8, 1.0, %v16128_v54  ;;  %vm12273_vm9 = vcmp.eq.s32.totalorder %v10833_v24, %v3508_v3  ;;  %v16253_v6 = vmov 0  ;;  %4242 = vmatmul.mubr.f32.gmra.mrb[20].mxu1 %v4241_v1 }
 0x68e   : > { %16251 = vst [vmem:[#allocation229_spill] sm:$0xff] %v12264_v52  ;;  %v16254_v6 = vsel %vm12273_vm9, 4294967295, %v16253_v6  ;;  %vm3277_vm10 = vcmp.eq.f32.partialorder %v11532_v11, %v12262_v59  ;;  %v4255_v47 = vsub.f32 %v12233_v50, %v15149_v44  ;;  %v12282_v29 = vsub.f32 %v7285_v27, %v7285_v27  ;;  %4251 = vmatprep.mubr.f32.mxu1 %v4250_v63  ;;  %v16264_v27 = vld [vmem:[#allocation95_spill] sm:$0xff]  ;;  %v16274_v50 = vld [vmem:[#allocation102_spill] sm:$0xff] }
 0x68f   : > { %16252 = vst [vmem:[#allocation230_spill] sm:$0xff] %v12266_v25  ;;  %16255 = vst [vmem:[#allocation231_spill] sm:$0xff] %v16254_v6  ;;  %vm12285_vm8 = vcmp.eq.s32.totalorder %v10836_v12, %v3524_v62  ;;  %v16257_v16 = vmov 0  ;;  %vm16260_vm11 = vcmask 7168   ;;  %v3537_v3 = vcvt.f32.s32 %v3536_v40  ;;  %v16458_v6 = vld [vmem:[#allocation36_spill] sm:$0xff] }
 0x690   : > { %16256 = vst [vmem:[#allocation232_spill] sm:$0xff] %v12282_v29  ;;  %v16258_v16 = vsel %vm12285_vm8, 4294967295, %v16257_v16  ;;  %6862 = vst.msk [vmem:[%s11771_s27 + $0x90] sm:$0xff] %vm16260_vm11, %v3524_v62  ;;  %v3278_v53 = vsel %vm3277_vm10, %v11660_v10, inf  ;;  %v12295_v11 = vsub.f32 %v11328_v37, %v15150_v41  ;;  %vm12298_vm12 = vcmp.eq.s32.totalorder %v10833_v24, %v3524_v62 }
 0x691   : > { %16259 = vst [vmem:[#allocation233_spill] sm:$0xff] %v16258_v16  ;;  %v16261_v13 = vmov 0  ;;  %v4256_v38 = vand.u32 4294901760, %v4255_v47  ;;  %3279 = vmin.xlane.f32.xlu1 %v3278_v53  ;;  %v15153_v1 = vand.u32 4294901760, %v12264_v52  ;;  %v15154_v63 = vand.u32 4294901760, %v12266_v25 }
 0x692   : > { %v16262_v13 = vsel %vm12298_vm12, 4294967295, %v16261_v13  ;;  %v3540_v40 = vadd.s32 %v16264_v27, %v3537_v3  ;;  %v15173_v10 = vand.u32 4294901760, %v12282_v29  ;;  %v7284_v44 = vsel %vm12273_vm9, 1.0, %v16128_v54  ;;  %v3552_v3 = vpop.xlane.xlu0 %3551 }
 0x693   : > { %16263 = vst [vmem:[#allocation234_spill] sm:$0xff] %v16262_v13  ;;  %v7287_v62 = vsel %vm12285_vm8, 1.0, %v16128_v54  ;;  %4257 = vmatmul.mubr.f32.gmra.mrb[22].mxu1 %v4256_v38  ;;  %v4264_v47 = vsub.f32 %v12264_v52, %v15153_v1  ;;  %v4270_v53 = vsub.f32 %v12266_v25, %v15154_v63  ;;  %v12318_v27 = vsub.f32 %v7284_v44, %v7284_v44 }
 0x694   : > { %v12320_v41 = vsub.f32 %v7287_v62, %v7287_v62  ;;  %vm12323_vm11 = vcmp.eq.s32.totalorder %v10833_v24, %v3540_v40  ;;  %v16267_v9 = vmov 0  ;;  %vm12328_vm10 = vcmp.eq.s32.totalorder %v10836_v12, %v3540_v40 }
 0x695   : > { %16265 = vst [vmem:[#allocation95_spill] sm:$0xff] %v12318_v27  ;;  %v16268_v9 = vsel %vm12323_vm11, 4294967295, %v16267_v9  ;;  %v16270_v38 = vmov 0  ;;  %vm16273_vm8 = vcmask 7168   ;;  %v3553_v1 = vcvt.f32.s32 %v3552_v3  ;;  %v3568_v3 = vpop.xlane.xlu1 %3567 }
 0x696   : > { %16266 = vst [vmem:[#allocation235_spill] sm:$0xff] %v12320_v41  ;;  %16269 = vst [vmem:[#allocation236_spill] sm:$0xff] %v16268_v9  ;;  %v16271_v38 = vsel %vm12328_vm10, 4294967295, %v16270_v38  ;;  %v4279_v44 = vsub.f32 %v12282_v29, %v15173_v10  ;;  %v4265_v63 = vand.u32 4294901760, %v4264_v47  ;;  %v4271_v62 = vand.u32 4294901760, %v4270_v53  ;;  %v16462_v9 = vld [vmem:[#allocation41_spill] sm:$0xff] }
 0x697   : > { %16272 = vst [vmem:[#allocation237_spill] sm:$0xff] %v16271_v38  ;;  %6863 = vst.msk [vmem:[%s11771_s27 + $0x98] sm:$0xff] %vm16273_vm8, %v3540_v40  ;;  %v15171_v25 = vand.u32 4294901760, %v12318_v27  ;;  %v15172_v52 = vand.u32 4294901760, %v12320_v41  ;;  %v3556_v42 = vadd.s32 %v16274_v50, %v3553_v1  ;;  %v7286_v37 = vsel %vm12298_vm12, 1.0, %v16128_v54 }
 0x698   : > { %v4280_v36 = vand.u32 4294901760, %v4279_v44  ;;  %v7289_v40 = vsel %vm12328_vm10, 1.0, %v16128_v54  ;;  %4266 = vmatprep.mubr.f32.mxu1 %v4265_v63  ;;  %v12352_v50 = vsub.f32 %v7286_v37, %v7286_v37  ;;  %v16277_v44 = vmov 0 }
 0x699   : > { %v4285_v47 = vsub.f32 %v12318_v27, %v15171_v25  ;;  %v4294_v53 = vsub.f32 %v12320_v41, %v15172_v52  ;;  %v12354_v1 = vsub.f32 %v7289_v40, %v7289_v40  ;;  %4272 = vmatmul.mubr.f32.gmra.mrb[24].mxu1 %v4271_v62  ;;  %vm12357_vm8 = vcmp.eq.s32.totalorder %v10833_v24, %v3556_v42  ;;  %v16284_v41 = vld [vmem:[#allocation99_spill] sm:$0xff] }
 0x69a   : > { %16275 = vst [vmem:[#allocation102_spill] sm:$0xff] %v12352_v50  ;;  %v16278_v44 = vsel %vm12357_vm8, 4294967295, %v16277_v44  ;;  %vm12362_vm10 = vcmp.eq.s32.totalorder %v10836_v12, %v3556_v42  ;;  %v16280_v63 = vmov 0  ;;  %vm16283_vm12 = vcmask 7168   ;;  %4281 = vmatprep.mubr.f32.mxu1 %v4280_v36 }
 0x69b   : > { %16276 = vst [vmem:[#allocation238_spill] sm:$0xff] %v12354_v1  ;;  %16279 = vst [vmem:[#allocation239_spill] sm:$0xff] %v16278_v44  ;;  %v16281_v63 = vsel %vm12362_vm10, 4294967295, %v16280_v63  ;;  %v3569_v25 = vcvt.f32.s32 %v3568_v3  ;;  %v7288_v37 = vsel %vm12323_vm11, 1.0, %v16128_v54  ;;  %v4286_v62 = vand.u32 4294901760, %v4285_v47  ;;  %v3584_v47 = vpop.xlane.xlu0 %3583 }
 0x69c   : > { %16282 = vst [vmem:[#allocation240_spill] sm:$0xff] %v16281_v63  ;;  %6864 = vst.msk [vmem:[%s11771_s27 + $0xa0] sm:$0xff] %vm16283_vm12, %v3556_v42  ;;  %v4295_v40 = vand.u32 4294901760, %v4294_v53  ;;  %v15186_v52 = vand.u32 4294901760, %v12352_v50  ;;  %v15187_v10 = vand.u32 4294901760, %v12354_v1  ;;  %v12374_v29 = vsub.f32 %v7288_v37, %v7288_v37 }
 0x69d   : > { %v3572_v27 = vadd.s32 %v16284_v41, %v3569_v25  ;;  %v7291_v42 = vsel %vm12362_vm10, 1.0, %v16128_v54  ;;  %v7290_v3 = vsel %vm12357_vm8, 1.0, %v16128_v54  ;;  %v16288_v37 = vmov 0  ;;  %4287 = vmatmul.mubr.f32.gmra.mrb[26].mxu1 %v4286_v62 }
 0x69e   : > { %16285 = vst [vmem:[#allocation99_spill] sm:$0xff] %v12374_v29  ;;  %v4300_v36 = vsub.f32 %v12352_v50, %v15186_v52  ;;  %v4309_v53 = vsub.f32 %v12354_v1, %v15187_v10  ;;  %v12388_v41 = vsub.f32 %v7291_v42, %v7291_v42  ;;  %v12390_v25 = vsub.f32 %v7290_v3, %v7290_v3 }
 0x69f   : > { %vm12393_vm12 = vcmp.eq.s32.totalorder %v10833_v24, %v3572_v27  ;;  %vm12398_vm10 = vcmp.eq.s32.totalorder %v10836_v12, %v3572_v27  ;;  %v16291_v21 = vmov 0  ;;  %vm16294_vm8 = vcmask 7168   ;;  %4296 = vmatprep.mubr.f32.mxu1 %v4295_v40  ;;  %v3600_v40 = vpop.xlane.xlu1 %3599 }
 0x6a0   : > { %16286 = vst [vmem:[#allocation241_spill] sm:$0xff] %v12388_v41  ;;  %16287 = vst [vmem:[#allocation242_spill] sm:$0xff] %v12390_v25  ;;  %v16289_v37 = vsel %vm12393_vm12, 4294967295, %v16288_v37  ;;  %v16292_v21 = vsel %vm12398_vm10, 4294967295, %v16291_v21  ;;  %v3585_v52 = vcvt.f32.s32 %v3584_v47  ;;  %v15200_v10 = vand.u32 4294901760, %v12374_v29 }
 0x6a1   : > { %16290 = vst [vmem:[#allocation243_spill] sm:$0xff] %v16289_v37  ;;  %16293 = vst [vmem:[#allocation244_spill] sm:$0xff] %v16292_v21  ;;  %v4301_v42 = vand.u32 4294901760, %v4300_v36  ;;  %v4310_v3 = vand.u32 4294901760, %v4309_v53  ;;  %v15203_v1 = vand.u32 4294901760, %v12388_v41  ;;  %v15206_v50 = vand.u32 4294901760, %v12390_v25 }
 0x6a2   : > { %6865 = vst.msk [vmem:[%s11771_s27 + $0xa8] sm:$0xff] %vm16294_vm8, %v3572_v27  ;;  %v3588_v15 = vadd.s32 %v16295_v43, %v3585_v52  ;;  %v4315_v28 = vsub.f32 %v12374_v29, %v15200_v10  ;;  %v7293_v27 = vsel %vm12398_vm10, 1.0, %v16128_v54  ;;  %v7292_v62 = vsel %vm12393_vm12, 1.0, %v16128_v54 }
 0x6a3   : > { %v4324_v36 = vsub.f32 %v12388_v41, %v15203_v1  ;;  %v4330_v43 = vsub.f32 %v12390_v25, %v15206_v50  ;;  %v12423_v52 = vsub.f32 %v7293_v27, %v7293_v27  ;;  %v12425_v47 = vsub.f32 %v7292_v62, %v7292_v62  ;;  %4302 = vmatmul.mubr.f32.gmra.mrb[28].mxu1 %v4301_v42  ;;  %v16305_v25 = vld [vmem:[#allocation61_spill] sm:$0xff] }
 0x6a4   : > { %vm12428_vm8 = vcmp.eq.s32.totalorder %v10833_v24, %v3588_v15  ;;  %v16298_v53 = vmov 0  ;;  %vm12433_vm10 = vcmp.eq.s32.totalorder %v10836_v12, %v3588_v15  ;;  %v16301_v10 = vmov 0  ;;  %4311 = vmatprep.mubr.f32.mxu1 %v4310_v3  ;;  %v3616_v3 = vpop.xlane.xlu0 %3615 }
 0x6a5   : > { %16296 = vst [vmem:[#allocation106_spill] sm:$0xff] %v12423_v52  ;;  %16297 = vst [vmem:[#allocation245_spill] sm:$0xff] %v12425_v47  ;;  %v16299_v53 = vsel %vm12428_vm8, 4294967295, %v16298_v53  ;;  %v16302_v10 = vsel %vm12433_vm10, 4294967295, %v16301_v10  ;;  %vm16304_vm12 = vcmask 7168   ;;  %v3601_v1 = vcvt.f32.s32 %v3600_v40 }
 0x6a6   : > { %16300 = vst [vmem:[#allocation246_spill] sm:$0xff] %v16299_v53  ;;  %16303 = vst [vmem:[#allocation247_spill] sm:$0xff] %v16302_v10  ;;  %v4316_v41 = vand.u32 4294901760, %v4315_v28  ;;  %v4325_v27 = vand.u32 4294901760, %v4324_v36  ;;  %v4331_v62 = vand.u32 4294901760, %v4330_v43  ;;  %v15216_v42 = vand.u32 4294901760, %v12423_v52 }
 0x6a7   : > { %6866 = vst.msk [vmem:[%s11771_s27 + $0xb0] sm:$0xff] %vm16304_vm12, %v3588_v15  ;;  %v15217_v50 = vand.u32 4294901760, %v12425_v47  ;;  %v3604_v29 = vadd.s32 %v16305_v25, %v3601_v1  ;;  %v7295_v59 = vsel %vm12433_vm10, 1.0, %v16128_v54  ;;  %v7294_v15 = vsel %vm12428_vm8, 1.0, %v16128_v54 }
 0x6a8   : > { %v4668_v28 = vand.u32 4294901760, %v12295_v11  ;;  %v4339_v40 = vsub.f32 %v12423_v52, %v15216_v42  ;;  %v12455_v1 = vsub.f32 %v7295_v59, %v7295_v59  ;;  %v12457_v25 = vsub.f32 %v7294_v15, %v7294_v15  ;;  %4317 = vmatmul.mubr.f32.gmra.mrb[30].mxu1 %v4316_v41  ;;  %v3632_v41 = vpop.xlane.xlu1 %3631 }
 0x6a9   : > { %v4345_v36 = vsub.f32 %v12425_v47, %v15217_v50  ;;  %vm12460_vm12 = vcmp.eq.s32.totalorder %v10833_v24, %v3604_v29  ;;  %v16308_v43 = vmov 0  ;;  %vm12465_vm10 = vcmp.eq.s32.totalorder %v10836_v12, %v3604_v29  ;;  %4326 = vmatprep.mubr.f32.mxu1 %v4325_v27 }
 0x6aa   : > { %16306 = vst [vmem:[#allocation61_spill] sm:$0xff] %v12455_v1  ;;  %16307 = vst [vmem:[#allocation248_spill] sm:$0xff] %v12457_v25  ;;  %v16309_v43 = vsel %vm12460_vm12, 4294967295, %v16308_v43  ;;  %v16311_v11 = vmov 0  ;;  %vm16314_vm8 = vcmask 7168   ;;  %v3617_v42 = vcvt.f32.s32 %v3616_v3 }
 0x6ab   : > { %16310 = vst [vmem:[#allocation249_spill] sm:$0xff] %v16309_v43  ;;  %v16312_v11 = vsel %vm12465_vm10, 4294967295, %v16311_v11  ;;  %6867 = vst.msk [vmem:[%s11771_s27 + $0xb8] sm:$0xff] %vm16314_vm8, %v3604_v29  ;;  %v16315_v50 = vand.u32 4294901760, %v12199_v19  ;;  %v4340_v15 = vand.u32 4294901760, %v4339_v40  ;;  %v4346_v47 = vand.u32 4294901760, %v4345_v36 }
 0x6ac   : > { %16313 = vst [vmem:[#allocation250_spill] sm:$0xff] %v16312_v11  ;;  %v15232_v52 = vand.u32 4294901760, %v12455_v1  ;;  %v15231_v46 = vand.u32 4294901760, %v12457_v25  ;;  %v3620_v2 = vadd.s32 %v16316_v22, %v3617_v42  ;;  %v7297_v10 = vsel %vm12465_vm10, 1.0, %v16128_v54  ;;  %v16317_v19 = vld [vmem:[#allocation179_spill] sm:$0xff]  ;;  %4332 = vmatmul.mubr.f32.gmra.mrb[32].mxu1 %v4331_v62 }
 0x6ad   : > { %v7799_v59 = vpack.c.bf16 %v4668_v28, %v16315_v50  ;;  %v7296_v29 = vsel %vm12460_vm12, 1.0, %v16128_v54  ;;  %v15237_v50 = vand.u32 4294901760, %v16317_v19  ;;  %v12489_v42 = vsub.f32 %v7297_v10, %v7297_v10  ;;  %4341 = vmatprep.mubr.f32.mxu1 %v4340_v15 }
 0x6ae   : > { %v4354_v27 = vsub.f32 %v12455_v1, %v15232_v52  ;;  %v4360_v22 = vsub.f32 %v12457_v25, %v15231_v46  ;;  %v12491_v28 = vsub.f32 %v7296_v29, %v7296_v29  ;;  %vm12495_vm8 = vcmp.eq.s32.totalorder %v10833_v24, %v3620_v2  ;;  %v16327_v52 = vld [vmem:[#allocation107_spill] sm:$0xff] }
 0x6af   : > { %7800 = vmatpush1.bf16.msra.mxu1 %v7799_v59  ;;  %16318 = vst [vmem:[#allocation108_spill] sm:$0xff] %v12489_v42  ;;  %v16320_v3 = vmov 0  ;;  %vm12500_vm10 = vcmp.eq.s32.totalorder %v10836_v12, %v3620_v2  ;;  %v16323_v40 = vmov 0  ;;  %vm16326_vm12 = vcmask 7168  }
 0x6b0   : > { %16319 = vst [vmem:[#allocation251_spill] sm:$0xff] %v12491_v28  ;;  %7801 = vmatprep.subr.bf16.mxu1 %v16022_v49  ;;  %v16321_v3 = vsel %vm12495_vm8, 4294967295, %v16320_v3  ;;  %v16324_v40 = vsel %vm12500_vm10, 4294967295, %v16323_v40  ;;  %6868 = vst.msk [vmem:[%s11771_s27 + $0xc0] sm:$0xff] %vm16326_vm12, %v3620_v2  ;;  %v3633_v36 = vcvt.f32.s32 %v3632_v41  ;;  %v4674_v10 = vsub.f32 %v16317_v19, %v15237_v50  ;;  %v3648_v50 = vpop.xlane.xlu0 %3647  ;;  %4347 = vmatmul.mubr.f32.gmra.mrb[34].mxu1 %v4346_v47 }
 0x6b1   : > { %16322 = vst [vmem:[#allocation252_spill] sm:$0xff] %v16321_v3  ;;  %16325 = vst [vmem:[#allocation253_spill] sm:$0xff] %v16324_v40  ;;  %v4355_v62 = vand.u32 4294901760, %v4354_v27  ;;  %v4361_v59 = vand.u32 4294901760, %v4360_v22  ;;  %v15242_v29 = vand.u32 4294901760, %v12489_v42  ;;  %v15245_v46 = vand.u32 4294901760, %v12491_v28 }
 0x6b2   : > { %v3636_v25 = vadd.s32 %v16327_v52, %v3633_v36  ;;  %v7299_v1 = vsel %vm12500_vm10, 1.0, %v16128_v54  ;;  %v7298_v2 = vsel %vm12495_vm8, 1.0, %v16128_v54  ;;  %v4675_v41 = vand.u32 4294901760, %v4674_v10  ;;  %v16338_v40 = vld [vmem:[#allocation112_spill] sm:$0xff] }
 0x6b3   : > { %v4369_v15 = vsub.f32 %v12489_v42, %v15242_v29  ;;  %v4375_v27 = vsub.f32 %v12491_v28, %v15245_v46  ;;  %v12524_v22 = vsub.f32 %v7299_v1, %v7299_v1  ;;  %v12526_v52 = vsub.f32 %v7298_v2, %v7298_v2  ;;  %v16337_v42 = vld [vmem:[#allocation180_spill] sm:$0xff]  ;;  %4356 = vmatprep.mubr.f32.mxu1 %v4355_v62 }
 0x6b4   : > { %vm12529_vm12 = vcmp.eq.s32.totalorder %v10833_v24, %v3636_v25  ;;  %v16330_v36 = vmov 0  ;;  %vm12534_vm10 = vcmp.eq.s32.totalorder %v10836_v12, %v3636_v25  ;;  %v16333_v10 = vmov 0  ;;  %4362 = vmatmul.mubr.f32.gmra.mrb[36].mxu1 %v4361_v59 }
 0x6b5   : > { %16328 = vst [vmem:[#allocation107_spill] sm:$0xff] %v12524_v22  ;;  %16329 = vst [vmem:[#allocation254_spill] sm:$0xff] %v12526_v52  ;;  %v16331_v36 = vsel %vm12529_vm12, 4294967295, %v16330_v36  ;;  %v16334_v10 = vsel %vm12534_vm10, 4294967295, %v16333_v10  ;;  %vm16336_vm8 = vcmask 7168   ;;  %v3649_v29 = vcvt.f32.s32 %v3648_v50  ;;  %v3664_v50 = vpop.xlane.xlu1 %3663 }
 0x6b6   : > { %16332 = vst [vmem:[#allocation255_spill] sm:$0xff] %v16331_v36  ;;  %16335 = vst [vmem:[#allocation256_spill] sm:$0xff] %v16334_v10  ;;  %v15257_v46 = vand.u32 4294901760, %v16337_v42  ;;  %v4370_v1 = vand.u32 4294901760, %v4369_v15  ;;  %v4376_v2 = vand.u32 4294901760, %v4375_v27  ;;  %v15260_v28 = vand.u32 4294901760, %v12524_v22 }
 0x6b7   : > { %6869 = vst.msk [vmem:[%s11771_s27 + $0xc8] sm:$0xff] %vm16336_vm8, %v3636_v25  ;;  %v15263_v19 = vand.u32 4294901760, %v12526_v52  ;;  %v3652_v3 = vadd.s32 %v16338_v40, %v3649_v29  ;;  %v7301_v11 = vsel %vm12534_vm10, 1.0, %v16128_v54  ;;  %v7300_v47 = vsel %vm12529_vm12, 1.0, %v16128_v54 }
 0x6b8   : > { %v4681_v25 = vsub.f32 %v16337_v42, %v15257_v46  ;;  %v4384_v62 = vsub.f32 %v12524_v22, %v15260_v28  ;;  %v12559_v29 = vsub.f32 %v7301_v11, %v7301_v11  ;;  %v12561_v15 = vsub.f32 %v7300_v47, %v7300_v47  ;;  %4371 = vmatprep.mubr.f32.mxu1 %v4370_v1 }
 0x6b9   : > { %v4390_v40 = vsub.f32 %v12526_v52, %v15263_v19  ;;  %vm12564_vm8 = vcmp.eq.s32.totalorder %v10833_v24, %v3652_v3  ;;  %v16341_v27 = vmov 0  ;;  %vm12569_vm10 = vcmp.eq.s32.totalorder %v10836_v12, %v3652_v3  ;;  %v16348_v52 = vld [vmem:[#allocation68_spill] sm:$0xff]  ;;  %4377 = vmatmul.mubr.f32.gmra.mrb[38].mxu1 %v4376_v2 }
 0x6ba   : > { %16339 = vst [vmem:[#allocation112_spill] sm:$0xff] %v12559_v29  ;;  %16340 = vst [vmem:[#allocation257_spill] sm:$0xff] %v12561_v15  ;;  %v16342_v27 = vsel %vm12564_vm8, 4294967295, %v16341_v27  ;;  %v16344_v46 = vmov 0  ;;  %vm16347_vm12 = vcmask 7168   ;;  %v3665_v28 = vcvt.f32.s32 %v3664_v50 }
 0x6bb   : > { %16343 = vst [vmem:[#allocation258_spill] sm:$0xff] %v16342_v27  ;;  %v16345_v46 = vsel %vm12569_vm10, 4294967295, %v16344_v46  ;;  %6870 = vst.msk [vmem:[%s11771_s27 + $0xd0] sm:$0xff] %vm16347_vm12, %v3652_v3  ;;  %v4682_v22 = vand.u32 4294901760, %v4681_v25  ;;  %v4385_v11 = vand.u32 4294901760, %v4384_v62  ;;  %v4391_v47 = vand.u32 4294901760, %v4390_v40  ;;  %v3680_v25 = vpop.xlane.xlu0 %3679 }
 0x6bc   : > { %16346 = vst [vmem:[#allocation259_spill] sm:$0xff] %v16345_v46  ;;  %v15273_v59 = vand.u32 4294901760, %v12559_v29  ;;  %v15274_v19 = vand.u32 4294901760, %v12561_v15  ;;  %v3668_v42 = vadd.s32 %v16348_v52, %v3665_v28  ;;  %v7303_v10 = vsel %vm12569_vm10, 1.0, %v16128_v54 }
 0x6bd   : > { %v7302_v3 = vsel %vm12564_vm8, 1.0, %v16128_v54  ;;  %v7802_v50 = vpack.c.bf16 %v4682_v22, %v4675_v41  ;;  %v12590_v40 = vsub.f32 %v7303_v10, %v7303_v10  ;;  %v16351_v52 = vmov 0  ;;  %4386 = vmatprep.mubr.f32.mxu1 %v4385_v11  ;;  %v3696_v11 = vpop.xlane.xlu1 %3695 }
 0x6be   : > { %v4399_v1 = vsub.f32 %v12559_v29, %v15273_v59  ;;  %v4405_v62 = vsub.f32 %v12561_v15, %v15274_v19  ;;  %v12592_v28 = vsub.f32 %v7302_v3, %v7302_v3  ;;  %vm12595_vm12 = vcmp.eq.s32.totalorder %v10833_v24, %v3668_v42  ;;  %v16358_v59 = vld [vmem:[#allocation182_spill] sm:$0xff]  ;;  %4392 = vmatmul.mubr.f32.gmra.mrb[40].mxu1 %v4391_v47 }
 0x6bf   : > { %16349 = vst [vmem:[#allocation68_spill] sm:$0xff] %v12590_v40  ;;  %v16352_v52 = vsel %vm12595_vm12, 4294967295, %v16351_v52  ;;  %vm12600_vm10 = vcmp.eq.s32.totalorder %v10836_v12, %v3668_v42  ;;  %v16354_v41 = vmov 0  ;;  %vm16357_vm8 = vcmask 7168   ;;  %7803 = vmatpush1.bf16.msra.mxu1 %v7802_v50 }
 0x6c0   : > { %16350 = vst [vmem:[#allocation260_spill] sm:$0xff] %v12592_v28  ;;  %16353 = vst [vmem:[#allocation261_spill] sm:$0xff] %v16352_v52  ;;  %v16355_v41 = vsel %vm12600_vm10, 4294967295, %v16354_v41  ;;  %v3681_v22 = vcvt.f32.s32 %v3680_v25  ;;  %v15288_v19 = vand.u32 4294901760, %v16358_v59  ;;  %v4400_v10 = vand.u32 4294901760, %v4399_v1  ;;  %7804 = vmatprep.subr.bf16.mxu1 %v16022_v49 }
 0x6c1   : > { %16356 = vst [vmem:[#allocation262_spill] sm:$0xff] %v16355_v41  ;;  %6871 = vst.msk [vmem:[%s11771_s27 + $0xd8] sm:$0xff] %vm16357_vm8, %v3668_v42  ;;  %v4406_v3 = vand.u32 4294901760, %v4405_v62  ;;  %v15287_v15 = vand.u32 4294901760, %v12590_v40  ;;  %v15289_v29 = vand.u32 4294901760, %v12592_v28  ;;  %v7305_v27 = vsel %vm12600_vm10, 1.0, %v16128_v54 }
 0x6c2   : > { %v3684_v46 = vadd.s32 %v11734_v48, %v3681_v22  ;;  %v7304_v42 = vsel %vm12595_vm12, 1.0, %v16128_v54  ;;  %v4688_v2 = vsub.f32 %v16358_v59, %v15288_v19  ;;  %v12626_v25 = vsub.f32 %v7305_v27, %v7305_v27  ;;  %4401 = vmatprep.mubr.f32.mxu1 %v4400_v10  ;;  %v3712_v10 = vpop.xlane.xlu0 %3711 }
 0x6c3   : > { %v4414_v50 = vsub.f32 %v12590_v40, %v15287_v15  ;;  %v4420_v48 = vsub.f32 %v12592_v28, %v15289_v29  ;;  %v12628_v1 = vsub.f32 %v7304_v42, %v7304_v42  ;;  %v16361_v62 = vmov 0  ;;  %4407 = vmatmul.mubr.f32.gmra.mrb[42].mxu1 %v4406_v3 }
 0x6c4   : > { %16359 = vst [vmem:[#allocation263_spill] sm:$0xff] %v12626_v25  ;;  %vm12631_vm8 = vcmp.eq.s32.totalorder %v10833_v24, %v3684_v46  ;;  %vm12636_vm10 = vcmp.eq.s32.totalorder %v10836_v12, %v3684_v46  ;;  %v16364_v22 = vmov 0  ;;  %vm16367_vm12 = vcmask 7168  }
 0x6c5   : > { %16360 = vst [vmem:[#allocation264_spill] sm:$0xff] %v12628_v1  ;;  %v16362_v62 = vsel %vm12631_vm8, 4294967295, %v16361_v62  ;;  %v16365_v22 = vsel %vm12636_vm10, 4294967295, %v16364_v22  ;;  %6872 = vst.msk [vmem:[%s11771_s27 + $0xe0] sm:$0xff] %vm16367_vm12, %v3684_v46  ;;  %v3697_v15 = vcvt.f32.s32 %v3696_v11  ;;  %v4689_v19 = vand.u32 4294901760, %v4688_v2  ;;  %v16368_v11 = vld [vmem:[#allocation183_spill] sm:$0xff] }
 0x6c6   : > { %16363 = vst [vmem:[#allocation265_spill] sm:$0xff] %v16362_v62  ;;  %16366 = vst [vmem:[#allocation266_spill] sm:$0xff] %v16365_v22  ;;  %v4415_v27 = vand.u32 4294901760, %v4414_v50  ;;  %v4421_v42 = vand.u32 4294901760, %v4420_v48  ;;  %v15299_v47 = vand.u32 4294901760, %v12626_v25  ;;  %v15300_v29 = vand.u32 4294901760, %v12628_v1 }
 0x6c7   : > { %v3700_v28 = vadd.s32 %v11736_v51, %v3697_v15  ;;  %v7307_v40 = vsel %vm12636_vm10, 1.0, %v16128_v54  ;;  %v7306_v46 = vsel %vm12631_vm8, 1.0, %v16128_v54  ;;  %v16371_v59 = vmov 0 }
 0x6c8   : > { %v4429_v50 = vsub.f32 %v12626_v25, %v15299_v47  ;;  %v4435_v48 = vsub.f32 %v12628_v1, %v15300_v29  ;;  %v12658_v51 = vsub.f32 %v7307_v40, %v7307_v40  ;;  %v12660_v15 = vsub.f32 %v7306_v46, %v7306_v46  ;;  %4416 = vmatprep.mubr.f32.mxu1 %v4415_v27 }
 0x6c9   : > { %vm12663_vm12 = vcmp.eq.s32.totalorder %v10833_v24, %v3700_v28  ;;  %vm12668_vm10 = vcmp.eq.s32.totalorder %v10836_v12, %v3700_v28  ;;  %v16374_v2 = vmov 0  ;;  %vm16377_vm8 = vcmask 7168   ;;  %4422 = vmatmul.mubr.f32.gmra.mrb[44].mxu1 %v4421_v42 }
 0x6ca   : > { %16369 = vst [vmem:[#allocation267_spill] sm:$0xff] %v12658_v51  ;;  %16370 = vst [vmem:[#allocation268_spill] sm:$0xff] %v12660_v15  ;;  %v16372_v59 = vsel %vm12663_vm12, 4294967295, %v16371_v59  ;;  %v16375_v2 = vsel %vm12668_vm10, 4294967295, %v16374_v2  ;;  %v3713_v47 = vcvt.f32.s32 %v3712_v10  ;;  %v16378_v29 = vand.u32 4294901760, %v16368_v11 }
 0x6cb   : > { %16373 = vst [vmem:[#allocation269_spill] sm:$0xff] %v16372_v59  ;;  %16376 = vst [vmem:[#allocation270_spill] sm:$0xff] %v16375_v2  ;;  %v4430_v46 = vand.u32 4294901760, %v4429_v50  ;;  %v4436_v1 = vand.u32 4294901760, %v4435_v48  ;;  %v15313_v25 = vand.u32 4294901760, %v12658_v51  ;;  %v15316_v22 = vand.u32 4294901760, %v12660_v15 }
 0x6cc   : > { %6873 = vst.msk [vmem:[%s11771_s27 + $0xe8] sm:$0xff] %vm16377_vm8, %v3700_v28  ;;  %v4695_v40 = vsub.f32 %v16368_v11, %v16378_v29  ;;  %v3716_v62 = vadd.s32 %v11738_v45, %v3713_v47  ;;  %v7309_v28 = vsel %vm12668_vm10, 1.0, %v16128_v54  ;;  %v7308_v3 = vsel %vm12663_vm12, 1.0, %v16128_v54  ;;  %v3728_v29 = vpop.xlane.xlu1 %3727 }
 0x6cd   : > { %v4444_v27 = vsub.f32 %v12658_v51, %v15313_v25  ;;  %v4450_v50 = vsub.f32 %v12660_v15, %v15316_v22  ;;  %v12692_v48 = vsub.f32 %v7309_v28, %v7309_v28  ;;  %v12694_v45 = vsub.f32 %v7308_v3, %v7308_v3  ;;  %4431 = vmatprep.mubr.f32.mxu1 %v4430_v46 }
 0x6ce   : > { %v4696_v10 = vand.u32 4294901760, %v4695_v40  ;;  %vm12697_vm8 = vcmp.eq.s32.totalorder %v10833_v24, %v3716_v62  ;;  %v16381_v47 = vmov 0  ;;  %vm12702_vm10 = vcmp.eq.s32.totalorder %v10836_v12, %v3716_v62  ;;  %4437 = vmatmul.mubr.f32.gmra.mrb[46].mxu1 %v4436_v1 }
 0x6cf   : > { %16379 = vst [vmem:[#allocation271_spill] sm:$0xff] %v12692_v48  ;;  %16380 = vst [vmem:[#allocation272_spill] sm:$0xff] %v12694_v45  ;;  %v16382_v47 = vsel %vm12697_vm8, 4294967295, %v16381_v47  ;;  %v16384_v40 = vmov 0  ;;  %vm16387_vm12 = vcmask 7168   ;;  %v3729_v25 = vcvt.f32.s32 %v3728_v29 }
 0x6d0   : > { %16383 = vst [vmem:[#allocation273_spill] sm:$0xff] %v16382_v47  ;;  %v16385_v40 = vsel %vm12702_vm10, 4294967295, %v16384_v40  ;;  %6874 = vst.msk [vmem:[%s11771_s27 + $0xf0] sm:$0xff] %vm16387_vm12, %v3716_v62  ;;  %v7805_v51 = vpack.c.bf16 %v4696_v10, %v4689_v19  ;;  %v4445_v28 = vand.u32 4294901760, %v4444_v27  ;;  %v4451_v3 = vand.u32 4294901760, %v4450_v50  ;;  %v16388_v19 = vld [vmem:[#allocation185_spill] sm:$0xff] }
 0x6d1   : > { %16386 = vst [vmem:[#allocation274_spill] sm:$0xff] %v16385_v40  ;;  %v15325_v42 = vand.u32 4294901760, %v12692_v48  ;;  %v15324_v22 = vand.u32 4294901760, %v12694_v45  ;;  %v3732_v15 = vadd.s32 %v12228_v31, %v3729_v25  ;;  %v7311_v11 = vsel %vm12702_vm10, 1.0, %v16128_v54  ;;  %v16398_v50 = vld [vmem:[#allocation186_spill] sm:$0xff] }
 0x6d2   : > { %v7310_v62 = vsel %vm12697_vm8, 1.0, %v16128_v54  ;;  %7806 = vmatpush1.bf16.msra.mxu1 %v7805_v51  ;;  %v15330_v46 = vand.u32 4294901760, %v16388_v19  ;;  %v12724_v31 = vsub.f32 %v7311_v11, %v7311_v11  ;;  %v16391_v27 = vmov 0  ;;  %4446 = vmatprep.mubr.f32.mxu1 %v4445_v28 }
 0x6d3   : > { %v4459_v10 = vsub.f32 %v12692_v48, %v15325_v42  ;;  %v4465_v29 = vsub.f32 %v12694_v45, %v15324_v22  ;;  %v12726_v25 = vsub.f32 %v7310_v62, %v7310_v62  ;;  %7807 = vmatprep.subr.bf16.mxu1 %v16022_v49  ;;  %vm12730_vm12 = vcmp.eq.s32.totalorder %v10833_v24, %v3732_v15 }
 0x6d4   : > { %16389 = vst [vmem:[#allocation275_spill] sm:$0xff] %v12724_v31  ;;  %v16392_v27 = vsel %vm12730_vm12, 4294967295, %v16391_v27  ;;  %vm12735_vm10 = vcmp.eq.s32.totalorder %v10836_v12, %v3732_v15  ;;  %v16394_v51 = vmov 0  ;;  %vm16397_vm8 = vcmask 7168   ;;  %4452 = vmatmul.mubr.f32.gmra.mrb[48].mxu1 %v4451_v3 }
 0x6d5   : > { %16390 = vst [vmem:[#allocation276_spill] sm:$0xff] %v12726_v25  ;;  %16393 = vst [vmem:[#allocation277_spill] sm:$0xff] %v16392_v27  ;;  %v16395_v51 = vsel %vm12735_vm10, 4294967295, %v16394_v51  ;;  %v4702_v11 = vsub.f32 %v16388_v19, %v15330_v46  ;;  %v15343_v62 = vand.u32 4294901760, %v16398_v50  ;;  %v4460_v22 = vand.u32 4294901760, %v4459_v10  ;;  %v16402_v27 = vld [vmem:[#allocation188_spill] sm:$0xff] }
 0x6d6   : > { %16396 = vst [vmem:[#allocation278_spill] sm:$0xff] %v16395_v51  ;;  %6875 = vst.msk [vmem:[%s11771_s27 + $0xf8] sm:$0xff] %vm16397_vm8, %v3732_v15  ;;  %v15345_v42 = vand.u32 4294901760, %v12724_v31  ;;  %v15348_v45 = vand.u32 4294901760, %v12726_v25  ;;  %v7313_v48 = vsel %vm12735_vm10, 1.0, %v16128_v54  ;;  %v7312_v1 = vsel %vm12730_vm12, 1.0, %v16128_v54 }
 0x6d7   : > { %v4703_v15 = vand.u32 4294901760, %v4702_v11  ;;  %v4709_v46 = vsub.f32 %v16398_v50, %v15343_v62  ;;  %v12762_v19 = vsub.f32 %v7313_v48, %v7313_v48  ;;  %v12764_v12 = vsub.f32 %v7312_v1, %v7312_v1  ;;  %v16401_v11 = vld [vmem:[#allocation187_spill] sm:$0xff]  ;;  %4461 = vmatprep.mubr.f32.mxu1 %v4460_v22  ;;  %v16403_v22 = vld [vmem:[#allocation52_spill] sm:$0xff] }
 0x6d8   : > { %v4474_v28 = vsub.f32 %v12724_v31, %v15345_v42  ;;  %v4480_v10 = vsub.f32 %v12726_v25, %v15348_v45  ;;  %v4466_v24 = vand.u32 4294901760, %v4465_v29  ;;  %v15349_v51 = vand.u32 4294901760, %v16401_v11  ;;  %v16722_v1 = vld [vmem:[#allocation200_spill] sm:$0xff] }
 0x6d9   : > { %16399 = vst [vmem:[#allocation279_spill] sm:$0xff] %v12762_v19  ;;  %16400 = vst [vmem:[#allocation280_spill] sm:$0xff] %v12764_v12  ;;  %v4710_v54 = vand.u32 4294901760, %v4709_v46  ;;  %v15352_v40 = vand.u32 4294901760, %v16402_v27  ;;  %v15354_v50 = vand.u32 4294901760, %v12762_v19  ;;  %v15358_v42 = vand.u32 4294901760, %v12764_v12 }
 0x6da   : > { %v4475_v62 = vand.u32 4294901760, %v4474_v28  ;;  %v4716_v48 = vsub.f32 %v16401_v11, %v15349_v51  ;;  %v4481_v46 = vand.u32 4294901760, %v4480_v10  ;;  %v6659_v28 = vsel %vm11761_vm13, -inf, %v16403_v22  ;;  %4467 = vmatmul.mubr.f32.gmra.mrb[50].mxu1 %v4466_v24  ;;  %v16405_v51 = vld [vmem:[#allocation19_spill] sm:$0xff]  ;;  %v16409_v11 = vld [vmem:[#allocation76_spill] sm:$0xff] }
 0x6db   : > { %v7808_v31 = vpack.c.bf16 %v4710_v54, %v4703_v15  ;;  %v4723_v3 = vsub.f32 %v16402_v27, %v15352_v40  ;;  %v4489_v29 = vsub.f32 %v12762_v19, %v15354_v50  ;;  %v4495_v54 = vsub.f32 %v12764_v12, %v15358_v42  ;;  %v16407_v50 = vld [vmem:[#allocation73_spill] sm:$0xff]  ;;  %v16713_v19 = vld [vmem:[#allocation58_spill] sm:$0xff] }
 0x6dc   : > { %v4717_v15 = vand.u32 4294901760, %v4716_v48  ;;  %v6660_v40 = vsel %vm11766_vm14, -inf, %v16405_v51  ;;  %4476 = vmatprep.mubr.f32.mxu1 %v4475_v62  ;;  %v6661_v22 = vsel %vm11799_vm15, -inf, %v16407_v50  ;;  %v6662_v48 = vsel %vm11804_vm0, -inf, %v16409_v11  ;;  %v16412_v62 = vld [vmem:[#allocation80_spill] sm:$0xff]  ;;  %v16413_v50 = vld [vmem:[#allocation82_spill] sm:$0xff] }
 0x6dd   : > { %v4724_v45 = vand.u32 4294901760, %v4723_v3  ;;  %v4490_v10 = vand.u32 4294901760, %v4489_v29  ;;  %7809 = vmatpush1.bf16.msra.mxu1 %v7808_v31  ;;  %v12788_v27 = vmax.f32 %v6659_v28, %v6660_v40  ;;  %v16411_v3 = vld [vmem:[#allocation77_spill] sm:$0xff]  ;;  %v6664_v40 = vsel %vm11842_vm2, -inf, %v16412_v62  ;;  %v16414_v28 = vld [vmem:[#allocation50_spill] sm:$0xff] }
 0x6de   : > { %7810 = vmatprep.subr.bf16.mxu1 %v16022_v49  ;;  %v6663_v51 = vsel %vm11837_vm1, -inf, %v16411_v3  ;;  %v12803_v31 = vmax.f32 %v6661_v22, %v6662_v48  ;;  %v6666_v11 = vsel %vm11879_vm4, -inf, %v16414_v28  ;;  %4482 = vmatmul.mubr.f32.gmra.mrb[52].mxu1 %v4481_v46  ;;  %v16415_v3 = vld [vmem:[#allocation54_spill] sm:$0xff]  ;;  %v16416_v22 = vld [vmem:[#allocation84_spill] sm:$0xff]  ;;  %vm16419_vm8 = vnez %v16172_v39  ;;  %v16717_v42 = vld [vmem:[#allocation173_spill] sm:$0xff] }
 0x6df   : > { %v7811_v24 = vpack.c.bf16 %v4724_v45, %v4717_v15  ;;  %v12805_v29 = vmax.f32 %v6663_v51, %v6664_v40  ;;  %v6665_v45 = vsel %vm11874_vm3, -inf, %v16413_v50  ;;  %v4496_v15 = vand.u32 4294901760, %v4495_v54  ;;  %4491 = vmatprep.mubr.f32.mxu1 %v4490_v10  ;;  %v16417_v40 = vld [vmem:[#allocation87_spill] sm:$0xff]  ;;  %v16418_v46 = vld [vmem:[#allocation88_spill] sm:$0xff]  ;;  %v16422_v10 = vld [vmem:[#allocation30_spill] sm:$0xff] }
 0x6e0   : > { %v12813_v12 = vmax.f32 %v6665_v45, %v6666_v11  ;;  %v6667_v62 = vsel %vm11910_vm5, -inf, %v16415_v3  ;;  %v6668_v48 = vsel %vm11915_vm6, -inf, %v16416_v22  ;;  %v6669_v50 = vsel %vm11945_vm7, -inf, %v16417_v40  ;;  %v16420_v45 = vld [vmem:[#allocation90_spill] sm:$0xff]  ;;  %v16424_v3 = vld [vmem:[#allocation32_spill] sm:$0xff]  ;;  %v16426_v22 = vld [vmem:[#allocation39_spill] sm:$0xff] }
 0x6e1   : > { %7812 = vmatpush1.bf16.msra.mxu1 %v7811_v24  ;;  %v12821_v51 = vmax.f32 %v6667_v62, %v6668_v48  ;;  %v6670_v54 = vsel %vm16419_vm8, -inf, %v16418_v46  ;;  %vm16421_vm3 = vnez %v16179_v8  ;;  %vm16423_vm5 = vnez %v16182_v56 }
 0x6e2   : > { %v6671_v28 = vsel %vm16421_vm3, -inf, %v16420_v45  ;;  %7813 = vmatprep.subr.bf16.mxu1 %v16022_v49  ;;  %v12833_v11 = vmax.f32 %v6669_v50, %v6670_v54  ;;  %v6672_v24 = vsel %vm16423_vm5, -inf, %v16422_v10  ;;  %vm16425_vm6 = vnez %v16188_v58  ;;  %v16428_v45 = vld [vmem:[#allocation94_spill] sm:$0xff]  ;;  %v16430_v54 = vld [vmem:[#allocation43_spill] sm:$0xff]  ;;  %4497 = vmatmul.mubr.f32.gmra.mrb[54].mxu1 %v4496_v15 }
 0x6e3   : > { %v6673_v62 = vsel %vm16425_vm6, -inf, %v16424_v3  ;;  %vm16427_vm7 = vnez %v16191_v23  ;;  %v12844_v40 = vmax.f32 %v6671_v28, %v6672_v24  ;;  %vm16429_vm3 = vnez %v16197_v7  ;;  %v16432_v3 = vld [vmem:[#allocation96_spill] sm:$0xff] }
 0x6e4   : > { %v6674_v48 = vsel %vm16427_vm7, -inf, %v16426_v22  ;;  %v6675_v50 = vsel %vm16429_vm3, -inf, %v16428_v45  ;;  %vm16431_vm8 = vnez %v16200_v61  ;;  %vm16433_vm6 = vnez %v16207_v26  ;;  %v16434_v22 = vld [vmem:[#allocation48_spill] sm:$0xff] }
 0x6e5   : > { %v12846_v46 = vmax.f32 %v6673_v62, %v6674_v48  ;;  %v6676_v10 = vsel %vm16431_vm8, -inf, %v16430_v54  ;;  %v6677_v58 = vsel %vm16433_vm6, -inf, %v16432_v3  ;;  %vm16435_vm7 = vnez %v16210_v57  ;;  %v16436_v62 = vld [vmem:[#allocation98_spill] sm:$0xff]  ;;  %v16438_v45 = vld [vmem:[#allocation100_spill] sm:$0xff] }
 0x6e6   : > { %v12854_v8 = vmax.f32 %v6675_v50, %v6676_v10  ;;  %v6678_v28 = vsel %vm16435_vm7, -inf, %v16434_v22  ;;  %vm16437_vm3 = vnez %v16217_v0  ;;  %vm16439_vm8 = vnez %v16220_v55  ;;  %v16440_v50 = vld [vmem:[#allocation103_spill] sm:$0xff]  ;;  %v16442_v3 = vld [vmem:[#allocation60_spill] sm:$0xff] }
 0x6e7   : > { %v12862_v24 = vmax.f32 %v6677_v58, %v6678_v28  ;;  %v6679_v48 = vsel %vm16437_vm3, -inf, %v16436_v62  ;;  %v6680_v15 = vsel %vm16439_vm8, -inf, %v16438_v45  ;;  %vm16441_vm5 = vnez %v16226_v32  ;;  %v16444_v58 = vld [vmem:[#allocation105_spill] sm:$0xff]  ;;  %v16446_v0 = vld [vmem:[#allocation63_spill] sm:$0xff]  ;;  %v16448_v32 = vld [vmem:[#allocation64_spill] sm:$0xff] }
 0x6e8   : > { %v6681_v54 = vsel %vm16441_vm5, -inf, %v16440_v50  ;;  %v12873_v10 = vmax.f32 %v6679_v48, %v6680_v15  ;;  %vm16443_vm6 = vnez %v16229_v35  ;;  %vm16445_vm7 = vnez %v16237_v33  ;;  %v16449_v15 = vld [vmem:[#allocation65_spill] sm:$0xff]  ;;  %v16453_v33 = vld [vmem:[#allocation22_spill] sm:$0xff] }
 0x6e9   : > { %v6682_v22 = vsel %vm16443_vm6, -inf, %v16442_v3  ;;  %v6683_v28 = vsel %vm16445_vm7, -inf, %v16444_v58  ;;  %vm16447_vm3 = vnez %v16240_v60  ;;  %v6685_v48 = vsel %vm12273_vm9, -inf, %v16448_v32  ;;  %v16451_v3 = vld [vmem:[#allocation21_spill] sm:$0xff]  ;;  %v16456_v32 = vld [vmem:[#allocation35_spill] sm:$0xff]  ;;  %v16543_v35 = vld [vmem:[#allocation146_spill] sm:$0xff] }
 0x6ea   : > { %v6684_v62 = vsel %vm16447_vm3, -inf, %v16446_v0  ;;  %v12884_v55 = vmax.f32 %v6681_v54, %v6682_v22  ;;  %vm16450_vm5 = vnez %v16247_v30  ;;  %vm16452_vm6 = vnez %v16262_v13  ;;  %v16455_v54 = vld [vmem:[#allocation26_spill] sm:$0xff]  ;;  %v16529_v60 = vld [vmem:[#allocation79_spill] sm:$0xff] }
 0x6eb   : > { %v12886_v45 = vmax.f32 %v6683_v28, %v6684_v62  ;;  %v6686_v50 = vsel %vm16450_vm5, -inf, %v16449_v15  ;;  %v6687_v58 = vsel %vm16452_vm6, -inf, %v16451_v3  ;;  %vm16454_vm7 = vnez %v16258_v16  ;;  %v16460_v16 = vld [vmem:[#allocation40_spill] sm:$0xff] }
 0x6ec   : > { %v6688_v0 = vsel %vm16454_vm7, -inf, %v16453_v33  ;;  %v6689_v22 = vsel %vm12323_vm11, -inf, %v16455_v54  ;;  %v12903_v28 = vmax.f32 %v6685_v48, %v6686_v50  ;;  %vm16457_vm9 = vnez %v16271_v38  ;;  %v16466_v54 = vld [vmem:[#allocation67_spill] sm:$0xff] }
 0x6ed   : > { %v12905_v62 = vmax.f32 %v6687_v58, %v6688_v0  ;;  %v6690_v15 = vsel %vm16457_vm9, -inf, %v16456_v32  ;;  %vm16459_vm5 = vnez %v16278_v44  ;;  %vm16461_vm6 = vnez %v16281_v63  ;;  %v16464_v58 = vld [vmem:[#allocation109_spill] sm:$0xff]  ;;  %v16469_v32 = vld [vmem:[#allocation247_spill] sm:$0xff] }
 0x6ee   : > { %v6691_v3 = vsel %vm16459_vm5, -inf, %v16458_v6  ;;  %v12913_v13 = vmax.f32 %v6689_v22, %v6690_v15  ;;  %v6692_v33 = vsel %vm16461_vm6, -inf, %v16460_v16  ;;  %vm16463_vm11 = vnez %v16289_v37  ;;  %v16468_v22 = vld [vmem:[#allocation111_spill] sm:$0xff]  ;;  %v16471_v37 = vld [vmem:[#allocation69_spill] sm:$0xff] }
 0x6ef   : > { %v6693_v48 = vsel %vm16463_vm11, -inf, %v16462_v9  ;;  %v12921_v50 = vmax.f32 %v6691_v3, %v6692_v33  ;;  %vm16465_vm7 = vnez %v16292_v21  ;;  %vm16467_vm9 = vnez %v16299_v53  ;;  %v16473_v3 = vld [vmem:[#allocation70_spill] sm:$0xff]  ;;  %v16493_v38 = vld [vmem:[#allocation259_spill] sm:$0xff] }
 0x6f0   : > { %v6694_v0 = vsel %vm16465_vm7, -inf, %v16464_v58  ;;  %v6695_v6 = vsel %vm16467_vm9, -inf, %v16466_v54  ;;  %vm16470_vm5 = vnez %v16469_v32  ;;  %vm16472_vm11 = vnez %v16309_v43  ;;  %v16474_v33 = vld [vmem:[#allocation250_spill] sm:$0xff]  ;;  %v16477_v54 = vld [vmem:[#allocation252_spill] sm:$0xff]  ;;  %v16479_v32 = vld [vmem:[#allocation71_spill] sm:$0xff] }
 0x6f1   : > { %v6696_v15 = vsel %vm16470_vm5, -inf, %v16468_v22  ;;  %v12932_v44 = vmax.f32 %v6693_v48, %v6694_v0  ;;  %v6697_v9 = vsel %vm16472_vm11, -inf, %v16471_v37  ;;  %vm16475_vm6 = vnez %v16474_v33  ;;  %v16476_v53 = vld [vmem:[#allocation114_spill] sm:$0xff]  ;;  %v16480_v22 = vld [vmem:[#allocation253_spill] sm:$0xff]  ;;  %v16486_v43 = vld [vmem:[#allocation256_spill] sm:$0xff] }
 0x6f2   : > { %v12934_v16 = vmax.f32 %v6695_v6, %v6696_v15  ;;  %v6698_v58 = vsel %vm16475_vm6, -inf, %v16473_v3  ;;  %vm16478_vm9 = vnez %v16477_v54  ;;  %vm16481_vm5 = vnez %v16480_v22  ;;  %v16483_v6 = vld [vmem:[#allocation20_spill] sm:$0xff]  ;;  %v16485_v15 = vld [vmem:[#allocation23_spill] sm:$0xff]  ;;  %v16505_v22 = vld [vmem:[#allocation266_spill] sm:$0xff] }
 0x6f3   : > { %v12942_v21 = vmax.f32 %v6697_v9, %v6698_v58  ;;  %v6699_v63 = vsel %vm16478_vm9, -inf, %v16476_v53  ;;  %v6700_v48 = vsel %vm16481_vm5, -inf, %v16479_v32  ;;  %vm16484_vm7 = vnez %v16331_v36  ;;  %v16488_v9 = vld [vmem:[#allocation74_spill] sm:$0xff]  ;;  %v16492_v53 = vld [vmem:[#allocation28_spill] sm:$0xff] }
 0x6f4   : > { %v12950_v0 = vmax.f32 %v6699_v63, %v6700_v48  ;;  %v6701_v37 = vsel %vm16484_vm7, -inf, %v16483_v6  ;;  %vm16487_vm11 = vnez %v16486_v43  ;;  %v16489_v58 = vld [vmem:[#allocation258_spill] sm:$0xff]  ;;  %vm16494_vm9 = vnez %v16493_v38  ;;  %v16495_v63 = vld [vmem:[#allocation31_spill] sm:$0xff]  ;;  %v16497_v36 = vld [vmem:[#allocation72_spill] sm:$0xff] }
 0x6f5   : > { %v6702_v3 = vsel %vm16487_vm11, -inf, %v16485_v15  ;;  %vm16490_vm6 = vnez %v16489_v58  ;;  %v6704_v32 = vsel %vm16494_vm9, -inf, %v16492_v53  ;;  %vm16496_vm5 = vnez %v16352_v52  ;;  %v16501_v58 = vld [vmem:[#allocation37_spill] sm:$0xff]  ;;  %v16508_v52 = vld [vmem:[#allocation75_spill] sm:$0xff] }
 0x6f6   : > { %16482 = vst [vmem:[#allocation52_spill] sm:$0xff] %v12950_v0  ;;  %v6703_v33 = vsel %vm16490_vm6, -inf, %v16488_v9  ;;  %v12961_v54 = vmax.f32 %v6701_v37, %v6702_v3  ;;  %v6705_v48 = vsel %vm16496_vm5, -inf, %v16495_v63  ;;  %vm16498_vm7 = vnez %v16355_v41  ;;  %v16502_v9 = vld [vmem:[#allocation265_spill] sm:$0xff]  ;;  %v16504_v3 = vld [vmem:[#allocation38_spill] sm:$0xff]  ;;  %v16510_v41 = vld [vmem:[#allocation44_spill] sm:$0xff] }
 0x6f7   : > { %v6706_v6 = vsel %vm16498_vm7, -inf, %v16497_v36  ;;  %v12972_v43 = vmax.f32 %v6703_v33, %v6704_v32  ;;  %vm16503_vm6 = vnez %v16502_v9  ;;  %vm16506_vm11 = vnez %v16505_v22  ;;  %v16513_v32 = vld [vmem:[#allocation46_spill] sm:$0xff]  ;;  %v16521_v9 = vld [vmem:[#allocation55_spill] sm:$0xff] }
 0x6f8   : > { %16491 = vst [vmem:[#allocation19_spill] sm:$0xff] %v12961_v54  ;;  %v12974_v15 = vmax.f32 %v6705_v48, %v6706_v6  ;;  %v6707_v37 = vsel %vm16503_vm6, -inf, %v16501_v58  ;;  %v6708_v53 = vsel %vm16506_vm11, -inf, %v16504_v3  ;;  %vm16509_vm5 = vnez %v16372_v59  ;;  %v16515_v48 = vld [vmem:[#allocation78_spill] sm:$0xff] }
 0x6f9   : > { %16499 = vst [vmem:[#allocation73_spill] sm:$0xff] %v12972_v43  ;;  %v12982_v38 = vmax.f32 %v6707_v37, %v6708_v53  ;;  %v6709_v63 = vsel %vm16509_vm5, -inf, %v16508_v52  ;;  %vm16511_vm7 = vnez %v16375_v2  ;;  %vm16514_vm9 = vnez %v16382_v47  ;;  %v16516_v6 = vld [vmem:[#allocation274_spill] sm:$0xff]  ;;  %v16518_v37 = vld [vmem:[#allocation53_spill] sm:$0xff] }
 0x6fa   : > { %16500 = vst [vmem:[#allocation76_spill] sm:$0xff] %v12974_v15  ;;  %v6710_v36 = vsel %vm16511_vm7, -inf, %v16510_v41  ;;  %v6711_v58 = vsel %vm16514_vm9, -inf, %v16513_v32  ;;  %vm16517_vm6 = vnez %v16516_v6  ;;  %v6713_v59 = vsel %vm12730_vm12, -inf, %v16518_v37  ;;  %v16527_v37 = vld [vmem:[#allocation142_spill] sm:$0xff] }
 0x6fb   : > { %16507 = vst [vmem:[#allocation77_spill] sm:$0xff] %v12982_v38  ;;  %v12990_v33 = vmax.f32 %v6709_v63, %v6710_v36  ;;  %v6712_v3 = vsel %vm16517_vm6, -inf, %v16515_v48  ;;  %v6714_v41 = vsel %vm12735_vm10, -inf, %v16521_v9  ;;  %v16524_v36 = vld [vmem:[#allocation216_spill] sm:$0xff]  ;;  %v16526_v38 = vld [vmem:[#allocation225_spill] sm:$0xff]  ;;  %v16530_v9 = vmov 0 }
 0x6fc   : > { %v13001_v52 = vmax.f32 %v6711_v58, %v6712_v3  ;;  %v13006_v63 = vmax.f32 %v6713_v59, %v6714_v41  ;;  %v3234_v47 = vcvt.f32.s32 %v16524_v36  ;;  %v3266_v53 = vcvt.f32.s32 %v16526_v38  ;;  %v16528_v58 = vld [vmem:[#allocation143_spill] sm:$0xff] }
 0x6fd   : > { %16512 = vst [vmem:[#allocation80_spill] sm:$0xff] %v12990_v33  ;;  %v16525_v33 = vld [vmem:[#allocation220_spill] sm:$0xff]  ;;  %v7814_v3 = vpack.c.bf16 %v16528_v58, %v16527_v37  ;;  %vm16533_vm10 = vcmask 7168   ;;  %v15439_v41 = vmov 1.0  }
 0x6fe   : > { %16520 = vst [vmem:[#allocation82_spill] sm:$0xff] %v13001_v52  ;;  %16523 = vst [vmem:[#allocation50_spill] sm:$0xff] %v13006_v63  ;;  %v3235_v22 = vshll.u32 %v3234_v47, 16  ;;  %v3250_v6 = vcvt.f32.s32 %v16525_v33  ;;  %v16534_v47 = vld [vmem:[#allocation56_spill] sm:$0xff]  ;;  %v16535_v33 = vmov 0  ;;  %v3267_v63 = vshll.u32 %v3266_v53, 16 }
 0x700   : > { %v3251_v52 = vshll.u32 %v3250_v6, 16  ;;  %v16539_v6 = vld [vmem:[#allocation24_spill] sm:$0xff] }
 0x70f   : > { %v3232_v32 = vpop.xlane.xlu0 %3231 }
 0x710   : > { %v3233_v48 = vcvt.f32.s32 %v3232_v32 }
 0x712   : > { %v3236_v30 = vadd.s32 %v3235_v22, %v3233_v48  ;;  %v16538_v22 = vmov 0.0  }
 0x714   : > { %v3248_v15 = vpop.xlane.xlu1 %3247  ;;  %vm13014_vm12 = vcmp.eq.s32.totalorder %v16529_v60, %v3236_v30  ;;  %6844 = vst.msk [vmem:[%s11771_s27] sm:$0xff] %vm16533_vm10, %v3236_v30  ;;  %vm13021_vm9 = vcmp.eq.s32.totalorder %v16534_v47, %v3236_v30 }
 0x715   : > { %v16531_v9 = vsel %vm13014_vm12, 4294967295, %v16530_v9  ;;  %v3249_v59 = vcvt.f32.s32 %v3248_v15  ;;  %v16536_v33 = vsel %vm13021_vm9, 4294967295, %v16535_v33  ;;  %v7250_v38 = vsel %vm13014_vm12, 1.0, %v16538_v22  ;;  %7314 = vmatprep.mubr.msk.f32.mxu1 %vm13021_vm9, %v15439_v41  ;;  %v16540_v15 = vld [vmem:[#allocation27_spill] sm:$0xff] }
 0x716   : > { %16532 = vst [vmem:[#allocation54_spill] sm:$0xff] %v16531_v9  ;;  %16537 = vst [vmem:[#allocation84_spill] sm:$0xff] %v16536_v33  ;;  %v6651_v36 = vsel %vm13014_vm12, -inf, %v16539_v6  ;;  %v6652_v30 = vsel %vm13021_vm9, -inf, %v16540_v15  ;;  %v7251_v32 = vsel %vm13021_vm9, 1.0, %v16538_v22  ;;  %v13040_v48 = vsub.f32 %v7250_v38, %v7250_v38  ;;  %7315 = vmatmul.mubr.msk.f32.vlgmr.msra.gmra.mrb[56].mxu1 %vm13014_vm12, %v15439_v41  ;;  %v16541_v6 = vld [vmem:[#allocation228_spill] sm:$0xff] }
 0x717   : > { %v3252_v58 = vadd.s32 %v3251_v52, %v3249_v59  ;;  %v6715_v37 = vmax.f32 %v6651_v36, %v6652_v30  ;;  %v13045_v2 = vsub.f32 %v7251_v32, %v7251_v32  ;;  %v3282_v43 = vcvt.f32.s32 %v16541_v6  ;;  %7815 = vmatpush1.bf16.msra.mxu1 %v7814_v3  ;;  %v16542_v15 = vld [vmem:[#allocation145_spill] sm:$0xff] }
 0x718   : > { %v7817_v0 = vpack.c.bf16 %v16543_v35, %v16542_v15  ;;  %v16544_v52 = vmov 0  ;;  %v16547_v59 = vmov 0  ;;  %7816 = vmatprep.subr.bf16.mxu1 %v16022_v49  ;;  %v16551_v3 = vld [vmem:[#allocation33_spill] sm:$0xff]  ;;  %v15443_v36 = vand.u32 4294901760, %v13040_v48 }
 0x719   : > { %v3264_v54 = vpop.xlane.xlu0 %3263  ;;  %6845 = vst.msk [vmem:[%s11771_s27 + $0x8] sm:$0xff] %vm16533_vm10, %v3252_v58  ;;  %6716 = vmax.xlane.f32.xlu1 %v6715_v37  ;;  %vm13053_vm9 = vcmp.eq.s32.totalorder %v16534_v47, %v3252_v58  ;;  %vm13058_vm12 = vcmp.eq.s32.totalorder %v16529_v60, %v3252_v58  ;;  %v15444_v53 = vand.u32 4294901760, %v13045_v2  ;;  %v3283_v33 = vshll.u32 %v3282_v43, 16 }
 0x71a   : > { %v3265_v38 = vcvt.f32.s32 %v3264_v54  ;;  %v16545_v52 = vsel %vm13053_vm9, 4294967295, %v16544_v52  ;;  %v16548_v59 = vsel %vm13058_vm12, 4294967295, %v16547_v59  ;;  %7316 = vmatprep.mubr.msk.f32.mxu1 %vm13053_vm9, %v15439_v41  ;;  %v16550_v54 = vld [vmem:[#allocation29_spill] sm:$0xff]  ;;  %v6654_v58 = vsel %vm13053_vm9, -inf, %v16551_v3 }
 0x71b   : > { %16546 = vst [vmem:[#allocation87_spill] sm:$0xff] %v16545_v52  ;;  %16549 = vst [vmem:[#allocation88_spill] sm:$0xff] %v16548_v59  ;;  %v6653_v37 = vsel %vm13058_vm12, -inf, %v16550_v54  ;;  %v7253_v30 = vsel %vm13053_vm9, 1.0, %v16538_v22  ;;  %7317 = vmatmul.mubr.msk.f32.gmra.mrb[58].mxu1 %vm13058_vm12, %v15439_v41  ;;  %v4024_v54 = vsub.f32 %v13045_v2, %v15444_v53  ;;  %v4030_v52 = vsub.f32 %v13040_v48, %v15443_v36  ;;  %v16553_v41 = vld [vmem:[#allocation149_spill] sm:$0xff] }
 0x71c   : > { %v3268_v32 = vadd.s32 %v3267_v63, %v3265_v38  ;;  %v6718_v6 = vmax.f32 %v6653_v37, %v6654_v58  ;;  %v13083_v9 = vsub.f32 %v7253_v30, %v7253_v30  ;;  %7818 = vmatpush1.bf16.msra.mxu1 %v7817_v0  ;;  %v7252_v63 = vsel %vm13058_vm12, 1.0, %v16538_v22  ;;  %v16552_v38 = vld [vmem:[#allocation148_spill] sm:$0xff]  ;;  %v16562_v59 = vld [vmem:[#allocation45_spill] sm:$0xff] }
 0x71d   : > { %v7820_v37 = vpack.c.bf16 %v16553_v41, %v16552_v38  ;;  %v16554_v43 = vmov 0  ;;  %v4025_v0 = vand.u32 4294901760, %v4024_v54  ;;  %v16557_v30 = vmov 0  ;;  %7819 = vmatprep.subr.bf16.mxu1 %v16022_v49 }
 0x71e   : > { %v3280_v3 = vpop.xlane.xlu1 %3279  ;;  %6846 = vst.msk [vmem:[%s11771_s27 + $0x10] sm:$0xff] %vm16533_vm10, %v3268_v32  ;;  %6719 = vmax.xlane.f32.xlu0 %v6718_v6  ;;  %vm13096_vm9 = vcmp.eq.s32.totalorder %v16534_v47, %v3268_v32  ;;  %vm13101_vm6 = vcmp.eq.s32.totalorder %v16529_v60, %v3268_v32  ;;  %v16560_v36 = vmov 1.0   ;;  %v4031_v53 = vand.u32 4294901760, %v4030_v52 }
 0x71f   : > { %v3281_v58 = vcvt.f32.s32 %v3280_v3  ;;  %v16555_v43 = vsel %vm13096_vm9, 4294967295, %v16554_v43  ;;  %v16558_v30 = vsel %vm13101_vm6, 4294967295, %v16557_v30  ;;  %7318 = vmatprep.mubr.msk.f32.mxu1 %vm13096_vm9, %v16560_v36  ;;  %v16561_v3 = vld [vmem:[#allocation34_spill] sm:$0xff]  ;;  %v6656_v54 = vsel %vm13096_vm9, -inf, %v16562_v59  ;;  %4026 = vmatprep.mubr.f32.mxu0 %v4025_v0  ;;  %v16564_v0 = vld [vmem:[#allocation152_spill] sm:$0xff] }
 0x720   : > { %16556 = vst [vmem:[#allocation90_spill] sm:$0xff] %v16555_v43  ;;  %16559 = vst [vmem:[#allocation30_spill] sm:$0xff] %v16558_v30  ;;  %v6655_v6 = vsel %vm13101_vm6, -inf, %v16561_v3  ;;  %v15451_v32 = vand.u32 4294901760, %v13083_v9  ;;  %7319 = vmatmul.mubr.msk.f32.gmra.mrb[60].mxu1 %vm13101_vm6, %v16560_v36  ;;  %v13119_v35 = vsub.f32 %v7252_v63, %v7252_v63  ;;  %v7255_v52 = vsel %vm13096_vm9, 1.0, %v16538_v22  ;;  %4032 = vmatmul.mubr.f32.vlgmr.msra.gmra.mrb[64].mxu0 %v4031_v53 }
 0x721   : > { %v3284_v41 = vadd.s32 %v3283_v33, %v3281_v58  ;;  %v6721_v38 = vmax.f32 %v6655_v6, %v6656_v54  ;;  %v13127_v3 = vsub.f32 %v7255_v52, %v7255_v52  ;;  %7821 = vmatpush1.bf16.msra.mxu1 %v7820_v37  ;;  %v7254_v33 = vsel %vm13101_vm6, 1.0, %v16538_v22  ;;  %v16563_v58 = vld [vmem:[#allocation151_spill] sm:$0xff] }
 0x722   : > { %v4039_v59 = vsub.f32 %v13083_v9, %v15451_v32  ;;  %v7823_v63 = vpack.c.bf16 %v16564_v0, %v16563_v58  ;;  %v16565_v53 = vmov 0  ;;  %v16568_v6 = vmov 0  ;;  %7822 = vmatprep.subr.bf16.mxu1 %v16022_v49  ;;  %v16572_v32 = vld [vmem:[#allocation51_spill] sm:$0xff] }
 0x723   : > { %6847 = vst.msk [vmem:[%s11771_s27 + $0x18] sm:$0xff] %vm16533_vm10, %v3284_v41  ;;  %6722 = vmax.xlane.f32.xlu1 %v6721_v38  ;;  %vm13137_vm9 = vcmp.eq.s32.totalorder %v16534_v47, %v3284_v41  ;;  %vm13142_vm12 = vcmp.eq.s32.totalorder %v16529_v60, %v3284_v41  ;;  %v15456_v37 = vand.u32 4294901760, %v13119_v35  ;;  %v13147_v54 = vsub.f32 %v7254_v33, %v7254_v33  ;;  %v16571_v47 = vld [vmem:[#allocation49_spill] sm:$0xff]  ;;  %s8950_s27 = sshll.u32 %s9120_s30, 4  ;;  %s8951_s27 = int_to_ptr.vmem [resolvable:$false] %s8950_s27 }
 0x724   : > { %v16566_v53 = vsel %vm13137_vm9, 4294967295, %v16565_v53  ;;  %v16569_v6 = vsel %vm13142_vm12, 4294967295, %v16568_v6  ;;  %7320 = vmatprep.mubr.msk.f32.mxu1 %vm13137_vm9, %v16560_v36  ;;  %v4040_v38 = vand.u32 4294901760, %v4039_v59  ;;  %v6657_v52 = vsel %vm13142_vm12, -inf, %v16571_v47  ;;  %s8952_s12 = scalar_lea.vmem %s8951_s27, 8192  ;;  %p8953_p5 = scmp.lt.s32.totalorder %s14338_s15, %s8951_s27 }
 0x725   : > { %16567 = vst [vmem:[#allocation32_spill] sm:$0xff] %v16566_v53  ;;  %16570 = vst [vmem:[#allocation39_spill] sm:$0xff] %v16569_v6  ;;  %v6658_v60 = vsel %vm13137_vm9, -inf, %v16572_v32  ;;  %v15468_v41 = vand.u32 4294901760, %v13127_v3  ;;  %7321 = vmatmul.mubr.msk.f32.gmra.mrb[62].mxu1 %vm13142_vm12, %v16560_v36  ;;  %v4045_v33 = vsub.f32 %v13119_v35, %v15456_v37  ;;  %v15466_v59 = vand.u32 4294901760, %v13147_v54  ;;  %v16728_v6 = vld [vmem:[#allocation204_spill] sm:$0xff] }
 0x726   : > { %v6724_v30 = vmax.f32 %v6657_v52, %v6658_v60  ;;  %v7257_v47 = vsel %vm13137_vm9, 1.0, %v16538_v22  ;;  %4041 = vmatprep.mubr.f32.mxu0 %v4040_v38  ;;  %7322 = vmatprep.mubr.msk.f32.mxu1 %vm11766_vm14, %v16560_v36  ;;  %v7256_v52 = vsel %vm13142_vm12, 1.0, %v16538_v22  ;;  %vm16579_vm10 = vnez %v16153_v34 }
 0x727   : > { %v4054_v32 = vsub.f32 %v13127_v3, %v15468_v41  ;;  %v13176_v43 = vsub.f32 %v7257_v47, %v7257_v47  ;;  %v4046_v60 = vand.u32 4294901760, %v4045_v33  ;;  %6728 = vmax.xlane.f32.xlu1 %v12788_v27  ;;  %v4060_v38 = vsub.f32 %v13147_v54, %v15466_v59  ;;  %7824 = vmatpush1.bf16.msra.mxu1 %v7823_v63  ;;  %v16574_v47 = vld [vmem:[#allocation155_spill] sm:$0xff]  ;;  %v16618_v59 = vld [vmem:[#allocation218_spill] sm:$0xff]  ;;  %v16629_v41 = vld [vmem:[#allocation80_spill] sm:$0xff] }
 0x728   : > { %6725 = vmax.xlane.f32.xlu0 %v6724_v30  ;;  %v13185_v37 = vsub.f32 %v7256_v52, %v7256_v52  ;;  %7825 = vmatprep.subr.bf16.mxu1 %v16022_v49 }
 0x729   : > { %v4055_v25 = vand.u32 4294901760, %v4054_v32  ;;  %v15465_v53 = vand.u32 4294901760, %v13176_v43  ;;  %4047 = vmatmul.mubr.f32.gmra.mrb[66].mxu0 %v4046_v60  ;;  %7323 = vmatmul.mubr.msk.f32.gmra.mrb[0].mxu1 %vm11761_vm13, %v16560_v36  ;;  %v4061_v22 = vand.u32 4294901760, %v4060_v38 }
 0x72a   : > { %v15464_v30 = vand.u32 4294901760, %v13185_v37  ;;  %7324 = vmatprep.mubr.msk.f32.mxu1 %vm11804_vm0, %v16560_v36 }
 0x72b   : > { %4056 = vmatprep.mubr.f32.mxu0 %v4055_v25  ;;  %v4069_v27 = vsub.f32 %v13176_v43, %v15465_v53  ;;  %6734 = vmax.xlane.f32.xlu1 %v12805_v29  ;;  %v16573_v25 = vld [vmem:[#allocation154_spill] sm:$0xff]  ;;  %v16615_v53 = vld [vmem:[#allocation73_spill] sm:$0xff] }
 0x72c   : > { %6731 = vmax.xlane.f32.xlu0 %v12803_v31  ;;  %v4075_v63 = vsub.f32 %v13185_v37, %v15464_v30  ;;  %v7826_v32 = vpack.c.bf16 %v16574_v47, %v16573_v25  ;;  %v16575_v31 = vld [vmem:[#allocation156_spill] sm:$0xff]  ;;  %v16576_v29 = vld [vmem:[#allocation158_spill] sm:$0xff]  ;;  %v16614_v30 = vld [vmem:[#allocation19_spill] sm:$0xff] }
 0x72d   : > { %v4070_v33 = vand.u32 4294901760, %v4069_v27  ;;  %4062 = vmatmul.mubr.f32.gmra.mrb[68].mxu0 %v4061_v22  ;;  %7325 = vmatmul.mubr.msk.f32.gmra.mrb[2].mxu1 %vm11799_vm15, %v16560_v36  ;;  %v7829_v60 = vpack.c.bf16 %v16576_v29, %v16575_v31 }
 0x72e   : > { %v4076_v52 = vand.u32 4294901760, %v4075_v63  ;;  %7326 = vmatprep.mubr.msk.f32.mxu1 %vm11842_vm2, %v16560_v36  ;;  %7827 = vmatpush1.bf16.msra.mxu1 %v7826_v32 }
 0x72f   : > { %4071 = vmatprep.mubr.f32.mxu0 %v4070_v33  ;;  %6740 = vmax.xlane.f32.xlu1 %v12821_v51  ;;  %v16578_v51 = vld [vmem:[#allocation160_spill] sm:$0xff]  ;;  %v16591_v33 = vld [vmem:[#allocation198_spill] sm:$0xff] }
 0x730   : > { %6737 = vmax.xlane.f32.xlu0 %v12813_v12  ;;  %7828 = vmatprep.subr.bf16.mxu1 %v16022_v49  ;;  %v16577_v12 = vld [vmem:[#allocation159_spill] sm:$0xff] }
 0x731   : > { %4077 = vmatmul.mubr.f32.gmra.mrb[70].mxu0 %v4076_v52  ;;  %7327 = vmatmul.mubr.msk.f32.gmra.mrb[4].mxu1 %vm11837_vm1, %v16560_v36  ;;  %v7832_v38 = vpack.c.bf16 %v16578_v51, %v16577_v12  ;;  %vm16580_vm1 = vnez %v16164_v5  ;;  %v16596_v52 = vld [vmem:[#allocation202_spill] sm:$0xff]  ;;  %v16704_v5 = vld [vmem:[#allocation137_spill] sm:$0xff] }
 0x732   : > { %7328 = vmatprep.mubr.msk.f32.mxu1 %vm11879_vm4, %v16560_v36  ;;  %7830 = vmatpush1.bf16.msra.mxu1 %v7829_v60  ;;  %vm16583_vm4 = vnez %v16161_v18  ;;  %v16703_v18 = vld [vmem:[#allocation129_spill] sm:$0xff] }
 0x733   : > { %6746 = vmax.xlane.f32.xlu1 %v12844_v40  ;;  %7831 = vmatprep.subr.bf16.mxu1 %v16022_v49  ;;  %v16582_v40 = vld [vmem:[#allocation162_spill] sm:$0xff] }
 0x734   : > { %6743 = vmax.xlane.f32.xlu0 %v12833_v11  ;;  %v16581_v11 = vld [vmem:[#allocation161_spill] sm:$0xff] }
 0x735   : > { %7329 = vmatmul.mubr.msk.f32.gmra.mrb[6].mxu1 %vm16579_vm10, %v16560_v36  ;;  %v7835_v22 = vpack.c.bf16 %v16582_v40, %v16581_v11  ;;  %vm16584_vm10 = vnez %v16172_v39  ;;  %v16702_v39 = vld [vmem:[#allocation191_spill] sm:$0xff] }
 0x736   : > { %7330 = vmatprep.mubr.msk.f32.mxu1 %vm16580_vm1, %v16560_v36  ;;  %7833 = vmatpush1.bf16.msra.mxu1 %v7832_v38  ;;  %vm16587_vm1 = vnez %v16169_v4 }
 0x737   : > { %6752 = vmax.xlane.f32.xlu1 %v12854_v8  ;;  %7834 = vmatprep.subr.bf16.mxu1 %v16022_v49  ;;  %v16585_v8 = vld [vmem:[#allocation163_spill] sm:$0xff] }
 0x738   : > { %6749 = vmax.xlane.f32.xlu0 %v12846_v46  ;;  %v16586_v46 = vld [vmem:[#allocation164_spill] sm:$0xff] }
 0x739   : > { %7331 = vmatmul.mubr.msk.f32.gmra.mrb[8].mxu1 %vm16583_vm4, %v16560_v36  ;;  %v7838_v27 = vpack.c.bf16 %v16586_v46, %v16585_v8  ;;  %vm16588_vm4 = vnez %v16182_v56  ;;  %v16698_v56 = vld [vmem:[#allocation123_spill] sm:$0xff] }
 0x73a   : > { %7332 = vmatprep.mubr.msk.f32.mxu1 %vm16584_vm10, %v16560_v36  ;;  %7836 = vmatpush1.bf16.msra.mxu1 %v7835_v22  ;;  %vm16592_vm10 = vnez %v16591_v33  ;;  %v16625_v22 = vld [vmem:[#allocation223_spill] sm:$0xff] }
 0x73b   : > { %6758 = vmax.xlane.f32.xlu1 %v12873_v10  ;;  %7837 = vmatprep.subr.bf16.mxu1 %v16022_v49  ;;  %v16590_v10 = vld [vmem:[#allocation167_spill] sm:$0xff] }
 0x73c   : > { %6755 = vmax.xlane.f32.xlu0 %v12862_v24  ;;  %v16589_v24 = vld [vmem:[#allocation166_spill] sm:$0xff] }
 0x73d   : > { %7333 = vmatmul.mubr.msk.f32.gmra.mrb[10].mxu1 %vm16587_vm1, %v16560_v36  ;;  %v7841_v63 = vpack.c.bf16 %v16590_v10, %v16589_v24  ;;  %vm16593_vm1 = vnez %v16191_v23  ;;  %v16697_v23 = vld [vmem:[#allocation190_spill] sm:$0xff] }
 0x73e   : > { %7334 = vmatprep.mubr.msk.f32.mxu1 %vm16588_vm4, %v16560_v36  ;;  %7839 = vmatpush1.bf16.msra.mxu1 %v7838_v27  ;;  %vm16597_vm4 = vnez %v16596_v52  ;;  %v16607_v27 = vld [vmem:[#allocation52_spill] sm:$0xff] }
 0x73f   : > { %6764 = vmax.xlane.f32.xlu1 %v12886_v45  ;;  %7840 = vmatprep.subr.bf16.mxu1 %v16022_v49  ;;  %v16595_v45 = vld [vmem:[#allocation169_spill] sm:$0xff] }
 0x740   : > { %6761 = vmax.xlane.f32.xlu0 %v12884_v55  ;;  %v16594_v55 = vld [vmem:[#allocation168_spill] sm:$0xff] }
 0x741   : > { %7335 = vmatmul.mubr.msk.f32.gmra.mrb[12].mxu1 %vm16592_vm10, %v16560_v36  ;;  %v7844_v32 = vpack.c.bf16 %v16595_v45, %v16594_v55  ;;  %vm16598_vm10 = vnez %v16200_v61  ;;  %v16695_v61 = vld [vmem:[#allocation153_spill] sm:$0xff] }
 0x742   : > { %7336 = vmatprep.mubr.msk.f32.mxu1 %vm16593_vm1, %v16560_v36  ;;  %7842 = vmatpush1.bf16.msra.mxu1 %v7841_v63  ;;  %vm16601_vm1 = vnez %v16197_v7  ;;  %v16694_v7 = vld [vmem:[#allocation125_spill] sm:$0xff] }
 0x743   : > { %6770 = vmax.xlane.f32.xlu1 %v12905_v62  ;;  %7843 = vmatprep.subr.bf16.mxu1 %v16022_v49  ;;  %v16600_v62 = vld [vmem:[#allocation171_spill] sm:$0xff] }
 0x744   : > { %6767 = vmax.xlane.f32.xlu0 %v12903_v28  ;;  %v16599_v28 = vld [vmem:[#allocation170_spill] sm:$0xff] }
 0x745   : > { %7337 = vmatmul.mubr.msk.f32.gmra.mrb[14].mxu1 %vm16597_vm4, %v16560_v36  ;;  %v7847_v60 = vpack.c.bf16 %v16600_v62, %v16599_v28  ;;  %vm16602_vm4 = vnez %v16210_v57  ;;  %v16693_v57 = vld [vmem:[#allocation117_spill] sm:$0xff] }
 0x746   : > { %7338 = vmatprep.mubr.msk.f32.mxu1 %vm16598_vm10, %v16560_v36  ;;  %7845 = vmatpush1.bf16.msra.mxu1 %v7844_v32  ;;  %vm16605_vm10 = vnez %v16207_v26  ;;  %v16610_v32 = vld [vmem:[#allocation214_spill] sm:$0xff] }
 0x747   : > { %6776 = vmax.xlane.f32.xlu1 %v12921_v50  ;;  %7846 = vmatprep.subr.bf16.mxu1 %v16022_v49  ;;  %v16604_v50 = vld [vmem:[#allocation180_spill] sm:$0xff]  ;;  %v16630_v26 = vld [vmem:[#allocation82_spill] sm:$0xff] }
 0x748   : > { %6773 = vmax.xlane.f32.xlu0 %v12913_v13  ;;  %v16603_v13 = vld [vmem:[#allocation179_spill] sm:$0xff] }
 0x749   : > { %7339 = vmatmul.mubr.msk.f32.gmra.mrb[16].mxu1 %vm16601_vm1, %v16560_v36  ;;  %v7850_v38 = vpack.c.bf16 %v16604_v50, %v16603_v13 }
 0x74a   : > { %7340 = vmatprep.mubr.msk.f32.mxu1 %vm16602_vm4, %v16560_v36  ;;  %7848 = vmatpush1.bf16.msra.mxu1 %v7847_v60  ;;  %vm16611_vm4 = vnez %v16610_v32  ;;  %v16612_v60 = vld [vmem:[#allocation219_spill] sm:$0xff]  ;;  %v16622_v32 = vld [vmem:[#allocation77_spill] sm:$0xff] }
 0x74b   : > { %6782 = vmax.xlane.f32.xlu1 %v12934_v16  ;;  %7849 = vmatprep.subr.bf16.mxu1 %v16022_v49  ;;  %v16609_v16 = vld [vmem:[#allocation183_spill] sm:$0xff] }
 0x74c   : > { %6779 = vmax.xlane.f32.xlu0 %v12932_v44  ;;  %v16608_v44 = vld [vmem:[#allocation182_spill] sm:$0xff] }
 0x74d   : > { %7341 = vmatmul.mubr.msk.f32.gmra.mrb[18].mxu1 %vm16605_vm10, %v16560_v36  ;;  %v7853_v63 = vpack.c.bf16 %v16609_v16, %v16608_v44  ;;  %vm16613_vm10 = vnez %v16612_v60  ;;  %v16621_v60 = vld [vmem:[#allocation76_spill] sm:$0xff]  ;;  %v16771_v44 = vld [vmem:[#allocation95_spill] sm:$0xff] }
 0x74e   : > { %7342 = vmatprep.mubr.msk.f32.mxu1 %vm16439_vm8, %v16560_v36  ;;  %7851 = vmatpush1.bf16.msra.mxu1 %v7850_v38  ;;  %v16617_v38 = vld [vmem:[#allocation186_spill] sm:$0xff]  ;;  %vm16619_vm8 = vnez %v16618_v59  ;;  %v16627_v59 = vld [vmem:[#allocation227_spill] sm:$0xff] }
 0x74f   : > { %6788 = vmax.xlane.f32.xlu1 %v16607_v27  ;;  %7852 = vmatprep.subr.bf16.mxu1 %v16022_v49 }
 0x750   : > { %6785 = vmax.xlane.f32.xlu0 %v12942_v21  ;;  %v16616_v21 = vld [vmem:[#allocation185_spill] sm:$0xff] }
 0x751   : > { %7343 = vmatmul.mubr.msk.f32.gmra.mrb[20].mxu1 %vm16611_vm4, %v16560_v36  ;;  %v7856_v27 = vpack.c.bf16 %v16617_v38, %v16616_v21  ;;  %v16748_v38 = vld [vmem:[#allocation178_spill] sm:$0xff] }
 0x752   : > { %7344 = vmatprep.mubr.msk.f32.mxu1 %vm16613_vm10, %v16560_v36  ;;  %7854 = vmatpush1.bf16.msra.mxu1 %v7853_v63  ;;  %vm16626_vm10 = vnez %v16625_v22  ;;  %v16754_v21 = vld [vmem:[#allocation222_spill] sm:$0xff] }
 0x753   : > { %6794 = vmax.xlane.f32.xlu1 %v16615_v53  ;;  %7855 = vmatprep.subr.bf16.mxu1 %v16022_v49  ;;  %v16623_v53 = vld [vmem:[#allocation187_spill] sm:$0xff] }
 0x754   : > { %6791 = vmax.xlane.f32.xlu0 %v16614_v30  ;;  %v16624_v30 = vld [vmem:[#allocation188_spill] sm:$0xff] }
 0x755   : > { %7345 = vmatmul.mubr.msk.f32.gmra.mrb[22].mxu1 %vm16619_vm8, %v16560_v36  ;;  %v7859_v63 = vpack.c.bf16 %v16624_v30, %v16623_v53  ;;  %vm16628_vm8 = vnez %v16627_v59  ;;  %v16636_v59 = vld [vmem:[#allocation234_spill] sm:$0xff]  ;;  %v16742_v30 = vld [vmem:[#allocation177_spill] sm:$0xff] }
 0x756   : > { %7346 = vmatprep.mubr.msk.f32.mxu1 %vm16447_vm3, %v16560_v36  ;;  %7857 = vmatpush1.bf16.msra.mxu1 %v7856_v27  ;;  %v16635_v27 = vld [vmem:[#allocation50_spill] sm:$0xff]  ;;  %v16747_v53 = vld [vmem:[#allocation217_spill] sm:$0xff] }
 0x757   : > { %6800 = vmax.xlane.f32.xlu1 %v16622_v32  ;;  %7858 = vmatprep.subr.bf16.mxu1 %v16022_v49  ;;  %v16631_v32 = vld [vmem:[#allocation231_spill] sm:$0xff] }
 0x758   : > { %6797 = vmax.xlane.f32.xlu0 %v16621_v60  ;;  %vm16632_vm3 = vnez %v16631_v32  ;;  %v16633_v60 = vld [vmem:[#allocation233_spill] sm:$0xff] }
 0x759   : > { %7347 = vmatmul.mubr.msk.f32.gmra.mrb[24].mxu1 %vm16626_vm10, %v16560_v36  ;;  %vm16634_vm10 = vnez %v16633_v60  ;;  %v16644_v60 = vld [vmem:[#allocation239_spill] sm:$0xff]  ;;  %v16692_v32 = vld [vmem:[#allocation189_spill] sm:$0xff] }
 0x75a   : > { %7348 = vmatprep.mubr.msk.f32.mxu1 %vm16628_vm8, %v16560_v36  ;;  %7860 = vmatpush1.bf16.msra.mxu1 %v7859_v63  ;;  %vm16637_vm8 = vnez %v16636_v59  ;;  %v16642_v63 = vld [vmem:[#allocation240_spill] sm:$0xff]  ;;  %v16648_v59 = vld [vmem:[#allocation243_spill] sm:$0xff] }
 0x75b   : > { %6806 = vmax.xlane.f32.xlu1 %v16630_v26  ;;  %7861 = vmatprep.subr.bf16.mxu1 %v16022_v49  ;;  %v16640_v26 = vld [vmem:[#allocation236_spill] sm:$0xff] }
 0x75c   : > { %6803 = vmax.xlane.f32.xlu0 %v16629_v41  ;;  %v16638_v41 = vld [vmem:[#allocation237_spill] sm:$0xff]  ;;  %vm16641_vm1 = vnez %v16640_v26  ;;  %v16652_v26 = vld [vmem:[#allocation246_spill] sm:$0xff] }
 0x75d   : > { %7349 = vmatmul.mubr.msk.f32.gmra.mrb[26].mxu1 %vm16632_vm3, %v16560_v36  ;;  %vm16639_vm4 = vnez %v16638_v41  ;;  %vm16643_vm3 = vnez %v16642_v63  ;;  %v16650_v41 = vld [vmem:[#allocation247_spill] sm:$0xff]  ;;  %v16654_v63 = vld [vmem:[#allocation250_spill] sm:$0xff] }
 0x75e   : > { %7350 = vmatprep.mubr.msk.f32.mxu1 %vm16634_vm10, %v16560_v36  ;;  %vm16645_vm10 = vnez %v16644_v60  ;;  %v16656_v60 = vld [vmem:[#allocation249_spill] sm:$0xff] }
 0x760   : > { %6809 = vmax.xlane.f32.xlu0 %v16635_v27  ;;  %v16646_v27 = vld [vmem:[#allocation244_spill] sm:$0xff] }
 0x761   : > { %7351 = vmatmul.mubr.msk.f32.gmra.mrb[28].mxu1 %vm16637_vm8, %v16560_v36  ;;  %vm16647_vm2 = vnez %v16646_v27  ;;  %vm16649_vm8 = vnez %v16648_v59  ;;  %v16658_v27 = vld [vmem:[#allocation253_spill] sm:$0xff]  ;;  %v16660_v59 = vld [vmem:[#allocation252_spill] sm:$0xff] }
 0x762   : > { %7352 = vmatprep.mubr.msk.f32.mxu1 %vm16639_vm4, %v16560_v36  ;;  %vm16651_vm4 = vnez %v16650_v41  ;;  %v16662_v41 = vld [vmem:[#allocation256_spill] sm:$0xff] }
 0x765   : > { %7353 = vmatmul.mubr.msk.f32.gmra.mrb[30].mxu1 %vm16641_vm1, %v16560_v36  ;;  %vm16653_vm1 = vnez %v16652_v26  ;;  %v16664_v26 = vld [vmem:[#allocation255_spill] sm:$0xff] }
 0x766   : > { %7354 = vmatprep.mubr.msk.f32.mxu1 %vm16643_vm3, %v16560_v36  ;;  %vm16655_vm3 = vnez %v16654_v63  ;;  %v16666_v63 = vld [vmem:[#allocation259_spill] sm:$0xff] }
 0x769   : > { %7355 = vmatmul.mubr.msk.f32.gmra.mrb[32].mxu1 %vm16645_vm10, %v16560_v36  ;;  %vm16657_vm10 = vnez %v16656_v60  ;;  %v16668_v60 = vld [vmem:[#allocation258_spill] sm:$0xff] }
 0x76a   : > { %7356 = vmatprep.mubr.msk.f32.mxu1 %vm16647_vm2, %v16560_v36  ;;  %vm16659_vm2 = vnez %v16658_v27  ;;  %v16670_v27 = vld [vmem:[#allocation262_spill] sm:$0xff] }
 0x76d   : > { %7357 = vmatmul.mubr.msk.f32.gmra.mrb[34].mxu1 %vm16649_vm8, %v16560_v36  ;;  %vm16661_vm8 = vnez %v16660_v59  ;;  %v16672_v59 = vld [vmem:[#allocation261_spill] sm:$0xff] }
 0x76e   : > { %7358 = vmatprep.mubr.msk.f32.mxu1 %vm16651_vm4, %v16560_v36  ;;  %vm16663_vm4 = vnez %v16662_v41  ;;  %v16683_v41 = vld [vmem:[#allocation278_spill] sm:$0xff] }
 0x771   : > { %7359 = vmatmul.mubr.msk.f32.gmra.mrb[36].mxu1 %vm16653_vm1, %v16560_v36  ;;  %vm16665_vm1 = vnez %v16664_v26  ;;  %v16675_v26 = vld [vmem:[#allocation265_spill] sm:$0xff] }
 0x772   : > { %7360 = vmatprep.mubr.msk.f32.mxu1 %vm16655_vm3, %v16560_v36  ;;  %vm16667_vm3 = vnez %v16666_v63 }
 0x775   : > { %7361 = vmatmul.mubr.msk.f32.gmra.mrb[38].mxu1 %vm16657_vm10, %v16560_v36  ;;  %vm16669_vm10 = vnez %v16668_v60  ;;  %v16687_v60 = vld [vmem:[#allocation141_spill] sm:$0xff] }
 0x776   : > { %7362 = vmatprep.mubr.msk.f32.mxu1 %vm16659_vm2, %v16560_v36  ;;  %vm16671_vm2 = vnez %v16670_v27  ;;  %v16679_v27 = vld [vmem:[#allocation274_spill] sm:$0xff] }
 0x779   : > { %7363 = vmatmul.mubr.msk.f32.gmra.mrb[40].mxu1 %vm16661_vm8, %v16560_v36  ;;  %vm16673_vm8 = vnez %v16672_v59  ;;  %v16681_v59 = vld [vmem:[#allocation273_spill] sm:$0xff] }
 0x77a   : > { %7364 = vmatprep.mubr.msk.f32.mxu1 %vm16663_vm4, %v16560_v36 }
 0x77d   : > { %7365 = vmatmul.mubr.msk.f32.gmra.mrb[42].mxu1 %vm16665_vm1, %v16560_v36  ;;  %vm16676_vm1 = vnez %v16675_v26  ;;  %v16685_v26 = vld [vmem:[#allocation277_spill] sm:$0xff] }
 0x77e   : > { %7366 = vmatprep.mubr.msk.f32.mxu1 %vm16667_vm3, %v16560_v36 }
 0x781   : > { %7367 = vmatmul.mubr.msk.f32.gmra.mrb[44].mxu1 %vm16669_vm10, %v16560_v36 }
 0x782   : > { %7368 = vmatprep.mubr.msk.f32.mxu1 %vm16671_vm2, %v16560_v36  ;;  %vm16680_vm2 = vnez %v16679_v27  ;;  %v16691_v27 = vld [vmem:[#allocation150_spill] sm:$0xff] }
 0x785   : > { %7369 = vmatmul.mubr.msk.f32.gmra.mrb[46].mxu1 %vm16673_vm8, %v16560_v36  ;;  %vm16682_vm8 = vnez %v16681_v59  ;;  %v16690_v59 = vld [vmem:[#allocation119_spill] sm:$0xff] }
 0x786   : > { %7370 = vmatprep.mubr.msk.f32.mxu1 %vm16506_vm11, %v16560_v36  ;;  %vm16684_vm11 = vnez %v16683_v41  ;;  %v16688_v41 = vld [vmem:[#allocation144_spill] sm:$0xff] }
 0x789   : > { %7371 = vmatmul.mubr.msk.f32.gmra.mrb[48].mxu1 %vm16676_vm1, %v16560_v36  ;;  %vm16686_vm1 = vnez %v16685_v26  ;;  %v16689_v26 = vld [vmem:[#allocation147_spill] sm:$0xff] }
 0x78a   : > { %7372 = vmatprep.mubr.msk.f32.mxu1 %vm16511_vm7, %v16560_v36 }
 0x78d   : > { %7373 = vmatmul.mubr.msk.f32.gmra.mrb[50].mxu1 %vm16509_vm5, %v16560_v36 }
 0x78e   : > { %7374 = vmatprep.mubr.msk.f32.mxu1 %vm16680_vm2, %v16560_v36 }
 0x791   : > { %7375 = vmatmul.mubr.msk.f32.gmra.mrb[52].mxu1 %vm16682_vm8, %v16560_v36 }
 0x792   : > { %7376 = vmatprep.mubr.msk.f32.mxu1 %vm16684_vm11, %v16560_v36 }
 0x795   : > { %7377 = vmatmul.mubr.msk.f32.gmra.mrb[54].mxu1 %vm16686_vm1, %v16560_v36  ;;  %vm16696_vm1 = vcmask 7168   ;;  %v16741_v36 = vld [vmem:[#allocation212_spill] sm:$0xff] }
 0x796   : > { %5081 = vmatprep.mubr.f32.mxu1 %v13045_v2  ;;  %vm16701_vm11 = vmmov %vm16696_vm1 }
 0x797   : > { %vm16712_vm8 = vmmov %vm16696_vm1 }
 0x798   : > { %vm16768_vm2 = vmmov %vm16696_vm1 }
 0x799   : > { %5084 = vmatmul.mubr.f32.vlgmr.msra.gmra.mrb[56].mxu1 %v13040_v48 }
 0x79a   : > { %7863 = vmatpush1.bf16.msra.mxu1 %v16687_v60  ;;  %5090 = vmatprep.mubr.f32.mxu1 %v13083_v9  ;;  %v16736_v60 = vld [vmem:[#allocation176_spill] sm:$0xff] }
 0x79b   : > { %7864 = vmatprep.subr.bf16.mxu1 %v16022_v49 }
 0x79d   : > { %5093 = vmatmul.mubr.f32.gmra.mrb[58].mxu1 %v13119_v35 }
 0x79e   : > { %5099 = vmatprep.mubr.f32.mxu1 %v13127_v3  ;;  %7866 = vmatpush1.bf16.msra.mxu1 %v16688_v41  ;;  %v16735_v41 = vld [vmem:[#allocation208_spill] sm:$0xff] }
 0x79f   : > { %7867 = vmatprep.subr.bf16.mxu1 %v16022_v49 }
 0x7a1   : > { %5102 = vmatmul.mubr.f32.gmra.mrb[60].mxu1 %v13147_v54 }
 0x7a2   : > { %5108 = vmatprep.mubr.f32.mxu1 %v13176_v43  ;;  %7869 = vmatpush1.bf16.msra.mxu1 %v16689_v26  ;;  %v16729_v26 = vld [vmem:[#allocation175_spill] sm:$0xff] }
 0x7a3   : > { %7870 = vmatprep.subr.bf16.mxu1 %v16022_v49 }
 0x7a5   : > { %5111 = vmatmul.mubr.f32.gmra.mrb[62].mxu1 %v13185_v37 }
 0x7a6   : > { %5117 = vmatprep.mubr.f32.mxu1 %v16690_v59  ;;  %7872 = vmatpush1.bf16.msra.mxu1 %v16691_v27  ;;  %v6717_v63 = vpop.xlane.xlu1 %6716  ;;  %v16723_v27 = vld [vmem:[#allocation174_spill] sm:$0xff] }
 0x7a7   : > { %7873 = vmatprep.subr.bf16.mxu1 %v16022_v49  ;;  %v6876_v22 = vsub.f32 %v16692_v32, %v6717_v63  ;;  %v16699_v32 = vld [vmem:[#allocation131_spill] sm:$0xff]  ;;  %v16700_v63 = vld [vmem:[#allocation157_spill] sm:$0xff] }
 0x7a9   : > { %5120 = vmatmul.mubr.f32.gmra.mrb[0].mxu1 %v16693_v57  ;;  %6908 = vst.msk [vmem:[%s13446_s29] sm:$0xff] %vm16696_vm1, %v6876_v22 }
 0x7aa   : > { %5126 = vmatprep.mubr.f32.mxu1 %v16694_v7  ;;  %7875 = vmatpush1.bf16.msra.mxu1 %v16695_v61  ;;  %v16716_v61 = vld [vmem:[#allocation196_spill] sm:$0xff] }
 0x7ab   : > { %7876 = vmatprep.subr.bf16.mxu1 %v16022_v49  ;;  %v6720_v52 = vpop.xlane.xlu0 %6719 }
 0x7ac   : > { %v6877_v33 = vsub.f32 %v16697_v23, %v6720_v52  ;;  %v16705_v23 = vld [vmem:[#allocation165_spill] sm:$0xff] }
 0x7ad   : > { %5129 = vmatmul.mubr.f32.gmra.mrb[2].mxu1 %v16698_v56 }
 0x7ae   : > { %5135 = vmatprep.mubr.f32.mxu1 %v16699_v32  ;;  %7878 = vmatpush1.bf16.msra.mxu1 %v16700_v63  ;;  %6909 = vst.msk [vmem:[%s13446_s29 + $0x8] sm:$0xff] %vm16701_vm11, %v6877_v33  ;;  %v16706_v33 = vld [vmem:[#allocation57_spill] sm:$0xff]  ;;  %vm16711_vm11 = vmmov %vm16696_vm1 }
 0x7af   : > { %7879 = vmatprep.subr.bf16.mxu1 %v16022_v49 }
 0x7b0   : > { %v6723_v4 = vpop.xlane.xlu1 %6722 }
 0x7b1   : > { %v6878_v22 = vsub.f32 %v16702_v39, %v6723_v4  ;;  %5138 = vmatmul.mubr.f32.gmra.mrb[4].mxu1 %v16703_v18  ;;  %v16709_v4 = vld [vmem:[#allocation140_spill] sm:$0xff] }
 0x7b2   : > { %5144 = vmatprep.mubr.f32.mxu1 %v16704_v5  ;;  %7881 = vmatpush1.bf16.msra.mxu1 %v16705_v23  ;;  %v16710_v39 = vld [vmem:[#allocation172_spill] sm:$0xff] }
 0x7b3   : > { %6910 = vst.msk [vmem:[%s13446_s29 + $0x10] sm:$0xff] %vm16696_vm1, %v6878_v22  ;;  %7882 = vmatprep.subr.bf16.mxu1 %v16022_v49 }
 0x7b4   : > { %v6729_v52 = vpop.xlane.xlu1 %6728 }
 0x7b5   : > { %v6726_v34 = vpop.xlane.xlu0 %6725  ;;  %v6880_v14 = vsub.f32 %v16706_v33, %v6729_v52  ;;  %5147 = vmatmul.mubr.f32.gmra.mrb[6].mxu1 %v16708_v17  ;;  %v16714_v33 = vld [vmem:[#allocation81_spill] sm:$0xff] }
 0x7b6   : > { %v6879_v63 = vsub.f32 %v16707_v20, %v6726_v34  ;;  %5153 = vmatprep.mubr.f32.mxu1 %v16709_v4  ;;  %7884 = vmatpush1.bf16.msra.mxu1 %v16710_v39  ;;  %v16715_v34 = vld [vmem:[#allocation193_spill] sm:$0xff]  ;;  %v16719_v39 = vld [vmem:[#allocation83_spill] sm:$0xff] }
 0x7b7   : > { %6912 = vst.msk [vmem:[%s13446_s29 + $0x20] sm:$0xff] %vm16711_vm11, %v6880_v14  ;;  %7885 = vmatprep.subr.bf16.mxu1 %v16022_v49  ;;  %vm16718_vm11 = vmmov %vm16696_vm1 }
 0x7b8   : > { %6911 = vst.msk [vmem:[%s13446_s29 + $0x18] sm:$0xff] %vm16712_vm8, %v6879_v63  ;;  %v6735_v22 = vpop.xlane.xlu1 %6734  ;;  %vm16724_vm8 = vmmov %vm16696_vm1 }
 0x7b9   : > { %v6732_v23 = vpop.xlane.xlu0 %6731  ;;  %v6882_v52 = vsub.f32 %v16713_v19, %v6735_v22  ;;  %5156 = vmatmul.mubr.f32.gmra.mrb[8].mxu1 %v16715_v34  ;;  %v16720_v22 = vld [vmem:[#allocation59_spill] sm:$0xff] }
 0x7ba   : > { %v6881_v20 = vsub.f32 %v16714_v33, %v6732_v23  ;;  %5162 = vmatprep.mubr.f32.mxu1 %v16716_v61  ;;  %7887 = vmatpush1.bf16.msra.mxu1 %v16717_v42  ;;  %v16721_v33 = vld [vmem:[#allocation197_spill] sm:$0xff] }
 0x7bb   : > { %6914 = vst.msk [vmem:[%s13446_s29 + $0x30] sm:$0xff] %vm16696_vm1, %v6882_v52  ;;  %7888 = vmatprep.subr.bf16.mxu1 %v16022_v49  ;;  %v16725_v42 = vld [vmem:[#allocation85_spill] sm:$0xff] }
 0x7bc   : > { %6913 = vst.msk [vmem:[%s13446_s29 + $0x28] sm:$0xff] %vm16718_vm11, %v6881_v20  ;;  %v6741_v14 = vpop.xlane.xlu1 %6740  ;;  %vm16730_vm11 = vmmov %vm16696_vm1 }
 0x7bd   : > { %v6738_v63 = vpop.xlane.xlu0 %6737  ;;  %v6884_v19 = vsub.f32 %v16719_v39, %v6741_v14  ;;  %5165 = vmatmul.mubr.f32.gmra.mrb[10].mxu1 %v16721_v33  ;;  %v16726_v14 = vld [vmem:[#allocation62_spill] sm:$0xff] }
 0x7be   : > { %v6883_v23 = vsub.f32 %v16720_v22, %v6738_v63  ;;  %5171 = vmatprep.mubr.f32.mxu1 %v16722_v1  ;;  %7890 = vmatpush1.bf16.msra.mxu1 %v16723_v27  ;;  %v16727_v22 = vld [vmem:[#allocation201_spill] sm:$0xff] }
 0x7bf   : > { %6916 = vst.msk [vmem:[%s13446_s29 + $0x40] sm:$0xff] %vm16724_vm8, %v6884_v19  ;;  %7891 = vmatprep.subr.bf16.mxu1 %v16022_v49  ;;  %vm16731_vm8 = vmmov %vm16696_vm1  ;;  %v16732_v27 = vld [vmem:[#allocation25_spill] sm:$0xff] }
 0x7c0   : > { %6915 = vst.msk [vmem:[%s13446_s29 + $0x38] sm:$0xff] %vm16696_vm1, %v6883_v23  ;;  %v6747_v52 = vpop.xlane.xlu1 %6746 }
 0x7c1   : > { %v6744_v20 = vpop.xlane.xlu0 %6743  ;;  %v6886_v39 = vsub.f32 %v16725_v42, %v6747_v52  ;;  %5174 = vmatmul.mubr.f32.gmra.mrb[12].mxu1 %v16727_v22  ;;  %v16733_v52 = vld [vmem:[#allocation86_spill] sm:$0xff] }
 0x7c2   : > { %v6885_v63 = vsub.f32 %v16726_v14, %v6744_v20  ;;  %5180 = vmatprep.mubr.f32.mxu1 %v16728_v6  ;;  %7893 = vmatpush1.bf16.msra.mxu1 %v16729_v26  ;;  %v16734_v14 = vld [vmem:[#allocation205_spill] sm:$0xff]  ;;  %v16738_v26 = vld [vmem:[#allocation91_spill] sm:$0xff] }
 0x7c3   : > { %6918 = vst.msk [vmem:[%s13446_s29 + $0x50] sm:$0xff] %vm16730_vm11, %v6886_v39  ;;  %7894 = vmatprep.subr.bf16.mxu1 %v16022_v49  ;;  %vm16737_vm11 = vmmov %vm16696_vm1 }
 0x7c4   : > { %6917 = vst.msk [vmem:[%s13446_s29 + $0x48] sm:$0xff] %vm16731_vm8, %v6885_v63  ;;  %v6753_v19 = vpop.xlane.xlu1 %6752  ;;  %vm16743_vm8 = vmmov %vm16696_vm1 }
 0x7c5   : > { %v6750_v23 = vpop.xlane.xlu0 %6749  ;;  %v6888_v42 = vsub.f32 %v16732_v27, %v6753_v19  ;;  %5183 = vmatmul.mubr.f32.gmra.mrb[14].mxu1 %v16734_v14  ;;  %v16739_v19 = vld [vmem:[#allocation89_spill] sm:$0xff] }
 0x7c6   : > { %v6887_v20 = vsub.f32 %v16733_v52, %v6750_v23  ;;  %5189 = vmatprep.mubr.f32.mxu1 %v16735_v41  ;;  %7896 = vmatpush1.bf16.msra.mxu1 %v16736_v60  ;;  %v16740_v52 = vld [vmem:[#allocation209_spill] sm:$0xff]  ;;  %v16744_v60 = vld [vmem:[#allocation42_spill] sm:$0xff] }
 0x7c7   : > { %6920 = vst.msk [vmem:[%s13446_s29 + $0x60] sm:$0xff] %vm16696_vm1, %v6888_v42  ;;  %7897 = vmatprep.subr.bf16.mxu1 %v16022_v49 }
 0x7c8   : > { %6919 = vst.msk [vmem:[%s13446_s29 + $0x58] sm:$0xff] %vm16737_vm11, %v6887_v20  ;;  %v6759_v39 = vpop.xlane.xlu1 %6758  ;;  %vm16749_vm11 = vmmov %vm16696_vm1 }
 0x7c9   : > { %v6756_v63 = vpop.xlane.xlu0 %6755  ;;  %v6890_v27 = vsub.f32 %v16738_v26, %v6759_v39  ;;  %5192 = vmatmul.mubr.f32.gmra.mrb[16].mxu1 %v16740_v52  ;;  %v16745_v39 = vld [vmem:[#allocation92_spill] sm:$0xff] }
 0x7ca   : > { %v6889_v23 = vsub.f32 %v16739_v19, %v6756_v63  ;;  %5198 = vmatprep.mubr.f32.mxu1 %v16741_v36  ;;  %7899 = vmatpush1.bf16.msra.mxu1 %v16742_v30  ;;  %v16746_v19 = vld [vmem:[#allocation213_spill] sm:$0xff]  ;;  %v16751_v30 = vld [vmem:[#allocation47_spill] sm:$0xff] }
 0x7cb   : > { %6922 = vst.msk [vmem:[%s13446_s29 + $0x70] sm:$0xff] %vm16743_vm8, %v6890_v27  ;;  %7900 = vmatprep.subr.bf16.mxu1 %v16022_v49  ;;  %vm16750_vm8 = vmmov %vm16696_vm1 }
 0x7cc   : > { %6921 = vst.msk [vmem:[%s13446_s29 + $0x68] sm:$0xff] %vm16696_vm1, %v6889_v23  ;;  %v6765_v42 = vpop.xlane.xlu1 %6764 }
 0x7cd   : > { %v6762_v20 = vpop.xlane.xlu0 %6761  ;;  %v6892_v26 = vsub.f32 %v16744_v60, %v6765_v42  ;;  %5201 = vmatmul.mubr.f32.gmra.mrb[18].mxu1 %v16746_v19  ;;  %v16752_v42 = vld [vmem:[#allocation93_spill] sm:$0xff]  ;;  %v16770_v19 = vld [vmem:[#allocation110_spill] sm:$0xff] }
 0x7ce   : > { %v6891_v63 = vsub.f32 %v16745_v39, %v6762_v20  ;;  %5207 = vmatprep.mubr.f32.mxu1 %v16747_v53  ;;  %7902 = vmatpush1.bf16.msra.mxu1 %v16748_v38  ;;  %v16753_v39 = vld [vmem:[#allocation221_spill] sm:$0xff] }
 0x7cf   : > { %6924 = vst.msk [vmem:[%s13446_s29 + $0x80] sm:$0xff] %vm16749_vm11, %v6892_v26  ;;  %7903 = vmatprep.subr.bf16.mxu1 %v16022_v49  ;;  %v16755_v53 = vld [vmem:[#allocation181_spill] sm:$0xff]  ;;  %vm16756_vm11 = vmmov %vm16696_vm1 }
 0x7d0   : > { %6923 = vst.msk [vmem:[%s13446_s29 + $0x78] sm:$0xff] %vm16750_vm8, %v6891_v63  ;;  %v6771_v27 = vpop.xlane.xlu1 %6770  ;;  %v16757_v38 = vld [vmem:[#allocation101_spill] sm:$0xff]  ;;  %vm16762_vm8 = vmmov %vm16696_vm1 }
 0x7d1   : > { %v6768_v23 = vpop.xlane.xlu0 %6767  ;;  %v6894_v60 = vsub.f32 %v16751_v30, %v6771_v27  ;;  %5210 = vmatmul.mubr.f32.gmra.mrb[20].mxu1 %v16753_v39  ;;  %v16758_v27 = vld [vmem:[#allocation97_spill] sm:$0xff] }
 0x7d2   : > { %v6893_v20 = vsub.f32 %v16752_v42, %v6768_v23  ;;  %5216 = vmatprep.mubr.f32.mxu1 %v16754_v21  ;;  %7905 = vmatpush1.bf16.msra.mxu1 %v16755_v53  ;;  %v16759_v42 = vld [vmem:[#allocation226_spill] sm:$0xff]  ;;  %v16760_v39 = vld [vmem:[#allocation229_spill] sm:$0xff]  ;;  %v16761_v21 = vld [vmem:[#allocation184_spill] sm:$0xff] }
 0x7d3   : > { %6926 = vst.msk [vmem:[%s13446_s29 + $0x90] sm:$0xff] %vm16696_vm1, %v6894_v60  ;;  %7906 = vmatprep.subr.bf16.mxu1 %v16022_v49  ;;  %v16763_v53 = vld [vmem:[#allocation66_spill] sm:$0xff] }
 0x7d4   : > { %6925 = vst.msk [vmem:[%s13446_s29 + $0x88] sm:$0xff] %vm16756_vm11, %v6893_v20  ;;  %v6777_v26 = vpop.xlane.xlu1 %6776  ;;  %vm16767_vm11 = vmmov %vm16696_vm1 }
 0x7d5   : > { %v6774_v63 = vpop.xlane.xlu0 %6773  ;;  %v6896_v30 = vsub.f32 %v16757_v38, %v6777_v26  ;;  %5219 = vmatmul.mubr.f32.gmra.mrb[22].mxu1 %v16759_v42  ;;  %v16764_v26 = vld [vmem:[#allocation104_spill] sm:$0xff] }
 0x7d6   : > { %v6895_v23 = vsub.f32 %v16758_v27, %v6774_v63  ;;  %5225 = vmatprep.mubr.f32.mxu1 %v16760_v39  ;;  %7908 = vmatpush1.bf16.msra.mxu1 %v16761_v21  ;;  %v16765_v27 = vld [vmem:[#allocation230_spill] sm:$0xff]  ;;  %v16766_v42 = vld [vmem:[#allocation232_spill] sm:$0xff]  ;;  %v16769_v21 = vld [vmem:[#allocation115_spill] sm:$0xff] }
 0x7d7   : > { %6928 = vst.msk [vmem:[%s13446_s29 + $0xa0] sm:$0xff] %vm16762_vm8, %v6896_v30  ;;  %7909 = vmatprep.subr.bf16.mxu1 %v16022_v49  ;;  %vm16773_vm8 = vmmov %vm16696_vm1 }
 0x7d8   : > { %6927 = vst.msk [vmem:[%s13446_s29 + $0x98] sm:$0xff] %vm16696_vm1, %v6895_v23  ;;  %v6783_v60 = vpop.xlane.xlu1 %6782 }
 0x7d9   : > { %v6780_v20 = vpop.xlane.xlu0 %6779  ;;  %v6898_v38 = vsub.f32 %v16763_v53, %v6783_v60  ;;  %5228 = vmatmul.mubr.f32.gmra.mrb[24].mxu1 %v16765_v27  ;;  %v16772_v53 = vld [vmem:[#allocation235_spill] sm:$0xff]  ;;  %v16776_v27 = vld [vmem:[#allocation102_spill] sm:$0xff] }
 0x7da   : > { %v6897_v63 = vsub.f32 %v16764_v26, %v6780_v20  ;;  %5234 = vmatprep.mubr.f32.mxu1 %v16766_v42 }
 0x7db   : > { %6930 = vst.msk [vmem:[%s13446_s29 + $0xb0] sm:$0xff] %vm16767_vm11, %v6898_v38  ;;  %v16774_v38 = vld [vmem:[#allocation121_spill] sm:$0xff]  ;;  %vm16779_vm11 = vmmov %vm16696_vm1 }
 0x7dc   : > { %6929 = vst.msk [vmem:[%s13446_s29 + $0xa8] sm:$0xff] %vm16768_vm2, %v6897_v63  ;;  %v6789_v30 = vpop.xlane.xlu1 %6788  ;;  %v16775_v63 = vld [vmem:[#allocation118_spill] sm:$0xff]  ;;  %vm16778_vm2 = vmmov %vm16696_vm1 }
 0x7dd   : > { %v6786_v23 = vpop.xlane.xlu0 %6785  ;;  %v6900_v39 = vsub.f32 %v16769_v21, %v6789_v30  ;;  %5237 = vmatmul.mubr.f32.gmra.mrb[26].mxu1 %v16771_v44  ;;  %v16777_v21 = vld [vmem:[#allocation238_spill] sm:$0xff]  ;;  %v16782_v44 = vld [vmem:[#allocation99_spill] sm:$0xff] }
 0x7de   : > { %v6899_v16 = vsub.f32 %v16770_v19, %v6786_v23  ;;  %5243 = vmatprep.mubr.f32.mxu1 %v16772_v53  ;;  %v16781_v23 = vld [vmem:[#allocation124_spill] sm:$0xff] }
 0x7df   : > { %6932 = vst.msk [vmem:[%s13446_s29 + $0xc0] sm:$0xff] %vm16773_vm8, %v6900_v39  ;;  %vm16784_vm8 = vmmov %vm16696_vm1 }
 0x7e0   : > { %6931 = vst.msk [vmem:[%s13446_s29 + $0xb8] sm:$0xff] %vm16696_vm1, %v6899_v16  ;;  %v6795_v60 = vpop.xlane.xlu1 %6794  ;;  %v16780_v16 = vld [vmem:[#allocation127_spill] sm:$0xff] }
 0x7e1   : > { %v6792_v20 = vpop.xlane.xlu0 %6791  ;;  %v6902_v26 = vsub.f32 %v16774_v38, %v6795_v60  ;;  %5246 = vmatmul.mubr.f32.gmra.mrb[28].mxu1 %v16776_v27  ;;  %v16783_v60 = vld [vmem:[#allocation241_spill] sm:$0xff]  ;;  %v16787_v27 = vld [vmem:[#allocation242_spill] sm:$0xff] }
 0x7e2   : > { %v6901_v42 = vsub.f32 %v16775_v63, %v6792_v20  ;;  %5252 = vmatprep.mubr.f32.mxu1 %v16777_v21  ;;  %v16786_v63 = vld [vmem:[#allocation130_spill] sm:$0xff] }
 0x7e3   : > { %6934 = vst.msk [vmem:[%s13446_s29 + $0xd0] sm:$0xff] %vm16778_vm2, %v6902_v26  ;;  %v16785_v26 = vld [vmem:[#allocation133_spill] sm:$0xff]  ;;  %vm16789_vm2 = vmmov %vm16696_vm1 }
 0x7e4   : > { %6933 = vst.msk [vmem:[%s13446_s29 + $0xc8] sm:$0xff] %vm16779_vm11, %v6901_v42  ;;  %v6801_v19 = vpop.xlane.xlu1 %6800  ;;  %vm16790_vm11 = vmmov %vm16696_vm1 }
 0x7e5   : > { %v6798_v39 = vpop.xlane.xlu0 %6797  ;;  %v6904_v30 = vsub.f32 %v16780_v16, %v6801_v19  ;;  %5255 = vmatmul.mubr.f32.gmra.mrb[30].mxu1 %v16782_v44  ;;  %v16788_v19 = vld [vmem:[#allocation106_spill] sm:$0xff]  ;;  %v16791_v16 = vld [vmem:[#allocation136_spill] sm:$0xff] }
 0x7e6   : > { %v6903_v53 = vsub.f32 %v16781_v23, %v6798_v39  ;;  %5261 = vmatprep.mubr.f32.mxu1 %v16783_v60 }
 0x7e7   : > { %6936 = vst.msk [vmem:[%s13446_s29 + $0xe0] sm:$0xff] %vm16784_vm8, %v6904_v30  ;;  %v16792_v30 = vld [vmem:[#allocation245_spill] sm:$0xff]  ;;  %vm16794_vm8 = vmmov %vm16696_vm1 }
 0x7e8   : > { %6935 = vst.msk [vmem:[%s13446_s29 + $0xd8] sm:$0xff] %vm16696_vm1, %v6903_v53  ;;  %v6807_v20 = vpop.xlane.xlu1 %6806  ;;  %v16793_v53 = vld [vmem:[#allocation61_spill] sm:$0xff] }
 0x7e9   : > { %v6804_v38 = vpop.xlane.xlu0 %6803  ;;  %v6906_v42 = vsub.f32 %v16785_v26, %v6807_v20  ;;  %5264 = vmatmul.mubr.f32.gmra.mrb[32].mxu1 %v16787_v27  ;;  %v16795_v20 = vld [vmem:[#allocation248_spill] sm:$0xff] }
 0x7ea   : > { %v6905_v21 = vsub.f32 %v16786_v63, %v6804_v38  ;;  %5270 = vmatprep.mubr.f32.mxu1 %v16788_v19  ;;  %v16796_v38 = vld [vmem:[#allocation108_spill] sm:$0xff]  ;;  %v16798_v63 = vld [vmem:[#allocation251_spill] sm:$0xff] }
 0x7eb   : > { %6938 = vst.msk [vmem:[%s13446_s29 + $0xf0] sm:$0xff] %vm16789_vm2, %v6906_v42  ;;  %v16799_v19 = vld [vmem:[#allocation107_spill] sm:$0xff] }
 0x7ec   : > { %6937 = vst.msk [vmem:[%s13446_s29 + $0xe8] sm:$0xff] %vm16790_vm11, %v6905_v21  ;;  %v16800_v21 = vld [vmem:[#allocation254_spill] sm:$0xff] }
 0x7ed   : > { %v6810_v39 = vpop.xlane.xlu0 %6809  ;;  %5273 = vmatmul.mubr.f32.gmra.mrb[34].mxu1 %v16792_v30  ;;  %v16803_v30 = vld [vmem:[#allocation257_spill] sm:$0xff] }
 0x7ee   : > { %v6907_v23 = vsub.f32 %v16791_v16, %v6810_v39  ;;  %5279 = vmatprep.mubr.f32.mxu1 %v16793_v53  ;;  %v16801_v39 = vld [vmem:[#allocation112_spill] sm:$0xff] }
 0x7f0   : > { %6939 = vst.msk [vmem:[%s13446_s29 + $0xf8] sm:$0xff] %vm16794_vm8, %v6907_v23  ;;  %v16804_v23 = vld [vmem:[#allocation68_spill] sm:$0xff] }
 0x7f1   : > { %5282 = vmatmul.mubr.f32.gmra.mrb[36].mxu1 %v16795_v20 }
 0x7f2   : > { %5288 = vmatprep.mubr.f32.mxu1 %v16796_v38 }
 0x7f3   : > { %v13602_v26 = vpop.f32.mrb[64].mxu0 }
 0x7f4   : > { %16797 = vst [vmem:[#allocation94_spill] sm:$0xff] %v13602_v26  ;;  %v4035_v42 = vpop.f32.mrb[65].mxu0  ;;  %v16806_v26 = vld [vmem:[#allocation260_spill] sm:$0xff] }
 0x7f5   : > { %5291 = vmatmul.mubr.f32.gmra.mrb[38].mxu1 %v16798_v63  ;;  %v16807_v63 = vld [vmem:[#allocation263_spill] sm:$0xff] }
 0x7f6   : > { %5297 = vmatprep.mubr.f32.mxu1 %v16799_v19 }
 0x7f9   : > { %5300 = vmatmul.mubr.f32.gmra.mrb[40].mxu1 %v16800_v21  ;;  %v16809_v21 = vld [vmem:[#allocation264_spill] sm:$0xff] }
 0x7fa   : > { %5306 = vmatprep.mubr.f32.mxu1 %v16801_v39  ;;  %v16810_v39 = vld [vmem:[#allocation267_spill] sm:$0xff] }
 0x7fc   : > { %v13608_v16 = vpop.f32.mrb[66].mxu0 }
 0x7fd   : > { %16802 = vst [vmem:[#allocation43_spill] sm:$0xff] %v13608_v16  ;;  %v4050_v53 = vpop.f32.mrb[67].mxu0  ;;  %5309 = vmatmul.mubr.f32.gmra.mrb[42].mxu1 %v16803_v30  ;;  %v16811_v16 = vld [vmem:[#allocation268_spill] sm:$0xff] }
 0x7fe   : > { %5315 = vmatprep.mubr.f32.mxu1 %v16804_v23  ;;  %v16812_v53 = vld [vmem:[#allocation271_spill] sm:$0xff]  ;;  %v16813_v30 = vld [vmem:[#allocation272_spill] sm:$0xff] }
 0x7ff   : > { %v16814_v23 = vld [vmem:[#allocation275_spill] sm:$0xff] }
 0x800   : > { %v13612_v20 = vpop.f32.mrb[68].mxu0 }
 0x801   : > { %16805 = vst [vmem:[#allocation96_spill] sm:$0xff] %v13612_v20  ;;  %v4065_v38 = vpop.f32.mrb[69].mxu0  ;;  %5318 = vmatmul.mubr.f32.gmra.mrb[44].mxu1 %v16806_v26  ;;  %v16816_v20 = vld [vmem:[#allocation279_spill] sm:$0xff] }
 0x802   : > { %5324 = vmatprep.mubr.f32.mxu1 %v16807_v63  ;;  %v16815_v38 = vld [vmem:[#allocation276_spill] sm:$0xff] }
 0x803   : > { %v16817_v63 = vld [vmem:[#allocation280_spill] sm:$0xff] }
 0x804   : > { %v13616_v42 = vpop.f32.mrb[70].mxu0 }
 0x805   : > { %16808 = vst [vmem:[#allocation48_spill] sm:$0xff] %v13616_v42  ;;  %v4080_v19 = vpop.f32.mrb[71].mxu0  ;;  %5327 = vmatmul.mubr.f32.gmra.mrb[46].mxu1 %v16809_v21  ;;  %v16819_v42 = vld [vmem:[#allocation142_spill] sm:$0xff] }
 0x806   : > { %5333 = vmatprep.mubr.f32.mxu1 %v16810_v39  ;;  %v16818_v19 = vand.u32 4294901760, %v13045_v2  ;;  %v16820_v21 = vand.u32 4294901760, %v16819_v42  ;;  %v16821_v39 = vld [vmem:[#allocation143_spill] sm:$0xff]  ;;  %v16828_v2 = vand.u32 4294901760, %v13119_v35  ;;  %v16836_v35 = vand.u32 4294901760, %v16563_v58 }
 0x807   : > { %v16822_v26 = vand.u32 4294901760, %v16821_v39  ;;  %v16829_v39 = vand.u32 4294901760, %v13127_v3  ;;  %v16837_v3 = vand.u32 4294901760, %v16564_v0  ;;  %v16842_v58 = vand.u32 4294901760, %v16693_v57 }
 0x808   : > { %v16843_v0 = vand.u32 4294901760, %v16694_v7  ;;  %v16848_v57 = vand.u32 4294901760, %v16577_v12  ;;  %v16849_v7 = vand.u32 4294901760, %v16578_v51  ;;  %v16854_v12 = vand.u32 4294901760, %v16708_v17 }
 0x809   : > { %5336 = vmatmul.mubr.f32.gmra.mrb[48].mxu1 %v16811_v16  ;;  %v7910_v16 = vpack.c.bf16 %v16822_v26, %v16820_v21  ;;  %v16832_v21 = vld [vmem:[#allocation149_spill] sm:$0xff]  ;;  %v16855_v51 = vand.u32 4294901760, %v16709_v4  ;;  %v16860_v17 = vand.u32 4294901760, %v16589_v24  ;;  %v16861_v4 = vand.u32 4294901760, %v16590_v10 }
 0x80a   : > { %5342 = vmatprep.mubr.f32.mxu1 %v16812_v53  ;;  %v16823_v53 = vand.u32 4294901760, %v13040_v48  ;;  %v16830_v48 = vld [vmem:[#allocation148_spill] sm:$0xff]  ;;  %v16866_v24 = vand.u32 4294901760, %v16727_v22  ;;  %v16867_v10 = vand.u32 4294901760, %v16728_v6  ;;  %v16872_v22 = vand.u32 4294901760, %v16603_v13  ;;  %v16880_v13 = vld [vmem:[#allocation213_spill] sm:$0xff] }
 0x80b   : > { %v16831_v26 = vand.u32 4294901760, %v16830_v48  ;;  %v16873_v6 = vand.u32 4294901760, %v16604_v50  ;;  %v16882_v50 = vld [vmem:[#allocation217_spill] sm:$0xff] }
 0x80d   : > { %5345 = vmatmul.mubr.f32.gmra.mrb[50].mxu1 %v16813_v30 }
 0x80e   : > { %5351 = vmatprep.mubr.f32.mxu1 %v16814_v23  ;;  %v16824_v23 = vand.u32 4294901760, %v13083_v9 }
 0x811   : > { %5354 = vmatmul.mubr.f32.gmra.mrb[52].mxu1 %v16815_v38  ;;  %v16825_v38 = vand.u32 4294901760, %v16542_v15  ;;  %v16834_v15 = vand.u32 4294901760, %v13147_v54  ;;  %v16840_v54 = vand.u32 4294901760, %v16573_v25  ;;  %v16846_v25 = vand.u32 4294901760, %v16698_v56 }
 0x812   : > { %5360 = vmatprep.mubr.f32.mxu1 %v16816_v20  ;;  %v16826_v20 = vld [vmem:[#allocation146_spill] sm:$0xff]  ;;  %v16852_v56 = vand.u32 4294901760, %v16581_v11  ;;  %v16858_v11 = vand.u32 4294901760, %v16715_v34  ;;  %v16864_v34 = vand.u32 4294901760, %v16594_v55  ;;  %v16870_v55 = vand.u32 4294901760, %v16734_v14 }
 0x813   : > { %v16827_v30 = vand.u32 4294901760, %v16826_v20  ;;  %v7919_v20 = vpack.c.bf16 %v16837_v3, %v16836_v35  ;;  %v16876_v14 = vld [vmem:[#allocation182_spill] sm:$0xff]  ;;  %v16883_v35 = vand.u32 4294901760, %v16882_v50  ;;  %v16943_v50 = vld [vmem:[#allocation267_spill] sm:$0xff] }
 0x815   : > { %5363 = vmatmul.mubr.f32.gmra.mrb[54].mxu1 %v16817_v63  ;;  %v7913_v63 = vpack.c.bf16 %v16827_v30, %v16825_v38  ;;  %v16835_v30 = vand.u32 4294901760, %v13176_v43  ;;  %v16841_v43 = vand.u32 4294901760, %v16574_v47  ;;  %v16847_v47 = vand.u32 4294901760, %v16699_v32 }
 0x816   : > { %5467 = vmatprep.mubr.f32.mxu1 %v16818_v19  ;;  %v7928_v38 = vpack.c.bf16 %v16849_v7, %v16848_v57  ;;  %v16853_v32 = vand.u32 4294901760, %v16582_v40  ;;  %v16859_v40 = vand.u32 4294901760, %v16716_v61  ;;  %v16865_v61 = vand.u32 4294901760, %v16595_v45  ;;  %v16898_v57 = vld [vmem:[#allocation229_spill] sm:$0xff] }
 0x817   : > { %v7922_v42 = vpack.c.bf16 %v16841_v43, %v16840_v54  ;;  %v16871_v45 = vand.u32 4294901760, %v16735_v41  ;;  %v16890_v43 = vld [vmem:[#allocation222_spill] sm:$0xff]  ;;  %v16899_v7 = vand.u32 4294901760, %v16898_v57 }
 0x818   : > { %v7931_v19 = vpack.c.bf16 %v16853_v32, %v16852_v56  ;;  %v7940_v48 = vpack.c.bf16 %v16865_v61, %v16864_v34  ;;  %v16904_v32 = vld [vmem:[#allocation95_spill] sm:$0xff]  ;;  %v16919_v61 = vld [vmem:[#allocation61_spill] sm:$0xff]  ;;  %v16962_v57 = vld [vmem:[#allocation54_spill] sm:$0xff] }
 0x819   : > { %5471 = vmatmul.mubr.f32.vlgmr.msra.gmra.mrb[56].mxu1 %v16823_v53  ;;  %vm16963_vm2 = vnez %v16962_v57 }
 0x81a   : > { %7911 = vmatpush1.bf16.msra.mxu1 %v7910_v16  ;;  %5478 = vmatprep.mubr.f32.mxu1 %v16824_v23  ;;  %v16833_v16 = vand.u32 4294901760, %v16832_v21  ;;  %v16839_v23 = vand.u32 4294901760, %v16690_v59  ;;  %v16845_v59 = vand.u32 4294901760, %v16576_v29  ;;  %v16851_v29 = vand.u32 4294901760, %v16704_v5 }
 0x81b   : > { %7912 = vmatprep.subr.bf16.mxu1 %v16022_v49  ;;  %v16857_v5 = vand.u32 4294901760, %v16586_v46  ;;  %v16863_v46 = vand.u32 4294901760, %v16722_v1  ;;  %v16869_v1 = vand.u32 4294901760, %v16600_v62  ;;  %v7946_v21 = vpack.c.bf16 %v16873_v6, %v16872_v22  ;;  %v16931_v22 = vld [vmem:[#allocation112_spill] sm:$0xff] }
 0x81c   : > { %v7916_v9 = vpack.c.bf16 %v16833_v16, %v16831_v26  ;;  %v16875_v62 = vand.u32 4294901760, %v16741_v36  ;;  %v16877_v16 = vand.u32 4294901760, %v16876_v14  ;;  %v16932_v6 = vand.u32 4294901760, %v16931_v22  ;;  %v17010_v22 = vld [vmem:[#allocation202_spill] sm:$0xff] }
 0x81d   : > { %5482 = vmatmul.mubr.f32.gmra.mrb[58].mxu1 %v16828_v2 }
 0x81e   : > { %5489 = vmatprep.mubr.f32.mxu1 %v16829_v39  ;;  %7914 = vmatpush1.bf16.msra.mxu1 %v7913_v63  ;;  %v16838_v63 = vand.u32 4294901760, %v13185_v37  ;;  %v16844_v37 = vand.u32 4294901760, %v16575_v31  ;;  %v16850_v31 = vand.u32 4294901760, %v16703_v18  ;;  %v16856_v18 = vand.u32 4294901760, %v16585_v8 }
 0x81f   : > { %7915 = vmatprep.subr.bf16.mxu1 %v16022_v49  ;;  %v7937_v39 = vpack.c.bf16 %v16861_v4, %v16860_v17  ;;  %v16862_v8 = vand.u32 4294901760, %v16721_v33  ;;  %v16868_v33 = vand.u32 4294901760, %v16599_v28  ;;  %v16874_v28 = vand.u32 4294901760, %v16740_v52  ;;  %v16884_v52 = vld [vmem:[#allocation185_spill] sm:$0xff] }
 0x820   : > { %v7925_v53 = vpack.c.bf16 %v16845_v59, %v16844_v37  ;;  %v7934_v2 = vpack.c.bf16 %v16857_v5, %v16856_v18  ;;  %v16885_v3 = vand.u32 4294901760, %v16884_v52  ;;  %v16894_v37 = vld [vmem:[#allocation188_spill] sm:$0xff]  ;;  %v16908_v18 = vld [vmem:[#allocation102_spill] sm:$0xff]  ;;  %v16913_v17 = vand.u32 4294901760, %v16783_v60  ;;  %v16925_v60 = vld [vmem:[#allocation251_spill] sm:$0xff] }
 0x821   : > { %5493 = vmatmul.mubr.f32.gmra.mrb[60].mxu1 %v16834_v15  ;;  %v7943_v26 = vpack.c.bf16 %v16869_v1, %v16868_v33  ;;  %v16895_v59 = vand.u32 4294901760, %v16894_v37  ;;  %v16909_v5 = vand.u32 4294901760, %v16908_v18  ;;  %v16914_v4 = vand.u32 4294901760, %v16787_v27  ;;  %v16927_v27 = vld [vmem:[#allocation107_spill] sm:$0xff]  ;;  %v16945_v52 = vld [vmem:[#allocation268_spill] sm:$0xff]  ;;  %v16976_v18 = vld [vmem:[#allocation113_spill] sm:$0xff] }
 0x822   : > { %5500 = vmatprep.mubr.f32.mxu1 %v16835_v30  ;;  %7917 = vmatpush1.bf16.msra.mxu1 %v7916_v9  ;;  %v16878_v9 = vld [vmem:[#allocation183_spill] sm:$0xff]  ;;  %v16881_v30 = vand.u32 4294901760, %v16880_v13  ;;  %v16926_v1 = vand.u32 4294901760, %v16925_v60  ;;  %v16941_v13 = vld [vmem:[#allocation264_spill] sm:$0xff]  ;;  %v17000_v60 = vld [vmem:[#allocation194_spill] sm:$0xff] }
 0x823   : > { %7918 = vmatprep.subr.bf16.mxu1 %v16022_v49  ;;  %v16879_v41 = vand.u32 4294901760, %v16878_v9 }
 0x825   : > { %5504 = vmatmul.mubr.f32.gmra.mrb[62].mxu1 %v16838_v63  ;;  %v7949_v15 = vpack.c.bf16 %v16879_v41, %v16877_v16  ;;  %v16937_v16 = vld [vmem:[#allocation260_spill] sm:$0xff]  ;;  %v16939_v41 = vld [vmem:[#allocation263_spill] sm:$0xff] }
 0x826   : > { %5511 = vmatprep.mubr.f32.mxu1 %v16839_v23  ;;  %7920 = vmatpush1.bf16.msra.mxu1 %v7919_v20  ;;  %v16886_v20 = vld [vmem:[#allocation186_spill] sm:$0xff]  ;;  %v16888_v23 = vld [vmem:[#allocation221_spill] sm:$0xff]  ;;  %v16938_v9 = vand.u32 4294901760, %v16937_v16 }
 0x827   : > { %7921 = vmatprep.subr.bf16.mxu1 %v16022_v49  ;;  %v16887_v36 = vand.u32 4294901760, %v16886_v20  ;;  %v16889_v54 = vand.u32 4294901760, %v16888_v23  ;;  %v16947_v20 = vld [vmem:[#allocation271_spill] sm:$0xff]  ;;  %v17020_v16 = vld [vmem:[#allocation210_spill] sm:$0xff] }
 0x829   : > { %5515 = vmatmul.mubr.f32.gmra.mrb[0].mxu1 %v16842_v58  ;;  %v7952_v63 = vpack.c.bf16 %v16887_v36, %v16885_v3  ;;  %v16892_v58 = vld [vmem:[#allocation187_spill] sm:$0xff]  ;;  %v16946_v3 = vand.u32 4294901760, %v16945_v52  ;;  %v16948_v36 = vand.u32 4294901760, %v16947_v20  ;;  %v17034_v52 = vld [vmem:[#allocation184_spill] sm:$0xff] }
 0x82a   : > { %5522 = vmatprep.mubr.f32.mxu1 %v16843_v0  ;;  %7923 = vmatpush1.bf16.msra.mxu1 %v7922_v42  ;;  %v16891_v42 = vand.u32 4294901760, %v16890_v43  ;;  %v16893_v0 = vand.u32 4294901760, %v16892_v58  ;;  %v17037_v20 = vld [vmem:[#allocation227_spill] sm:$0xff] }
 0x82b   : > { %7924 = vmatprep.subr.bf16.mxu1 %v16022_v49 }
 0x82d   : > { %5526 = vmatmul.mubr.f32.gmra.mrb[2].mxu1 %v16846_v25  ;;  %v16896_v25 = vld [vmem:[#allocation226_spill] sm:$0xff] }
 0x82e   : > { %5533 = vmatprep.mubr.f32.mxu1 %v16847_v47  ;;  %7926 = vmatpush1.bf16.msra.mxu1 %v7925_v53  ;;  %v7955_v53 = vpack.c.bf16 %v16895_v59, %v16893_v0  ;;  %v16897_v47 = vand.u32 4294901760, %v16896_v25  ;;  %v16955_v0 = vld [vmem:[#allocation279_spill] sm:$0xff]  ;;  %v16957_v59 = vld [vmem:[#allocation280_spill] sm:$0xff]  ;;  %v16959_v25 = vmov 1.0  }
 0x82f   : > { %7927 = vmatprep.subr.bf16.mxu1 %v16022_v49  ;;  %v16956_v37 = vand.u32 4294901760, %v16955_v0  ;;  %v17055_v0 = vld [vmem:[#allocation243_spill] sm:$0xff] }
 0x831   : > { %5537 = vmatmul.mubr.f32.gmra.mrb[4].mxu1 %v16850_v31 }
 0x832   : > { %5544 = vmatprep.mubr.f32.mxu1 %v16851_v29  ;;  %7929 = vmatpush1.bf16.msra.mxu1 %v7928_v38  ;;  %v16900_v38 = vld [vmem:[#allocation230_spill] sm:$0xff]  ;;  %v16902_v29 = vld [vmem:[#allocation232_spill] sm:$0xff] }
 0x833   : > { %7930 = vmatprep.subr.bf16.mxu1 %v16022_v49  ;;  %v16901_v31 = vand.u32 4294901760, %v16900_v38  ;;  %v16903_v56 = vand.u32 4294901760, %v16902_v29  ;;  %v16965_v38 = vld [vmem:[#allocation87_spill] sm:$0xff]  ;;  %v16969_v29 = vld [vmem:[#allocation90_spill] sm:$0xff] }
 0x834   : > { %vm16966_vm11 = vnez %v16965_v38  ;;  %vm16970_vm5 = vnez %v16969_v29  ;;  %v17142_v38 = vld [vmem:[#allocation94_spill] sm:$0xff] }
 0x835   : > { %5548 = vmatmul.mubr.f32.gmra.mrb[6].mxu1 %v16854_v12  ;;  %v16906_v12 = vld [vmem:[#allocation235_spill] sm:$0xff] }
 0x836   : > { %5555 = vmatprep.mubr.f32.mxu1 %v16855_v51  ;;  %7932 = vmatpush1.bf16.msra.mxu1 %v7931_v19  ;;  %v16905_v19 = vand.u32 4294901760, %v16904_v32  ;;  %v16907_v51 = vand.u32 4294901760, %v16906_v12  ;;  %v16974_v12 = vld [vmem:[#allocation147_spill] sm:$0xff] }
 0x837   : > { %7933 = vmatprep.subr.bf16.mxu1 %v16022_v49  ;;  %v8828_v32 = vld [vmem:[%s9348_s20] sm:$0xff] }
 0x839   : > { %5559 = vmatmul.mubr.f32.gmra.mrb[8].mxu1 %v16858_v11 }
 0x83a   : > { %5566 = vmatprep.mubr.f32.mxu1 %v16859_v40  ;;  %7935 = vmatpush1.bf16.msra.mxu1 %v7934_v2  ;;  %v16910_v2 = vld [vmem:[#allocation238_spill] sm:$0xff]  ;;  %v16912_v40 = vand.u32 4294901760, %v16782_v44  ;;  %v16923_v44 = vld [vmem:[#allocation108_spill] sm:$0xff] }
 0x83b   : > { %7936 = vmatprep.subr.bf16.mxu1 %v16022_v49  ;;  %v16911_v11 = vand.u32 4294901760, %v16910_v2  ;;  %v16924_v33 = vand.u32 4294901760, %v16923_v44  ;;  %v16978_v2 = vld [vmem:[#allocation116_spill] sm:$0xff]  ;;  %v16997_v44 = vld [vmem:[#allocation195_spill] sm:$0xff] }
 0x83d   : > { %5570 = vmatmul.mubr.f32.gmra.mrb[10].mxu1 %v16862_v8 }
 0x83e   : > { %5577 = vmatprep.mubr.f32.mxu1 %v16863_v46  ;;  %7938 = vmatpush1.bf16.msra.mxu1 %v7937_v39  ;;  %v16915_v39 = vld [vmem:[#allocation106_spill] sm:$0xff]  ;;  %v16917_v46 = vld [vmem:[#allocation245_spill] sm:$0xff] }
 0x83f   : > { %7939 = vmatprep.subr.bf16.mxu1 %v16022_v49  ;;  %v16916_v8 = vand.u32 4294901760, %v16915_v39  ;;  %v16918_v34 = vand.u32 4294901760, %v16917_v46  ;;  %v16984_v39 = vld [vmem:[#allocation157_spill] sm:$0xff]  ;;  %v16987_v46 = vld [vmem:[#allocation132_spill] sm:$0xff] }
 0x841   : > { %5581 = vmatmul.mubr.f32.gmra.mrb[12].mxu1 %v16866_v24  ;;  %v16921_v24 = vld [vmem:[#allocation248_spill] sm:$0xff] }
 0x842   : > { %5588 = vmatprep.mubr.f32.mxu1 %v16867_v10  ;;  %7941 = vmatpush1.bf16.msra.mxu1 %v7940_v48  ;;  %v16920_v48 = vand.u32 4294901760, %v16919_v61  ;;  %v16922_v10 = vand.u32 4294901760, %v16921_v24  ;;  %v16990_v61 = vld [vmem:[#allocation134_spill] sm:$0xff]  ;;  %v16994_v24 = vld [vmem:[#allocation172_spill] sm:$0xff] }
 0x843   : > { %7942 = vmatprep.subr.bf16.mxu1 %v16022_v49 }
 0x845   : > { %5592 = vmatmul.mubr.f32.gmra.mrb[14].mxu1 %v16870_v55  ;;  %v16929_v55 = vld [vmem:[#allocation254_spill] sm:$0xff] }
 0x846   : > { %5599 = vmatprep.mubr.f32.mxu1 %v16871_v45  ;;  %7944 = vmatpush1.bf16.msra.mxu1 %v7943_v26  ;;  %v16928_v26 = vand.u32 4294901760, %v16927_v27  ;;  %v16930_v45 = vand.u32 4294901760, %v16929_v55  ;;  %v17004_v27 = vld [vmem:[#allocation174_spill] sm:$0xff]  ;;  %v17007_v55 = vld [vmem:[#allocation203_spill] sm:$0xff] }
 0x847   : > { %7945 = vmatprep.subr.bf16.mxu1 %v16022_v49 }
 0x849   : > { %5603 = vmatmul.mubr.f32.gmra.mrb[16].mxu1 %v16874_v28 }
 0x84a   : > { %5610 = vmatprep.mubr.f32.mxu1 %v16875_v62  ;;  %7947 = vmatpush1.bf16.msra.mxu1 %v7946_v21  ;;  %v16933_v21 = vld [vmem:[#allocation257_spill] sm:$0xff]  ;;  %v16935_v62 = vld [vmem:[#allocation68_spill] sm:$0xff] }
 0x84b   : > { %7948 = vmatprep.subr.bf16.mxu1 %v16022_v49  ;;  %v16934_v28 = vand.u32 4294901760, %v16933_v21  ;;  %v16936_v14 = vand.u32 4294901760, %v16935_v62  ;;  %v17014_v21 = vld [vmem:[#allocation176_spill] sm:$0xff]  ;;  %v17017_v62 = vld [vmem:[#allocation211_spill] sm:$0xff] }
 0x84d   : > { %5614 = vmatmul.mubr.f32.gmra.mrb[18].mxu1 %v16881_v30  ;;  %v16942_v30 = vand.u32 4294901760, %v16941_v13  ;;  %v17027_v13 = vld [vmem:[#allocation219_spill] sm:$0xff] }
 0x84e   : > { %5621 = vmatprep.mubr.f32.mxu1 %v16883_v35  ;;  %7950 = vmatpush1.bf16.msra.mxu1 %v7949_v15  ;;  %v16940_v15 = vand.u32 4294901760, %v16939_v41  ;;  %v16944_v35 = vand.u32 4294901760, %v16943_v50  ;;  %v17024_v41 = vld [vmem:[#allocation178_spill] sm:$0xff] }
 0x84f   : > { %7951 = vmatprep.subr.bf16.mxu1 %v16022_v49  ;;  %v17030_v50 = vld [vmem:[#allocation218_spill] sm:$0xff] }
 0x851   : > { %5625 = vmatmul.mubr.f32.gmra.mrb[20].mxu1 %v16889_v54  ;;  %v16951_v54 = vld [vmem:[#allocation275_spill] sm:$0xff] }
 0x852   : > { %5632 = vmatprep.mubr.f32.mxu1 %v16891_v42  ;;  %7953 = vmatpush1.bf16.msra.mxu1 %v7952_v63  ;;  %v16949_v63 = vld [vmem:[#allocation272_spill] sm:$0xff]  ;;  %v16952_v43 = vand.u32 4294901760, %v16951_v54 }
 0x853   : > { %7954 = vmatprep.subr.bf16.mxu1 %v16022_v49  ;;  %v16950_v23 = vand.u32 4294901760, %v16949_v63  ;;  %v16953_v42 = vld [vmem:[#allocation276_spill] sm:$0xff]  ;;  %v17043_v63 = vld [vmem:[#allocation234_spill] sm:$0xff] }
 0x854   : > { %v16954_v58 = vand.u32 4294901760, %v16953_v42  ;;  %v17047_v54 = vld [vmem:[#allocation236_spill] sm:$0xff]  ;;  %v17051_v42 = vld [vmem:[#allocation239_spill] sm:$0xff] }
 0x855   : > { %5636 = vmatmul.mubr.f32.gmra.mrb[22].mxu1 %v16897_v47  ;;  %v16960_v47 = vld [vmem:[#allocation84_spill] sm:$0xff] }
 0x856   : > { %5643 = vmatprep.mubr.f32.mxu1 %v16899_v7  ;;  %7956 = vmatpush1.bf16.msra.mxu1 %v7955_v53  ;;  %v16958_v53 = vand.u32 4294901760, %v16957_v59  ;;  %vm16961_vm1 = vnez %v16960_v47  ;;  %v16964_v7 = vld [vmem:[#allocation141_spill] sm:$0xff]  ;;  %v17059_v59 = vld [vmem:[#allocation246_spill] sm:$0xff] }
 0x857   : > { %7957 = vmatprep.subr.bf16.mxu1 %v16022_v49  ;;  %v17140_v47 = vld [vmem:[#allocation265_spill] sm:$0xff] }
 0x859   : > { %5647 = vmatmul.mubr.f32.gmra.mrb[24].mxu1 %v16901_v31  ;;  %v16967_v31 = vld [vmem:[#allocation88_spill] sm:$0xff] }
 0x85a   : > { %5654 = vmatprep.mubr.f32.mxu1 %v16903_v56  ;;  %vm16968_vm8 = vnez %v16967_v31  ;;  %v16971_v56 = vld [vmem:[#allocation144_spill] sm:$0xff] }
 0x85d   : > { %5658 = vmatmul.mubr.f32.gmra.mrb[26].mxu1 %v16905_v19  ;;  %v16973_v19 = vld [vmem:[#allocation32_spill] sm:$0xff] }
 0x85e   : > { %5665 = vmatprep.mubr.f32.mxu1 %v16907_v51  ;;  %v16975_v51 = vld [vmem:[#allocation39_spill] sm:$0xff] }
 0x861   : > { %5669 = vmatmul.mubr.f32.gmra.mrb[28].mxu1 %v16909_v5  ;;  %v16977_v5 = vld [vmem:[#allocation150_spill] sm:$0xff] }
 0x862   : > { %5676 = vmatprep.mubr.f32.mxu1 %v16911_v11  ;;  %v16979_v11 = vld [vmem:[#allocation120_spill] sm:$0xff] }
 0x865   : > { %5680 = vmatmul.mubr.f32.gmra.mrb[30].mxu1 %v16912_v40  ;;  %v16980_v40 = vld [vmem:[#allocation153_spill] sm:$0xff] }
 0x866   : > { %5687 = vmatprep.mubr.f32.mxu1 %v16913_v17  ;;  %v16981_v17 = vld [vmem:[#allocation122_spill] sm:$0xff] }
 0x869   : > { %5691 = vmatmul.mubr.f32.gmra.mrb[32].mxu1 %v16914_v4  ;;  %v16982_v4 = vld [vmem:[#allocation126_spill] sm:$0xff] }
 0x86a   : > { %5698 = vmatprep.mubr.f32.mxu1 %v16916_v8  ;;  %v16985_v8 = vld [vmem:[#allocation128_spill] sm:$0xff] }
 0x86d   : > { %5702 = vmatmul.mubr.f32.gmra.mrb[34].mxu1 %v16918_v34  ;;  %v16989_v34 = vld [vmem:[#allocation165_spill] sm:$0xff] }
 0x86e   : > { %5709 = vmatprep.mubr.f32.mxu1 %v16920_v48  ;;  %v16992_v48 = vld [vmem:[#allocation138_spill] sm:$0xff] }
 0x871   : > { %5713 = vmatmul.mubr.f32.gmra.mrb[36].mxu1 %v16922_v10  ;;  %v16995_v10 = vld [vmem:[#allocation139_spill] sm:$0xff] }
 0x872   : > { %5720 = vmatprep.mubr.f32.mxu1 %v16924_v33  ;;  %v16999_v33 = vld [vmem:[#allocation173_spill] sm:$0xff] }
 0x875   : > { %5724 = vmatmul.mubr.f32.gmra.mrb[38].mxu1 %v16926_v1  ;;  %v17002_v1 = vld [vmem:[#allocation199_spill] sm:$0xff] }
 0x876   : > { %5731 = vmatprep.mubr.f32.mxu1 %v16928_v26  ;;  %v17005_v26 = vld [vmem:[#allocation198_spill] sm:$0xff] }
 0x879   : > { %5735 = vmatmul.mubr.f32.gmra.mrb[40].mxu1 %v16930_v45  ;;  %v17009_v45 = vld [vmem:[#allocation175_spill] sm:$0xff] }
 0x87a   : > { %5742 = vmatprep.mubr.f32.mxu1 %v16932_v6  ;;  %v17012_v6 = vld [vmem:[#allocation207_spill] sm:$0xff] }
 0x87d   : > { %5746 = vmatmul.mubr.f32.gmra.mrb[42].mxu1 %v16934_v28  ;;  %v17015_v28 = vld [vmem:[#allocation206_spill] sm:$0xff] }
 0x87e   : > { %5753 = vmatprep.mubr.f32.mxu1 %v16936_v14  ;;  %v17019_v14 = vld [vmem:[#allocation177_spill] sm:$0xff] }
 0x881   : > { %5757 = vmatmul.mubr.f32.gmra.mrb[44].mxu1 %v16938_v9  ;;  %v17022_v9 = vld [vmem:[#allocation215_spill] sm:$0xff] }
 0x882   : > { %5764 = vmatprep.mubr.f32.mxu1 %v16940_v15  ;;  %v17025_v15 = vld [vmem:[#allocation214_spill] sm:$0xff] }
 0x885   : > { %5768 = vmatmul.mubr.f32.gmra.mrb[46].mxu1 %v16942_v30  ;;  %v17029_v30 = vld [vmem:[#allocation181_spill] sm:$0xff] }
 0x886   : > { %5775 = vmatprep.mubr.f32.mxu1 %v16944_v35  ;;  %v17032_v35 = vld [vmem:[#allocation224_spill] sm:$0xff] }
 0x889   : > { %5779 = vmatmul.mubr.f32.gmra.mrb[48].mxu1 %v16946_v3  ;;  %v17035_v3 = vld [vmem:[#allocation223_spill] sm:$0xff] }
 0x88a   : > { %5786 = vmatprep.mubr.f32.mxu1 %v16948_v36  ;;  %v17041_v36 = vld [vmem:[#allocation233_spill] sm:$0xff] }
 0x88d   : > { %5790 = vmatmul.mubr.f32.gmra.mrb[50].mxu1 %v16950_v23  ;;  %v17045_v23 = vld [vmem:[#allocation237_spill] sm:$0xff] }
 0x88e   : > { %5797 = vmatprep.mubr.f32.mxu1 %v16952_v43  ;;  %v17049_v43 = vld [vmem:[#allocation240_spill] sm:$0xff] }
 0x891   : > { %5801 = vmatmul.mubr.f32.gmra.mrb[52].mxu1 %v16954_v58  ;;  %v17053_v58 = vld [vmem:[#allocation244_spill] sm:$0xff] }
 0x892   : > { %5808 = vmatprep.mubr.f32.mxu1 %v16956_v37  ;;  %v17057_v37 = vld [vmem:[#allocation247_spill] sm:$0xff] }
 0x895   : > { %5812 = vmatmul.mubr.f32.gmra.mrb[54].mxu1 %v16958_v53  ;;  %v17061_v53 = vld [vmem:[#allocation250_spill] sm:$0xff] }
 0x896   : > { %7378 = vmatprep.mubr.msk.f32.mxu1 %vm16961_vm1, %v16959_v25 }
 0x899   : > { %7379 = vmatmul.mubr.msk.f32.vlgmr.msra.gmra.mrb[56].mxu1 %vm16963_vm2, %v16959_v25 }
 0x89a   : > { %7959 = vmatpush1.bf16.msra.mxu1 %v16964_v7  ;;  %7380 = vmatprep.mubr.msk.f32.mxu1 %vm16966_vm11, %v16959_v25  ;;  %v17063_v7 = vld [vmem:[#allocation249_spill] sm:$0xff] }
 0x89b   : > { %7960 = vmatprep.subr.bf16.mxu1 %v16022_v49 }
 0x89d   : > { %7381 = vmatmul.mubr.msk.f32.gmra.mrb[58].mxu1 %vm16968_vm8, %v16959_v25 }
 0x89e   : > { %7382 = vmatprep.mubr.msk.f32.mxu1 %vm16970_vm5, %v16959_v25  ;;  %7962 = vmatpush1.bf16.msra.mxu1 %v16971_v56  ;;  %v17065_v56 = vld [vmem:[#allocation253_spill] sm:$0xff] }
 0x89f   : > { %7963 = vmatprep.subr.bf16.mxu1 %v16022_v49 }
 0x8a1   : > { %7383 = vmatmul.mubr.msk.f32.gmra.mrb[60].mxu1 %vm13101_vm6, %v16959_v25 }
 0x8a2   : > { %7384 = vmatprep.mubr.msk.f32.mxu1 %vm13137_vm9, %v16959_v25  ;;  %7965 = vmatpush1.bf16.msra.mxu1 %v16974_v12  ;;  %vm17046_vm9 = vnez %v17045_v23  ;;  %v17067_v12 = vld [vmem:[#allocation252_spill] sm:$0xff] }
 0x8a3   : > { %7966 = vmatprep.subr.bf16.mxu1 %v16022_v49 }
 0x8a5   : > { %7385 = vmatmul.mubr.msk.f32.gmra.mrb[62].mxu1 %vm13142_vm12, %v16959_v25 }
 0x8a6   : > { %7386 = vmatprep.mubr.msk.f32.mxu1 %vm11766_vm14, %v16959_v25  ;;  %7968 = vmatpush1.bf16.msra.mxu1 %v16977_v5  ;;  %vm16983_vm14 = vnez %v16982_v4  ;;  %v17069_v5 = vld [vmem:[#allocation256_spill] sm:$0xff] }
 0x8a7   : > { %7969 = vmatprep.subr.bf16.mxu1 %v16022_v49 }
 0x8a9   : > { %7387 = vmatmul.mubr.msk.f32.gmra.mrb[0].mxu1 %vm11761_vm13, %v16959_v25  ;;  %vm16986_vm13 = vnez %v16985_v8 }
 0x8aa   : > { %7388 = vmatprep.mubr.msk.f32.mxu1 %vm11804_vm0, %v16959_v25  ;;  %7971 = vmatpush1.bf16.msra.mxu1 %v16980_v40  ;;  %vm16988_vm0 = vnez %v16987_v46  ;;  %v17070_v40 = vld [vmem:[#allocation255_spill] sm:$0xff] }
 0x8ab   : > { %7972 = vmatprep.subr.bf16.mxu1 %v16022_v49 }
 0x8ad   : > { %7389 = vmatmul.mubr.msk.f32.gmra.mrb[2].mxu1 %vm11799_vm15, %v16959_v25  ;;  %vm16991_vm15 = vnez %v16990_v61 }
 0x8ae   : > { %7390 = vmatprep.mubr.msk.f32.mxu1 %vm16983_vm14, %v16959_v25  ;;  %7974 = vmatpush1.bf16.msra.mxu1 %v16984_v39  ;;  %vm16993_vm14 = vnez %v16992_v48 }
 0x8af   : > { %7975 = vmatprep.subr.bf16.mxu1 %v16022_v49 }
 0x8b1   : > { %7391 = vmatmul.mubr.msk.f32.gmra.mrb[4].mxu1 %vm16986_vm13, %v16959_v25  ;;  %vm16996_vm13 = vnez %v16995_v10 }
 0x8b2   : > { %7392 = vmatprep.mubr.msk.f32.mxu1 %vm16988_vm0, %v16959_v25  ;;  %7977 = vmatpush1.bf16.msra.mxu1 %v16989_v34  ;;  %vm16998_vm0 = vnez %v16997_v44  ;;  %v17073_v34 = vld [vmem:[#allocation258_spill] sm:$0xff] }
 0x8b3   : > { %7978 = vmatprep.subr.bf16.mxu1 %v16022_v49 }
 0x8b5   : > { %7393 = vmatmul.mubr.msk.f32.gmra.mrb[6].mxu1 %vm16991_vm15, %v16959_v25  ;;  %vm17001_vm15 = vnez %v17000_v60 }
 0x8b6   : > { %7394 = vmatprep.mubr.msk.f32.mxu1 %vm16993_vm14, %v16959_v25  ;;  %7980 = vmatpush1.bf16.msra.mxu1 %v16994_v24  ;;  %vm17003_vm14 = vnez %v17002_v1  ;;  %v17074_v24 = vld [vmem:[#allocation262_spill] sm:$0xff] }
 0x8b7   : > { %7981 = vmatprep.subr.bf16.mxu1 %v16022_v49 }
 0x8b9   : > { %7395 = vmatmul.mubr.msk.f32.gmra.mrb[8].mxu1 %vm16996_vm13, %v16959_v25  ;;  %vm17006_vm13 = vnez %v17005_v26 }
 0x8ba   : > { %7396 = vmatprep.mubr.msk.f32.mxu1 %vm16998_vm0, %v16959_v25  ;;  %7983 = vmatpush1.bf16.msra.mxu1 %v16999_v33  ;;  %vm17008_vm0 = vnez %v17007_v55  ;;  %v17076_v33 = vld [vmem:[#allocation261_spill] sm:$0xff] }
 0x8bb   : > { %7984 = vmatprep.subr.bf16.mxu1 %v16022_v49 }
 0x8bd   : > { %7397 = vmatmul.mubr.msk.f32.gmra.mrb[10].mxu1 %vm17001_vm15, %v16959_v25  ;;  %vm17011_vm15 = vnez %v17010_v22 }
 0x8be   : > { %7398 = vmatprep.mubr.msk.f32.mxu1 %vm17003_vm14, %v16959_v25  ;;  %7986 = vmatpush1.bf16.msra.mxu1 %v17004_v27  ;;  %vm17013_vm14 = vnez %v17012_v6  ;;  %v17078_v27 = vld [vmem:[#allocation266_spill] sm:$0xff] }
 0x8bf   : > { %7987 = vmatprep.subr.bf16.mxu1 %v16022_v49 }
 0x8c1   : > { %7399 = vmatmul.mubr.msk.f32.gmra.mrb[12].mxu1 %vm17006_vm13, %v16959_v25  ;;  %vm17016_vm13 = vnez %v17015_v28 }
 0x8c2   : > { %7400 = vmatprep.mubr.msk.f32.mxu1 %vm17008_vm0, %v16959_v25  ;;  %7989 = vmatpush1.bf16.msra.mxu1 %v17009_v45  ;;  %vm17018_vm0 = vnez %v17017_v62  ;;  %v17080_v45 = vld [vmem:[#allocation265_spill] sm:$0xff] }
 0x8c3   : > { %7990 = vmatprep.subr.bf16.mxu1 %v16022_v49 }
 0x8c5   : > { %7401 = vmatmul.mubr.msk.f32.gmra.mrb[14].mxu1 %vm17011_vm15, %v16959_v25  ;;  %vm17021_vm15 = vnez %v17020_v16 }
 0x8c6   : > { %7402 = vmatprep.mubr.msk.f32.mxu1 %vm17013_vm14, %v16959_v25  ;;  %7992 = vmatpush1.bf16.msra.mxu1 %v17014_v21  ;;  %vm17023_vm14 = vnez %v17022_v9 }
 0x8c7   : > { %7993 = vmatprep.subr.bf16.mxu1 %v16022_v49 }
 0x8c9   : > { %7403 = vmatmul.mubr.msk.f32.gmra.mrb[16].mxu1 %vm17016_vm13, %v16959_v25  ;;  %vm17026_vm13 = vnez %v17025_v15 }
 0x8ca   : > { %7404 = vmatprep.mubr.msk.f32.mxu1 %vm17018_vm0, %v16959_v25  ;;  %7995 = vmatpush1.bf16.msra.mxu1 %v17019_v14  ;;  %vm17028_vm0 = vnez %v17027_v13  ;;  %v17083_v14 = vld [vmem:[#allocation269_spill] sm:$0xff] }
 0x8cb   : > { %7996 = vmatprep.subr.bf16.mxu1 %v16022_v49 }
 0x8cd   : > { %7405 = vmatmul.mubr.msk.f32.gmra.mrb[18].mxu1 %vm17021_vm15, %v16959_v25  ;;  %vm17031_vm15 = vnez %v17030_v50 }
 0x8ce   : > { %7406 = vmatprep.mubr.msk.f32.mxu1 %vm17023_vm14, %v16959_v25  ;;  %7998 = vmatpush1.bf16.msra.mxu1 %v17024_v41  ;;  %vm17033_vm14 = vnez %v17032_v35  ;;  %v17085_v41 = vld [vmem:[#allocation274_spill] sm:$0xff] }
 0x8cf   : > { %7999 = vmatprep.subr.bf16.mxu1 %v16022_v49 }
 0x8d1   : > { %7407 = vmatmul.mubr.msk.f32.gmra.mrb[20].mxu1 %vm17026_vm13, %v16959_v25  ;;  %vm17036_vm13 = vnez %v17035_v3 }
 0x8d2   : > { %7408 = vmatprep.mubr.msk.f32.mxu1 %vm17028_vm0, %v16959_v25  ;;  %8001 = vmatpush1.bf16.msra.mxu1 %v17029_v30  ;;  %vm17038_vm0 = vnez %v17037_v20  ;;  %v17087_v30 = vld [vmem:[#allocation273_spill] sm:$0xff] }
 0x8d3   : > { %8002 = vmatprep.subr.bf16.mxu1 %v16022_v49  ;;  %v17039_v49 = vld [vmem:[#allocation231_spill] sm:$0xff] }
 0x8d4   : > { %vm17040_vm12 = vnez %v17039_v49 }
 0x8d5   : > { %7409 = vmatmul.mubr.msk.f32.gmra.mrb[22].mxu1 %vm17031_vm15, %v16959_v25  ;;  %vm17042_vm15 = vnez %v17041_v36 }
 0x8d6   : > { %7410 = vmatprep.mubr.msk.f32.mxu1 %vm17033_vm14, %v16959_v25  ;;  %8004 = vmatpush1.bf16.msra.mxu1 %v17034_v52  ;;  %vm17044_vm14 = vnez %v17043_v63  ;;  %v17089_v52 = vld [vmem:[#allocation278_spill] sm:$0xff] }
 0x8d9   : > { %7411 = vmatmul.mubr.msk.f32.gmra.mrb[24].mxu1 %vm17036_vm13, %v16959_v25  ;;  %vm17048_vm13 = vnez %v17047_v54 }
 0x8da   : > { %7412 = vmatprep.mubr.msk.f32.mxu1 %vm17038_vm0, %v16959_v25  ;;  %vm17050_vm0 = vnez %v17049_v43 }
 0x8dd   : > { %7413 = vmatmul.mubr.msk.f32.gmra.mrb[26].mxu1 %vm17040_vm12, %v16959_v25  ;;  %vm17052_vm12 = vnez %v17051_v42 }
 0x8de   : > { %7414 = vmatprep.mubr.msk.f32.mxu1 %vm17042_vm15, %v16959_v25  ;;  %vm17054_vm15 = vnez %v17053_v58 }
 0x8e1   : > { %7415 = vmatmul.mubr.msk.f32.gmra.mrb[28].mxu1 %vm17044_vm14, %v16959_v25  ;;  %vm17056_vm14 = vnez %v17055_v0 }
 0x8e2   : > { %7416 = vmatprep.mubr.msk.f32.mxu1 %vm17046_vm9, %v16959_v25  ;;  %vm17058_vm9 = vnez %v17057_v37  ;;  %v8835_v37 = vld [vmem:[%s9348_s20 + $0x38] sm:$0xff] }
 0x8e5   : > { %7417 = vmatmul.mubr.msk.f32.gmra.mrb[30].mxu1 %vm17048_vm13, %v16959_v25  ;;  %vm17060_vm13 = vnez %v17059_v59 }
 0x8e6   : > { %7418 = vmatprep.mubr.msk.f32.mxu1 %vm17050_vm0, %v16959_v25  ;;  %vm17062_vm0 = vnez %v17061_v53 }
 0x8e9   : > { %7419 = vmatmul.mubr.msk.f32.gmra.mrb[32].mxu1 %vm17052_vm12, %v16959_v25  ;;  %vm17064_vm12 = vnez %v17063_v7 }
 0x8ea   : > { %7420 = vmatprep.mubr.msk.f32.mxu1 %vm17054_vm15, %v16959_v25  ;;  %vm17066_vm15 = vnez %v17065_v56 }
 0x8ed   : > { %7421 = vmatmul.mubr.msk.f32.gmra.mrb[34].mxu1 %vm17056_vm14, %v16959_v25  ;;  %vm17068_vm14 = vnez %v17067_v12 }
 0x8ee   : > { %7422 = vmatprep.mubr.msk.f32.mxu1 %vm17058_vm9, %v16959_v25 }
 0x8f1   : > { %7423 = vmatmul.mubr.msk.f32.gmra.mrb[36].mxu1 %vm17060_vm13, %v16959_v25  ;;  %vm17071_vm13 = vnez %v17070_v40 }
 0x8f2   : > { %7424 = vmatprep.mubr.msk.f32.mxu1 %vm17062_vm0, %v16959_v25 }
 0x8f5   : > { %7425 = vmatmul.mubr.msk.f32.gmra.mrb[38].mxu1 %vm17064_vm12, %v16959_v25 }
 0x8f6   : > { %7426 = vmatprep.mubr.msk.f32.mxu1 %vm17066_vm15, %v16959_v25  ;;  %vm17075_vm15 = vnez %v17074_v24 }
 0x8f9   : > { %7427 = vmatmul.mubr.msk.f32.gmra.mrb[40].mxu1 %vm17068_vm14, %v16959_v25  ;;  %vm17077_vm14 = vnez %v17076_v33 }
 0x8fa   : > { %7428 = vmatprep.mubr.msk.f32.mxu1 %vm16663_vm4, %v16959_v25  ;;  %vm17079_vm4 = vnez %v17078_v27 }
 0x8fd   : > { %7429 = vmatmul.mubr.msk.f32.gmra.mrb[42].mxu1 %vm17071_vm13, %v16959_v25  ;;  %vm17081_vm13 = vnez %v17080_v45  ;;  %v17091_v45 = vld [vmem:[#allocation277_spill] sm:$0xff] }
 0x8fe   : > { %7430 = vmatprep.mubr.msk.f32.mxu1 %vm16667_vm3, %v16959_v25 }
 0x901   : > { %7431 = vmatmul.mubr.msk.f32.gmra.mrb[44].mxu1 %vm16669_vm10, %v16959_v25  ;;  %vm17084_vm10 = vnez %v17083_v14  ;;  %v8838_v14 = vld [vmem:[%s9348_s20 + $0x50] sm:$0xff] }
 0x902   : > { %7432 = vmatprep.mubr.msk.f32.mxu1 %vm17075_vm15, %v16959_v25  ;;  %vm17086_vm15 = vnez %v17085_v41 }
 0x905   : > { %7433 = vmatmul.mubr.msk.f32.gmra.mrb[46].mxu1 %vm17077_vm14, %v16959_v25  ;;  %vm17088_vm14 = vnez %v17087_v30 }
 0x906   : > { %7434 = vmatprep.mubr.msk.f32.mxu1 %vm17079_vm4, %v16959_v25  ;;  %vm17090_vm4 = vnez %v17089_v52 }
 0x909   : > { %7435 = vmatmul.mubr.msk.f32.gmra.mrb[48].mxu1 %vm17081_vm13, %v16959_v25  ;;  %vm17092_vm13 = vnez %v17091_v45 }
 0x90a   : > { %7436 = vmatprep.mubr.msk.f32.mxu1 %vm16511_vm7, %v16959_v25 }
 0x90d   : > { %7437 = vmatmul.mubr.msk.f32.gmra.mrb[50].mxu1 %vm17084_vm10, %v16959_v25 }
 0x90e   : > { %7438 = vmatprep.mubr.msk.f32.mxu1 %vm17086_vm15, %v16959_v25 }
 0x911   : > { %7439 = vmatmul.mubr.msk.f32.gmra.mrb[52].mxu1 %vm17088_vm14, %v16959_v25 }
 0x912   : > { %7440 = vmatprep.mubr.msk.f32.mxu1 %vm17090_vm4, %v16959_v25 }
 0x915   : > { %7441 = vmatmul.mubr.msk.f32.gmra.mrb[54].mxu1 %vm17092_vm13, %v16959_v25 }
 0x916   : > { %7442 = vmatprep.mubr.msk.f32.mxu1 %vm16961_vm1, %v16959_v25  ;;  %vm17093_vm1 = vnez %v16973_v19 }
 0x919   : > { %7443 = vmatmul.mubr.msk.f32.vlgmr.msra.gmra.mrb[56].mxu1 %vm16963_vm2, %v16959_v25  ;;  %vm17094_vm2 = vnez %v16975_v51 }
 0x91a   : > { %7444 = vmatprep.mubr.msk.f32.mxu1 %vm16966_vm11, %v16959_v25  ;;  %vm17095_vm11 = vnez %v16976_v18 }
 0x91d   : > { %7445 = vmatmul.mubr.msk.f32.gmra.mrb[58].mxu1 %vm16968_vm8, %v16959_v25  ;;  %vm17096_vm8 = vnez %v16978_v2  ;;  %v17143_v2 = vld [vmem:[#allocation43_spill] sm:$0xff] }
 0x91e   : > { %7446 = vmatprep.mubr.msk.f32.mxu1 %vm16970_vm5, %v16959_v25  ;;  %vm17097_vm5 = vnez %v16979_v11 }
 0x921   : > { %7447 = vmatmul.mubr.msk.f32.gmra.mrb[60].mxu1 %vm13101_vm6, %v16959_v25  ;;  %vm17098_vm6 = vnez %v16981_v17 }
 0x922   : > { %7448 = vmatprep.mubr.msk.f32.mxu1 %vm17093_vm1, %v16959_v25  ;;  %vm17099_vm1 = vnez %v16982_v4  ;;  %v8829_v4 = vld [vmem:[%s9348_s20 + $0x8] sm:$0xff] }
 0x925   : > { %7449 = vmatmul.mubr.msk.f32.gmra.mrb[62].mxu1 %vm17094_vm2, %v16959_v25  ;;  %vm17100_vm2 = vnez %v16985_v8 }
 0x926   : > { %7450 = vmatprep.mubr.msk.f32.mxu1 %vm17095_vm11, %v16959_v25  ;;  %vm17101_vm11 = vnez %v16987_v46 }
 0x929   : > { %7451 = vmatmul.mubr.msk.f32.gmra.mrb[0].mxu1 %vm17096_vm8, %v16959_v25  ;;  %vm17102_vm8 = vnez %v16990_v61  ;;  %v17144_v61 = vld [vmem:[#allocation96_spill] sm:$0xff] }
 0x92a   : > { %7452 = vmatprep.mubr.msk.f32.mxu1 %vm17097_vm5, %v16959_v25  ;;  %vm17103_vm5 = vnez %v16992_v48 }
 0x92d   : > { %7453 = vmatmul.mubr.msk.f32.gmra.mrb[2].mxu1 %vm17098_vm6, %v16959_v25  ;;  %vm17104_vm6 = vnez %v16995_v10 }
 0x92e   : > { %7454 = vmatprep.mubr.msk.f32.mxu1 %vm17099_vm1, %v16959_v25  ;;  %vm17105_vm1 = vnez %v16997_v44  ;;  %v8830_v44 = vld [vmem:[%s9348_s20 + $0x10] sm:$0xff] }
 0x931   : > { %7455 = vmatmul.mubr.msk.f32.gmra.mrb[4].mxu1 %vm17100_vm2, %v16959_v25  ;;  %vm17106_vm2 = vnez %v17000_v60 }
 0x932   : > { %7456 = vmatprep.mubr.msk.f32.mxu1 %vm17101_vm11, %v16959_v25  ;;  %vm17107_vm11 = vnez %v17002_v1 }
 0x935   : > { %7457 = vmatmul.mubr.msk.f32.gmra.mrb[6].mxu1 %vm17102_vm8, %v16959_v25  ;;  %vm17108_vm8 = vnez %v17005_v26 }
 0x936   : > { %7458 = vmatprep.mubr.msk.f32.mxu1 %vm17103_vm5, %v16959_v25  ;;  %vm17109_vm5 = vnez %v17007_v55  ;;  %v17145_v55 = vld [vmem:[#allocation48_spill] sm:$0xff] }
 0x939   : > { %7459 = vmatmul.mubr.msk.f32.gmra.mrb[8].mxu1 %vm17104_vm6, %v16959_v25  ;;  %vm17110_vm6 = vnez %v17010_v22 }
 0x93a   : > { %7460 = vmatprep.mubr.msk.f32.mxu1 %vm17105_vm1, %v16959_v25  ;;  %vm17111_vm1 = vnez %v17012_v6 }
 0x93d   : > { %7461 = vmatmul.mubr.msk.f32.gmra.mrb[10].mxu1 %vm17106_vm2, %v16959_v25  ;;  %vm17112_vm2 = vnez %v17015_v28  ;;  %v8831_v28 = vld [vmem:[%s9348_s20 + $0x18] sm:$0xff] }
 0x93e   : > { %7462 = vmatprep.mubr.msk.f32.mxu1 %vm17107_vm11, %v16959_v25  ;;  %vm17113_vm11 = vnez %v17017_v62 }
 0x941   : > { %7463 = vmatmul.mubr.msk.f32.gmra.mrb[12].mxu1 %vm17108_vm8, %v16959_v25  ;;  %vm17114_vm8 = vnez %v17020_v16 }
 0x942   : > { %7464 = vmatprep.mubr.msk.f32.mxu1 %vm17109_vm5, %v16959_v25  ;;  %vm17115_vm5 = vnez %v17022_v9 }
 0x945   : > { %7465 = vmatmul.mubr.msk.f32.gmra.mrb[14].mxu1 %vm17110_vm6, %v16959_v25  ;;  %vm17116_vm6 = vnez %v17025_v15  ;;  %v8832_v15 = vld [vmem:[%s9348_s20 + $0x20] sm:$0xff] }
 0x946   : > { %7466 = vmatprep.mubr.msk.f32.mxu1 %vm17111_vm1, %v16959_v25  ;;  %vm17117_vm1 = vnez %v17027_v13 }
 0x949   : > { %7467 = vmatmul.mubr.msk.f32.gmra.mrb[16].mxu1 %vm17112_vm2, %v16959_v25  ;;  %vm17118_vm2 = vnez %v17030_v50 }
 0x94a   : > { %7468 = vmatprep.mubr.msk.f32.mxu1 %vm17113_vm11, %v16959_v25  ;;  %vm17119_vm11 = vnez %v17032_v35 }
 0x94d   : > { %7469 = vmatmul.mubr.msk.f32.gmra.mrb[18].mxu1 %vm17114_vm8, %v16959_v25  ;;  %vm17120_vm8 = vnez %v17035_v3 }
 0x94e   : > { %7470 = vmatprep.mubr.msk.f32.mxu1 %vm17115_vm5, %v16959_v25  ;;  %vm17121_vm5 = vnez %v17037_v20  ;;  %v8833_v20 = vld [vmem:[%s9348_s20 + $0x28] sm:$0xff] }
 0x951   : > { %7471 = vmatmul.mubr.msk.f32.gmra.mrb[20].mxu1 %vm17116_vm6, %v16959_v25  ;;  %vm17122_vm6 = vnez %v17039_v49 }
 0x952   : > { %7472 = vmatprep.mubr.msk.f32.mxu1 %vm17117_vm1, %v16959_v25  ;;  %vm17123_vm1 = vnez %v17041_v36 }
 0x955   : > { %7473 = vmatmul.mubr.msk.f32.gmra.mrb[22].mxu1 %vm17118_vm2, %v16959_v25  ;;  %vm17124_vm2 = vnez %v17043_v63 }
 0x956   : > { %7474 = vmatprep.mubr.msk.f32.mxu1 %vm17119_vm11, %v16959_v25  ;;  %vm17125_vm11 = vnez %v17045_v23 }
 0x959   : > { %7475 = vmatmul.mubr.msk.f32.gmra.mrb[24].mxu1 %vm17120_vm8, %v16959_v25  ;;  %vm17126_vm8 = vnez %v17047_v54  ;;  %v8834_v54 = vld [vmem:[%s9348_s20 + $0x30] sm:$0xff] }
 0x95a   : > { %7476 = vmatprep.mubr.msk.f32.mxu1 %vm17121_vm5, %v16959_v25  ;;  %vm17127_vm5 = vnez %v17049_v43 }
 0x95d   : > { %7477 = vmatmul.mubr.msk.f32.gmra.mrb[26].mxu1 %vm17122_vm6, %v16959_v25  ;;  %vm17128_vm6 = vnez %v17051_v42 }
 0x95e   : > { %7478 = vmatprep.mubr.msk.f32.mxu1 %vm17123_vm1, %v16959_v25  ;;  %vm17129_vm1 = vnez %v17053_v58 }
 0x961   : > { %7479 = vmatmul.mubr.msk.f32.gmra.mrb[28].mxu1 %vm17124_vm2, %v16959_v25  ;;  %vm17130_vm2 = vnez %v17055_v0 }
 0x962   : > { %7480 = vmatprep.mubr.msk.f32.mxu1 %vm17125_vm11, %v16959_v25  ;;  %vm17131_vm11 = vnez %v17059_v59 }
 0x965   : > { %7481 = vmatmul.mubr.msk.f32.gmra.mrb[30].mxu1 %vm17126_vm8, %v16959_v25  ;;  %vm17132_vm8 = vnez %v17065_v56 }
 0x966   : > { %7482 = vmatprep.mubr.msk.f32.mxu1 %vm17127_vm5, %v16959_v25  ;;  %vm17133_vm5 = vnez %v17067_v12  ;;  %v8836_v12 = vld [vmem:[%s9348_s20 + $0x40] sm:$0xff] }
 0x969   : > { %7483 = vmatmul.mubr.msk.f32.gmra.mrb[32].mxu1 %vm17128_vm6, %v16959_v25  ;;  %vm17135_vm6 = vnez %v17070_v40 }
 0x96a   : > { %7484 = vmatprep.mubr.msk.f32.mxu1 %vm17129_vm1, %v16959_v25  ;;  %vm17138_vm1 = vnez %v17076_v33 }
 0x96d   : > { %7485 = vmatmul.mubr.msk.f32.gmra.mrb[34].mxu1 %vm17130_vm2, %v16959_v25  ;;  %vm17139_vm2 = vnez %v17078_v27 }
 0x96e   : > { %7486 = vmatprep.mubr.msk.f32.mxu1 %vm17058_vm9, %v16959_v25  ;;  %vm17134_vm9 = vnez %v17069_v5 }
 0x971   : > { %7487 = vmatmul.mubr.msk.f32.gmra.mrb[36].mxu1 %vm17131_vm11, %v16959_v25 }
 0x972   : > { %7488 = vmatprep.mubr.msk.f32.mxu1 %vm17062_vm0, %v16959_v25  ;;  %vm17136_vm0 = vnez %v17073_v34 }
 0x975   : > { %7489 = vmatmul.mubr.msk.f32.gmra.mrb[38].mxu1 %vm17064_vm12, %v16959_v25  ;;  %vm17137_vm12 = vnez %v17074_v24  ;;  %v8837_v24 = vld [vmem:[%s9348_s20 + $0x48] sm:$0xff] }
 0x976   : > { %7490 = vmatprep.mubr.msk.f32.mxu1 %vm17132_vm8, %v16959_v25 }
 0x979   : > { %7491 = vmatmul.mubr.msk.f32.gmra.mrb[40].mxu1 %vm17133_vm5, %v16959_v25 }
 0x97a   : > { %7492 = vmatprep.mubr.msk.f32.mxu1 %vm17134_vm9, %v16959_v25 }
 0x97d   : > { %7493 = vmatmul.mubr.msk.f32.gmra.mrb[42].mxu1 %vm17135_vm6, %v16959_v25 }
 0x97e   : > { %7494 = vmatprep.mubr.msk.f32.mxu1 %vm16667_vm3, %v16959_v25  ;;  %vm17141_vm3 = vnez %v17140_v47 }
 0x981   : > { %7495 = vmatmul.mubr.msk.f32.gmra.mrb[44].mxu1 %vm17136_vm0, %v16959_v25 }
 0x982   : > { %7496 = vmatprep.mubr.msk.f32.mxu1 %vm17137_vm12, %v16959_v25 }
 0x985   : > { %7497 = vmatmul.mubr.msk.f32.gmra.mrb[46].mxu1 %vm17138_vm1, %v16959_v25 }
 0x986   : > { %7498 = vmatprep.mubr.msk.f32.mxu1 %vm17139_vm2, %v16959_v25 }
 0x989   : > { %7499 = vmatmul.mubr.msk.f32.gmra.mrb[48].mxu1 %vm17141_vm3, %v16959_v25 }
 0x98a   : > { %7500 = vmatprep.mubr.msk.f32.mxu1 %vm16511_vm7, %v16959_v25 }
 0x98d   : > { %7501 = vmatmul.mubr.msk.f32.gmra.mrb[50].mxu1 %vm17084_vm10, %v16959_v25 }
 0x98e   : > { %7502 = vmatprep.mubr.msk.f32.mxu1 %vm17086_vm15, %v16959_v25 }
 0x991   : > { %7503 = vmatmul.mubr.msk.f32.gmra.mrb[52].mxu1 %vm17088_vm14, %v16959_v25 }
 0x992   : > { %7504 = vmatprep.mubr.msk.f32.mxu1 %vm17090_vm4, %v16959_v25 }
 0x995   : > { %7505 = vmatmul.mubr.msk.f32.gmra.mrb[54].mxu1 %vm17092_vm13, %v16959_v25 }
 0x9ec   : > { %v6302_v57 = vpop.f32.mrb[56].mxu1 }
 0x9ed   : > { %v8037_v31 = vadd.f32 %v6302_v57, %v17142_v38  ;;  %v6304_v29 = vpop.f32.mrb[57].mxu1  ;;  %v8839_v57 = vld [vmem:[%s9348_s20 + $0x58] sm:$0xff] }
 0x9ef   : > { %v6523_v19 = vsub.f32 %v8037_v31, %v8828_v32  ;;  %6811 = vst [vmem:[%s14253_s18] sm:$0xff] %v8037_v31 }
 0x9f0   : > { %v6309_v51 = vpop.f32.mrb[58].mxu1 }
 0x9f1   : > { %v6555_v18 = vmul.f32 %v6523_v19, %v6523_v19  ;;  %v8038_v11 = vadd.f32 %v6309_v51, %v17143_v2  ;;  %v6311_v17 = vpop.f32.mrb[59].mxu1  ;;  %v8840_v19 = vld [vmem:[%s9348_s20 + $0x60] sm:$0xff] }
 0x9f2   : > { %v8841_v17 = vld [vmem:[%s9348_s20 + $0x68] sm:$0xff] }
 0x9f3   : > { %v6524_v25 = vsub.f32 %v8038_v11, %v8829_v4  ;;  %6812 = vst [vmem:[%s14253_s18 + $0x8] sm:$0xff] %v8038_v11  ;;  %6587 = vadd.xlane.f32.xlu0 %v6555_v18 }
 0x9f4   : > { %v6316_v8 = vpop.f32.mrb[60].mxu1 }
 0x9f5   : > { %v6556_v46 = vmul.f32 %v6524_v25, %v6524_v25  ;;  %v8039_v48 = vadd.f32 %v6316_v8, %v17144_v61  ;;  %v6318_v10 = vpop.f32.mrb[61].mxu1  ;;  %v8842_v61 = vld [vmem:[%s9348_s20 + $0x70] sm:$0xff] }
 0x9f7   : > { %v6525_v60 = vsub.f32 %v8039_v48, %v8830_v44  ;;  %6813 = vst [vmem:[%s14253_s18 + $0x10] sm:$0xff] %v8039_v48  ;;  %6589 = vadd.xlane.f32.xlu1 %v6556_v46 }
 0x9f8   : > { %v6323_v1 = vpop.f32.mrb[62].mxu1 }
 0x9f9   : > { %v6557_v26 = vmul.f32 %v6525_v60, %v6525_v60  ;;  %v8040_v22 = vadd.f32 %v6323_v1, %v17145_v55  ;;  %v6325_v6 = vpop.f32.mrb[63].mxu1  ;;  %v8843_v1 = vld [vmem:[%s9348_s20 + $0x78] sm:$0xff] }
 0x9fb   : > { %v6526_v62 = vsub.f32 %v8040_v22, %v8831_v28  ;;  %6814 = vst [vmem:[%s14253_s18 + $0x18] sm:$0xff] %v8040_v22  ;;  %6591 = vadd.xlane.f32.xlu0 %v6557_v26  ;;  %v8844_v28 = vld [vmem:[%s9348_s20 + $0x80] sm:$0xff] }
 0x9fc   : > { %v6330_v16 = vpop.f32.mrb[0].mxu1 }
 0x9fd   : > { %v6558_v9 = vmul.f32 %v6526_v62, %v6526_v62  ;;  %v6527_v13 = vsub.f32 %v6330_v16, %v8832_v15  ;;  %6815 = vst [vmem:[%s14253_s18 + $0x20] sm:$0xff] %v6330_v16  ;;  %v6332_v50 = vpop.f32.mrb[1].mxu1 }
 0x9ff   : > { %v6559_v35 = vmul.f32 %v6527_v13, %v6527_v13  ;;  %6593 = vadd.xlane.f32.xlu1 %v6558_v9  ;;  %v8845_v13 = vld [vmem:[%s9348_s20 + $0x88] sm:$0xff] }
 0xa00   : > { %v6337_v3 = vpop.f32.mrb[2].mxu1 }
 0xa01   : > { %v6528_v49 = vsub.f32 %v6337_v3, %v8833_v20  ;;  %6816 = vst [vmem:[%s14253_s18 + $0x28] sm:$0xff] %v6337_v3  ;;  %v6339_v36 = vpop.f32.mrb[3].mxu1  ;;  %6595 = vadd.xlane.f32.xlu0 %v6559_v35 }
 0xa03   : > { %v6560_v63 = vmul.f32 %v6528_v49, %v6528_v49  ;;  %v8846_v49 = vld [vmem:[%s9348_s20 + $0x90] sm:$0xff] }
 0xa04   : > { %v6344_v23 = vpop.f32.mrb[4].mxu1 }
 0xa05   : > { %v6529_v43 = vsub.f32 %v6344_v23, %v8834_v54  ;;  %6817 = vst [vmem:[%s14253_s18 + $0x30] sm:$0xff] %v6344_v23  ;;  %v6346_v42 = vpop.f32.mrb[5].mxu1  ;;  %6597 = vadd.xlane.f32.xlu1 %v6560_v63 }
 0xa07   : > { %v6561_v58 = vmul.f32 %v6529_v43, %v6529_v43  ;;  %v8847_v43 = vld [vmem:[%s9348_s20 + $0x98] sm:$0xff] }
 0xa08   : > { %v6351_v0 = vpop.f32.mrb[6].mxu1 }
 0xa09   : > { %v6530_v59 = vsub.f32 %v6351_v0, %v8835_v37  ;;  %6818 = vst [vmem:[%s14253_s18 + $0x38] sm:$0xff] %v6351_v0  ;;  %v6353_v53 = vpop.f32.mrb[7].mxu1  ;;  %6599 = vadd.xlane.f32.xlu0 %v6561_v58 }
 0xa0b   : > { %v6562_v7 = vmul.f32 %v6530_v59, %v6530_v59  ;;  %v8848_v59 = vld [vmem:[%s9348_s20 + $0xa0] sm:$0xff] }
 0xa0c   : > { %v6358_v56 = vpop.f32.mrb[8].mxu1 }
 0xa0d   : > { %v6531_v5 = vsub.f32 %v6358_v56, %v8836_v12  ;;  %6819 = vst [vmem:[%s14253_s18 + $0x40] sm:$0xff] %v6358_v56  ;;  %v6360_v40 = vpop.f32.mrb[9].mxu1  ;;  %6601 = vadd.xlane.f32.xlu1 %v6562_v7 }
 0xa0f   : > { %v6563_v39 = vmul.f32 %v6531_v5, %v6531_v5  ;;  %v8849_v5 = vld [vmem:[%s9348_s20 + $0xa8] sm:$0xff] }
 0xa10   : > { %v6365_v34 = vpop.f32.mrb[10].mxu1 }
 0xa11   : > { %v6532_v33 = vsub.f32 %v6365_v34, %v8837_v24  ;;  %6820 = vst [vmem:[%s14253_s18 + $0x48] sm:$0xff] %v6365_v34  ;;  %v6367_v27 = vpop.f32.mrb[11].mxu1  ;;  %6603 = vadd.xlane.f32.xlu0 %v6563_v39 }
 0xa13   : > { %v6564_v45 = vmul.f32 %v6532_v33, %v6532_v33  ;;  %v8850_v33 = vld [vmem:[%s9348_s20 + $0xb0] sm:$0xff] }
 0xa14   : > { %v6372_v21 = vpop.f32.mrb[12].mxu1 }
 0xa15   : > { %v6533_v41 = vsub.f32 %v6372_v21, %v8838_v14  ;;  %6821 = vst [vmem:[%s14253_s18 + $0x50] sm:$0xff] %v6372_v21  ;;  %v6374_v30 = vpop.f32.mrb[13].mxu1  ;;  %6605 = vadd.xlane.f32.xlu1 %v6564_v45 }
 0xa17   : > { %v6565_v52 = vmul.f32 %v6533_v41, %v6533_v41  ;;  %v8851_v41 = vld [vmem:[%s9348_s20 + $0xb8] sm:$0xff] }
 0xa18   : > { %v6379_v47 = vpop.f32.mrb[14].mxu1 }
 0xa19   : > { %v6534_v38 = vsub.f32 %v6379_v47, %v8839_v57  ;;  %6822 = vst [vmem:[%s14253_s18 + $0x58] sm:$0xff] %v6379_v47  ;;  %v6381_v31 = vpop.f32.mrb[15].mxu1  ;;  %6607 = vadd.xlane.f32.xlu0 %v6565_v52 }
 0xa1b   : > { %v6566_v29 = vmul.f32 %v6534_v38, %v6534_v38  ;;  %v8852_v38 = vld [vmem:[%s9348_s20 + $0xc0] sm:$0xff] }
 0xa1c   : > { %v6386_v32 = vpop.f32.mrb[16].mxu1 }
 0xa1d   : > { %v6535_v51 = vsub.f32 %v6386_v32, %v8840_v19  ;;  %6823 = vst [vmem:[%s14253_s18 + $0x60] sm:$0xff] %v6386_v32  ;;  %v6388_v18 = vpop.f32.mrb[17].mxu1  ;;  %6609 = vadd.xlane.f32.xlu1 %v6566_v29 }
 0xa1f   : > { %v6567_v2 = vmul.f32 %v6535_v51, %v6535_v51  ;;  %v8853_v51 = vld [vmem:[%s9348_s20 + $0xc8] sm:$0xff] }
 0xa20   : > { %v6393_v11 = vpop.f32.mrb[18].mxu1 }
 0xa21   : > { %v6536_v4 = vsub.f32 %v6393_v11, %v8841_v17  ;;  %6824 = vst [vmem:[%s14253_s18 + $0x68] sm:$0xff] %v6393_v11  ;;  %v6395_v25 = vpop.f32.mrb[19].mxu1  ;;  %6611 = vadd.xlane.f32.xlu0 %v6567_v2 }
 0xa23   : > { %v6568_v8 = vmul.f32 %v6536_v4, %v6536_v4  ;;  %v8854_v4 = vld [vmem:[%s9348_s20 + $0xd0] sm:$0xff] }
 0xa24   : > { %v6400_v46 = vpop.f32.mrb[20].mxu1 }
 0xa25   : > { %v6537_v48 = vsub.f32 %v6400_v46, %v8842_v61  ;;  %6825 = vst [vmem:[%s14253_s18 + $0x70] sm:$0xff] %v6400_v46  ;;  %v6402_v10 = vpop.f32.mrb[21].mxu1  ;;  %6613 = vadd.xlane.f32.xlu1 %v6568_v8 }
 0xa27   : > { %v6569_v44 = vmul.f32 %v6537_v48, %v6537_v48  ;;  %v8855_v48 = vld [vmem:[%s9348_s20 + $0xd8] sm:$0xff] }
 0xa28   : > { %v6407_v60 = vpop.f32.mrb[22].mxu1 }
 0xa29   : > { %v6538_v26 = vsub.f32 %v6407_v60, %v8843_v1  ;;  %6826 = vst [vmem:[%s14253_s18 + $0x78] sm:$0xff] %v6407_v60  ;;  %v6409_v55 = vpop.f32.mrb[23].mxu1  ;;  %6615 = vadd.xlane.f32.xlu0 %v6569_v44 }
 0xa2b   : > { %v6570_v22 = vmul.f32 %v6538_v26, %v6538_v26  ;;  %v8856_v26 = vld [vmem:[%s9348_s20 + $0xe0] sm:$0xff] }
 0xa2c   : > { %v6414_v6 = vpop.f32.mrb[24].mxu1 }
 0xa2d   : > { %v6539_v62 = vsub.f32 %v6414_v6, %v8844_v28  ;;  %6827 = vst [vmem:[%s14253_s18 + $0x80] sm:$0xff] %v6414_v6  ;;  %v6416_v16 = vpop.f32.mrb[25].mxu1  ;;  %6617 = vadd.xlane.f32.xlu1 %v6570_v22 }
 0xa2f   : > { %v6571_v9 = vmul.f32 %v6539_v62, %v6539_v62  ;;  %v8857_v62 = vld [vmem:[%s9348_s20 + $0xe8] sm:$0xff] }
 0xa30   : > { %v6421_v15 = vpop.f32.mrb[26].mxu1 }
 0xa31   : > { %v6540_v50 = vsub.f32 %v6421_v15, %v8845_v13  ;;  %6828 = vst [vmem:[%s14253_s18 + $0x88] sm:$0xff] %v6421_v15  ;;  %v6423_v35 = vpop.f32.mrb[27].mxu1  ;;  %6619 = vadd.xlane.f32.xlu0 %v6571_v9 }
 0xa33   : > { %v6572_v3 = vmul.f32 %v6540_v50, %v6540_v50  ;;  %v8858_v50 = vld [vmem:[%s9348_s20 + $0xf0] sm:$0xff] }
 0xa34   : > { %v6428_v20 = vpop.f32.mrb[28].mxu1 }
 0xa35   : > { %v6541_v36 = vsub.f32 %v6428_v20, %v8846_v49  ;;  %6829 = vst [vmem:[%s14253_s18 + $0x90] sm:$0xff] %v6428_v20  ;;  %v6430_v63 = vpop.f32.mrb[29].mxu1  ;;  %6621 = vadd.xlane.f32.xlu1 %v6572_v3 }
 0xa37   : > { %v6573_v23 = vmul.f32 %v6541_v36, %v6541_v36  ;;  %v8859_v36 = vld [vmem:[%s9348_s20 + $0xf8] sm:$0xff]  ;;  %s8946_s20 = scalar_lea.vmem %s14338_s15, 4096 }
 0xa38   : > { %v6435_v54 = vpop.f32.mrb[30].mxu1  ;;  %p8947_p11 = scmp.ne.s32.totalorder %s14338_s15, %s8946_s20  ;;  %p8954_p9 = scmp.lt.s32.totalorder %s8952_s12, %s8946_s20 }
 0xa39   : > { %v6542_v42 = vsub.f32 %v6435_v54, %v8847_v43  ;;  %6830 = vst [vmem:[%s14253_s18 + $0x98] sm:$0xff] %v6435_v54  ;;  %v6437_v58 = vpop.f32.mrb[31].mxu1  ;;  %6623 = vadd.xlane.f32.xlu0 %v6573_v23 }
 0xa3a   : > { %p8948_p1 = pnand %p8947_p11, %p17146_p0  ;;  %p8955_p12 = por %p8954_p9, %p8953_p5 }
 0xa3b   : > { %v6574_v0 = vmul.f32 %v6542_v42, %v6542_v42 }
 0xa3c   : > { %v6442_v37 = vpop.f32.mrb[32].mxu1  ;;  %p8949_p3 = pneg %p8948_p1 }
 0xa3d   : > { %v6543_v53 = vsub.f32 %v6442_v37, %v8848_v59  ;;  %6831 = vst [vmem:[%s14253_s18 + $0xa0] sm:$0xff] %v6442_v37  ;;  %v6444_v7 = vpop.f32.mrb[33].mxu1  ;;  %6625 = vadd.xlane.f32.xlu1 %v6574_v0 }
 0xa3e   : > { %p8956_p2 = pnand %p8955_p12, %p8949_p3 }
 0xa3f   : > { %v6575_v56 = vmul.f32 %v6543_v53, %v6543_v53 }
 0xa40   : > { %v6449_v12 = vpop.f32.mrb[34].mxu1 }
 0xa41   : > { %v6544_v40 = vsub.f32 %v6449_v12, %v8849_v5  ;;  %6832 = vst [vmem:[%s14253_s18 + $0xa8] sm:$0xff] %v6449_v12  ;;  %v6451_v39 = vpop.f32.mrb[35].mxu1  ;;  %6627 = vadd.xlane.f32.xlu0 %v6575_v56 }
 0xa43   : > { %v6576_v34 = vmul.f32 %v6544_v40, %v6544_v40 }
 0xa44   : > { %v6456_v24 = vpop.f32.mrb[36].mxu1 }
 0xa45   : > { %v6545_v27 = vsub.f32 %v6456_v24, %v8850_v33  ;;  %6833 = vst [vmem:[%s14253_s18 + $0xb0] sm:$0xff] %v6456_v24  ;;  %v6458_v45 = vpop.f32.mrb[37].mxu1  ;;  %6629 = vadd.xlane.f32.xlu1 %v6576_v34 }
 0xa47   : > { %v6577_v21 = vmul.f32 %v6545_v27, %v6545_v27 }
 0xa48   : > { %v6463_v14 = vpop.f32.mrb[38].mxu1 }
 0xa49   : > { %v6546_v30 = vsub.f32 %v6463_v14, %v8851_v41  ;;  %6834 = vst [vmem:[%s14253_s18 + $0xb8] sm:$0xff] %v6463_v14  ;;  %v6465_v52 = vpop.f32.mrb[39].mxu1  ;;  %6631 = vadd.xlane.f32.xlu0 %v6577_v21 }
 0xa4b   : > { %v6578_v47 = vmul.f32 %v6546_v30, %v6546_v30 }
 0xa4c   : > { %v6470_v57 = vpop.f32.mrb[40].mxu1 }
 0xa4d   : > { %v6547_v31 = vsub.f32 %v6470_v57, %v8852_v38  ;;  %6835 = vst [vmem:[%s14253_s18 + $0xc0] sm:$0xff] %v6470_v57  ;;  %v6472_v29 = vpop.f32.mrb[41].mxu1  ;;  %6633 = vadd.xlane.f32.xlu1 %v6578_v47 }
 0xa4f   : > { %v6579_v32 = vmul.f32 %v6547_v31, %v6547_v31 }
 0xa50   : > { %v6477_v19 = vpop.f32.mrb[42].mxu1 }
 0xa51   : > { %v6548_v18 = vsub.f32 %v6477_v19, %v8853_v51  ;;  %6836 = vst [vmem:[%s14253_s18 + $0xc8] sm:$0xff] %v6477_v19  ;;  %v6479_v2 = vpop.f32.mrb[43].mxu1  ;;  %6635 = vadd.xlane.f32.xlu0 %v6579_v32 }
 0xa53   : > { %v6580_v11 = vmul.f32 %v6548_v18, %v6548_v18 }
 0xa54   : > { %v6484_v17 = vpop.f32.mrb[44].mxu1 }
 0xa55   : > { %v6549_v25 = vsub.f32 %v6484_v17, %v8854_v4  ;;  %6837 = vst [vmem:[%s14253_s18 + $0xd0] sm:$0xff] %v6484_v17  ;;  %v6486_v8 = vpop.f32.mrb[45].mxu1  ;;  %6637 = vadd.xlane.f32.xlu1 %v6580_v11 }
 0xa57   : > { %v6581_v46 = vmul.f32 %v6549_v25, %v6549_v25 }
 0xa58   : > { %v6491_v61 = vpop.f32.mrb[46].mxu1 }
 0xa59   : > { %v6550_v10 = vsub.f32 %v6491_v61, %v8855_v48  ;;  %6838 = vst [vmem:[%s14253_s18 + $0xd8] sm:$0xff] %v6491_v61  ;;  %v6493_v44 = vpop.f32.mrb[47].mxu1  ;;  %6639 = vadd.xlane.f32.xlu0 %v6581_v46 }
 0xa5b   : > { %v6582_v60 = vmul.f32 %v6550_v10, %v6550_v10 }
 0xa5c   : > { %v6498_v1 = vpop.f32.mrb[48].mxu1 }
 0xa5d   : > { %v6551_v55 = vsub.f32 %v6498_v1, %v8856_v26  ;;  %6839 = vst [vmem:[%s14253_s18 + $0xe0] sm:$0xff] %v6498_v1  ;;  %v6500_v22 = vpop.f32.mrb[49].mxu1  ;;  %6641 = vadd.xlane.f32.xlu1 %v6582_v60 }
 0xa5f   : > { %v6583_v6 = vmul.f32 %v6551_v55, %v6551_v55 }
 0xa60   : > { %v6505_v28 = vpop.f32.mrb[50].mxu1 }
 0xa61   : > { %v6552_v16 = vsub.f32 %v6505_v28, %v8857_v62  ;;  %6840 = vst [vmem:[%s14253_s18 + $0xe8] sm:$0xff] %v6505_v28  ;;  %v6507_v9 = vpop.f32.mrb[51].mxu1  ;;  %6643 = vadd.xlane.f32.xlu0 %v6583_v6 }
 0xa63   : > { %v6584_v15 = vmul.f32 %v6552_v16, %v6552_v16 }
 0xa64   : > { %v6512_v13 = vpop.f32.mrb[52].mxu1 }
 0xa65   : > { %v6553_v35 = vsub.f32 %v6512_v13, %v8858_v50  ;;  %6841 = vst [vmem:[%s14253_s18 + $0xf0] sm:$0xff] %v6512_v13  ;;  %v6514_v3 = vpop.f32.mrb[53].mxu1  ;;  %6645 = vadd.xlane.f32.xlu1 %v6584_v15 }
 0xa67   : > { %v6585_v20 = vmul.f32 %v6553_v35, %v6553_v35 }
 0xa68   : > { %v6519_v49 = vpop.f32.mrb[54].mxu1 }
 0xa69   : > { %v6554_v63 = vsub.f32 %v6519_v49, %v8859_v36  ;;  %6842 = vst [vmem:[%s14253_s18 + $0xf8] sm:$0xff] %v6519_v49  ;;  %v6521_v23 = vpop.f32.mrb[55].mxu1  ;;  %6647 = vadd.xlane.f32.xlu0 %v6585_v20 }
 0xa6b   : > { %v6586_v54 = vmul.f32 %v6554_v63, %v6554_v63 }
 0xa6d   : > { %6649 = vadd.xlane.f32.xlu1 %v6586_v54 }
 0xa80   : > { %v6588_v43 = vpop.xlane.xlu0 %6587 }
 0xa81   : > { %8959 = shalt.err (!%p8956_p2)
}
 0xa82   : > { %s8960_s19 = scalar_lea.hbm %s14329_s14, 4096  ;;  %s8964_s30 = scalar_lea.hbm %s14560_s4, 8192 }
 0xa83   : > { %p8961_p13 = scmp.ne.s32.totalorder %s14329_s14, %s8960_s19  ;;  %p8965_p4 = scmp.lt.u32.totalorder %s14329_s14, %s14560_s4 }
 0xa84   : > { %p8966_p7 = scmp.lt.u32.totalorder %s8964_s30, %s8960_s19  ;;  %p8968_p11 = scmp.lt.u32.totalorder %s8960_s19, %s14329_s14 }
 0xa85   : > { %p8962_p6 = pnand %p8961_p13, %p17146_p0 }
 0xa86   : > { %p8967_p8 = por %p8966_p7, %p8965_p4 }
 0xa87   : > { %p8963_p10 = pneg %p8962_p6 }
 0xa88   : > { %p8969_p1 = por %p8968_p11, %p8967_p8 }
 0xa8a   : > { %p8970_p3 = pnand %p8969_p1, %p8963_p10 }
 0xa8c   : > { %8973 = shalt.err (!%p8970_p3)
}
 0xa8d   : > { %s9121_s20 = smov 128   ;;  %s9122_s12 = smov 8   ;;  %vm17147_vm13 = vcmask 7168  }
 0xa8e   : > { %8684 = dma.vmem_to_hbm [thread:$0]  (%p17146_p0), %s14338_s15, 4096, %s14329_s14, %s14340_s25, %s9121_s20, %s9121_s20, %s9122_s12  }
 0xa8f   : > { %s14368_s0 = scalar_lea.vmem [#allocation12], %s9344_s16  ;;  %s14376_s17 = scalar_lea.hbm %s14559_s3, %s14323_s7 }
 0xa90   : > { %6940 = vst.msk [vmem:[%s14368_s0] sm:$0xff] %vm17147_vm13, %v6588_v43  ;;  %s7001_s30 = sshll.u32 %s14253_s18, 4  ;;  %s6973_s1 = scalar_lea.sflag [#allocation4], %s9341_s26  ;;  %s14379_s30 = int_to_ptr.vmem [resolvable:$true] %s7001_s30 }
 0xa91   : > { %s8974_s2 = scalar_lea.vmem %s14379_s30, 4096  ;;  %s9123_s16 = smov [#allocation8]  }
 0xa92   : > { %p8975_p5 = scmp.ne.s32.totalorder %s14379_s30, %s8974_s2  ;;  %s8978_s14 = sshll.u32 %s9123_s16, 4  ;;  %s8979_s14 = int_to_ptr.vmem [resolvable:$false] %s8978_s14 }
 0xa93   : > { %s8980_s15 = scalar_lea.vmem %s8979_s14, 8192  ;;  %p8981_p2 = scmp.lt.s32.totalorder %s14379_s30, %s8979_s14 }
 0xa94   : > { %p8976_p9 = pnand %p8975_p5, %p17146_p0  ;;  %p8982_p13 = scmp.lt.s32.totalorder %s8980_s15, %s8974_s2 }
 0xa96   : > { %p8977_p12 = pneg %p8976_p9  ;;  %p8983_p6 = por %p8982_p13, %p8981_p2 }
 0xa98   : > { %p8984_p10 = pnand %p8983_p6, %p8977_p12 }
 0xa9a   : > { %8987 = shalt.err (!%p8984_p10)
}
 0xa9b   : > { %s8988_s18 = scalar_lea.hbm %s14376_s17, 4096  ;;  %s8992_s16 = scalar_lea.hbm %s14559_s3, 8192 }
 0xa9c   : > { %p8989_p4 = scmp.ne.s32.totalorder %s14376_s17, %s8988_s18  ;;  %p8993_p11 = scmp.lt.u32.totalorder %s14376_s17, %s14559_s3 }
 0xa9d   : > { %p8994_p1 = scmp.lt.u32.totalorder %s8992_s16, %s8988_s18  ;;  %p8996_p5 = scmp.lt.u32.totalorder %s8988_s18, %s14376_s17 }
 0xa9e   : > { %p8990_p7 = pnand %p8989_p4, %p17146_p0 }
 0xa9f   : > { %p8995_p3 = por %p8994_p1, %p8993_p11 }
 0xaa0   : > { %p8991_p8 = pneg %p8990_p7 }
 0xaa1   : > { %p8997_p9 = por %p8996_p5, %p8995_p3 }
 0xaa3   : > { %p8998_p12 = pnand %p8997_p9, %p8991_p8 }
 0xaa5   : > { %9001 = shalt.err (!%p8998_p12)
}
 0xaa6   : > { %8683 = dma.vmem_to_hbm [thread:$0]  (%p17146_p0), %s14379_s30, 4096, %s14376_s17, %s6973_s1, %s9121_s20, %s9121_s20, %s9122_s12   ;;  %v6590_v42 = vpop.xlane.xlu1 %6589  ;;  %vm17149_vm14 = vmmov %vm17147_vm13 }
 0xaa7   : > { %s17148_s2 = sshll.u32 %s13446_s29, 4  ;;  %6941 = vst.msk [vmem:[%s14368_s0 + $0x8] sm:$0xff] %vm17149_vm14, %v6590_v42  ;;  %s9124_s15 = smov [#allocation11]   ;;  %s14411_s2 = int_to_ptr.vmem [resolvable:$true] %s17148_s2 }
 0xaa8   : > { %s9002_s27 = scalar_lea.vmem %s14411_s2, 4096  ;;  %s9006_s18 = sshll.u32 %s9124_s15, 4  ;;  %s9007_s18 = int_to_ptr.vmem [resolvable:$false] %s9006_s18 }
 0xaa9   : > { %p9003_p2 = scmp.ne.s32.totalorder %s14411_s2, %s9002_s27  ;;  %s9008_s19 = scalar_lea.vmem %s9007_s18, 8192 }
 0xaaa   : > { %p9009_p10 = scmp.lt.s32.totalorder %s14411_s2, %s9007_s18  ;;  %p9010_p4 = scmp.lt.s32.totalorder %s9008_s19, %s9002_s27 }
 0xaab   : > { %p9004_p13 = pnand %p9003_p2, %p17146_p0 }
 0xaac   : > { %p9011_p7 = por %p9010_p4, %p9009_p10 }
 0xaad   : > { %p9005_p6 = pneg %p9004_p13 }
 0xaaf   : > { %p9012_p8 = pnand %p9011_p7, %p9005_p6 }
 0xab1   : > { %9015 = shalt.err (!%p9012_p8)
}
 0xab2   : > { %s9016_s1 = scalar_lea.hbm %s14336_s11, 4096  ;;  %s9020_s30 = scalar_lea.hbm %s14561_s5, 8192 }
 0xab3   : > { %p9017_p11 = scmp.ne.s32.totalorder %s14336_s11, %s9016_s1  ;;  %p9021_p5 = scmp.lt.u32.totalorder %s14336_s11, %s14561_s5 }
 0xab4   : > { %p9022_p9 = scmp.lt.u32.totalorder %s9020_s30, %s9016_s1  ;;  %p9024_p2 = scmp.lt.u32.totalorder %s9016_s1, %s14336_s11 }
 0xab5   : > { %p9018_p1 = pnand %p9017_p11, %p17146_p0 }
 0xab6   : > { %p9023_p12 = por %p9022_p9, %p9021_p5 }
 0xab7   : > { %p9019_p3 = pneg %p9018_p1 }
 0xab8   : > { %p9025_p13 = por %p9024_p2, %p9023_p12 }
 0xaba   : > { %p9026_p6 = pnand %p9025_p13, %p9019_p3 }
 0xabc   : > { %9029 = shalt.err (!%p9026_p6)
}
 0xabd   : > { %8685 = dma.vmem_to_hbm [thread:$0]  (%p17146_p0), %s14411_s2, 4096, %s14336_s11, %s14340_s25, %s9121_s20, %s9121_s20, %s9122_s12   ;;  %v6592_v58 = vpop.xlane.xlu0 %6591  ;;  %vm17150_vm15 = vmmov %vm17147_vm13  ;;  %v6594_v0 = vpop.xlane.xlu1 %6593 }
 0xabe   : > { %6942 = vst.msk [vmem:[%s14368_s0 + $0x10] sm:$0xff] %vm17150_vm15, %v6592_v58  ;;  %vm17151_vm4 = vmmov %vm17147_vm13  ;;  %s7049_s11 = sshll.u32 %s14368_s0, 4  ;;  %s14503_s2 = scalar_lea.hbm %s14562_s6, %s14323_s7  ;;  %s14505_s11 = int_to_ptr.vmem [resolvable:$true] %s7049_s11 }
 0xabf   : > { %6943 = vst.msk [vmem:[%s14368_s0 + $0x18] sm:$0xff] %vm17151_vm4, %v6594_v0  ;;  %vm17152_vm7 = vmmov %vm17151_vm4  ;;  %s6988_s27 = scalar_lea.sflag [#allocation13], %s9341_s26  ;;  %s9030_s15 = scalar_lea.vmem %s14505_s11, 4096 }
 0xac0   : > { %vm17153_vm10 = vmmov %vm17151_vm4  ;;  %p9031_p10 = scmp.ne.s32.totalorder %s14505_s11, %s9030_s15  ;;  %s9125_s18 = smov [#allocation12]  }
 0xac1   : > { %v6596_v37 = vpop.xlane.xlu0 %6595  ;;  %v6598_v59 = vpop.xlane.xlu1 %6597  ;;  %vm17154_vm11 = vmmov %vm17151_vm4  ;;  %s9034_s19 = sshll.u32 %s9125_s18, 4  ;;  %s9035_s19 = int_to_ptr.vmem [resolvable:$false] %s9034_s19 }
 0xac2   : > { %6944 = vst.msk [vmem:[%s14368_s0 + $0x20] sm:$0xff] %vm17152_vm7, %v6596_v37  ;;  %vm17155_vm8 = vmmov %vm17151_vm4  ;;  %p9032_p4 = pnand %p9031_p10, %p17146_p0  ;;  %s9036_s1 = scalar_lea.vmem %s9035_s19, 8192 }
 0xac3   : > { %6945 = vst.msk [vmem:[%s14368_s0 + $0x28] sm:$0xff] %vm17153_vm10, %v6598_v59  ;;  %vm17156_vm5 = vmmov %vm17151_vm4  ;;  %p9037_p8 = scmp.lt.s32.totalorder %s14505_s11, %s9035_s19  ;;  %p9038_p11 = scmp.lt.s32.totalorder %s9036_s1, %s9030_s15 }
 0xac4   : > { %vm17157_vm9 = vmmov %vm17151_vm4  ;;  %p9033_p7 = pneg %p9032_p4 }
 0xac5   : > { %v6600_v53 = vpop.xlane.xlu0 %6599  ;;  %v6602_v7 = vpop.xlane.xlu1 %6601  ;;  %vm17158_vm6 = vmmov %vm17151_vm4  ;;  %p9039_p1 = por %p9038_p11, %p9037_p8 }
 0xac6   : > { %6946 = vst.msk [vmem:[%s14368_s0 + $0x30] sm:$0xff] %vm17154_vm11, %v6600_v53  ;;  %vm17159_vm0 = vmmov %vm17151_vm4 }
 0xac7   : > { %6947 = vst.msk [vmem:[%s14368_s0 + $0x38] sm:$0xff] %vm17155_vm8, %v6602_v7  ;;  %vm17160_vm12 = vmmov %vm17159_vm0  ;;  %p9040_p3 = pnand %p9039_p1, %p9033_p7 }
 0xac8   : > { %vm17161_vm1 = vmmov %vm17159_vm0 }
 0xac9   : > { %v6604_v56 = vpop.xlane.xlu0 %6603  ;;  %v6606_v12 = vpop.xlane.xlu1 %6605  ;;  %vm17162_vm2 = vmmov %vm17159_vm0 }
 0xaca   : > { %6948 = vst.msk [vmem:[%s14368_s0 + $0x40] sm:$0xff] %vm17156_vm5, %v6604_v56  ;;  %vm17163_vm3 = vmmov %vm17159_vm0 }
 0xacb   : > { %6949 = vst.msk [vmem:[%s14368_s0 + $0x48] sm:$0xff] %vm17157_vm9, %v6606_v12  ;;  %vm17164_vm13 = vmmov %vm17159_vm0 }
 0xacc   : > { %vm17165_vm14 = vmmov %vm17159_vm0 }
 0xacd   : > { %v6608_v5 = vpop.xlane.xlu0 %6607  ;;  %v6610_v40 = vpop.xlane.xlu1 %6609  ;;  %vm17166_vm15 = vmmov %vm17159_vm0 }
 0xace   : > { %6950 = vst.msk [vmem:[%s14368_s0 + $0x50] sm:$0xff] %vm17158_vm6, %v6608_v5  ;;  %vm17167_vm4 = vmmov %vm17159_vm0 }
 0xacf   : > { %6951 = vst.msk [vmem:[%s14368_s0 + $0x58] sm:$0xff] %vm17159_vm0, %v6610_v40  ;;  %vm17168_vm7 = vmmov %vm17159_vm0 }
 0xad0   : > { %vm17169_vm10 = vmmov %vm17159_vm0 }
 0xad1   : > { %v6612_v39 = vpop.xlane.xlu0 %6611  ;;  %v6614_v34 = vpop.xlane.xlu1 %6613  ;;  %vm17170_vm11 = vmmov %vm17159_vm0 }
 0xad2   : > { %6952 = vst.msk [vmem:[%s14368_s0 + $0x60] sm:$0xff] %vm17160_vm12, %v6612_v39  ;;  %vm17171_vm8 = vmmov %vm17159_vm0 }
 0xad3   : > { %6953 = vst.msk [vmem:[%s14368_s0 + $0x68] sm:$0xff] %vm17161_vm1, %v6614_v34  ;;  %vm17172_vm5 = vmmov %vm17159_vm0 }
 0xad4   : > { %vm17173_vm9 = vmmov %vm17159_vm0 }
 0xad5   : > { %v6616_v24 = vpop.xlane.xlu0 %6615  ;;  %v6618_v33 = vpop.xlane.xlu1 %6617  ;;  %vm17174_vm6 = vmmov %vm17159_vm0 }
 0xad6   : > { %6954 = vst.msk [vmem:[%s14368_s0 + $0x70] sm:$0xff] %vm17162_vm2, %v6616_v24  ;;  %vm17175_vm12 = vmmov %vm17159_vm0 }
 0xad7   : > { %6955 = vst.msk [vmem:[%s14368_s0 + $0x78] sm:$0xff] %vm17163_vm3, %v6618_v33  ;;  %vm17176_vm1 = vmmov %vm17159_vm0 }
 0xad8   : > { %vm17177_vm2 = vmmov %vm17159_vm0 }
 0xad9   : > { %v6620_v27 = vpop.xlane.xlu0 %6619  ;;  %v6622_v45 = vpop.xlane.xlu1 %6621  ;;  %vm17178_vm3 = vmmov %vm17159_vm0 }
 0xada   : > { %6956 = vst.msk [vmem:[%s14368_s0 + $0x80] sm:$0xff] %vm17164_vm13, %v6620_v27 }
 0xadb   : > { %6957 = vst.msk [vmem:[%s14368_s0 + $0x88] sm:$0xff] %vm17165_vm14, %v6622_v45 }
 0xadd   : > { %v6624_v21 = vpop.xlane.xlu0 %6623  ;;  %v6626_v14 = vpop.xlane.xlu1 %6625 }
 0xade   : > { %6958 = vst.msk [vmem:[%s14368_s0 + $0x90] sm:$0xff] %vm17166_vm15, %v6624_v21 }
 0xadf   : > { %6959 = vst.msk [vmem:[%s14368_s0 + $0x98] sm:$0xff] %vm17167_vm4, %v6626_v14 }
 0xae1   : > { %v6628_v41 = vpop.xlane.xlu0 %6627  ;;  %v6630_v30 = vpop.xlane.xlu1 %6629 }
 0xae2   : > { %6960 = vst.msk [vmem:[%s14368_s0 + $0xa0] sm:$0xff] %vm17168_vm7, %v6628_v41 }
 0xae3   : > { %6961 = vst.msk [vmem:[%s14368_s0 + $0xa8] sm:$0xff] %vm17169_vm10, %v6630_v30 }
 0xae5   : > { %v6632_v52 = vpop.xlane.xlu0 %6631  ;;  %v6634_v47 = vpop.xlane.xlu1 %6633 }
 0xae6   : > { %6962 = vst.msk [vmem:[%s14368_s0 + $0xb0] sm:$0xff] %vm17170_vm11, %v6632_v52 }
 0xae7   : > { %6963 = vst.msk [vmem:[%s14368_s0 + $0xb8] sm:$0xff] %vm17171_vm8, %v6634_v47 }
 0xae9   : > { %v6636_v57 = vpop.xlane.xlu0 %6635  ;;  %v6638_v38 = vpop.xlane.xlu1 %6637 }
 0xaea   : > { %6964 = vst.msk [vmem:[%s14368_s0 + $0xc0] sm:$0xff] %vm17172_vm5, %v6636_v57 }
 0xaeb   : > { %6965 = vst.msk [vmem:[%s14368_s0 + $0xc8] sm:$0xff] %vm17173_vm9, %v6638_v38 }
 0xaed   : > { %v6640_v31 = vpop.xlane.xlu0 %6639  ;;  %v6642_v29 = vpop.xlane.xlu1 %6641 }
 0xaee   : > { %6966 = vst.msk [vmem:[%s14368_s0 + $0xd0] sm:$0xff] %vm17174_vm6, %v6640_v31 }
 0xaef   : > { %6967 = vst.msk [vmem:[%s14368_s0 + $0xd8] sm:$0xff] %vm17159_vm0, %v6642_v29 }
 0xaf1   : > { %v6644_v32 = vpop.xlane.xlu0 %6643 }
 0xaf2   : > { %6968 = vst.msk [vmem:[%s14368_s0 + $0xe0] sm:$0xff] %vm17175_vm12, %v6644_v32  ;;  %v6646_v19 = vpop.xlane.xlu1 %6645 }
 0xaf3   : > { %6969 = vst.msk [vmem:[%s14368_s0 + $0xe8] sm:$0xff] %vm17176_vm1, %v6646_v19 }
 0xaf6   : > { %v6648_v51 = vpop.xlane.xlu0 %6647 }
 0xaf7   : > { %6970 = vst.msk [vmem:[%s14368_s0 + $0xf0] sm:$0xff] %vm17177_vm2, %v6648_v51 }
 0xafa   : > { %v6650_v18 = vpop.xlane.xlu1 %6649 }
 0xafb   : > { %6971 = vst.msk [vmem:[%s14368_s0 + $0xf8] sm:$0xff] %vm17178_vm3, %v6650_v18 }
 0xafc   : > { %9043 = shalt.err (!%p9040_p3)
}
 0xafd   : > { %s9044_s7 = scalar_lea.hbm %s14503_s2, 4096  ;;  %s9048_s17 = scalar_lea.hbm %s14562_s6, 8192 }
 0xafe   : > { %p9045_p5 = scmp.ne.s32.totalorder %s14503_s2, %s9044_s7  ;;  %p9049_p2 = scmp.lt.u32.totalorder %s14503_s2, %s14562_s6 }
 0xaff   : > { %p9050_p13 = scmp.lt.u32.totalorder %s9048_s17, %s9044_s7  ;;  %p9052_p10 = scmp.lt.u32.totalorder %s9044_s7, %s14503_s2 }
 0xb00   : > { %p9046_p9 = pnand %p9045_p5, %p17146_p0 }
 0xb01   : > { %p9051_p6 = por %p9050_p13, %p9049_p2 }
 0xb02   : > { %p9047_p12 = pneg %p9046_p9 }
 0xb03   : > { %p9053_p4 = por %p9052_p10, %p9051_p6 }
 0xb05   : > { %p9054_p7 = pnand %p9053_p4, %p9047_p12 }
 0xb07   : > { %9057 = shalt.err (!%p9054_p7)
}
 0xb08   : > { %8686 = dma.vmem_to_hbm [thread:$0]  (%p17146_p0), %s14505_s11, 4096, %s14503_s2, %s6988_s27, %s9121_s20, %s9121_s20, %s9122_s12  }
 0xb09 PF: > { %s7064_s16 = sand.u32 1, %s9096_s21   ;;  %p17179_p8 = scmp.ne.s32.totalorder %s15520_s28, 0 }
 0xb0a   : > { %p17180_p11 = scmp.ge.s32.totalorder %s9108_s24, 2  ;;  %s7065_s25 = scalar_lea.sflag [#allocation4], %s7064_s16 }
 0xb0c   : > { %p8703_p1 = pnand %p17180_p11, %p17179_p8 }
 0xb0e   : > { %9083 = dma.done.wait (!%p8703_p1), %s7065_s25, 4096  }
 0xb0f   : > { %9085 = vsyncadd (!%p8703_p1), %s7065_s25, 4294963200  ;;  %s17181_s8 = sadd.s32 4294967294, %s9108_s24  }
 0xb10   : > { %s7073_s14 = sand.u32 1, %s17181_s8  }
 0xb11   : > { %s7074_s15 = scalar_lea.sflag [#allocation10], %s7073_s14 }
 0xb12   : > { %9087 = dma.done.wait (!%p8703_p1), %s7074_s15, 8192  }
 0xb13   : > { %9089 = vsyncadd (!%p8703_p1), %s7074_s15, 4294959104  ;;  %s7092_s26 = scalar_lea.sflag [#allocation13], %s7064_s16 }
 0xb14   : > { %9091 = dma.done.wait (!%p8703_p1), %s7092_s26, 4096  }
 0xb15   : > { %9093 = vsyncadd (!%p8703_p1), %s7092_s26, 4294963200  ;;  %p27_p0 = scmp.ge.s32.totalorder %s9276_s9, 4   ;;  %s17182_s21 = smov %s9100_s22 }
 0xb16   : > { %s17183_s22 = smov %s9104_s23  ;;  %s17184_s23 = smov %s9285_s13 }
 0xb17   : > { %s17185_s24 = smov %s9276_s9  ;;  %29 = sbr.rel (!%p27_p0) target bundleno = 14 (0xe), region = 134 }
 0xb1e   :  { %7097 = vsyncpa [#allocation3], 1 }
 0xb1f   :  { %7099 = vsyncpa [#allocation3 + $0x1], 1 }
 0xb20   :  { %7100 = vsyncpa [#allocation6], 1 }
 0xb21   :  { %7101 = vsyncpa [#allocation4], 1 }
 0xb22   :  { %7103 = vsyncpa [#allocation4 + $0x1], 1 }
 0xb23   :  { %7104 = vsyncpa [#allocation10], 1 }
 0xb24   :  { %7106 = vsyncpa [#allocation10 + $0x1], 1 }
 0xb25   :  { %7107 = vsyncpa [#allocation13], 1 }
 0xb26   :  { %7109 = vsyncpa [#allocation13 + $0x1], 1 }

</bundles_post_ra>
